<compile_context>
chip_gen: v6e
topology: v6e:2x2x1
jax: 0.10.0
libtpu: 0.0.40
codegen_flags: <defaults>
</compile_context>

<pallas_src>
import functools

import jax
import jax.numpy as jnp
from jax.experimental import pallas as pl
from jax.experimental.pallas import tpu as pltpu


FEAT_SIZE = 7
LATENT_DIM = FEAT_SIZE * FEAT_SIZE * 128                    # 6272
CONV_OUT = (64, 128, 256, 128)                              # img_dim=56 encoder
CONV_KSP = ((5, 2, 1), (3, 2, 1), (3, 2, 1), (3, 1, 1))     # (kernel, stride, pad)

_K_SINGLE_STEP_MAX = 4096   # full-K x/w blocks stay far below scoped-VMEM limits


def _round_up(x, m):
    return ((x + m - 1) // m) * m


def _pick_tile(total, cap, prefer_two_blocks=True):
    """Largest multiple of 128 dividing `total` (a multiple of 128), capped at
    `cap`; if prefer_two_blocks, also capped at total//2 so a 'parallel' grid
    axis keeps >=2 blocks for megacore (v7x) sharding."""
    if total <= 128:
        return total
    limit = min(cap, total // 2) if prefer_two_blocks else min(cap, total)
    best = 128
    t = 128
    while t <= limit:
        if total % t == 0:
            best = t
        t += 128
    return best


# ----------------------------- conv GEMM kernels ----------------------------- #
def _mm_bias_relu_kernel(x_ref, w_ref, b_ref, o_ref):
    """Single-K-step tile: relu(x @ w + b) written straight to the output."""
    acc = jnp.dot(x_ref[...], w_ref[...], preferred_element_type=jnp.float32)
    o_ref[...] = jnp.maximum(acc + b_ref[...], 0.0).astype(o_ref.dtype)


def _mm_bias_relu_acc_kernel(x_ref, w_ref, b_ref, o_ref, acc_ref):
    """General K-looped tile (only used if K is too large for one step)."""
    @pl.when(pl.program_id(2) == 0)
    def _init():
        acc_ref[...] = jnp.zeros_like(acc_ref)

    acc_ref[...] += jnp.dot(x_ref[...], w_ref[...],
                            preferred_element_type=jnp.float32)

    @pl.when(pl.program_id(2) == pl.num_programs(2) - 1)
    def _finalize():
        o_ref[...] = jnp.maximum(acc_ref[...] + b_ref[...], 0.0).astype(o_ref.dtype)


def matmul_bias_relu(x, w, b, *, out_dtype=jnp.bfloat16):
    """relu(x @ w + b). x:(Mp,Kp) bf16, w:(Kp,Np) bf16, b:(1,Np) f32.

    Mp, Kp, Np are pre-padded to multiples of 128 by the caller.
    """
    mp, kp = x.shape
    kp2, np_ = w.shape
    assert kp == kp2 and mp % 128 == 0 and kp % 128 == 0 and np_ % 128 == 0
    tm = _pick_tile(mp, 512)
    # With a single M block, split N instead so v7x still sees 2 parallel blocks.
    tn = 128 if (mp // tm == 1 and np_ >= 256) else min(256, np_)

    if kp <= _K_SINGLE_STEP_MAX:
        return pl.pallas_call(
            _mm_bias_relu_kernel,
            out_shape=jax.ShapeDtypeStruct((mp, np_), out_dtype),
            grid=(mp // tm, np_ // tn),
            in_specs=[
                pl.BlockSpec((tm, kp), lambda i, j: (i, 0)),
                pl.BlockSpec((kp, tn), lambda i, j: (0, j)),
                pl.BlockSpec((1, tn), lambda i, j: (0, j)),
            ],
            out_specs=pl.BlockSpec((tm, tn), lambda i, j: (i, j)),
            compiler_params=pltpu.CompilerParams(
                dimension_semantics=("parallel", "parallel")),
        )(x, w, b)

    tk = _pick_tile(kp, 1024, prefer_two_blocks=False)
    return pl.pallas_call(
        _mm_bias_relu_acc_kernel,
        out_shape=jax.ShapeDtypeStruct((mp, np_), out_dtype),
        grid=(mp // tm, np_ // tn, kp // tk),
        in_specs=[
            pl.BlockSpec((tm, tk), lambda i, j, k: (i, k)),
            pl.BlockSpec((tk, tn), lambda i, j, k: (k, j)),
            pl.BlockSpec((1, tn), lambda i, j, k: (0, j)),
        ],
        out_specs=pl.BlockSpec((tm, tn), lambda i, j, k: (i, j)),
        scratch_shapes=[pltpu.VMEM((tm, tn), jnp.float32)],
        compiler_params=pltpu.CompilerParams(
            dimension_semantics=("parallel", "parallel", "arbitrary")),
    )(x, w, b)


# --------------------------- fused linear-head kernel -------------------------- #
def _head_kernel(x_ref, w1_ref, b1_ref, w2_ref, b2_ref, o_ref, h_acc):
    """Fused Linear(6272,400)+ReLU -> Linear(400,A). Hidden stays in VMEM."""
    k = pl.program_id(0)

    @pl.when(k == 0)
    def _init():
        h_acc[...] = jnp.zeros_like(h_acc)

    h_acc[...] += jnp.dot(x_ref[...], w1_ref[...],
                          preferred_element_type=jnp.float32)

    @pl.when(k == pl.num_programs(0) - 1)
    def _finalize():
        h = jnp.maximum(h_acc[...] + b1_ref[...], 0.0)
        out = jnp.dot(h.astype(jnp.bfloat16), w2_ref[...],
                      preferred_element_type=jnp.float32) + b2_ref[...]
        o_ref[...] = out.astype(o_ref.dtype)


def linear_head(x_flat, head, action_steps):
    w1, b1, w2, b2 = head["w1"], head["b1"], head["w2"], head["b2"]
    batch, k1 = x_flat.shape
    k1p, n1p = w1.shape
    n2p = w2.shape[1]
    assert k1 == k1p
    mp = _round_up(max(batch, 8), 8)
    if mp > batch:
        x_flat = jnp.pad(x_flat, ((0, mp - batch), (0, 0)))
    tk = _pick_tile(k1p, 1024, prefer_two_blocks=False)   # 896 -> 7 pipelined K steps
    out = pl.pallas_call(
        _head_kernel,
        out_shape=jax.ShapeDtypeStruct((mp, n2p), jnp.float32),
        grid=(k1p // tk,),
        in_specs=[
            pl.BlockSpec((mp, tk), lambda k: (0, k)),
            pl.BlockSpec((tk, n1p), lambda k: (k, 0)),
            pl.BlockSpec((1, n1p), lambda k: (0, 0)),
            pl.BlockSpec((n1p, n2p), lambda k: (0, 0)),
            pl.BlockSpec((1, n2p), lambda k: (0, 0)),
        ],
        out_specs=pl.BlockSpec((mp, n2p), lambda k: (0, 0)),
        scratch_shapes=[pltpu.VMEM((mp, n1p), jnp.float32)],
        compiler_params=pltpu.CompilerParams(
            dimension_semantics=("arbitrary",)),
    )(x_flat, w1, b1, w2, b2)
    return out[:batch, :action_steps]


# ----------------------------- conv via NHWC im2col ---------------------------- #
def _im2col_nhwc(x, kh, kw, stride, padding):
    """x: (B, H, W, C) bf16 -> (B*oh*ow, kh*kw*C) in (kh, kw, C) order, C fastest."""
    b, h, w, c = x.shape
    xp = jnp.pad(x, ((0, 0), (padding, padding), (padding, padding), (0, 0)))
    hp, wp = h + 2 * padding, w + 2 * padding
    oh = (hp - kh) // stride + 1
    ow = (wp - kw) // stride + 1
    cols = [xp[:, i:i + stride * oh:stride, j:j + stride * ow:stride, :]
            for i in range(kh) for j in range(kw)]
    patches = jnp.concatenate(cols, axis=-1)            # (B, oh, ow, kh*kw*C) bf16
    return patches.reshape(b * oh * ow, kh * kw * c), oh, ow


def conv2d_relu(x, w_mat, b_row, k, stride, padding):
    """NHWC Conv2d + ReLU in bf16. w_mat is the prepacked (Kp, Np) bf16 GEMM weight."""
    batch = x.shape[0]
    patches, oh, ow = _im2col_nhwc(x, k, k, stride, padding)
    m, kdim = patches.shape
    kp, np_ = w_mat.shape
    mp = _round_up(m, 128)
    if mp > m or kp > kdim:                             # tail M / K padding (zeros)
        patches = jnp.pad(patches, ((0, mp - m), (0, kp - kdim)))
    y = matmul_bias_relu(patches, w_mat, b_row, out_dtype=jnp.bfloat16)
    return y[:m].reshape(batch, oh, ow, np_)            # NHWC bf16; padded channels are 0


# --------------------------------- QImage model -------------------------------- #
def init_qimage_params(key, img_stack, action_steps):
    """PyTorch-layout weights, prepacked ONCE into GEMM-ready bf16 matrices."""
    convs = []
    cin = img_stack
    cin_eff = img_stack                 # channels of the (padded) NHWC activation
    for cout, (k, _, _) in zip(CONV_OUT, CONV_KSP):
        key, wk = jax.random.split(key)
        fan_in = cin * k * k
        w = jax.random.normal(wk, (cout, cin, k, k), jnp.float32) * jnp.sqrt(2.0 / fan_in)
        b = jnp.zeros((cout,), jnp.float32)
        if cin_eff > cin:               # zero rows for previous layer's padded channels
            w = jnp.pad(w, ((0, 0), (0, cin_eff - cin), (0, 0), (0, 0)))
        kdim = k * k * cin_eff
        kp = _round_up(kdim, 128)
        np_ = _round_up(cout, 128)
        # (kh, kw, C) patch order, C fastest — matches _im2col_nhwc.
        w_mat = jnp.transpose(w, (2, 3, 1, 0)).reshape(kdim, cout)
        w_mat = jnp.pad(w_mat, ((0, kp - kdim), (0, np_ - cout))).astype(jnp.bfloat16)
        b_row = jnp.pad(b, (0, np_ - cout)).reshape(1, np_).astype(jnp.float32)
        convs.append((w_mat, b_row))
        cin = cout
        cin_eff = np_

    key, k1, k2 = jax.random.split(key, 3)
    w1 = jax.random.normal(k1, (400, LATENT_DIM), jnp.float32) * jnp.sqrt(2.0 / LATENT_DIM)
    b1 = jnp.zeros((400,), jnp.float32)
    w2 = jax.random.normal(k2, (action_steps, 400), jnp.float32) * jnp.sqrt(2.0 / 400)
    b2 = jnp.zeros((action_steps,), jnp.float32)
    # Permute Linear1 columns from torch's NCHW flatten order to our NHWC flatten.
    w1 = w1.reshape(400, CONV_OUT[-1], FEAT_SIZE, FEAT_SIZE)
    w1 = jnp.transpose(w1, (0, 2, 3, 1)).reshape(400, LATENT_DIM)
    n1p = _round_up(400, 128)
    n2p = _round_up(action_steps, 128)
    head = {
        "w1": jnp.pad(w1.T, ((0, 0), (0, n1p - 400))).astype(jnp.bfloat16),
        "b1": jnp.pad(b1, (0, n1p - 400)).reshape(1, n1p),
        "w2": jnp.pad(w2.T, ((0, n1p - 400), (0, n2p - action_steps))).astype(jnp.bfloat16),
        "b2": jnp.pad(b2, (0, n2p - action_steps)).reshape(1, n2p),
    }
    return {"convs": convs, "head": head}


@functools.partial(jax.jit, static_argnums=2)
def qimage_forward(params, x, action_steps):
    """x: (B, C, H, W) NCHW float32, exactly like the PyTorch module."""
    x = jnp.transpose(x, (0, 2, 3, 1)).astype(jnp.bfloat16)   # single layout change; bf16 NHWC after
    for (w_mat, b_row), (k, s, p) in zip(params["convs"], CONV_KSP):
        x = conv2d_relu(x, w_mat, b_row, k, s, p)
    batch = x.shape[0]
    x = x.reshape(batch, -1)                    # NHWC flatten (w1 columns permuted to match)
    return linear_head(x, params["head"], action_steps)


if __name__ == "__main__":
    key = jax.random.PRNGKey(0)
    key, xk, pk = jax.random.split(key, 3)

    batch = 2
    img_stack = 4
    img_dim = 56          # img_dim=56 QImage config; final feature map is 7x7x128
    action_steps = 8

    x = jax.random.normal(xk, (batch, img_stack, img_dim, img_dim), jnp.float32)
    params = init_qimage_params(pk, img_stack, action_steps)

    out = qimage_forward(params, x, action_steps)
    out = jax.block_until_ready(out)
    assert out.shape == (batch, action_steps), out.shape
    assert out.dtype == jnp.float32
    assert bool(jnp.all(jnp.isfinite(out)))
    print("KERNEL_OK")
</pallas_src>

<mosaic_0001>
module attributes {stable_mosaic.version = 11 : i64} {
  func.func @_mm_bias_relu_kernel(%arg0: i32, %arg1: i32, %arg2: memref<512x128xbf16, #tpu.memory_space<vmem>>, %arg3: memref<128x128xbf16, #tpu.memory_space<vmem>>, %arg4: memref<1x128xf32, #tpu.memory_space<vmem>>, %arg5: memref<512x128xbf16, #tpu.memory_space<vmem>>) attributes {dimension_semantics = [#tpu.dimension_semantics<parallel>, #tpu.dimension_semantics<parallel>], iteration_bounds = array<i64: 3, 1>, scalar_prefetch = 0 : i64, scratch_operands = 0 : i64, tpu.core_type = #tpu.core_type<tc>, window_params = [{transform_indices = @transform_0, window_bounds = array<i64: 512, 128>}, {transform_indices = @transform_1, window_bounds = array<i64: 128, 128>}, {transform_indices = @transform_2, window_bounds = array<i64: 1, 128>}, {transform_indices = @transform_3, window_bounds = array<i64: 512, 128>}]} {
    %c0 = arith.constant 0 : index
    %c0_0 = arith.constant 0 : index
    %0 = vector.load %arg2[%c0, %c0_0] : memref<512x128xbf16, #tpu.memory_space<vmem>>, vector<512x128xbf16>
    %c0_1 = arith.constant 0 : index
    %c0_2 = arith.constant 0 : index
    %1 = vector.load %arg3[%c0_1, %c0_2] : memref<128x128xbf16, #tpu.memory_space<vmem>>, vector<128x128xbf16>
    %cst = arith.constant dense<0.000000e+00> : vector<512x128xf32>
    %2 = tpu.matmul %0, %1, %cst {dimension_numbers = #tpu.dot_dimension_numbers<[1], [0], [0], [1], [0, 0, 1, 1], [], []>} : vector<512x128xbf16>, vector<128x128xbf16>, vector<512x128xf32> -> vector<512x128xf32>
    %c0_3 = arith.constant 0 : index
    %c0_4 = arith.constant 0 : index
    %3 = vector.load %arg4[%c0_3, %c0_4] : memref<1x128xf32, #tpu.memory_space<vmem>>, vector<1x128xf32>
    %4 = vector.broadcast %3 : vector<1x128xf32> to vector<512x128xf32>
    %5 = arith.addf %2, %4 : vector<512x128xf32>
    %cst_5 = arith.constant 0.000000e+00 : f32
    %6 = vector.broadcast %cst_5 : f32 to vector<512x128xf32>
    %7 = arith.maximumf %5, %6 : vector<512x128xf32>
    %8 = arith.truncf %7 : vector<512x128xf32> to vector<512x128xbf16>
    %c0_6 = arith.constant 0 : index
    %c0_7 = arith.constant 0 : index
    %9 = vector.load %arg5[%c0_6, %c0_7] : memref<512x128xbf16, #tpu.memory_space<vmem>>, vector<512x128xbf16>
    tpu.vector_store %arg5[%c0_6, %c0_7], %8 {strides = array<i32>} : memref<512x128xbf16, #tpu.memory_space<vmem>>, vector<512x128xbf16>,
    return
  }
  func.func @transform_0(%arg0: i32, %arg1: i32) -> (i32, i32) {
    %c0_i32 = arith.constant 0 : i32
    %c0_i32_0 = arith.constant 0 : i32
    return %arg0, %c0_i32 : i32, i32
  }
  func.func @transform_1(%arg0: i32, %arg1: i32) -> (i32, i32) {
    %c0_i32 = arith.constant 0 : i32
    %c0_i32_0 = arith.constant 0 : i32
    return %c0_i32, %arg1 : i32, i32
  }
  func.func @transform_2(%arg0: i32, %arg1: i32) -> (i32, i32) {
    %c0_i32 = arith.constant 0 : i32
    %c0_i32_0 = arith.constant 0 : i32
    return %c0_i32, %arg1 : i32, i32
  }
  func.func @transform_3(%arg0: i32, %arg1: i32) -> (i32, i32) {
    %c0_i32 = arith.constant 0 : i32
    return %arg0, %arg1 : i32, i32
  }
}

module attributes {stable_mosaic.version = 11 : i64} {
  func.func @_mm_bias_relu_kernel(%arg0: i32, %arg1: i32, %arg2: memref<256x1152xbf16, #tpu.memory_space<vmem>>, %arg3: memref<1152x128xbf16, #tpu.memory_space<vmem>>, %arg4: memref<1x128xf32, #tpu.memory_space<vmem>>, %arg5: memref<256x128xbf16, #tpu.memory_space<vmem>>) attributes {dimension_semantics = [#tpu.dimension_semantics<parallel>, #tpu.dimension_semantics<parallel>], iteration_bounds = array<i64: 2, 1>, scalar_prefetch = 0 : i64, scratch_operands = 0 : i64, tpu.core_type = #tpu.core_type<tc>, window_params = [{transform_indices = @transform_0, window_bounds = array<i64: 256, 1152>}, {transform_indices = @transform_1, window_bounds = array<i64: 1152, 128>}, {transform_indices = @transform_2, window_bounds = array<i64: 1, 128>}, {transform_indices = @transform_3, window_bounds = array<i64: 256, 128>}]} {
    %c0 = arith.constant 0 : index
    %c0_0 = arith.constant 0 : index
    %0 = vector.load %arg2[%c0, %c0_0] : memref<256x1152xbf16, #tpu.memory_space<vmem>>, vector<256x1152xbf16>
    %c0_1 = arith.constant 0 : index
    %c0_2 = arith.constant 0 : index
    %1 = vector.load %arg3[%c0_1, %c0_2] : memref<1152x128xbf16, #tpu.memory_space<vmem>>, vector<1152x128xbf16>
    %cst = arith.constant dense<0.000000e+00> : vector<256x128xf32>
    %2 = tpu.matmul %0, %1, %cst {dimension_numbers = #tpu.dot_dimension_numbers<[1], [0], [0], [1], [0, 0, 1, 1], [], []>} : vector<256x1152xbf16>, vector<1152x128xbf16>, vector<256x128xf32> -> vector<256x128xf32>
    %c0_3 = arith.constant 0 : index
    %c0_4 = arith.constant 0 : index
    %3 = vector.load %arg4[%c0_3, %c0_4] : memref<1x128xf32, #tpu.memory_space<vmem>>, vector<1x128xf32>
    %4 = vector.broadcast %3 : vector<1x128xf32> to vector<256x128xf32>
    %5 = arith.addf %2, %4 : vector<256x128xf32>
    %cst_5 = arith.constant 0.000000e+00 : f32
    %6 = vector.broadcast %cst_5 : f32 to vector<256x128xf32>
    %7 = arith.maximumf %5, %6 : vector<256x128xf32>
    %8 = arith.truncf %7 : vector<256x128xf32> to vector<256x128xbf16>
    %c0_6 = arith.constant 0 : index
    %c0_7 = arith.constant 0 : index
    %9 = vector.load %arg5[%c0_6, %c0_7] : memref<256x128xbf16, #tpu.memory_space<vmem>>, vector<256x128xbf16>
    tpu.vector_store %arg5[%c0_6, %c0_7], %8 {strides = array<i32>} : memref<256x128xbf16, #tpu.memory_space<vmem>>, vector<256x128xbf16>,
    return
  }
  func.func @transform_0(%arg0: i32, %arg1: i32) -> (i32, i32) {
    %c0_i32 = arith.constant 0 : i32
    %c0_i32_0 = arith.constant 0 : i32
    return %arg0, %c0_i32 : i32, i32
  }
  func.func @transform_1(%arg0: i32, %arg1: i32) -> (i32, i32) {
    %c0_i32 = arith.constant 0 : i32
    %c0_i32_0 = arith.constant 0 : i32
    return %c0_i32, %arg1 : i32, i32
  }
  func.func @transform_2(%arg0: i32, %arg1: i32) -> (i32, i32) {
    %c0_i32 = arith.constant 0 : i32
    %c0_i32_0 = arith.constant 0 : i32
    return %c0_i32, %arg1 : i32, i32
  }
  func.func @transform_3(%arg0: i32, %arg1: i32) -> (i32, i32) {
    %c0_i32 = arith.constant 0 : i32
    return %arg0, %arg1 : i32, i32
  }
}

module attributes {stable_mosaic.version = 11 : i64} {
  func.func @_mm_bias_relu_kernel(%arg0: i32, %arg1: i32, %arg2: memref<128x1152xbf16, #tpu.memory_space<vmem>>, %arg3: memref<1152x128xbf16, #tpu.memory_space<vmem>>, %arg4: memref<1x128xf32, #tpu.memory_space<vmem>>, %arg5: memref<128x128xbf16, #tpu.memory_space<vmem>>) attributes {dimension_semantics = [#tpu.dimension_semantics<parallel>, #tpu.dimension_semantics<parallel>], iteration_bounds = array<i64: 1, 2>, scalar_prefetch = 0 : i64, scratch_operands = 0 : i64, tpu.core_type = #tpu.core_type<tc>, window_params = [{transform_indices = @transform_0, window_bounds = array<i64: 128, 1152>}, {transform_indices = @transform_1, window_bounds = array<i64: 1152, 128>}, {transform_indices = @transform_2, window_bounds = array<i64: 1, 128>}, {transform_indices = @transform_3, window_bounds = array<i64: 128, 128>}]} {
    %c0 = arith.constant 0 : index
    %c0_0 = arith.constant 0 : index
    %0 = vector.load %arg2[%c0, %c0_0] : memref<128x1152xbf16, #tpu.memory_space<vmem>>, vector<128x1152xbf16>
    %c0_1 = arith.constant 0 : index
    %c0_2 = arith.constant 0 : index
    %1 = vector.load %arg3[%c0_1, %c0_2] : memref<1152x128xbf16, #tpu.memory_space<vmem>>, vector<1152x128xbf16>
    %cst = arith.constant dense<0.000000e+00> : vector<128x128xf32>
    %2 = tpu.matmul %0, %1, %cst {dimension_numbers = #tpu.dot_dimension_numbers<[1], [0], [0], [1], [0, 0, 1, 1], [], []>} : vector<128x1152xbf16>, vector<1152x128xbf16>, vector<128x128xf32> -> vector<128x128xf32>
    %c0_3 = arith.constant 0 : index
    %c0_4 = arith.constant 0 : index
    %3 = vector.load %arg4[%c0_3, %c0_4] : memref<1x128xf32, #tpu.memory_space<vmem>>, vector<1x128xf32>
    %4 = vector.broadcast %3 : vector<1x128xf32> to vector<128x128xf32>
    %5 = arith.addf %2, %4 : vector<128x128xf32>
    %cst_5 = arith.constant 0.000000e+00 : f32
    %6 = vector.broadcast %cst_5 : f32 to vector<128x128xf32>
    %7 = arith.maximumf %5, %6 : vector<128x128xf32>
    %8 = arith.truncf %7 : vector<128x128xf32> to vector<128x128xbf16>
    %c0_6 = arith.constant 0 : index
    %c0_7 = arith.constant 0 : index
    %9 = vector.load %arg5[%c0_6, %c0_7] : memref<128x128xbf16, #tpu.memory_space<vmem>>, vector<128x128xbf16>
    tpu.vector_store %arg5[%c0_6, %c0_7], %8 {strides = array<i32>} : memref<128x128xbf16, #tpu.memory_space<vmem>>, vector<128x128xbf16>,
    return
  }
  func.func @transform_0(%arg0: i32, %arg1: i32) -> (i32, i32) {
    %c0_i32 = arith.constant 0 : i32
    %c0_i32_0 = arith.constant 0 : i32
    return %arg0, %c0_i32 : i32, i32
  }
  func.func @transform_1(%arg0: i32, %arg1: i32) -> (i32, i32) {
    %c0_i32 = arith.constant 0 : i32
    %c0_i32_0 = arith.constant 0 : i32
    return %c0_i32, %arg1 : i32, i32
  }
  func.func @transform_2(%arg0: i32, %arg1: i32) -> (i32, i32) {
    %c0_i32 = arith.constant 0 : i32
    %c0_i32_0 = arith.constant 0 : i32
    return %c0_i32, %arg1 : i32, i32
  }
  func.func @transform_3(%arg0: i32, %arg1: i32) -> (i32, i32) {
    %c0_i32 = arith.constant 0 : i32
    return %arg0, %arg1 : i32, i32
  }
}

module attributes {stable_mosaic.version = 11 : i64} {
  func.func @_mm_bias_relu_kernel(%arg0: i32, %arg1: i32, %arg2: memref<128x2304xbf16, #tpu.memory_space<vmem>>, %arg3: memref<2304x128xbf16, #tpu.memory_space<vmem>>, %arg4: memref<1x128xf32, #tpu.memory_space<vmem>>, %arg5: memref<128x128xbf16, #tpu.memory_space<vmem>>) attributes {dimension_semantics = [#tpu.dimension_semantics<parallel>, #tpu.dimension_semantics<parallel>], iteration_bounds = array<i64: 1, 1>, scalar_prefetch = 0 : i64, scratch_operands = 0 : i64, tpu.core_type = #tpu.core_type<tc>, window_params = [{transform_indices = @transform_0, window_bounds = array<i64: 128, 2304>}, {transform_indices = @transform_1, window_bounds = array<i64: 2304, 128>}, {transform_indices = @transform_2, window_bounds = array<i64: 1, 128>}, {transform_indices = @transform_3, window_bounds = array<i64: 128, 128>}]} {
    %c0 = arith.constant 0 : index
    %c0_0 = arith.constant 0 : index
    %0 = vector.load %arg2[%c0, %c0_0] : memref<128x2304xbf16, #tpu.memory_space<vmem>>, vector<128x2304xbf16>
    %c0_1 = arith.constant 0 : index
    %c0_2 = arith.constant 0 : index
    %1 = vector.load %arg3[%c0_1, %c0_2] : memref<2304x128xbf16, #tpu.memory_space<vmem>>, vector<2304x128xbf16>
    %cst = arith.constant dense<0.000000e+00> : vector<128x128xf32>
    %2 = tpu.matmul %0, %1, %cst {dimension_numbers = #tpu.dot_dimension_numbers<[1], [0], [0], [1], [0, 0, 1, 1], [], []>} : vector<128x2304xbf16>, vector<2304x128xbf16>, vector<128x128xf32> -> vector<128x128xf32>
    %c0_3 = arith.constant 0 : index
    %c0_4 = arith.constant 0 : index
    %3 = vector.load %arg4[%c0_3, %c0_4] : memref<1x128xf32, #tpu.memory_space<vmem>>, vector<1x128xf32>
    %4 = vector.broadcast %3 : vector<1x128xf32> to vector<128x128xf32>
    %5 = arith.addf %2, %4 : vector<128x128xf32>
    %cst_5 = arith.constant 0.000000e+00 : f32
    %6 = vector.broadcast %cst_5 : f32 to vector<128x128xf32>
    %7 = arith.maximumf %5, %6 : vector<128x128xf32>
    %8 = arith.truncf %7 : vector<128x128xf32> to vector<128x128xbf16>
    %c0_6 = arith.constant 0 : index
    %c0_7 = arith.constant 0 : index
    %9 = vector.load %arg5[%c0_6, %c0_7] : memref<128x128xbf16, #tpu.memory_space<vmem>>, vector<128x128xbf16>
    tpu.vector_store %arg5[%c0_6, %c0_7], %8 {strides = array<i32>} : memref<128x128xbf16, #tpu.memory_space<vmem>>, vector<128x128xbf16>,
    return
  }
  func.func @transform_0(%arg0: i32, %arg1: i32) -> (i32, i32) {
    %c0_i32 = arith.constant 0 : i32
    %c0_i32_0 = arith.constant 0 : i32
    return %arg0, %c0_i32 : i32, i32
  }
  func.func @transform_1(%arg0: i32, %arg1: i32) -> (i32, i32) {
    %c0_i32 = arith.constant 0 : i32
    %c0_i32_0 = arith.constant 0 : i32
    return %c0_i32, %arg1 : i32, i32
  }
  func.func @transform_2(%arg0: i32, %arg1: i32) -> (i32, i32) {
    %c0_i32 = arith.constant 0 : i32
    %c0_i32_0 = arith.constant 0 : i32
    return %c0_i32, %arg1 : i32, i32
  }
  func.func @transform_3(%arg0: i32, %arg1: i32) -> (i32, i32) {
    %c0_i32 = arith.constant 0 : i32
    return %arg0, %arg1 : i32, i32
  }
}

module attributes {stable_mosaic.version = 11 : i64} {
  func.func @_head_kernel(%arg0: i32, %arg1: memref<8x896xbf16, #tpu.memory_space<vmem>>, %arg2: memref<896x512xbf16, #tpu.memory_space<vmem>>, %arg3: memref<1x512xf32, #tpu.memory_space<vmem>>, %arg4: memref<512x128xbf16, #tpu.memory_space<vmem>>, %arg5: memref<1x128xf32, #tpu.memory_space<vmem>>, %arg6: memref<8x128xf32, #tpu.memory_space<vmem>>, %arg7: memref<8x512xf32, #tpu.memory_space<vmem>>) attributes {dimension_semantics = [#tpu.dimension_semantics<arbitrary>], iteration_bounds = array<i64: 7>, scalar_prefetch = 0 : i64, scratch_operands = 1 : i64, tpu.core_type = #tpu.core_type<tc>, window_params = [{transform_indices = @transform_0, window_bounds = array<i64: 8, 896>}, {transform_indices = @transform_1, window_bounds = array<i64: 896, 512>}, {pipeline_mode = #tpu.pipeline_mode<synchronous>, transform_indices = @transform_2, window_bounds = array<i64: 1, 512>}, {pipeline_mode = #tpu.pipeline_mode<synchronous>, transform_indices = @transform_3, window_bounds = array<i64: 512, 128>}, {pipeline_mode = #tpu.pipeline_mode<synchronous>, transform_indices = @transform_4, window_bounds = array<i64: 1, 128>}, {pipeline_mode = #tpu.pipeline_mode<synchronous>, transform_indices = @transform_5, window_bounds = array<i64: 8, 128>}]} {
    %c0_i32 = arith.constant 0 : i32
    %0 = arith.cmpi eq, %arg0, %c0_i32 : i32
    %1 = arith.extui %0 : i1 to i32
    %c0_i32_0 = arith.constant 0 : i32
    %2 = arith.cmpi ne, %1, %c0_i32_0 : i32
    scf.if %2 {
      %cst_9 = arith.constant 0.000000e+00 : f32
      %12 = vector.broadcast %cst_9 : f32 to vector<8x512xf32>
      %c0_10 = arith.constant 0 : index
      %c0_11 = arith.constant 0 : index
      %13 = vector.load %arg7[%c0_10, %c0_11] : memref<8x512xf32, #tpu.memory_space<vmem>>, vector<8x512xf32>
      tpu.vector_store %arg7[%c0_10, %c0_11], %12 {strides = array<i32>} : memref<8x512xf32, #tpu.memory_space<vmem>>, vector<8x512xf32>,
    } else {
    }
    %c0 = arith.constant 0 : index
    %c0_1 = arith.constant 0 : index
    %3 = vector.load %arg7[%c0, %c0_1] : memref<8x512xf32, #tpu.memory_space<vmem>>, vector<8x512xf32>
    %c0_2 = arith.constant 0 : index
    %c0_3 = arith.constant 0 : index
    %4 = vector.load %arg1[%c0_2, %c0_3] : memref<8x896xbf16, #tpu.memory_space<vmem>>, vector<8x896xbf16>
    %c0_4 = arith.constant 0 : index
    %c0_5 = arith.constant 0 : index
    %5 = vector.load %arg2[%c0_4, %c0_5] : memref<896x512xbf16, #tpu.memory_space<vmem>>, vector<896x512xbf16>
    %cst = arith.constant dense<0.000000e+00> : vector<8x512xf32>
    %6 = tpu.matmul %4, %5, %cst {dimension_numbers = #tpu.dot_dimension_numbers<[1], [0], [0], [1], [0, 0, 1, 1], [], []>} : vector<8x896xbf16>, vector<896x512xbf16>, vector<8x512xf32> -> vector<8x512xf32>
    %7 = arith.addf %3, %6 : vector<8x512xf32>
    %c0_6 = arith.constant 0 : index
    %c0_7 = arith.constant 0 : index
    %8 = vector.load %arg7[%c0_6, %c0_7] : memref<8x512xf32, #tpu.memory_space<vmem>>, vector<8x512xf32>
    tpu.vector_store %arg7[%c0_6, %c0_7], %7 {strides = array<i32>} : memref<8x512xf32, #tpu.memory_space<vmem>>, vector<8x512xf32>,
    %c6_i32 = arith.constant 6 : i32
    %9 = arith.cmpi eq, %arg0, %c6_i32 : i32
    %10 = arith.extui %9 : i1 to i32
    %c0_i32_8 = arith.constant 0 : i32
    %11 = arith.cmpi ne, %10, %c0_i32_8 : i32
    scf.if %11 {
      %c0_9 = arith.constant 0 : index
      %c0_10 = arith.constant 0 : index
      %12 = vector.load %arg7[%c0_9, %c0_10] : memref<8x512xf32, #tpu.memory_space<vmem>>, vector<8x512xf32>
      %c0_11 = arith.constant 0 : index
      %c0_12 = arith.constant 0 : index
      %13 = vector.load %arg3[%c0_11, %c0_12] : memref<1x512xf32, #tpu.memory_space<vmem>>, vector<1x512xf32>
      %14 = vector.broadcast %13 : vector<1x512xf32> to vector<8x512xf32>
      %15 = arith.addf %12, %14 : vector<8x512xf32>
      %cst_13 = arith.constant 0.000000e+00 : f32
      %16 = vector.broadcast %cst_13 : f32 to vector<8x512xf32>
      %17 = arith.maximumf %15, %16 : vector<8x512xf32>
      %18 = arith.truncf %17 : vector<8x512xf32> to vector<8x512xbf16>
      %c0_14 = arith.constant 0 : index
      %c0_15 = arith.constant 0 : index
      %19 = vector.load %arg4[%c0_14, %c0_15] : memref<512x128xbf16, #tpu.memory_space<vmem>>, vector<512x128xbf16>
      %cst_16 = arith.constant dense<0.000000e+00> : vector<8x128xf32>
      %20 = tpu.matmul %18, %19, %cst_16 {dimension_numbers = #tpu.dot_dimension_numbers<[1], [0], [0], [1], [0, 0, 1, 1], [], []>} : vector<8x512xbf16>, vector<512x128xbf16>, vector<8x128xf32> -> vector<8x128xf32>
      %c0_17 = arith.constant 0 : index
      %c0_18 = arith.constant 0 : index
      %21 = vector.load %arg5[%c0_17, %c0_18] : memref<1x128xf32, #tpu.memory_space<vmem>>, vector<1x128xf32>
      %22 = vector.broadcast %21 : vector<1x128xf32> to vector<8x128xf32>
      %23 = arith.addf %20, %22 : vector<8x128xf32>
      %c0_19 = arith.constant 0 : index
      %c0_20 = arith.constant 0 : index
      %24 = vector.load %arg6[%c0_19, %c0_20] : memref<8x128xf32, #tpu.memory_space<vmem>>, vector<8x128xf32>
      tpu.vector_store %arg6[%c0_19, %c0_20], %23 {strides = array<i32>} : memref<8x128xf32, #tpu.memory_space<vmem>>, vector<8x128xf32>,
    } else {
    }
    return
  }
  func.func @transform_0(%arg0: i32) -> (i32, i32) {
    %c0_i32 = arith.constant 0 : i32
    %c0_i32_0 = arith.constant 0 : i32
    return %c0_i32, %arg0 : i32, i32
  }
  func.func @transform_1(%arg0: i32) -> (i32, i32) {
    %c0_i32 = arith.constant 0 : i32
    %c0_i32_0 = arith.constant 0 : i32
    return %arg0, %c0_i32 : i32, i32
  }
  func.func @transform_2(%arg0: i32) -> (i32, i32) {
    %c0_i32 = arith.constant 0 : i32
    %c0_i32_0 = arith.constant 0 : i32
    %c0_i32_1 = arith.constant 0 : i32
    return %c0_i32, %c0_i32_0 : i32, i32
  }
  func.func @transform_3(%arg0: i32) -> (i32, i32) {
    %c0_i32 = arith.constant 0 : i32
    %c0_i32_0 = arith.constant 0 : i32
    %c0_i32_1 = arith.constant 0 : i32
    return %c0_i32, %c0_i32_0 : i32, i32
  }
  func.func @transform_4(%arg0: i32) -> (i32, i32) {
    %c0_i32 = arith.constant 0 : i32
    %c0_i32_0 = arith.constant 0 : i32
    %c0_i32_1 = arith.constant 0 : i32
    return %c0_i32, %c0_i32_0 : i32, i32
  }
  func.func @transform_5(%arg0: i32) -> (i32, i32) {
    %c0_i32 = arith.constant 0 : i32
    %c0_i32_0 = arith.constant 0 : i32
    %c0_i32_1 = arith.constant 0 : i32
    return %c0_i32, %c0_i32_0 : i32, i32
  }
}

</mosaic_0001>

<bundles_post_ra>
// kernel: qimage_forward.5
= control target key start
LH: loop header
LB: loop body
LE: loop exit
PB: predicated region body
PF: predicated region fallthrough
CT: control target
= control target key end

     0   :  { %s1945_s12 = smov 0   ;;  %s1947_s13 = smov 0   ;;  %s2146_s0 = inlined_call_operand.vmem [shape: bf16[1536,128], index: 0, kind: input, shape index: {}]   ;;  %s2147_s1 = inlined_call_operand.vmem [shape: bf16[128,128], index: 1, kind: input, shape index: {}]   ;;  %s2148_s2 = inlined_call_operand.vmem [shape: f32[1,128], index: 2, kind: input, shape index: {}]   ;;  %s2149_s3 = inlined_call_operand.vmem [shape: bf16[1536,128], index: 3, kind: output, shape index: {}]  }
   0x1   :  { %s1949_s14 = smov 0  }
   0x2 LB: > { %s25_s15 = sadd.s32 1, %s1919_s13  ;;  %p1334_p0 = scmp.ge.s32.totalorder %s1923_s14, 1  ;;  %s1923_s14 = sphi %s1949_s14, %s13_s14   ;;  %s1919_s13 = sphi %s1947_s13, %s2151_s13   ;;  %s1915_s12 = sphi %s1945_s12, %s2150_s12  }
   0x3   : > { %p27_p1 = scmp.ge.s32.totalorder %s25_s15, 3  ;;  %p169_p2 = scmp.lt.s32.totalorder %s1923_s14, 4 }
   0x5   : > { %s2153_s15 = smov (%p27_p1, %s25_s15), 0  ;;  %p170_p3 = pnand %p1334_p0, %p169_p2 }
   0x6   : > { %s1335_s18 = sshll.u32 (!%p170_p3), %s1915_s12, 6 }
   0x7   : > { %173 = sbr.rel (%p170_p3) target bundleno = 307 (0x133), region = 32  ;;  %p204_p4 = scmp.lt.s32.totalorder (!%p170_p3), %s1335_s18, 191 }
   0xc   : > { %v1861_v0 = vld [vmem:[%s2147_s1 + $0x38] sm:$0xff]   ;;  %v1862_v1 = vld [vmem:[%s2147_s1 + $0x30] sm:$0xff]   ;;  %s2155_s18 = smov (!%p204_p4, %s1335_s18), 191  ;;  %v1863_v2 = vld [vmem:[%s2147_s1 + $0x28] sm:$0xff]  }
   0xd   : > { %1741 = vmatprep.subr.bf16.mxu0 %v1861_v0  ;;  %1821 = vmatprep.subr.bf16.mxu1 %v1861_v0  ;;  %s1336_s23 = sshll.u32 %s2155_s18, 2  ;;  %v1864_v3 = vld [vmem:[%s2147_s1 + $0x20] sm:$0xff]   ;;  %v1865_v6 = vld [vmem:[%s2147_s1 + $0x18] sm:$0xff]   ;;  %v1866_v7 = vld [vmem:[%s2147_s1 + $0x10] sm:$0xff]  }
   0xe   : > { %1742 = vmatpush3.bf16.msra.mxu0 %v1861_v0  ;;  %1829 = vmatpush3.bf16.msra.mxu1 %v1861_v0  ;;  %s1980_s26 = scalar_lea.vmem %s2146_s0, %s1336_s23  ;;  %v1867_v8 = vld [vmem:[%s2147_s1 + $0x8] sm:$0xff]   ;;  %v1868_v9 = vld [vmem:[%s2147_s1] sm:$0xff]   ;;  %s2047_s17 = scalar_lea.vmem %s2149_s3, %s1336_s23 }
   0xf   : > { %1743 = vmatprep.subr.bf16.mxu0 %v1862_v1  ;;  %1822 = vmatprep.subr.bf16.mxu1 %v1862_v1  ;;  %v1869_v4 = vld [vmem:[%s1980_s26] sm:$0xff]   ;;  %v1871_v10 = vld [vmem:[%s1980_s26 + $0x8] sm:$0xff]   ;;  %v1873_v12 = vld [vmem:[%s1980_s26 + $0x10] sm:$0xff]  }
  0x10   : > { %v1870_v5 = vld [vmem:[%s1980_s26 + $0x80] sm:$0xff]   ;;  %1757 = vmatprep.mubr.bf16.mxu0 %v1869_v4  ;;  %v1872_v11 = vld [vmem:[%s1980_s26 + $0x88] sm:$0xff]   ;;  %v1874_v13 = vld [vmem:[%s1980_s26 + $0x90] sm:$0xff]  }
  0x11   : > { %1789 = vmatprep.mubr.bf16.mxu1 %v1870_v5  ;;  %v1875_v14 = vld [vmem:[%s1980_s26 + $0x18] sm:$0xff]   ;;  %v1877_v16 = vld [vmem:[%s1980_s26 + $0x20] sm:$0xff]   ;;  %v1879_v18 = vld [vmem:[%s1980_s26 + $0x28] sm:$0xff]  }
  0x12   : > { %1744 = vmatpush3.bf16.msra.mxu0 %v1862_v1  ;;  %1830 = vmatpush3.bf16.msra.mxu1 %v1862_v1  ;;  %v1876_v15 = vld [vmem:[%s1980_s26 + $0x98] sm:$0xff]   ;;  %v1878_v17 = vld [vmem:[%s1980_s26 + $0xa0] sm:$0xff]   ;;  %v1880_v19 = vld [vmem:[%s1980_s26 + $0xa8] sm:$0xff]  }
  0x13   : > { %1745 = vmatprep.subr.bf16.mxu0 %v1863_v2  ;;  %1823 = vmatprep.subr.bf16.mxu1 %v1863_v2  ;;  %v1881_v20 = vld [vmem:[%s1980_s26 + $0x30] sm:$0xff]   ;;  %v1883_v22 = vld [vmem:[%s1980_s26 + $0x38] sm:$0xff]   ;;  %v1885_v24 = vld [vmem:[%s1980_s26 + $0x40] sm:$0xff]  }
  0x14   : > { %v1882_v21 = vld [vmem:[%s1980_s26 + $0xb0] sm:$0xff]   ;;  %v1884_v23 = vld [vmem:[%s1980_s26 + $0xb8] sm:$0xff]   ;;  %v1886_v25 = vld [vmem:[%s1980_s26 + $0xc0] sm:$0xff]  }
  0x15   : > { %v1887_v26 = vld [vmem:[%s1980_s26 + $0x48] sm:$0xff]   ;;  %v1889_v28 = vld [vmem:[%s1980_s26 + $0x50] sm:$0xff]   ;;  %v1891_v30 = vld [vmem:[%s1980_s26 + $0x58] sm:$0xff]  }
  0x16   : > { %1746 = vmatpush3.bf16.msra.mxu0 %v1863_v2  ;;  %1831 = vmatpush3.bf16.msra.mxu1 %v1863_v2  ;;  %v1888_v27 = vld [vmem:[%s1980_s26 + $0xc8] sm:$0xff]   ;;  %v1890_v29 = vld [vmem:[%s1980_s26 + $0xd0] sm:$0xff]   ;;  %v1892_v31 = vld [vmem:[%s1980_s26 + $0xd8] sm:$0xff]  }
  0x17   : > { %1747 = vmatprep.subr.bf16.mxu0 %v1864_v3  ;;  %1824 = vmatprep.subr.bf16.mxu1 %v1864_v3  ;;  %v1893_v32 = vld [vmem:[%s1980_s26 + $0x60] sm:$0xff]   ;;  %v1895_v34 = vld [vmem:[%s1980_s26 + $0x68] sm:$0xff]   ;;  %v1897_v36 = vld [vmem:[%s1980_s26 + $0x70] sm:$0xff]  }
  0x18   : > { %v1894_v33 = vld [vmem:[%s1980_s26 + $0xe0] sm:$0xff]   ;;  %v1896_v35 = vld [vmem:[%s1980_s26 + $0xe8] sm:$0xff]   ;;  %v1898_v37 = vld [vmem:[%s1980_s26 + $0xf0] sm:$0xff]  }
  0x19   : > { %v1899_v38 = vld [vmem:[%s1980_s26 + $0x78] sm:$0xff]   ;;  %v2032_v40 = vld [vmem:[%s2148_s2] ss:$0 sm:$0xff] }
  0x1a   : > { %1748 = vmatpush3.bf16.msra.mxu0 %v1864_v3  ;;  %1832 = vmatpush3.bf16.msra.mxu1 %v1864_v3  ;;  %v1900_v39 = vld [vmem:[%s1980_s26 + $0xf8] sm:$0xff]  }
  0x1b   : > { %1749 = vmatprep.subr.bf16.mxu0 %v1865_v6  ;;  %1825 = vmatprep.subr.bf16.mxu1 %v1865_v6 }
  0x1e   : > { %1750 = vmatpush3.bf16.msra.mxu0 %v1865_v6  ;;  %1833 = vmatpush3.bf16.msra.mxu1 %v1865_v6 }
  0x1f   : > { %1751 = vmatprep.subr.bf16.mxu0 %v1866_v7  ;;  %1826 = vmatprep.subr.bf16.mxu1 %v1866_v7 }
  0x22   : > { %1752 = vmatpush3.bf16.msra.mxu0 %v1866_v7  ;;  %1834 = vmatpush3.bf16.msra.mxu1 %v1866_v7 }
  0x23   : > { %1753 = vmatprep.subr.bf16.mxu0 %v1867_v8  ;;  %1827 = vmatprep.subr.bf16.mxu1 %v1867_v8 }
  0x26   : > { %1754 = vmatpush3.bf16.msra.mxu0 %v1867_v8  ;;  %1835 = vmatpush3.bf16.msra.mxu1 %v1867_v8 }
  0x27   : > { %1755 = vmatprep.subr.bf16.mxu0 %v1868_v9  ;;  %1828 = vmatprep.subr.bf16.mxu1 %v1868_v9 }
  0x2a   : > { %1756 = vmatpush3.bf16.msra.mxu0 %v1868_v9  ;;  %1836 = vmatpush3.bf16.msra.mxu1 %v1868_v9 }
  0x2d   : > { %1758 = vmatmul.mubr.bf16.vlgmr.msra.gmra.mxu0 %v1871_v10  ;;  %1790 = vmatmul.mubr.bf16.vlgmr.msra.gmra.mxu1 %v1872_v11 }
  0x2e   : > { %1761 = vmatprep.mubr.bf16.mxu0 %v1873_v12  ;;  %1793 = vmatprep.mubr.bf16.mxu1 %v1874_v13 }
  0x35   : > { %1762 = vmatmul.mubr.bf16.gmra.mxu0 %v1875_v14  ;;  %1794 = vmatmul.mubr.bf16.gmra.mxu1 %v1876_v15 }
  0x36   : > { %1765 = vmatprep.mubr.bf16.mxu0 %v1877_v16  ;;  %1797 = vmatprep.mubr.bf16.mxu1 %v1878_v17 }
  0x3d   : > { %1766 = vmatmul.mubr.bf16.gmra.mxu0 %v1879_v18  ;;  %1798 = vmatmul.mubr.bf16.gmra.mxu1 %v1880_v19 }
  0x3e   : > { %1769 = vmatprep.mubr.bf16.mxu0 %v1881_v20  ;;  %1801 = vmatprep.mubr.bf16.mxu1 %v1882_v21 }
  0x45   : > { %1770 = vmatmul.mubr.bf16.gmra.mxu0 %v1883_v22  ;;  %1802 = vmatmul.mubr.bf16.gmra.mxu1 %v1884_v23 }
  0x46   : > { %1773 = vmatprep.mubr.bf16.mxu0 %v1885_v24  ;;  %1805 = vmatprep.mubr.bf16.mxu1 %v1886_v25 }
  0x4d   : > { %1774 = vmatmul.mubr.bf16.gmra.mxu0 %v1887_v26  ;;  %1806 = vmatmul.mubr.bf16.gmra.mxu1 %v1888_v27 }
  0x4e   : > { %1777 = vmatprep.mubr.bf16.mxu0 %v1889_v28  ;;  %1809 = vmatprep.mubr.bf16.mxu1 %v1890_v29 }
  0x55   : > { %1778 = vmatmul.mubr.bf16.gmra.mxu0 %v1891_v30  ;;  %1810 = vmatmul.mubr.bf16.gmra.mxu1 %v1892_v31 }
  0x56   : > { %1781 = vmatprep.mubr.bf16.mxu0 %v1893_v32  ;;  %1813 = vmatprep.mubr.bf16.mxu1 %v1894_v33 }
  0x5d   : > { %1782 = vmatmul.mubr.bf16.gmra.mxu0 %v1895_v34  ;;  %1814 = vmatmul.mubr.bf16.gmra.mxu1 %v1896_v35 }
  0x5e   : > { %1785 = vmatprep.mubr.bf16.mxu0 %v1897_v36  ;;  %1817 = vmatprep.mubr.bf16.mxu1 %v1898_v37 }
  0x65   : > { %1786 = vmatmul.mubr.bf16.gmra.mxu0 %v1899_v38  ;;  %1818 = vmatmul.mubr.bf16.gmra.mxu1 %v1900_v39 }
  0xed   : > { %v1759_v41 = vpop.f32.mrf.mxu0  ;;  %v1791_v42 = vpop.f32.mrf.mxu1 }
  0xee   : > { %v596_v43 = vadd.f32 %v1759_v41, %v2032_v40  ;;  %v724_v44 = vadd.f32 %v1791_v42, %v2032_v40 }
  0xef   : > { %v587_v45 = vpop.f32.mrf.mxu0  ;;  %v715_v46 = vpop.f32.mrf.mxu1 }
  0xf0   : > { %v588_v47 = vadd.f32 %v2032_v40, %v587_v45  ;;  %v716_v48 = vadd.f32 %v2032_v40, %v715_v46  ;;  %v844_v53 = vmax.f32 %v596_v43, 0.0  ;;  %v876_v54 = vmax.f32 %v724_v44, 0.0 }
  0xf1   : > { %v1760_v49 = vpop.f32.mrf.mxu0  ;;  %v1792_v50 = vpop.f32.mrf.mxu1 }
  0xf2   : > { %v599_v51 = vadd.f32 %v1760_v49, %v2032_v40  ;;  %v727_v52 = vadd.f32 %v1792_v50, %v2032_v40  ;;  %v842_v61 = vmax.f32 %v588_v47, 0.0  ;;  %v874_v62 = vmax.f32 %v716_v48, 0.0 }
  0xf3   : > { %v590_v55 = vpop.f32.mrf.mxu0  ;;  %v718_v56 = vpop.f32.mrf.mxu1 }
  0xf4   : > { %v845_v57 = vmax.f32 %v599_v51, 0.0  ;;  %v877_v58 = vmax.f32 %v727_v52, 0.0  ;;  %v591_v59 = vadd.f32 %v2032_v40, %v590_v55  ;;  %v719_v60 = vadd.f32 %v2032_v40, %v718_v56 }
  0xf5   : > { %v1763_v63 = vpop.f32.mrf.mxu0  ;;  %v1795_v0 = vpop.f32.mrf.mxu1 }
  0xf6   : > { %v1518_v1 = vpack.c.bf16 %v845_v57, %v844_v53  ;;  %v1598_v2 = vpack.c.bf16 %v877_v58, %v876_v54  ;;  %v843_v3 = vmax.f32 %v591_v59, 0.0  ;;  %v875_v4 = vmax.f32 %v719_v60, 0.0 }
  0xf7   : > { %v612_v5 = vadd.f32 %v1763_v63, %v2032_v40  ;;  %v740_v6 = vadd.f32 %v1795_v0, %v2032_v40  ;;  %v603_v7 = vpop.f32.mrf.mxu0  ;;  %v731_v8 = vpop.f32.mrf.mxu1 }
  0xf8   : > { %1670 = vst [vmem:[%s2047_s17 + $0x8] sm:$0xff] %v1518_v1   ;;  %1686 = vst [vmem:[%s2047_s17 + $0x88] sm:$0xff] %v1598_v2   ;;  %v1513_v9 = vpack.c.bf16 %v843_v3, %v842_v61  ;;  %v1593_v10 = vpack.c.bf16 %v875_v4, %v874_v62  ;;  %v604_v11 = vadd.f32 %v2032_v40, %v603_v7 }
  0xf9   : > { %v732_v12 = vadd.f32 %v2032_v40, %v731_v8  ;;  %v1764_v13 = vpop.f32.mrf.mxu0  ;;  %v1796_v14 = vpop.f32.mrf.mxu1  ;;  %v848_v17 = vmax.f32 %v612_v5, 0.0  ;;  %v880_v18 = vmax.f32 %v740_v6, 0.0 }
  0xfa   : > { %1514 = vst [vmem:[%s2047_s17] sm:$0xff] %v1513_v9   ;;  %1685 = vst [vmem:[%s2047_s17 + $0x80] sm:$0xff] %v1593_v10   ;;  %v615_v15 = vadd.f32 %v1764_v13, %v2032_v40  ;;  %v743_v16 = vadd.f32 %v1796_v14, %v2032_v40  ;;  %v846_v25 = vmax.f32 %v604_v11, 0.0 }
  0xfb   : > { %v606_v19 = vpop.f32.mrf.mxu0  ;;  %v734_v20 = vpop.f32.mrf.mxu1  ;;  %v878_v26 = vmax.f32 %v732_v12, 0.0 }
  0xfc   : > { %v849_v21 = vmax.f32 %v615_v15, 0.0  ;;  %v881_v22 = vmax.f32 %v743_v16, 0.0  ;;  %v607_v23 = vadd.f32 %v2032_v40, %v606_v19  ;;  %v735_v24 = vadd.f32 %v2032_v40, %v734_v20 }
  0xfd   : > { %v1767_v27 = vpop.f32.mrf.mxu0  ;;  %v1799_v28 = vpop.f32.mrf.mxu1 }
  0xfe   : > { %v1528_v29 = vpack.c.bf16 %v849_v21, %v848_v17  ;;  %v1608_v30 = vpack.c.bf16 %v881_v22, %v880_v18  ;;  %v847_v31 = vmax.f32 %v607_v23, 0.0  ;;  %v879_v32 = vmax.f32 %v735_v24, 0.0 }
  0xff   : > { %v628_v33 = vadd.f32 %v1767_v27, %v2032_v40  ;;  %v756_v34 = vadd.f32 %v1799_v28, %v2032_v40  ;;  %v619_v35 = vpop.f32.mrf.mxu0  ;;  %v747_v36 = vpop.f32.mrf.mxu1 }
 0x100   : > { %1672 = vst [vmem:[%s2047_s17 + $0x18] sm:$0xff] %v1528_v29   ;;  %1688 = vst [vmem:[%s2047_s17 + $0x98] sm:$0xff] %v1608_v30   ;;  %v1523_v37 = vpack.c.bf16 %v847_v31, %v846_v25  ;;  %v1603_v38 = vpack.c.bf16 %v879_v32, %v878_v26  ;;  %v620_v39 = vadd.f32 %v2032_v40, %v619_v35 }
 0x101   : > { %v748_v41 = vadd.f32 %v2032_v40, %v747_v36  ;;  %v1768_v42 = vpop.f32.mrf.mxu0  ;;  %v1800_v43 = vpop.f32.mrf.mxu1  ;;  %v852_v46 = vmax.f32 %v628_v33, 0.0  ;;  %v884_v47 = vmax.f32 %v756_v34, 0.0 }
 0x102   : > { %1671 = vst [vmem:[%s2047_s17 + $0x10] sm:$0xff] %v1523_v37   ;;  %1687 = vst [vmem:[%s2047_s17 + $0x90] sm:$0xff] %v1603_v38   ;;  %v631_v44 = vadd.f32 %v1768_v42, %v2032_v40  ;;  %v759_v45 = vadd.f32 %v1800_v43, %v2032_v40  ;;  %v850_v54 = vmax.f32 %v620_v39, 0.0 }
 0x103   : > { %v622_v48 = vpop.f32.mrf.mxu0  ;;  %v750_v49 = vpop.f32.mrf.mxu1  ;;  %v882_v55 = vmax.f32 %v748_v41, 0.0 }
 0x104   : > { %v853_v50 = vmax.f32 %v631_v44, 0.0  ;;  %v885_v51 = vmax.f32 %v759_v45, 0.0  ;;  %v623_v52 = vadd.f32 %v2032_v40, %v622_v48  ;;  %v751_v53 = vadd.f32 %v2032_v40, %v750_v49 }
 0x105   : > { %v1771_v56 = vpop.f32.mrf.mxu0  ;;  %v1803_v57 = vpop.f32.mrf.mxu1 }
 0x106   : > { %v1538_v58 = vpack.c.bf16 %v853_v50, %v852_v46  ;;  %v1618_v59 = vpack.c.bf16 %v885_v51, %v884_v47  ;;  %v851_v60 = vmax.f32 %v623_v52, 0.0  ;;  %v883_v61 = vmax.f32 %v751_v53, 0.0 }
 0x107   : > { %v644_v62 = vadd.f32 %v1771_v56, %v2032_v40  ;;  %v772_v63 = vadd.f32 %v1803_v57, %v2032_v40  ;;  %v635_v0 = vpop.f32.mrf.mxu0  ;;  %v763_v1 = vpop.f32.mrf.mxu1 }
 0x108   : > { %1674 = vst [vmem:[%s2047_s17 + $0x28] sm:$0xff] %v1538_v58   ;;  %1690 = vst [vmem:[%s2047_s17 + $0xa8] sm:$0xff] %v1618_v59   ;;  %v1533_v2 = vpack.c.bf16 %v851_v60, %v850_v54  ;;  %v1613_v3 = vpack.c.bf16 %v883_v61, %v882_v55  ;;  %v636_v4 = vadd.f32 %v2032_v40, %v635_v0 }
 0x109   : > { %v764_v5 = vadd.f32 %v2032_v40, %v763_v1  ;;  %v1772_v6 = vpop.f32.mrf.mxu0  ;;  %v1804_v7 = vpop.f32.mrf.mxu1  ;;  %v856_v10 = vmax.f32 %v644_v62, 0.0  ;;  %v888_v11 = vmax.f32 %v772_v63, 0.0 }
 0x10a   : > { %1673 = vst [vmem:[%s2047_s17 + $0x20] sm:$0xff] %v1533_v2   ;;  %1689 = vst [vmem:[%s2047_s17 + $0xa0] sm:$0xff] %v1613_v3   ;;  %v647_v8 = vadd.f32 %v1772_v6, %v2032_v40  ;;  %v775_v9 = vadd.f32 %v1804_v7, %v2032_v40  ;;  %v854_v18 = vmax.f32 %v636_v4, 0.0 }
 0x10b   : > { %v638_v12 = vpop.f32.mrf.mxu0  ;;  %v766_v13 = vpop.f32.mrf.mxu1  ;;  %v886_v19 = vmax.f32 %v764_v5, 0.0 }
 0x10c   : > { %v857_v14 = vmax.f32 %v647_v8, 0.0  ;;  %v889_v15 = vmax.f32 %v775_v9, 0.0  ;;  %v639_v16 = vadd.f32 %v2032_v40, %v638_v12  ;;  %v767_v17 = vadd.f32 %v2032_v40, %v766_v13 }
 0x10d   : > { %v1775_v20 = vpop.f32.mrf.mxu0  ;;  %v1807_v21 = vpop.f32.mrf.mxu1 }
 0x10e   : > { %v1548_v22 = vpack.c.bf16 %v857_v14, %v856_v10  ;;  %v1628_v23 = vpack.c.bf16 %v889_v15, %v888_v11  ;;  %v855_v24 = vmax.f32 %v639_v16, 0.0  ;;  %v887_v25 = vmax.f32 %v767_v17, 0.0 }
 0x10f   : > { %v660_v26 = vadd.f32 %v1775_v20, %v2032_v40  ;;  %v788_v27 = vadd.f32 %v1807_v21, %v2032_v40  ;;  %v651_v28 = vpop.f32.mrf.mxu0  ;;  %v779_v29 = vpop.f32.mrf.mxu1 }
 0x110   : > { %1676 = vst [vmem:[%s2047_s17 + $0x38] sm:$0xff] %v1548_v22   ;;  %1692 = vst [vmem:[%s2047_s17 + $0xb8] sm:$0xff] %v1628_v23   ;;  %v1543_v30 = vpack.c.bf16 %v855_v24, %v854_v18  ;;  %v1623_v31 = vpack.c.bf16 %v887_v25, %v886_v19  ;;  %v652_v32 = vadd.f32 %v2032_v40, %v651_v28 }
 0x111   : > { %v780_v33 = vadd.f32 %v2032_v40, %v779_v29  ;;  %v1776_v34 = vpop.f32.mrf.mxu0  ;;  %v1808_v35 = vpop.f32.mrf.mxu1  ;;  %v860_v38 = vmax.f32 %v660_v26, 0.0  ;;  %v892_v39 = vmax.f32 %v788_v27, 0.0 }
 0x112   : > { %1675 = vst [vmem:[%s2047_s17 + $0x30] sm:$0xff] %v1543_v30   ;;  %1691 = vst [vmem:[%s2047_s17 + $0xb0] sm:$0xff] %v1623_v31   ;;  %v663_v36 = vadd.f32 %v1776_v34, %v2032_v40  ;;  %v791_v37 = vadd.f32 %v1808_v35, %v2032_v40  ;;  %v858_v47 = vmax.f32 %v652_v32, 0.0 }
 0x113   : > { %v654_v41 = vpop.f32.mrf.mxu0  ;;  %v782_v42 = vpop.f32.mrf.mxu1  ;;  %v890_v48 = vmax.f32 %v780_v33, 0.0 }
 0x114   : > { %v861_v43 = vmax.f32 %v663_v36, 0.0  ;;  %v893_v44 = vmax.f32 %v791_v37, 0.0  ;;  %v655_v45 = vadd.f32 %v2032_v40, %v654_v41  ;;  %v783_v46 = vadd.f32 %v2032_v40, %v782_v42 }
 0x115   : > { %v1779_v49 = vpop.f32.mrf.mxu0  ;;  %v1811_v50 = vpop.f32.mrf.mxu1 }
 0x116   : > { %v1558_v51 = vpack.c.bf16 %v861_v43, %v860_v38  ;;  %v1638_v52 = vpack.c.bf16 %v893_v44, %v892_v39  ;;  %v859_v53 = vmax.f32 %v655_v45, 0.0  ;;  %v891_v54 = vmax.f32 %v783_v46, 0.0 }
 0x117   : > { %v676_v55 = vadd.f32 %v1779_v49, %v2032_v40  ;;  %v804_v56 = vadd.f32 %v1811_v50, %v2032_v40  ;;  %v667_v57 = vpop.f32.mrf.mxu0  ;;  %v795_v58 = vpop.f32.mrf.mxu1 }
 0x118   : > { %1678 = vst [vmem:[%s2047_s17 + $0x48] sm:$0xff] %v1558_v51   ;;  %1694 = vst [vmem:[%s2047_s17 + $0xc8] sm:$0xff] %v1638_v52   ;;  %v1553_v59 = vpack.c.bf16 %v859_v53, %v858_v47  ;;  %v1633_v60 = vpack.c.bf16 %v891_v54, %v890_v48  ;;  %v668_v61 = vadd.f32 %v2032_v40, %v667_v57 }
 0x119   : > { %v796_v62 = vadd.f32 %v2032_v40, %v795_v58  ;;  %v1780_v63 = vpop.f32.mrf.mxu0  ;;  %v1812_v0 = vpop.f32.mrf.mxu1  ;;  %v864_v3 = vmax.f32 %v676_v55, 0.0  ;;  %v896_v4 = vmax.f32 %v804_v56, 0.0 }
 0x11a   : > { %1677 = vst [vmem:[%s2047_s17 + $0x40] sm:$0xff] %v1553_v59   ;;  %1693 = vst [vmem:[%s2047_s17 + $0xc0] sm:$0xff] %v1633_v60   ;;  %v679_v1 = vadd.f32 %v1780_v63, %v2032_v40  ;;  %v807_v2 = vadd.f32 %v1812_v0, %v2032_v40  ;;  %v862_v11 = vmax.f32 %v668_v61, 0.0 }
 0x11b   : > { %v670_v5 = vpop.f32.mrf.mxu0  ;;  %v798_v6 = vpop.f32.mrf.mxu1  ;;  %v894_v12 = vmax.f32 %v796_v62, 0.0 }
 0x11c   : > { %v865_v7 = vmax.f32 %v679_v1, 0.0  ;;  %v897_v8 = vmax.f32 %v807_v2, 0.0  ;;  %v671_v9 = vadd.f32 %v2032_v40, %v670_v5  ;;  %v799_v10 = vadd.f32 %v2032_v40, %v798_v6 }
 0x11d   : > { %v1783_v13 = vpop.f32.mrf.mxu0  ;;  %v1815_v14 = vpop.f32.mrf.mxu1 }
 0x11e   : > { %v1568_v15 = vpack.c.bf16 %v865_v7, %v864_v3  ;;  %v1648_v16 = vpack.c.bf16 %v897_v8, %v896_v4  ;;  %v863_v17 = vmax.f32 %v671_v9, 0.0  ;;  %v895_v18 = vmax.f32 %v799_v10, 0.0 }
 0x11f   : > { %v692_v19 = vadd.f32 %v1783_v13, %v2032_v40  ;;  %v820_v20 = vadd.f32 %v1815_v14, %v2032_v40  ;;  %v683_v21 = vpop.f32.mrf.mxu0  ;;  %v811_v22 = vpop.f32.mrf.mxu1 }
 0x120   : > { %1680 = vst [vmem:[%s2047_s17 + $0x58] sm:$0xff] %v1568_v15   ;;  %1696 = vst [vmem:[%s2047_s17 + $0xd8] sm:$0xff] %v1648_v16   ;;  %v1563_v23 = vpack.c.bf16 %v863_v17, %v862_v11  ;;  %v1643_v24 = vpack.c.bf16 %v895_v18, %v894_v12  ;;  %v684_v25 = vadd.f32 %v2032_v40, %v683_v21 }
 0x121   : > { %v812_v26 = vadd.f32 %v2032_v40, %v811_v22  ;;  %v1784_v27 = vpop.f32.mrf.mxu0  ;;  %v1816_v28 = vpop.f32.mrf.mxu1  ;;  %v868_v31 = vmax.f32 %v692_v19, 0.0  ;;  %v900_v32 = vmax.f32 %v820_v20, 0.0 }
 0x122   : > { %1679 = vst [vmem:[%s2047_s17 + $0x50] sm:$0xff] %v1563_v23   ;;  %1695 = vst [vmem:[%s2047_s17 + $0xd0] sm:$0xff] %v1643_v24   ;;  %v695_v29 = vadd.f32 %v1784_v27, %v2032_v40  ;;  %v823_v30 = vadd.f32 %v1816_v28, %v2032_v40  ;;  %v866_v39 = vmax.f32 %v684_v25, 0.0 }
 0x123   : > { %v686_v33 = vpop.f32.mrf.mxu0  ;;  %v814_v34 = vpop.f32.mrf.mxu1  ;;  %v898_v41 = vmax.f32 %v812_v26, 0.0 }
 0x124   : > { %v869_v35 = vmax.f32 %v695_v29, 0.0  ;;  %v901_v36 = vmax.f32 %v823_v30, 0.0  ;;  %v687_v37 = vadd.f32 %v2032_v40, %v686_v33  ;;  %v815_v38 = vadd.f32 %v2032_v40, %v814_v34 }
 0x125   : > { %v1787_v42 = vpop.f32.mrf.mxu0  ;;  %v1819_v43 = vpop.f32.mrf.mxu1 }
 0x126   : > { %v1578_v44 = vpack.c.bf16 %v869_v35, %v868_v31  ;;  %v1658_v45 = vpack.c.bf16 %v901_v36, %v900_v32  ;;  %v867_v46 = vmax.f32 %v687_v37, 0.0  ;;  %v899_v47 = vmax.f32 %v815_v38, 0.0 }
 0x127   : > { %v708_v48 = vadd.f32 %v1787_v42, %v2032_v40  ;;  %v836_v49 = vadd.f32 %v1819_v43, %v2032_v40  ;;  %v699_v50 = vpop.f32.mrf.mxu0  ;;  %v827_v51 = vpop.f32.mrf.mxu1 }
 0x128   : > { %1682 = vst [vmem:[%s2047_s17 + $0x68] sm:$0xff] %v1578_v44   ;;  %1698 = vst [vmem:[%s2047_s17 + $0xe8] sm:$0xff] %v1658_v45   ;;  %v1573_v52 = vpack.c.bf16 %v867_v46, %v866_v39  ;;  %v1653_v53 = vpack.c.bf16 %v899_v47, %v898_v41  ;;  %v700_v54 = vadd.f32 %v2032_v40, %v699_v50 }
 0x129   : > { %v828_v55 = vadd.f32 %v2032_v40, %v827_v51  ;;  %v1788_v56 = vpop.f32.mrf.mxu0  ;;  %v1820_v57 = vpop.f32.mrf.mxu1  ;;  %v872_v60 = vmax.f32 %v708_v48, 0.0  ;;  %v904_v61 = vmax.f32 %v836_v49, 0.0 }
 0x12a   : > { %1681 = vst [vmem:[%s2047_s17 + $0x60] sm:$0xff] %v1573_v52   ;;  %1697 = vst [vmem:[%s2047_s17 + $0xe0] sm:$0xff] %v1653_v53   ;;  %v711_v58 = vadd.f32 %v1788_v56, %v2032_v40  ;;  %v839_v59 = vadd.f32 %v1820_v57, %v2032_v40  ;;  %v870_v4 = vmax.f32 %v700_v54, 0.0 }
 0x12b   : > { %v702_v62 = vpop.f32.mrf.mxu0  ;;  %v830_v63 = vpop.f32.mrf.mxu1  ;;  %v902_v5 = vmax.f32 %v828_v55, 0.0 }
 0x12c   : > { %v873_v0 = vmax.f32 %v711_v58, 0.0  ;;  %v905_v1 = vmax.f32 %v839_v59, 0.0  ;;  %v703_v2 = vadd.f32 %v2032_v40, %v702_v62  ;;  %v831_v3 = vadd.f32 %v2032_v40, %v830_v63 }
 0x12e   : > { %v1588_v6 = vpack.c.bf16 %v873_v0, %v872_v60  ;;  %v1668_v7 = vpack.c.bf16 %v905_v1, %v904_v61  ;;  %v871_v8 = vmax.f32 %v703_v2, 0.0  ;;  %v903_v9 = vmax.f32 %v831_v3, 0.0 }
 0x130   : > { %1684 = vst [vmem:[%s2047_s17 + $0x78] sm:$0xff] %v1588_v6   ;;  %1700 = vst [vmem:[%s2047_s17 + $0xf8] sm:$0xff] %v1668_v7   ;;  %v1583_v10 = vpack.c.bf16 %v871_v8, %v870_v4  ;;  %v1663_v11 = vpack.c.bf16 %v903_v9, %v902_v5 }
 0x132   : > { %1683 = vst [vmem:[%s2047_s17 + $0x70] sm:$0xff] %v1583_v10   ;;  %1699 = vst [vmem:[%s2047_s17 + $0xf0] sm:$0xff] %v1663_v11  }
 0x133 PF: > { %s13_s14 = sadd.s32 1, %s1923_s14   ;;  %s2150_s12 = smov %s1919_s13 }
 0x134   : > { %p10_p5 = scmp.ge.s32.totalorder %s13_s14, 5   ;;  %s2151_s13 = smov %s2153_s15 }
 0x136   :  { %12 = sbr.rel (!%p10_p5) target bundleno = 2 (0x2), region = 68 }

// kernel: qimage_forward.6
= control target key start
LH: loop header
LB: loop body
LE: loop exit
PB: predicated region body
PF: predicated region fallthrough
CT: control target
= control target key end

     0   :  { %s4081_s12 = smov 0   ;;  %s4083_s13 = smov 0   ;;  %s4946_s0 = inlined_call_operand.vmem [shape: bf16[512,1152], index: 0, kind: input, shape index: {}]   ;;  %s4947_s1 = inlined_call_operand.vmem [shape: bf16[1152,128], index: 1, kind: input, shape index: {}]   ;;  %s4948_s2 = inlined_call_operand.vmem [shape: f32[1,128], index: 2, kind: input, shape index: {}]   ;;  %s4949_s3 = inlined_call_operand.vmem [shape: bf16[512,128], index: 3, kind: output, shape index: {}]  }
   0x1   :  { %s4085_s14 = smov 0  }
   0x2 LB: > { %s25_s15 = sadd.s32 1, %s4055_s13  ;;  %p2813_p0 = scmp.ge.s32.totalorder %s4059_s14, 1  ;;  %s4059_s14 = sphi %s4085_s14, %s13_s14   ;;  %s4055_s13 = sphi %s4083_s13, %s4973_s13   ;;  %s4051_s12 = sphi %s4081_s12, %s4972_s12  }
   0x3   : > { %p27_p1 = scmp.ge.s32.totalorder %s25_s15, 2  ;;  %p170_p2 = scmp.lt.s32.totalorder %s4059_s14, 3 }
   0x5   : > { %s4975_s15 = smov (%p27_p1, %s25_s15), 0  ;;  %p171_p3 = pnand %p2813_p0, %p170_p2 }
   0x7   : > { %174 = sbr.rel (%p171_p3) target bundleno = 535 (0x217), region = 32 }
   0xc   : > { %v3757_v0 = vld [vmem:[%s4947_s1 + $0x78] sm:$0xff]   ;;  %s2814_s18 = sshll.u32 %s4051_s12, 5  ;;  %v3759_v2 = vld [vmem:[%s4947_s1 + $0x70] sm:$0xff]   ;;  %v3761_v4 = vld [vmem:[%s4947_s1 + $0x68] sm:$0xff]  }
   0xd   : > { %v3758_v1 = vld [vmem:[%s4947_s1 + $0x38] sm:$0xff]   ;;  %3196 = vmatprep.subr.bf16.mxu0 %v3757_v0  ;;  %3716 = vmatprep.subr.bf16.mxu1 %v3757_v0  ;;  %p206_p4 = scmp.lt.s32.totalorder %s2814_s18, 63  ;;  %v3760_v3 = vld [vmem:[%s4947_s1 + $0x30] sm:$0xff]   ;;  %v3762_v5 = vld [vmem:[%s4947_s1 + $0x28] sm:$0xff]  }
   0xe   : > { %3197 = vmatpush3.bf16.msra.mxu0 %v3758_v1  ;;  %3724 = vmatpush3.bf16.msra.mxu1 %v3758_v1  ;;  %v3763_v6 = vld [vmem:[%s4947_s1 + $0x60] sm:$0xff]   ;;  %v3765_v8 = vld [vmem:[%s4947_s1 + $0x58] sm:$0xff]   ;;  %v3767_v10 = vld [vmem:[%s4947_s1 + $0x50] sm:$0xff]  }
   0xf   : > { %3198 = vmatprep.subr.bf16.mxu0 %v3759_v2  ;;  %3717 = vmatprep.subr.bf16.mxu1 %v3759_v2  ;;  %s4977_s18 = smov (!%p206_p4, %s2814_s18), 63  ;;  %v3764_v7 = vld [vmem:[%s4947_s1 + $0x20] sm:$0xff]   ;;  %v3766_v9 = vld [vmem:[%s4947_s1 + $0x18] sm:$0xff]   ;;  %v3768_v13 = vld [vmem:[%s4947_s1 + $0x10] sm:$0xff]  }
  0x10   : > { %s3732_s4 = smul.u32 36, %s4977_s18  ;;  %v3769_v14 = vld [vmem:[%s4947_s1 + $0x48] sm:$0xff]   ;;  %v3771_v16 = vld [vmem:[%s4947_s1 + $0x40] sm:$0xff]   ;;  %v3779_v18 = vld [vmem:[%s4947_s1 + $0xf8] sm:$0xff]  }
  0x11   : > { %v3770_v15 = vld [vmem:[%s4947_s1 + $0x8] sm:$0xff]   ;;  %v3772_v17 = vld [vmem:[%s4947_s1] sm:$0xff]   ;;  %v3782_v21 = vld [vmem:[%s4947_s1 + $0x178] sm:$0xff]  }
  0x12   : > { %3199 = vmatpush3.bf16.msra.mxu0 %v3760_v3  ;;  %3725 = vmatpush3.bf16.msra.mxu1 %v3760_v3  ;;  %s4132_s11 = scalar_lea.vmem %s4946_s0, %s3732_s4  ;;  %v3780_v22 = vld [vmem:[%s4947_s1 + $0xb8] sm:$0xff]   ;;  %v3781_v23 = vld [vmem:[%s4947_s1 + $0xf0] sm:$0xff]   ;;  %v3791_v31 = vld [vmem:[%s4947_s1 + $0xe8] sm:$0xff]  }
  0x13   : > { %3200 = vmatprep.subr.bf16.mxu0 %v3761_v4  ;;  %3718 = vmatprep.subr.bf16.mxu1 %v3761_v4  ;;  %v3775_v11 = vld [vmem:[%s4132_s11 + $0x4] ss:$36 sps:$4 sm:$0xff]   ;;  %v3784_v24 = vld [vmem:[%s4947_s1 + $0x138] sm:$0xff]   ;;  %v3785_v25 = vld [vmem:[%s4132_s11 + $0x4c] ss:$36 sps:$4 sm:$0xff]  }
  0x14   : > { %v3778_v12 = vld [vmem:[%s4132_s11 + $0x364] ss:$36 sps:$4 sm:$0xff]   ;;  %1740 = vmatprep.mubr.bf16.mxu0 %v3775_v11  ;;  %v3787_v26 = vld [vmem:[%s4132_s11 + $0x3ac] ss:$36 sps:$4 sm:$0xff]   ;;  %v3795_v35 = vld [vmem:[%s4132_s11 + $0x94] ss:$36 sps:$4 sm:$0xff]  }
  0x15   : > { %1836 = vmatprep.mubr.bf16.mxu1 %v3778_v12  ;;  %v3773_v19 = vld [vmem:[%s4132_s11] ss:$36 sps:$4 sm:$0xff]   ;;  %v3783_v27 = vld [vmem:[%s4947_s1 + $0xb0] sm:$0xff]   ;;  %v3789_v29 = vld [vmem:[%s4132_s11 + $0x48] ss:$36 sps:$4 sm:$0xff]  }
  0x16   : > { %3201 = vmatpush3.bf16.msra.mxu0 %v3762_v5  ;;  %3726 = vmatpush3.bf16.msra.mxu1 %v3762_v5  ;;  %v3776_v20 = vld [vmem:[%s4132_s11 + $0x360] ss:$36 sps:$4 sm:$0xff]   ;;  %v3802_v28 = vld [vmem:[%s4947_s1 + $0x170] sm:$0xff]   ;;  %v3790_v30 = vld [vmem:[%s4132_s11 + $0x3a8] ss:$36 sps:$4 sm:$0xff]  }
  0x17   : > { %3202 = vmatprep.subr.bf16.mxu0 %v3763_v6  ;;  %3719 = vmatprep.subr.bf16.mxu1 %v3763_v6  ;;  %v3792_v32 = vld [vmem:[%s4947_s1 + $0xa8] sm:$0xff]   ;;  %v3804_v33 = vld [vmem:[%s4947_s1 + $0x130] sm:$0xff]   ;;  %v3793_v34 = vld [vmem:[%s4947_s1 + $0xe0] sm:$0xff]  }
  0x18   : > { %v3797_v36 = vld [vmem:[%s4132_s11 + $0x3f4] ss:$36 sps:$4 sm:$0xff]   ;;  %v3794_v37 = vld [vmem:[%s4947_s1 + $0xa0] sm:$0xff]   ;;  %v3816_v43 = vld [vmem:[%s4947_s1 + $0x168] sm:$0xff]  }
  0x19   : > { %v3799_v38 = vld [vmem:[%s4132_s11 + $0x90] ss:$36 sps:$4 sm:$0xff]   ;;  %v3801_v40 = vld [vmem:[%s4947_s1 + $0xd8] sm:$0xff]   ;;  %v3818_v46 = vld [vmem:[%s4947_s1 + $0x128] sm:$0xff]  }
  0x1a   : > { %3203 = vmatpush3.bf16.msra.mxu0 %v3764_v7  ;;  %3727 = vmatpush3.bf16.msra.mxu1 %v3764_v7  ;;  %v3800_v39 = vld [vmem:[%s4132_s11 + $0x3f0] ss:$36 sps:$4 sm:$0xff]   ;;  %v3803_v41 = vld [vmem:[%s4947_s1 + $0x98] sm:$0xff]   ;;  %v3813_v48 = vld [vmem:[%s4947_s1 + $0xc8] sm:$0xff]  }
  0x1b   : > { %3204 = vmatprep.subr.bf16.mxu0 %v3765_v8  ;;  %3720 = vmatprep.subr.bf16.mxu1 %v3765_v8  ;;  %v3805_v42 = vld [vmem:[%s4947_s1 + $0xd0] sm:$0xff]   ;;  %v3807_v44 = vld [vmem:[%s4132_s11 + $0xdc] ss:$36 sps:$4 sm:$0xff]   ;;  %v3814_v51 = vld [vmem:[%s4947_s1 + $0x88] sm:$0xff]  }
  0x1c   : > { %v3809_v45 = vld [vmem:[%s4132_s11 + $0x43c] ss:$36 sps:$4 sm:$0xff]   ;;  %v3806_v47 = vld [vmem:[%s4947_s1 + $0x90] sm:$0xff]   ;;  %v3819_v53 = vld [vmem:[%s4132_s11 + $0x124] ss:$36 sps:$4 sm:$0xff]  }
  0x1d   : > { %v3811_v49 = vld [vmem:[%s4132_s11 + $0xd8] ss:$36 sps:$4 sm:$0xff]   ;;  %v3815_v52 = vld [vmem:[%s4947_s1 + $0xc0] sm:$0xff]   ;;  %v3823_v54 = vld [vmem:[%s4132_s11 + $0xc] ss:$36 sps:$4 sm:$0xff]  }
  0x1e   : > { %3205 = vmatpush3.bf16.msra.mxu0 %v3766_v9  ;;  %3728 = vmatpush3.bf16.msra.mxu1 %v3766_v9  ;;  %v3812_v50 = vld [vmem:[%s4132_s11 + $0x438] ss:$36 sps:$4 sm:$0xff]   ;;  %v3833_v55 = vld [vmem:[%s4947_s1 + $0x160] sm:$0xff]   ;;  %v3821_v58 = vld [vmem:[%s4132_s11 + $0x8] ss:$36 sps:$4 sm:$0xff]  }
  0x1f   : > { %3206 = vmatprep.subr.bf16.mxu0 %v3767_v10  ;;  %3721 = vmatprep.subr.bf16.mxu1 %v3767_v10  ;;  %v3834_v56 = vld [vmem:[%s4947_s1 + $0x120] sm:$0xff]   ;;  %v3825_v60 = vld [vmem:[%s4947_s1 + $0x1f8] sm:$0xff]   ;;  %v3827_v62 = vld [vmem:[%s4132_s11 + $0x16c] ss:$36 sps:$4 sm:$0xff]  }
  0x20   : > { %v3817_v57 = vld [vmem:[%s4947_s1 + $0x80] sm:$0xff]   ;;  %v3826_v61 = vld [vmem:[%s4947_s1 + $0x1b8] sm:$0xff]   ;;  %v3841_v1 = vld [vmem:[%s4947_s1 + $0x1f0] sm:$0xff]  }
  0x21   : > { %v3824_v59 = vld [vmem:[%s4132_s11 + $0x120] ss:$36 sps:$4 sm:$0xff]   ;;  %v3829_v63 = vld [vmem:[%s4132_s11 + $0x54] ss:$36 sps:$4 sm:$0xff]   ;;  %v3831_v4 = vld [vmem:[%s4132_s11 + $0x168] ss:$36 sps:$4 sm:$0xff]  }
  0x22   : > { %3207 = vmatpush3.bf16.msra.mxu0 %v3768_v13  ;;  %3729 = vmatpush3.bf16.msra.mxu1 %v3768_v13  ;;  %v3843_v0 = vld [vmem:[%s4947_s1 + $0x158] sm:$0xff]   ;;  %v3842_v3 = vld [vmem:[%s4947_s1 + $0x1b0] sm:$0xff]   ;;  %v3858_v9 = vld [vmem:[%s4947_s1 + $0x1e8] sm:$0xff]  }
  0x23   : > { %3208 = vmatprep.subr.bf16.mxu0 %v3769_v14  ;;  %3722 = vmatprep.subr.bf16.mxu1 %v3769_v14  ;;  %v3844_v2 = vld [vmem:[%s4947_s1 + $0x118] sm:$0xff]   ;;  %v3832_v5 = vld [vmem:[%s4132_s11 + $0x50] ss:$36 sps:$4 sm:$0xff]   ;;  %v3860_v11 = vld [vmem:[%s4947_s1 + $0x1a8] sm:$0xff]  }
  0x24   : > { %v3835_v6 = vld [vmem:[%s4132_s11 + $0x1b4] ss:$36 sps:$4 sm:$0xff]   ;;  %v3837_v7 = vld [vmem:[%s4132_s11 + $0x9c] ss:$36 sps:$4 sm:$0xff]  }
  0x25   : > { %v3857_v8 = vld [vmem:[%s4947_s1 + $0x150] sm:$0xff]   ;;  %v3840_v13 = vld [vmem:[%s4132_s11 + $0x98] ss:$36 sps:$4 sm:$0xff]  }
  0x26   : > { %3209 = vmatpush3.bf16.msra.mxu0 %v3770_v15  ;;  %3730 = vmatpush3.bf16.msra.mxu1 %v3770_v15  ;;  %v3859_v10 = vld [vmem:[%s4947_s1 + $0x110] sm:$0xff]   ;;  %v3845_v14 = vld [vmem:[%s4132_s11 + $0x1fc] ss:$36 sps:$4 sm:$0xff]   ;;  %v3867_v15 = vld [vmem:[%s4947_s1 + $0x148] sm:$0xff]  }
  0x27   : > { %3210 = vmatprep.subr.bf16.mxu0 %v3771_v16  ;;  %3723 = vmatprep.subr.bf16.mxu1 %v3771_v16  ;;  %v3839_v12 = vld [vmem:[%s4132_s11 + $0x1b0] ss:$36 sps:$4 sm:$0xff]   ;;  %v3868_v16 = vld [vmem:[%s4947_s1 + $0x108] sm:$0xff]  }
  0x2a   : > { %3211 = vmatpush3.bf16.msra.mxu0 %v3772_v17  ;;  %3731 = vmatpush3.bf16.msra.mxu1 %v3772_v17  ;;  %v3847_v17 = vld [vmem:[%s4132_s11 + $0xe4] ss:$36 sps:$4 sm:$0xff]  }
  0x2b   : > { %3308 = vmatprep.subr.bf16.mxu1 %v3779_v18  ;;  %3420 = vmatprep.subr.bf16.mxu0 %v3782_v21  ;;  %v3875_v18 = vld [vmem:[%s4947_s1 + $0x1e0] sm:$0xff]  }
  0x2c   : > { %v3850_v21 = vld [vmem:[%s4132_s11 + $0xe0] ss:$36 sps:$4 sm:$0xff]  }
  0x2d   : > { %1741 = vmatmul.mubr.bf16.vlgmr.msra.gmra.mxu0 %v3773_v19  ;;  %1837 = vmatmul.mubr.bf16.vlgmr.msra.gmra.mxu1 %v3776_v20  ;;  %v3876_v19 = vld [vmem:[%s4947_s1 + $0x1a0] sm:$0xff]   ;;  %v3849_v20 = vld [vmem:[%s4132_s11 + $0x1f8] ss:$36 sps:$4 sm:$0xff]  }
  0x2e   : > { %3309 = vmatpush3.bf16.msra.mxu1 %v3780_v22  ;;  %3421 = vmatpush3.bf16.msra.mxu0 %v3784_v24  ;;  %v3851_v22 = vld [vmem:[%s4132_s11 + $0x244] ss:$36 sps:$4 sm:$0xff]  }
  0x2f   : > { %3310 = vmatprep.subr.bf16.mxu1 %v3781_v23  ;;  %1748 = vmatprep.mubr.bf16.mxu0 %v3785_v25  ;;  %v3853_v23 = vld [vmem:[%s4132_s11 + $0x12c] ss:$36 sps:$4 sm:$0xff]   ;;  %v3883_v24 = vld [vmem:[%s4947_s1 + $0x140] sm:$0xff]  }
  0x30   : > { %1844 = vmatprep.mubr.bf16.mxu1 %v3787_v26  ;;  %3422 = vmatprep.subr.bf16.mxu0 %v3802_v28  ;;  %v3884_v25 = vld [vmem:[%s4947_s1 + $0x100] sm:$0xff]   ;;  %v3891_v26 = vld [vmem:[%s4947_s1 + $0x1d8] sm:$0xff]  }
  0x31   : > { %v3892_v28 = vld [vmem:[%s4947_s1 + $0x198] sm:$0xff]  }
  0x32   : > { %3311 = vmatpush3.bf16.msra.mxu1 %v3783_v27  ;;  %3423 = vmatpush3.bf16.msra.mxu0 %v3804_v33  ;;  %v3855_v27 = vld [vmem:[%s4132_s11 + $0x240] ss:$36 sps:$4 sm:$0xff]   ;;  %v3906_v33 = vld [vmem:[%s4947_s1 + $0x1d0] sm:$0xff]  }
  0x33   : > { %3312 = vmatprep.subr.bf16.mxu1 %v3791_v31  ;;  %3424 = vmatprep.subr.bf16.mxu0 %v3816_v43  ;;  %v3861_v31 = vld [vmem:[%s4132_s11 + $0x28c] ss:$36 sps:$4 sm:$0xff]   ;;  %v3877_v43 = vld [vmem:[%s4132_s11 + $0x31c] ss:$36 sps:$4 sm:$0xff]  }
  0x35   : > { %1749 = vmatmul.mubr.bf16.gmra.mxu0 %v3789_v29  ;;  %1845 = vmatmul.mubr.bf16.gmra.mxu1 %v3790_v30  ;;  %v3893_v29 = vld [vmem:[%s4947_s1 + $0x238] sm:$0xff]   ;;  %v3856_v30 = vld [vmem:[%s4132_s11 + $0x128] ss:$36 sps:$4 sm:$0xff]  }
  0x36   : > { %3313 = vmatpush3.bf16.msra.mxu1 %v3792_v32  ;;  %1756 = vmatprep.mubr.bf16.mxu0 %v3795_v35  ;;  %v3863_v32 = vld [vmem:[%s4132_s11 + $0x174] ss:$36 sps:$4 sm:$0xff]  }
  0x37   : > { %3314 = vmatprep.subr.bf16.mxu1 %v3793_v34  ;;  %1852 = vmatprep.mubr.bf16.mxu1 %v3797_v36  ;;  %v3865_v34 = vld [vmem:[%s4132_s11 + $0x288] ss:$36 sps:$4 sm:$0xff]   ;;  %v3907_v35 = vld [vmem:[%s4947_s1 + $0x190] sm:$0xff]  }
  0x38   : > { %3425 = vmatpush3.bf16.msra.mxu0 %v3818_v46  ;;  %v3866_v36 = vld [vmem:[%s4132_s11 + $0x170] ss:$36 sps:$4 sm:$0xff]   ;;  %v3882_v46 = vld [vmem:[%s4132_s11 + $0x200] ss:$36 sps:$4 sm:$0xff]  }
  0x39   : > { %3426 = vmatprep.subr.bf16.mxu0 %v3833_v55  ;;  %v3908_v55 = vld [vmem:[%s4947_s1 + $0x230] sm:$0xff]  }
  0x3a   : > { %3315 = vmatpush3.bf16.msra.mxu1 %v3794_v37  ;;  %v3869_v37 = vld [vmem:[%s4132_s11 + $0x2d4] ss:$36 sps:$4 sm:$0xff]  }
  0x3b   : > { %3316 = vmatprep.subr.bf16.mxu1 %v3801_v40  ;;  %v3874_v40 = vld [vmem:[%s4132_s11 + $0x1b8] ss:$36 sps:$4 sm:$0xff]  }
  0x3c   : > { %3427 = vmatpush3.bf16.msra.mxu0 %v3834_v56  ;;  %v3923_v56 = vld [vmem:[%s4947_s1 + $0x228] sm:$0xff]  }
  0x3d   : > { %1757 = vmatmul.mubr.bf16.gmra.mxu0 %v3799_v38  ;;  %1853 = vmatmul.mubr.bf16.gmra.mxu1 %v3800_v39  ;;  %v3871_v38 = vld [vmem:[%s4132_s11 + $0x1bc] ss:$36 sps:$4 sm:$0xff]   ;;  %v3873_v39 = vld [vmem:[%s4132_s11 + $0x2d0] ss:$36 sps:$4 sm:$0xff]  }
  0x3e   : > { %3317 = vmatpush3.bf16.msra.mxu1 %v3803_v41  ;;  %1764 = vmatprep.mubr.bf16.mxu0 %v3807_v44  ;;  %v3921_v41 = vld [vmem:[%s4947_s1 + $0x1c8] sm:$0xff]  }
  0x3f   : > { %3318 = vmatprep.subr.bf16.mxu1 %v3805_v42  ;;  %1860 = vmatprep.mubr.bf16.mxu1 %v3809_v45  ;;  %v3922_v42 = vld [vmem:[%s4947_s1 + $0x188] sm:$0xff]   ;;  %v3881_v45 = vld [vmem:[%s4132_s11 + $0x318] ss:$36 sps:$4 sm:$0xff]  }
  0x40   : > { %3428 = vmatprep.subr.bf16.mxu0 %v3843_v0  ;;  %v3879_v44 = vld [vmem:[%s4132_s11 + $0x204] ss:$36 sps:$4 sm:$0xff]  }
  0x41   : > { %3429 = vmatpush3.bf16.msra.mxu0 %v3844_v2  ;;  %v3905_v0 = vld [vmem:[%s4132_s11 + $0xa0] ss:$36 sps:$4 sm:$0xff]   ;;  %v3911_v2 = vld [vmem:[%s4132_s11 + $0xec] ss:$36 sps:$4 sm:$0xff]  }
  0x42   : > { %3319 = vmatpush3.bf16.msra.mxu1 %v3806_v47  ;;  %3430 = vmatprep.subr.bf16.mxu0 %v3857_v8  ;;  %v3936_v47 = vld [vmem:[%s4947_s1 + $0x1c0] sm:$0xff]   ;;  %v3917_v8 = vld [vmem:[%s4132_s11 + $0x134] ss:$36 sps:$4 sm:$0xff]  }
  0x43   : > { %3320 = vmatprep.subr.bf16.mxu1 %v3813_v48  ;;  %v3937_v48 = vld [vmem:[%s4947_s1 + $0x180] sm:$0xff]  }
  0x45   : > { %1765 = vmatmul.mubr.bf16.gmra.mxu0 %v3811_v49  ;;  %1861 = vmatmul.mubr.bf16.gmra.mxu1 %v3812_v50  ;;  %v3885_v49 = vld [vmem:[%s4132_s11 + $0x24c] ss:$36 sps:$4 sm:$0xff]   ;;  %v3889_v50 = vld [vmem:[%s4132_s11 + $0x14] ss:$36 sps:$4 sm:$0xff]  }
  0x46   : > { %3321 = vmatpush3.bf16.msra.mxu1 %v3814_v51  ;;  %1772 = vmatprep.mubr.bf16.mxu0 %v3819_v53  ;;  %v3887_v51 = vld [vmem:[%s4132_s11 + $0x10] ss:$36 sps:$4 sm:$0xff]  }
  0x47   : > { %3322 = vmatprep.subr.bf16.mxu1 %v3815_v52  ;;  %1901 = vmatprep.mubr.bf16.mxu1 %v3823_v54  ;;  %v3890_v52 = vld [vmem:[%s4132_s11 + $0x248] ss:$36 sps:$4 sm:$0xff]   ;;  %v3894_v53 = vld [vmem:[%s4132_s11 + $0x294] ss:$36 sps:$4 sm:$0xff]   ;;  %v3896_v54 = vld [vmem:[%s4132_s11 + $0x5c] ss:$36 sps:$4 sm:$0xff]  }
  0x48   : > { %3431 = vmatpush3.bf16.msra.mxu0 %v3859_v10  ;;  %v3919_v10 = vld [vmem:[%s4132_s11 + $0x368] ss:$36 sps:$4 sm:$0xff]  }
  0x49   : > { %3432 = vmatprep.subr.bf16.mxu0 %v3867_v15  ;;  %v3929_v15 = vld [vmem:[%s4132_s11 + $0x178] ss:$36 sps:$4 sm:$0xff]  }
  0x4a   : > { %3323 = vmatpush3.bf16.msra.mxu1 %v3817_v57  ;;  %v3898_v57 = vld [vmem:[%s4132_s11 + $0x290] ss:$36 sps:$4 sm:$0xff]  }
  0x4b   : > { %3532 = vmatprep.subr.bf16.mxu1 %v3825_v60  ;;  %v3902_v60 = vld [vmem:[%s4132_s11 + $0xa4] ss:$36 sps:$4 sm:$0xff]  }
  0x4c   : > { %3433 = vmatpush3.bf16.msra.mxu0 %v3868_v16  ;;  %v3930_v16 = vld [vmem:[%s4132_s11 + $0x3fc] ss:$36 sps:$4 sm:$0xff]  }
  0x4d   : > { %1773 = vmatmul.mubr.bf16.gmra.mxu0 %v3824_v59  ;;  %1902 = vmatmul.mubr.bf16.vlgmr.msra.gmra.mxu1 %v3821_v58  ;;  %v3899_v58 = vld [vmem:[%s4132_s11 + $0x58] ss:$36 sps:$4 sm:$0xff]  }
  0x4e   : > { %3533 = vmatpush3.bf16.msra.mxu1 %v3826_v61  ;;  %1780 = vmatprep.mubr.bf16.mxu0 %v3827_v62  ;;  %v3900_v59 = vld [vmem:[%s4132_s11 + $0x2dc] ss:$36 sps:$4 sm:$0xff]  }
  0x4f   : > { %1909 = vmatprep.mubr.bf16.mxu1 %v3829_v63  ;;  %3534 = vmatprep.subr.bf16.mxu1 %v3841_v1  ;;  %v3938_v61 = vld [vmem:[%s4947_s1 + $0x220] sm:$0xff]   ;;  %v3904_v62 = vld [vmem:[%s4132_s11 + $0x2d8] ss:$36 sps:$4 sm:$0xff]  }
  0x50   : > { %3434 = vmatprep.subr.bf16.mxu0 %v3883_v24  ;;  %v3951_v63 = vld [vmem:[%s4947_s1 + $0x218] sm:$0xff]   ;;  %v3909_v1 = vld [vmem:[%s4132_s11 + $0x324] ss:$36 sps:$4 sm:$0xff]  }
  0x51   : > { %3435 = vmatpush3.bf16.msra.mxu0 %v3884_v25  ;;  %v3945_v24 = vld [vmem:[%s4132_s11 + $0x254] ss:$36 sps:$4 sm:$0xff]   ;;  %v3949_v25 = vld [vmem:[%s4132_s11 + $0x1c] ss:$36 sps:$4 sm:$0xff]  }
  0x52   : > { %3535 = vmatpush3.bf16.msra.mxu1 %v3842_v3  ;;  %3668 = vmatprep.subr.bf16.mxu0 %v3893_v29  ;;  %v3964_v3 = vld [vmem:[%s4947_s1 + $0x210] sm:$0xff]  }
  0x53   : > { %3536 = vmatprep.subr.bf16.mxu1 %v3858_v9  ;;  %v3990_v9 = vld [vmem:[%s4947_s1 + $0x200] sm:$0xff]  }
  0x55   : > { %1781 = vmatmul.mubr.bf16.gmra.mxu0 %v3831_v4  ;;  %1910 = vmatmul.mubr.bf16.gmra.mxu1 %v3832_v5  ;;  %v3913_v4 = vld [vmem:[%s4132_s11 + $0x320] ss:$36 sps:$4 sm:$0xff]   ;;  %v3977_v5 = vld [vmem:[%s4947_s1 + $0x208] sm:$0xff]  }
  0x56   : > { %1788 = vmatprep.mubr.bf16.mxu0 %v3835_v6  ;;  %1917 = vmatprep.mubr.bf16.mxu1 %v3837_v7  ;;  %v3914_v6 = vld [vmem:[%s4132_s11 + $0xe8] ss:$36 sps:$4 sm:$0xff]  }
  0x57   : > { %3537 = vmatpush3.bf16.msra.mxu1 %v3860_v11  ;;  %v3915_v7 = vld [vmem:[%s4132_s11 + $0x36c] ss:$36 sps:$4 sm:$0xff]  }
  0x58   : > { %3538 = vmatprep.subr.bf16.mxu1 %v3875_v18  ;;  %v3920_v11 = vld [vmem:[%s4132_s11 + $0x130] ss:$36 sps:$4 sm:$0xff]   ;;  %v3934_v18 = vld [vmem:[%s4132_s11 + $0x3f8] ss:$36 sps:$4 sm:$0xff]  }
  0x5b   : > { %3539 = vmatpush3.bf16.msra.mxu1 %v3876_v19  ;;  %v3935_v19 = vld [vmem:[%s4132_s11 + $0x1c0] ss:$36 sps:$4 sm:$0xff]  }
  0x5c   : > { %3540 = vmatprep.subr.bf16.mxu1 %v3891_v26  ;;  %v3947_v26 = vld [vmem:[%s4132_s11 + $0x18] ss:$36 sps:$4 sm:$0xff]  }
  0x5d   : > { %1789 = vmatmul.mubr.bf16.gmra.mxu0 %v3839_v12  ;;  %1918 = vmatmul.mubr.bf16.gmra.mxu1 %v3840_v13  ;;  %v3924_v12 = vld [vmem:[%s4132_s11 + $0x3b4] ss:$36 sps:$4 sm:$0xff]   ;;  %v3926_v13 = vld [vmem:[%s4132_s11 + $0x17c] ss:$36 sps:$4 sm:$0xff]  }
  0x5e   : > { %1796 = vmatprep.mubr.bf16.mxu0 %v3845_v14  ;;  %1925 = vmatprep.mubr.bf16.mxu1 %v3847_v17  ;;  %v3928_v14 = vld [vmem:[%s4132_s11 + $0x3b0] ss:$36 sps:$4 sm:$0xff]   ;;  %v3932_v17 = vld [vmem:[%s4132_s11 + $0x1c4] ss:$36 sps:$4 sm:$0xff]  }
  0x5f   : > { %3541 = vmatpush3.bf16.msra.mxu1 %v3892_v28  ;;  %v3952_v28 = vld [vmem:[%s4132_s11 + $0x29c] ss:$36 sps:$4 sm:$0xff]  }
  0x60   : > { %3542 = vmatprep.subr.bf16.mxu1 %v3906_v33  ;;  %v3960_v33 = vld [vmem:[%s4132_s11 + $0xac] ss:$36 sps:$4 sm:$0xff]  }
  0x63   : > { %3543 = vmatpush3.bf16.msra.mxu1 %v3907_v35  ;;  %v3963_v35 = vld [vmem:[%s4132_s11 + $0xa8] ss:$36 sps:$4 sm:$0xff]  }
  0x64   : > { %3544 = vmatprep.subr.bf16.mxu1 %v3921_v41  ;;  %v3973_v41 = vld [vmem:[%s4132_s11 + $0x13c] ss:$36 sps:$4 sm:$0xff]  }
  0x65   : > { %1797 = vmatmul.mubr.bf16.gmra.mxu0 %v3849_v20  ;;  %1926 = vmatmul.mubr.bf16.gmra.mxu1 %v3850_v21  ;;  %v3939_v20 = vld [vmem:[%s4132_s11 + $0x444] ss:$36 sps:$4 sm:$0xff]   ;;  %v3941_v21 = vld [vmem:[%s4132_s11 + $0x20c] ss:$36 sps:$4 sm:$0xff]  }
  0x66   : > { %1804 = vmatprep.mubr.bf16.mxu0 %v3851_v22  ;;  %1933 = vmatprep.mubr.bf16.mxu1 %v3853_v23  ;;  %v3943_v22 = vld [vmem:[%s4132_s11 + $0x440] ss:$36 sps:$4 sm:$0xff]   ;;  %v3944_v23 = vld [vmem:[%s4132_s11 + $0x208] ss:$36 sps:$4 sm:$0xff]  }
  0x67   : > { %3545 = vmatpush3.bf16.msra.mxu1 %v3922_v42  ;;  %v3975_v42 = vld [vmem:[%s4132_s11 + $0x370] ss:$36 sps:$4 sm:$0xff]  }
  0x68   : > { %3546 = vmatprep.subr.bf16.mxu1 %v3936_v47 }
  0x6b   : > { %3547 = vmatpush3.bf16.msra.mxu1 %v3937_v48 }
  0x6d   : > { %1805 = vmatmul.mubr.bf16.gmra.mxu0 %v3855_v27  ;;  %1934 = vmatmul.mubr.bf16.gmra.mxu1 %v3856_v30  ;;  %v3950_v27 = vld [vmem:[%s4132_s11 + $0x250] ss:$36 sps:$4 sm:$0xff]   ;;  %v3956_v30 = vld [vmem:[%s4132_s11 + $0x298] ss:$36 sps:$4 sm:$0xff]  }
  0x6e   : > { %1812 = vmatprep.mubr.bf16.mxu0 %v3861_v31  ;;  %1941 = vmatprep.mubr.bf16.mxu1 %v3863_v32  ;;  %v3957_v31 = vld [vmem:[%s4132_s11 + $0x60] ss:$36 sps:$4 sm:$0xff]  }
  0x6f   : > { %v3958_v32 = vld [vmem:[%s4132_s11 + $0x2e4] ss:$36 sps:$4 sm:$0xff]  }
  0x75   : > { %1813 = vmatmul.mubr.bf16.gmra.mxu0 %v3865_v34  ;;  %1942 = vmatmul.mubr.bf16.gmra.mxu1 %v3866_v36  ;;  %v3962_v34 = vld [vmem:[%s4132_s11 + $0x2e0] ss:$36 sps:$4 sm:$0xff]   ;;  %v3965_v36 = vld [vmem:[%s4132_s11 + $0x32c] ss:$36 sps:$4 sm:$0xff]  }
  0x76   : > { %1820 = vmatprep.mubr.bf16.mxu0 %v3869_v37  ;;  %1949 = vmatprep.mubr.bf16.mxu1 %v3871_v38  ;;  %v3967_v37 = vld [vmem:[%s4132_s11 + $0xf4] ss:$36 sps:$4 sm:$0xff]   ;;  %v3969_v38 = vld [vmem:[%s4132_s11 + $0x328] ss:$36 sps:$4 sm:$0xff]  }
  0x7d   : > { %1821 = vmatmul.mubr.bf16.gmra.mxu0 %v3873_v39  ;;  %1950 = vmatmul.mubr.bf16.gmra.mxu1 %v3874_v40  ;;  %v3970_v39 = vld [vmem:[%s4132_s11 + $0xf0] ss:$36 sps:$4 sm:$0xff]  }
  0x7e   : > { %1828 = vmatprep.mubr.bf16.mxu0 %v3877_v43  ;;  %1957 = vmatprep.mubr.bf16.mxu1 %v3879_v44  ;;  %v3971_v40 = vld [vmem:[%s4132_s11 + $0x374] ss:$36 sps:$4 sm:$0xff]   ;;  %v3978_v44 = vld [vmem:[%s4132_s11 + $0x3bc] ss:$36 sps:$4 sm:$0xff]  }
  0x7f   : > { %v3976_v43 = vld [vmem:[%s4132_s11 + $0x138] ss:$36 sps:$4 sm:$0xff]  }
  0x85   : > { %1829 = vmatmul.mubr.bf16.gmra.mxu0 %v3881_v45  ;;  %1958 = vmatmul.mubr.bf16.gmra.mxu1 %v3882_v46  ;;  %v3980_v45 = vld [vmem:[%s4132_s11 + $0x184] ss:$36 sps:$4 sm:$0xff]  }
  0x86   : > { %1965 = vmatprep.mubr.bf16.mxu1 %v3885_v49  ;;  %2062 = vmatprep.mubr.bf16.mxu0 %v3889_v50 }
  0x8d   : > { %1966 = vmatmul.mubr.bf16.gmra.mxu1 %v3890_v52  ;;  %2063 = vmatmul.mubr.bf16.vlgmr.msra.gmra.mxu0 %v3887_v51 }
  0x8e   : > { %3669 = vmatpush3.bf16.msra.mxu0 %v3893_v29  ;;  %1973 = vmatprep.mubr.bf16.mxu1 %v3894_v53  ;;  %v3954_v29 = vld [vmem:[%s4132_s11 + $0x64] ss:$36 sps:$4 sm:$0xff]  }
  0x8f   : > { %2070 = vmatprep.mubr.bf16.mxu0 %v3896_v54  ;;  %3670 = vmatprep.subr.bf16.mxu0 %v3908_v55  ;;  %v3982_v54 = vld [vmem:[%s4132_s11 + $0x3b8] ss:$36 sps:$4 sm:$0xff]  }
  0x92   : > { %3671 = vmatpush3.bf16.msra.mxu0 %v3908_v55  ;;  %v3983_v55 = vld [vmem:[%s4132_s11 + $0x180] ss:$36 sps:$4 sm:$0xff]  }
  0x93   : > { %3672 = vmatprep.subr.bf16.mxu0 %v3923_v56 }
  0x95   : > { %1974 = vmatmul.mubr.bf16.gmra.mxu1 %v3898_v57  ;;  %2071 = vmatmul.mubr.bf16.gmra.mxu0 %v3899_v58  ;;  %v3986_v57 = vld [vmem:[%s4132_s11 + $0x1cc] ss:$36 sps:$4 sm:$0xff]  }
  0x96   : > { %1981 = vmatprep.mubr.bf16.mxu1 %v3900_v59  ;;  %2078 = vmatprep.mubr.bf16.mxu0 %v3902_v60 }
  0x97   : > { %3673 = vmatpush3.bf16.msra.mxu0 %v3923_v56  ;;  %v3984_v56 = vld [vmem:[%s4132_s11 + $0x404] ss:$36 sps:$4 sm:$0xff]  }
  0x98   : > { %3674 = vmatprep.subr.bf16.mxu0 %v3938_v61 }
  0x9b   : > { %3675 = vmatpush3.bf16.msra.mxu0 %v3938_v61 }
  0x9c   : > { %3676 = vmatprep.subr.bf16.mxu0 %v3951_v63 }
  0x9d   : > { %1982 = vmatmul.mubr.bf16.gmra.mxu1 %v3904_v62  ;;  %2079 = vmatmul.mubr.bf16.gmra.mxu0 %v3905_v0 }
  0x9e   : > { %1989 = vmatprep.mubr.bf16.mxu1 %v3909_v1  ;;  %2086 = vmatprep.mubr.bf16.mxu0 %v3911_v2 }
  0x9f   : > { %3677 = vmatpush3.bf16.msra.mxu0 %v3951_v63 }
  0xa0   : > { %3678 = vmatprep.subr.bf16.mxu0 %v3964_v3 }
  0xa3   : > { %3679 = vmatpush3.bf16.msra.mxu0 %v3964_v3 }
  0xa4   : > { %3680 = vmatprep.subr.bf16.mxu0 %v3977_v5 }
  0xa5   : > { %1990 = vmatmul.mubr.bf16.gmra.mxu1 %v3913_v4  ;;  %2087 = vmatmul.mubr.bf16.gmra.mxu0 %v3914_v6  ;;  %v3988_v6 = vld [vmem:[%s4132_s11 + $0x400] ss:$36 sps:$4 sm:$0xff]  }
  0xa6   : > { %1997 = vmatprep.mubr.bf16.mxu1 %v3915_v7  ;;  %2094 = vmatprep.mubr.bf16.mxu0 %v3917_v8  ;;  %v3989_v7 = vld [vmem:[%s4132_s11 + $0x1c8] ss:$36 sps:$4 sm:$0xff]  }
  0xa7   : > { %3681 = vmatpush3.bf16.msra.mxu0 %v3977_v5  ;;  %v3991_v8 = vld [vmem:[%s4132_s11 + $0x44c] ss:$36 sps:$4 sm:$0xff]  }
  0xa8   : > { %3682 = vmatprep.subr.bf16.mxu0 %v3990_v9 }
  0xab   : > { %3683 = vmatpush3.bf16.msra.mxu0 %v3990_v9  ;;  %v3993_v9 = vld [vmem:[%s4132_s11 + $0x214] ss:$36 sps:$4 sm:$0xff]  }
  0xad   : > { %1998 = vmatmul.mubr.bf16.gmra.mxu1 %v3919_v10  ;;  %2095 = vmatmul.mubr.bf16.gmra.mxu0 %v3920_v11 }
  0xae   : > { %2005 = vmatprep.mubr.bf16.mxu1 %v3924_v12  ;;  %2102 = vmatprep.mubr.bf16.mxu0 %v3926_v13 }
  0xb5   : > { %2006 = vmatmul.mubr.bf16.gmra.mxu1 %v3928_v14  ;;  %2103 = vmatmul.mubr.bf16.gmra.mxu0 %v3929_v15 }
  0xb6   : > { %2013 = vmatprep.mubr.bf16.mxu1 %v3930_v16  ;;  %2110 = vmatprep.mubr.bf16.mxu0 %v3932_v17 }
  0xbd   : > { %2014 = vmatmul.mubr.bf16.gmra.mxu1 %v3934_v18  ;;  %2111 = vmatmul.mubr.bf16.gmra.mxu0 %v3935_v19 }
  0xbe   : > { %2021 = vmatprep.mubr.bf16.mxu1 %v3939_v20  ;;  %2118 = vmatprep.mubr.bf16.mxu0 %v3941_v21 }
  0xc5   : > { %2022 = vmatmul.mubr.bf16.gmra.mxu1 %v3943_v22  ;;  %2119 = vmatmul.mubr.bf16.gmra.mxu0 %v3944_v23  ;;  %v3995_v22 = vld [vmem:[%s4132_s11 + $0x448] ss:$36 sps:$4 sm:$0xff]   ;;  %v3996_v23 = vld [vmem:[%s4132_s11 + $0x210] ss:$36 sps:$4 sm:$0xff]  }
  0xc6   : > { %2126 = vmatprep.mubr.bf16.mxu0 %v3945_v24  ;;  %2223 = vmatprep.mubr.bf16.mxu1 %v3949_v25  ;;  %v3999_v24 = vld [vmem:[%s4132_s11 + $0x25c] ss:$36 sps:$4 sm:$0xff]  }
  0xc7   : > { %v4000_v25 = vld [vmem:[%s4132_s11 + $0x20] ss:$36 sps:$4 sm:$0xff]  }
  0xcd   : > { %2127 = vmatmul.mubr.bf16.gmra.mxu0 %v3950_v27  ;;  %2224 = vmatmul.mubr.bf16.vlgmr.msra.gmra.mxu1 %v3947_v26 }
  0xce   : > { %2134 = vmatprep.mubr.bf16.mxu0 %v3952_v28  ;;  %2231 = vmatprep.mubr.bf16.mxu1 %v3954_v29 }
  0xd5   : > { %2135 = vmatmul.mubr.bf16.gmra.mxu0 %v3956_v30  ;;  %2232 = vmatmul.mubr.bf16.gmra.mxu1 %v3957_v31 }
  0xd6   : > { %2142 = vmatprep.mubr.bf16.mxu0 %v3958_v32  ;;  %2239 = vmatprep.mubr.bf16.mxu1 %v3960_v33 }
  0xdd   : > { %2143 = vmatmul.mubr.bf16.gmra.mxu0 %v3962_v34  ;;  %2240 = vmatmul.mubr.bf16.gmra.mxu1 %v3963_v35 }
  0xde   : > { %2150 = vmatprep.mubr.bf16.mxu0 %v3965_v36  ;;  %2247 = vmatprep.mubr.bf16.mxu1 %v3967_v37 }
  0xe5   : > { %2151 = vmatmul.mubr.bf16.gmra.mxu0 %v3969_v38  ;;  %2248 = vmatmul.mubr.bf16.gmra.mxu1 %v3970_v39  ;;  %v3997_v38 = vld [vmem:[%s4132_s11 + $0x258] ss:$36 sps:$4 sm:$0xff]   ;;  %v4001_v39 = vld [vmem:[%s4132_s11 + $0x68] ss:$36 sps:$4 sm:$0xff]  }
  0xe6   : > { %2158 = vmatprep.mubr.bf16.mxu0 %v3971_v40  ;;  %2255 = vmatprep.mubr.bf16.mxu1 %v3973_v41  ;;  %v4004_v40 = vld [vmem:[%s4132_s11 + $0x2a4] ss:$36 sps:$4 sm:$0xff]   ;;  %v4005_v41 = vld [vmem:[%s4132_s11 + $0xb0] ss:$36 sps:$4 sm:$0xff]  }
  0xed   : > { %v3212_v46 = vpop.f32.mrf.mxu0  ;;  %v3284_v47 = vpop.f32.mrf.mxu1  ;;  %2159 = vmatmul.mubr.bf16.gmra.mxu0 %v3975_v42  ;;  %2256 = vmatmul.mubr.bf16.gmra.mxu1 %v3976_v43 }
  0xee   : > { %2166 = vmatprep.mubr.bf16.mxu0 %v3978_v44  ;;  %2263 = vmatprep.mubr.bf16.mxu1 %v3980_v45 }
  0xef   : > { %v3213_v48 = vpop.f32.mrf.mxu0  ;;  %v3285_v49 = vpop.f32.mrf.mxu1 }
  0xf0   : > { %v4425_v50 = vadd.f32 %v3213_v48, %v3212_v46  ;;  %v4427_v51 = vadd.f32 %v3285_v49, %v3284_v47  ;;  %v4476_v48 = vld [vmem:[%s4948_s2] ss:$0 sm:$0xff] }
  0xf1   : > { %v3215_v52 = vpop.f32.mrf.mxu0  ;;  %v3287_v53 = vpop.f32.mrf.mxu1 }
  0xf3   : > { %v3216_v58 = vpop.f32.mrf.mxu0  ;;  %v3288_v59 = vpop.f32.mrf.mxu1 }
  0xf4   : > { %v4433_v60 = vadd.f32 %v3216_v58, %v3215_v52  ;;  %v4435_v61 = vadd.f32 %v3288_v59, %v3287_v53  ;;  %v1743_v53 = vadd.f32 %v4425_v50, %v4476_v48  ;;  %v4002_v58 = vld [vmem:[%s4132_s11 + $0x2a0] ss:$36 sps:$4 sm:$0xff]   ;;  %v4006_v59 = vld [vmem:[%s4132_s11 + $0xf8] ss:$36 sps:$4 sm:$0xff]  }
  0xf5   : > { %v3218_v62 = vpop.f32.mrf.mxu0  ;;  %v3290_v63 = vpop.f32.mrf.mxu1  ;;  %2167 = vmatmul.mubr.bf16.gmra.mxu0 %v3982_v54  ;;  %2264 = vmatmul.mubr.bf16.gmra.mxu1 %v3983_v55 }
  0xf6   : > { %2174 = vmatprep.mubr.bf16.mxu0 %v3984_v56  ;;  %2271 = vmatprep.mubr.bf16.mxu1 %v3986_v57 }
  0xf7   : > { %v3219_v0 = vpop.f32.mrf.mxu0  ;;  %v3291_v1 = vpop.f32.mrf.mxu1 }
  0xf8   : > { %v4437_v2 = vadd.f32 %v3219_v0, %v3218_v62  ;;  %v4439_v3 = vadd.f32 %v3291_v1, %v3290_v63  ;;  %v4009_v63 = vld [vmem:[%s4132_s11 + $0x2ec] ss:$36 sps:$4 sm:$0xff]   ;;  %v4010_v0 = vld [vmem:[%s4132_s11 + $0x140] ss:$36 sps:$4 sm:$0xff]  }
  0xf9   : > { %v3221_v4 = vpop.f32.mrf.mxu0  ;;  %v3293_v5 = vpop.f32.mrf.mxu1 }
  0xfb   : > { %v3222_v10 = vpop.f32.mrf.mxu0  ;;  %v3294_v11 = vpop.f32.mrf.mxu1 }
  0xfc   : > { %v4445_v12 = vadd.f32 %v3222_v10, %v3221_v4  ;;  %v4447_v13 = vadd.f32 %v3294_v11, %v3293_v5  ;;  %v1746_v5 = vadd.f32 %v4433_v60, %v4476_v48  ;;  %v1751_v60 = vadd.f32 %v4437_v2, %v4476_v48 }
  0xfd   : > { %v3224_v14 = vpop.f32.mrf.mxu0  ;;  %v3296_v15 = vpop.f32.mrf.mxu1  ;;  %2175 = vmatmul.mubr.bf16.gmra.mxu0 %v3988_v6  ;;  %2272 = vmatmul.mubr.bf16.gmra.mxu1 %v3989_v7 }
  0xfe   : > { %2182 = vmatprep.mubr.bf16.mxu0 %v3991_v8  ;;  %2279 = vmatprep.mubr.bf16.mxu1 %v3993_v9 }
  0xff   : > { %v3225_v16 = vpop.f32.mrf.mxu0  ;;  %v3297_v17 = vpop.f32.mrf.mxu1 }
 0x100   : > { %v4449_v18 = vadd.f32 %v3225_v16, %v3224_v14  ;;  %v4451_v19 = vadd.f32 %v3297_v17, %v3296_v15 }
 0x101   : > { %v3227_v20 = vpop.f32.mrf.mxu0  ;;  %v3299_v21 = vpop.f32.mrf.mxu1 }
 0x103   : > { %v3228_v26 = vpop.f32.mrf.mxu0  ;;  %v3300_v27 = vpop.f32.mrf.mxu1 }
 0x104   : > { %v4457_v28 = vadd.f32 %v3228_v26, %v3227_v20  ;;  %v4459_v29 = vadd.f32 %v3300_v27, %v3299_v21  ;;  %v4007_v20 = vld [vmem:[%s4132_s11 + $0x2e8] ss:$36 sps:$4 sm:$0xff]   ;;  %v1754_v27 = vadd.f32 %v4445_v12, %v4476_v48  ;;  %v1759_v12 = vadd.f32 %v4449_v18, %v4476_v48 }
 0x105   : > { %v3230_v30 = vpop.f32.mrf.mxu0  ;;  %v3302_v31 = vpop.f32.mrf.mxu1  ;;  %2183 = vmatmul.mubr.bf16.gmra.mxu0 %v3995_v22  ;;  %2280 = vmatmul.mubr.bf16.gmra.mxu1 %v3996_v23  ;;  %v4011_v21 = vld [vmem:[%s4132_s11 + $0x188] ss:$36 sps:$4 sm:$0xff]   ;;  %v4014_v23 = vld [vmem:[%s4132_s11 + $0x334] ss:$36 sps:$4 sm:$0xff]  }
 0x106   : > { %2287 = vmatprep.mubr.bf16.mxu1 %v3999_v24  ;;  %3684 = vmatprep.mubr.bf16.mxu0 %v4000_v25  ;;  %v4015_v24 = vld [vmem:[%s4132_s11 + $0x1d0] ss:$36 sps:$4 sm:$0xff]  }
 0x107   : > { %v3231_v32 = vpop.f32.mrf.mxu0  ;;  %v3303_v33 = vpop.f32.mrf.mxu1 }
 0x108   : > { %v4461_v34 = vadd.f32 %v3231_v32, %v3230_v30  ;;  %v4463_v35 = vadd.f32 %v3303_v33, %v3302_v31 }
 0x109   : > { %v3233_v36 = vpop.f32.mrf.mxu0  ;;  %v3305_v37 = vpop.f32.mrf.mxu1 }
 0x10b   : > { %v3234_v42 = vpop.f32.mrf.mxu0  ;;  %v3306_v43 = vpop.f32.mrf.mxu1 }
 0x10c   : > { %v4469_v44 = vadd.f32 %v3234_v42, %v3233_v36  ;;  %v4471_v45 = vadd.f32 %v3306_v43, %v3305_v37  ;;  %v4012_v42 = vld [vmem:[%s4132_s11 + $0x330] ss:$36 sps:$4 sm:$0xff]   ;;  %v4016_v43 = vld [vmem:[%s4132_s11 + $0x218] ss:$36 sps:$4 sm:$0xff]  }
 0x10d   : > { %v3236_v46 = vpop.f32.mrf.mxu0  ;;  %v3324_v47 = vpop.f32.mrf.mxu1  ;;  %2288 = vmatmul.mubr.bf16.gmra.mxu1 %v3997_v38  ;;  %3685 = vmatmul.mubr.bf16.vlgmr.msra.gmra.mxu0 %v4001_v39 }
 0x10e   : > { %2295 = vmatprep.mubr.bf16.mxu1 %v4004_v40  ;;  %3688 = vmatprep.mubr.bf16.mxu0 %v4005_v41 }
 0x10f   : > { %v3237_v49 = vpop.f32.mrf.mxu0  ;;  %v3325_v52 = vpop.f32.mrf.mxu1 }
 0x110   : > { %v4480_v54 = vadd.f32 %v3237_v49, %v3236_v46  ;;  %v3326_v55 = vadd.f32 %v3325_v52, %v3324_v47  ;;  %v4019_v47 = vld [vmem:[%s4132_s11 + $0x37c] ss:$36 sps:$4 sm:$0xff]  }
 0x111   : > { %v3239_v56 = vpop.f32.mrf.mxu0  ;;  %v3327_v57 = vpop.f32.mrf.mxu1  ;;  %v4020_v49 = vld [vmem:[%s4132_s11 + $0x260] ss:$36 sps:$4 sm:$0xff]  }
 0x112   : > { %v4484_v62 = vadd.f32 %v3326_v55, %v1743_v53  ;;  %v1762_v55 = vadd.f32 %v4457_v28, %v4476_v48  ;;  %v1767_v28 = vadd.f32 %v4461_v34, %v4476_v48 }
 0x113   : > { %v3240_v1 = vpop.f32.mrf.mxu0  ;;  %v3328_v4 = vpop.f32.mrf.mxu1 }
 0x114   : > { %v4490_v6 = vadd.f32 %v3240_v1, %v3239_v56  ;;  %v3329_v50 = vadd.f32 %v3328_v4, %v3327_v57 }
 0x115   : > { %v3242_v7 = vpop.f32.mrf.mxu0  ;;  %v3330_v8 = vpop.f32.mrf.mxu1  ;;  %2296 = vmatmul.mubr.bf16.gmra.mxu1 %v4002_v58  ;;  %3689 = vmatmul.mubr.bf16.gmra.mxu0 %v4006_v59 }
 0x116   : > { %v4492_v9 = vadd.f32 %v3329_v50, %v1746_v5  ;;  %2303 = vmatprep.mubr.bf16.mxu1 %v4009_v63  ;;  %3692 = vmatprep.mubr.bf16.mxu0 %v4010_v0 }
 0x117   : > { %v3243_v10 = vpop.f32.mrf.mxu0  ;;  %v3331_v11 = vpop.f32.mrf.mxu1 }
 0x118   : > { %v4496_v14 = vadd.f32 %v3243_v10, %v3242_v7  ;;  %v3332_v15 = vadd.f32 %v3331_v11, %v3330_v8  ;;  %v4017_v7 = vld [vmem:[%s4132_s11 + $0x378] ss:$36 sps:$4 sm:$0xff]   ;;  %v4021_v8 = vld [vmem:[%s4132_s11 + $0x2a8] ss:$36 sps:$4 sm:$0xff]  }
 0x119   : > { %v3245_v16 = vpop.f32.mrf.mxu0  ;;  %v3333_v17 = vpop.f32.mrf.mxu1  ;;  %v4024_v11 = vld [vmem:[%s4132_s11 + $0x3c4] ss:$36 sps:$4 sm:$0xff]  }
 0x11a   : > { %v4500_v22 = vadd.f32 %v3332_v15, %v1751_v60  ;;  %v4025_v60 = vld [vmem:[%s4132_s11 + $0x2f0] ss:$36 sps:$4 sm:$0xff]  }
 0x11b   : > { %v3246_v25 = vpop.f32.mrf.mxu0  ;;  %v3334_v26 = vpop.f32.mrf.mxu1 }
 0x11c   : > { %v4506_v30 = vadd.f32 %v3246_v25, %v3245_v16  ;;  %v3335_v2 = vadd.f32 %v3334_v26, %v3333_v17  ;;  %v1770_v17 = vadd.f32 %v4469_v44, %v4476_v48  ;;  %v1775_v44 = vadd.f32 %v4480_v54, %v4476_v48 }
 0x11d   : > { %v3248_v31 = vpop.f32.mrf.mxu0  ;;  %v3336_v32 = vpop.f32.mrf.mxu1  ;;  %2304 = vmatmul.mubr.bf16.gmra.mxu1 %v4007_v20  ;;  %3693 = vmatmul.mubr.bf16.gmra.mxu0 %v4011_v21 }
 0x11e   : > { %v4508_v33 = vadd.f32 %v3335_v2, %v1754_v27  ;;  %2311 = vmatprep.mubr.bf16.mxu1 %v4014_v23  ;;  %3696 = vmatprep.mubr.bf16.mxu0 %v4015_v24 }
 0x11f   : > { %v3249_v36 = vpop.f32.mrf.mxu0  ;;  %v3337_v37 = vpop.f32.mrf.mxu1 }
 0x120   : > { %v4512_v38 = vadd.f32 %v3249_v36, %v3248_v31  ;;  %v3338_v39 = vadd.f32 %v3337_v37, %v3336_v32  ;;  %v4022_v36 = vld [vmem:[%s4132_s11 + $0x3c0] ss:$36 sps:$4 sm:$0xff]   ;;  %v4026_v37 = vld [vmem:[%s4132_s11 + $0x338] ss:$36 sps:$4 sm:$0xff]  }
 0x121   : > { %v3251_v40 = vpop.f32.mrf.mxu0  ;;  %v3339_v41 = vpop.f32.mrf.mxu1 }
 0x122   : > { %v4516_v46 = vadd.f32 %v3338_v39, %v1759_v12  ;;  %v4029_v39 = vld [vmem:[%s4132_s11 + $0x40c] ss:$36 sps:$4 sm:$0xff]  }
 0x123   : > { %v3252_v52 = vpop.f32.mrf.mxu0  ;;  %v3340_v53 = vpop.f32.mrf.mxu1 }
 0x124   : > { %v4522_v56 = vadd.f32 %v3252_v52, %v3251_v40  ;;  %v3341_v18 = vadd.f32 %v3340_v53, %v3339_v41  ;;  %v4030_v40 = vld [vmem:[%s4132_s11 + $0x380] ss:$36 sps:$4 sm:$0xff]  }
 0x125   : > { %v3254_v57 = vpop.f32.mrf.mxu0  ;;  %v3342_v58 = vpop.f32.mrf.mxu1  ;;  %2312 = vmatmul.mubr.bf16.gmra.mxu1 %v4012_v42  ;;  %3697 = vmatmul.mubr.bf16.gmra.mxu0 %v4016_v43  ;;  %v1778_v43 = vadd.f32 %v4490_v6, %v4476_v48  ;;  %v1783_v6 = vadd.f32 %v4496_v14, %v4476_v48 }
 0x126   : > { %v4524_v59 = vadd.f32 %v3341_v18, %v1762_v55  ;;  %2319 = vmatprep.mubr.bf16.mxu1 %v4019_v47  ;;  %3700 = vmatprep.mubr.bf16.mxu0 %v4020_v49 }
 0x127   : > { %v3255_v63 = vpop.f32.mrf.mxu0  ;;  %v3343_v0 = vpop.f32.mrf.mxu1 }
 0x128   : > { %v4528_v1 = vadd.f32 %v3255_v63, %v3254_v57  ;;  %v3344_v4 = vadd.f32 %v3343_v0, %v3342_v58 }
 0x129   : > { %v3257_v5 = vpop.f32.mrf.mxu0  ;;  %v3345_v50 = vpop.f32.mrf.mxu1 }
 0x12a   : > { %v4532_v10 = vadd.f32 %v3344_v4, %v1767_v28  ;;  %v4027_v28 = vld [vmem:[%s4132_s11 + $0x408] ss:$36 sps:$4 sm:$0xff]  }
 0x12b   : > { %v3258_v15 = vpop.f32.mrf.mxu0  ;;  %v3346_v16 = vpop.f32.mrf.mxu1  ;;  %v4031_v4 = vld [vmem:[%s4132_s11 + $0x3c8] ss:$36 sps:$4 sm:$0xff]  }
 0x12c   : > { %v4538_v20 = vadd.f32 %v3258_v15, %v3257_v5  ;;  %v3347_v34 = vadd.f32 %v3346_v16, %v3345_v50  ;;  %v4034_v50 = vld [vmem:[%s4132_s11 + $0x454] ss:$36 sps:$4 sm:$0xff]  }
 0x12d   : > { %v3260_v21 = vpop.f32.mrf.mxu0  ;;  %v3348_v23 = vpop.f32.mrf.mxu1  ;;  %2320 = vmatmul.mubr.bf16.gmra.mxu1 %v4017_v7  ;;  %3701 = vmatmul.mubr.bf16.gmra.mxu0 %v4021_v8  ;;  %v4035_v7 = vld [vmem:[%s4132_s11 + $0x410] ss:$36 sps:$4 sm:$0xff]  }
 0x12e   : > { %v4540_v24 = vadd.f32 %v3347_v34, %v1770_v17  ;;  %2327 = vmatprep.mubr.bf16.mxu1 %v4024_v11  ;;  %3704 = vmatprep.mubr.bf16.mxu0 %v4025_v60  ;;  %v1786_v60 = vadd.f32 %v4506_v30, %v4476_v48 }
 0x12f   : > { %v3261_v25 = vpop.f32.mrf.mxu0  ;;  %v3349_v26 = vpop.f32.mrf.mxu1 }
 0x130   : > { %v4544_v27 = vadd.f32 %v3261_v25, %v3260_v21  ;;  %v3350_v2 = vadd.f32 %v3349_v26, %v3348_v23  ;;  %v1791_v25 = vadd.f32 %v4512_v38, %v4476_v48 }
 0x131   : > { %v3263_v31 = vpop.f32.mrf.mxu0  ;;  %v3351_v32 = vpop.f32.mrf.mxu1 }
 0x132   : > { %v4548_v12 = vadd.f32 %v3350_v2, %v1775_v44 }
 0x133   : > { %v3264_v41 = vpop.f32.mrf.mxu0  ;;  %v3352_v42 = vpop.f32.mrf.mxu1 }
 0x134   : > { %v4554_v47 = vadd.f32 %v3264_v41, %v3263_v31  ;;  %v3353_v54 = vadd.f32 %v3352_v42, %v3351_v32  ;;  %v4032_v31 = vld [vmem:[%s4132_s11 + $0x450] ss:$36 sps:$4 sm:$0xff]   ;;  %v4036_v32 = vld [vmem:[%s4132_s11 + $0x458] ss:$36 sps:$4 sm:$0xff]   ;;  %s2817_s11 = sshll.u32 %s4977_s18, 2 }
 0x135   : > { %v3266_v49 = vpop.f32.mrf.mxu0  ;;  %v3354_v52 = vpop.f32.mrf.mxu1  ;;  %2328 = vmatmul.mubr.bf16.gmra.mxu1 %v4022_v36  ;;  %3705 = vmatmul.mubr.bf16.gmra.mxu0 %v4026_v37  ;;  %s4853_s8 = scalar_lea.vmem %s4949_s3, %s2817_s11 }
 0x136   : > { %v4556_v53 = vadd.f32 %v3353_v54, %v1778_v43  ;;  %2335 = vmatprep.mubr.bf16.mxu1 %v4029_v39  ;;  %3708 = vmatprep.mubr.bf16.mxu0 %v4030_v40  ;;  %v1794_v40 = vadd.f32 %v4522_v56, %v4476_v48 }
 0x137   : > { %v3267_v55 = vpop.f32.mrf.mxu0  ;;  %v3355_v18 = vpop.f32.mrf.mxu1 }
 0x138   : > { %v4560_v57 = vadd.f32 %v3267_v55, %v3266_v49  ;;  %v3356_v58 = vadd.f32 %v3355_v18, %v3354_v52  ;;  %v1799_v55 = vadd.f32 %v4528_v1, %v4476_v48 }
 0x139   : > { %v3269_v63 = vpop.f32.mrf.mxu0  ;;  %v3357_v0 = vpop.f32.mrf.mxu1 }
 0x13a   : > { %v4564_v5 = vadd.f32 %v3356_v58, %v1783_v6 }
 0x13b   : > { %v3270_v8 = vpop.f32.mrf.mxu0  ;;  %v3358_v11 = vpop.f32.mrf.mxu1 }
 0x13c   : > { %v4570_v15 = vadd.f32 %v3270_v8, %v3269_v63  ;;  %v3359_v14 = vadd.f32 %v3358_v11, %v3357_v0 }
 0x13d   : > { %v3272_v16 = vpop.f32.mrf.mxu0  ;;  %v3360_v17 = vpop.f32.mrf.mxu1  ;;  %2336 = vmatmul.mubr.bf16.gmra.mxu1 %v4027_v28  ;;  %3709 = vmatmul.mubr.bf16.gmra.mxu0 %v4031_v4  ;;  %v1802_v4 = vadd.f32 %v4538_v20, %v4476_v48 }
 0x13e   : > { %v4572_v34 = vadd.f32 %v3359_v14, %v1786_v60  ;;  %2343 = vmatprep.mubr.bf16.mxu1 %v4034_v50  ;;  %3712 = vmatprep.mubr.bf16.mxu0 %v4035_v7 }
 0x13f   : > { %v3273_v21 = vpop.f32.mrf.mxu0  ;;  %v3361_v23 = vpop.f32.mrf.mxu1 }
 0x140   : > { %v4576_v26 = vadd.f32 %v3273_v21, %v3272_v16  ;;  %v3362_v30 = vadd.f32 %v3361_v23, %v3360_v17  ;;  %v1807_v16 = vadd.f32 %v4544_v27, %v4476_v48 }
 0x141   : > { %v3275_v44 = vpop.f32.mrf.mxu0  ;;  %v3363_v2 = vpop.f32.mrf.mxu1 }
 0x142   : > { %v4580_v36 = vadd.f32 %v3362_v30, %v1791_v25 }
 0x143   : > { %v3276_v37 = vpop.f32.mrf.mxu0  ;;  %v3364_v39 = vpop.f32.mrf.mxu1 }
 0x144   : > { %v4584_v41 = vadd.f32 %v3276_v37, %v3275_v44  ;;  %v3365_v42 = vadd.f32 %v3364_v39, %v3363_v2 }
 0x145   : > { %v3278_v43 = vpop.f32.mrf.mxu0  ;;  %v3366_v54 = vpop.f32.mrf.mxu1  ;;  %2344 = vmatmul.mubr.bf16.gmra.mxu1 %v4032_v31  ;;  %3713 = vmatmul.mubr.bf16.gmra.mxu0 %v4036_v32  ;;  %v1810_v31 = vadd.f32 %v4554_v47, %v4476_v48 }
 0x146   : > { %v4586_v38 = vadd.f32 %v3365_v42, %v1794_v40 }
 0x147   : > { %v3279_v49 = vpop.f32.mrf.mxu0  ;;  %v3367_v52 = vpop.f32.mrf.mxu1 }
 0x148   : > { %v4590_v18 = vadd.f32 %v3279_v49, %v3278_v43  ;;  %v3368_v6 = vadd.f32 %v3367_v52, %v3366_v54 }
 0x149   : > { %v3281_v58 = vpop.f32.mrf.mxu0  ;;  %v3369_v63 = vpop.f32.mrf.mxu1 }
 0x14a   : > { %v4592_v56 = vadd.f32 %v3368_v6, %v1799_v55 }
 0x14b   : > { %v3282_v0 = vpop.f32.mrf.mxu0  ;;  %v3370_v28 = vpop.f32.mrf.mxu1 }
 0x14c   : > { %v4596_v50 = vadd.f32 %v3282_v0, %v3281_v58  ;;  %v3371_v7 = vadd.f32 %v3370_v28, %v3369_v63 }
 0x14d   : > { %v3372_v8 = vpop.f32.mrf.mxu1  ;;  %v3436_v11 = vpop.f32.mrf.mxu0 }
 0x14e   : > { %v4598_v60 = vadd.f32 %v3371_v7, %v1802_v4 }
 0x14f   : > { %v3373_v1 = vpop.f32.mrf.mxu1  ;;  %v3437_v14 = vpop.f32.mrf.mxu0 }
 0x150   : > { %v3374_v17 = vadd.f32 %v3373_v1, %v3372_v8  ;;  %v3438_v21 = vadd.f32 %v3437_v14, %v3436_v11 }
 0x151   : > { %v3375_v23 = vpop.f32.mrf.mxu1  ;;  %v3439_v25 = vpop.f32.mrf.mxu0 }
 0x152   : > { %v4602_v30 = vadd.f32 %v3374_v17, %v1807_v16  ;;  %v4605_v20 = vadd.f32 %v3438_v21, %v4484_v62  ;;  %v1815_v62 = vadd.f32 %v4560_v57, %v4476_v48 }
 0x153   : > { %v3376_v44 = vpop.f32.mrf.mxu1  ;;  %v3440_v2 = vpop.f32.mrf.mxu0 }
 0x154   : > { %v3377_v32 = vadd.f32 %v3376_v44, %v3375_v23  ;;  %v3441_v37 = vadd.f32 %v3440_v2, %v3439_v25 }
 0x155   : > { %v3378_v39 = vpop.f32.mrf.mxu1  ;;  %v3442_v40 = vpop.f32.mrf.mxu0 }
 0x156   : > { %v4609_v42 = vadd.f32 %v3377_v32, %v1810_v31  ;;  %v4612_v27 = vadd.f32 %v3441_v37, %v4492_v9  ;;  %v1818_v9 = vadd.f32 %v4570_v15, %v4476_v48 }
 0x157   : > { %v3379_v43 = vpop.f32.mrf.mxu1  ;;  %v3443_v54 = vpop.f32.mrf.mxu0 }
 0x158   : > { %v3380_v49 = vadd.f32 %v3379_v43, %v3378_v39  ;;  %v3444_v52 = vadd.f32 %v3443_v54, %v3442_v40 }
 0x159   : > { %v3381_v55 = vpop.f32.mrf.mxu1  ;;  %v3445_v6 = vpop.f32.mrf.mxu0 }
 0x15a   : > { %v4616_v58 = vadd.f32 %v3380_v49, %v1815_v62  ;;  %v4619_v47 = vadd.f32 %v3444_v52, %v4500_v22  ;;  %v1823_v22 = vadd.f32 %v4576_v26, %v4476_v48 }
 0x15b   : > { %v3382_v63 = vpop.f32.mrf.mxu1  ;;  %v3446_v0 = vpop.f32.mrf.mxu0 }
 0x15c   : > { %v3383_v28 = vadd.f32 %v3382_v63, %v3381_v55  ;;  %v3447_v4 = vadd.f32 %v3446_v0, %v3445_v6 }
 0x15d   : > { %v3384_v7 = vpop.f32.mrf.mxu1  ;;  %v3448_v8 = vpop.f32.mrf.mxu0 }
 0x15e   : > { %v4623_v11 = vadd.f32 %v3383_v28, %v1818_v9  ;;  %v4626_v57 = vadd.f32 %v3447_v4, %v4508_v33  ;;  %v1826_v33 = vadd.f32 %v4584_v41, %v4476_v48 }
 0x15f   : > { %v3385_v1 = vpop.f32.mrf.mxu1  ;;  %v3449_v14 = vpop.f32.mrf.mxu0 }
 0x160   : > { %v3386_v16 = vadd.f32 %v3385_v1, %v3384_v7  ;;  %v3450_v17 = vadd.f32 %v3449_v14, %v3448_v8 }
 0x161   : > { %v3387_v21 = vpop.f32.mrf.mxu1  ;;  %v3451_v23 = vpop.f32.mrf.mxu0 }
 0x162   : > { %v4630_v25 = vadd.f32 %v3386_v16, %v1823_v22  ;;  %v4633_v15 = vadd.f32 %v3450_v17, %v4516_v46  ;;  %v1831_v46 = vadd.f32 %v4590_v18, %v4476_v48 }
 0x163   : > { %v3388_v44 = vpop.f32.mrf.mxu1  ;;  %v3452_v2 = vpop.f32.mrf.mxu0 }
 0x164   : > { %v3389_v31 = vadd.f32 %v3388_v44, %v3387_v21  ;;  %v3453_v32 = vadd.f32 %v3452_v2, %v3451_v23 }
 0x165   : > { %v3390_v37 = vpop.f32.mrf.mxu1  ;;  %v3454_v39 = vpop.f32.mrf.mxu0 }
 0x166   : > { %v4637_v40 = vadd.f32 %v3389_v31, %v1826_v33  ;;  %v4640_v26 = vadd.f32 %v3453_v32, %v4524_v59  ;;  %v1834_v59 = vadd.f32 %v4596_v50, %v4476_v48 }
 0x167   : > { %v3391_v43 = vpop.f32.mrf.mxu1  ;;  %v3455_v54 = vpop.f32.mrf.mxu0 }
 0x168   : > { %v3392_v62 = vadd.f32 %v3391_v43, %v3390_v37  ;;  %v3456_v49 = vadd.f32 %v3455_v54, %v3454_v39 }
 0x169   : > { %v3393_v52 = vpop.f32.mrf.mxu1  ;;  %v3457_v55 = vpop.f32.mrf.mxu0 }
 0x16a   : > { %v4644_v6 = vadd.f32 %v3392_v62, %v1831_v46  ;;  %v4647_v41 = vadd.f32 %v3456_v49, %v4532_v10  ;;  %v1839_v10 = vadd.f32 %v4427_v51, %v4476_v48 }
 0x16b   : > { %v3394_v63 = vpop.f32.mrf.mxu1  ;;  %v3458_v0 = vpop.f32.mrf.mxu0 }
 0x16c   : > { %v3395_v9 = vadd.f32 %v3394_v63, %v3393_v52  ;;  %v3459_v28 = vadd.f32 %v3458_v0, %v3457_v55 }
 0x16d   : > { %v3396_v4 = vpop.f32.mrf.mxu1  ;;  %v3460_v7 = vpop.f32.mrf.mxu0 }
 0x16e   : > { %v4651_v8 = vadd.f32 %v3395_v9, %v1834_v59  ;;  %v4654_v18 = vadd.f32 %v3459_v28, %v4540_v24  ;;  %v1842_v24 = vadd.f32 %v4435_v61, %v4476_v48 }
 0x16f   : > { %v3397_v1 = vpop.f32.mrf.mxu1  ;;  %v3461_v14 = vpop.f32.mrf.mxu0 }
 0x170   : > { %v3398_v22 = vadd.f32 %v3397_v1, %v3396_v4  ;;  %v3462_v16 = vadd.f32 %v3461_v14, %v3460_v7 }
 0x171   : > { %v3399_v17 = vpop.f32.mrf.mxu1  ;;  %v3463_v21 = vpop.f32.mrf.mxu0 }
 0x172   : > { %v4658_v23 = vadd.f32 %v3398_v22, %v1839_v10  ;;  %v4661_v50 = vadd.f32 %v3462_v16, %v4548_v12  ;;  %v1847_v12 = vadd.f32 %v4439_v3, %v4476_v48 }
 0x173   : > { %v3400_v44 = vpop.f32.mrf.mxu1  ;;  %v3464_v2 = vpop.f32.mrf.mxu0 }
 0x174   : > { %v3401_v33 = vadd.f32 %v3400_v44, %v3399_v17  ;;  %v3465_v31 = vadd.f32 %v3464_v2, %v3463_v21 }
 0x175   : > { %v3402_v32 = vpop.f32.mrf.mxu1  ;;  %v3466_v37 = vpop.f32.mrf.mxu0 }
 0x176   : > { %v4665_v39 = vadd.f32 %v3401_v33, %v1842_v24  ;;  %v4668_v51 = vadd.f32 %v3465_v31, %v4556_v53  ;;  %v1850_v53 = vadd.f32 %v4447_v13, %v4476_v48 }
 0x177   : > { %v3403_v43 = vpop.f32.mrf.mxu1  ;;  %v3467_v54 = vpop.f32.mrf.mxu0 }
 0x178   : > { %v3404_v46 = vadd.f32 %v3403_v43, %v3402_v32  ;;  %v3468_v62 = vadd.f32 %v3467_v54, %v3466_v37 }
 0x179   : > { %v3405_v49 = vpop.f32.mrf.mxu1  ;;  %v3469_v52 = vpop.f32.mrf.mxu0 }
 0x17a   : > { %v4672_v55 = vadd.f32 %v3404_v46, %v1847_v12  ;;  %v4675_v61 = vadd.f32 %v3468_v62, %v4564_v5  ;;  %v1855_v5 = vadd.f32 %v4451_v19, %v4476_v48 }
 0x17b   : > { %v3406_v63 = vpop.f32.mrf.mxu1  ;;  %v3470_v0 = vpop.f32.mrf.mxu0 }
 0x17c   : > { %v3407_v59 = vadd.f32 %v3406_v63, %v3405_v49  ;;  %v3471_v9 = vadd.f32 %v3470_v0, %v3469_v52 }
 0x17d   : > { %v3408_v28 = vpop.f32.mrf.mxu1  ;;  %v3472_v4 = vpop.f32.mrf.mxu0 }
 0x17e   : > { %v4679_v7 = vadd.f32 %v3407_v59, %v1850_v53  ;;  %v4682_v3 = vadd.f32 %v3471_v9, %v4572_v34  ;;  %v1858_v34 = vadd.f32 %v4459_v29, %v4476_v48 }
 0x17f   : > { %v3409_v1 = vpop.f32.mrf.mxu1  ;;  %v3473_v14 = vpop.f32.mrf.mxu0 }
 0x180   : > { %v3410_v10 = vadd.f32 %v3409_v1, %v3408_v28  ;;  %v3474_v22 = vadd.f32 %v3473_v14, %v3472_v4 }
 0x181   : > { %v3411_v16 = vpop.f32.mrf.mxu1  ;;  %v3475_v17 = vpop.f32.mrf.mxu0 }
 0x182   : > { %v4686_v21 = vadd.f32 %v3410_v10, %v1855_v5  ;;  %v4689_v13 = vadd.f32 %v3474_v22, %v4580_v36  ;;  %v1863_v36 = vadd.f32 %v4463_v35, %v4476_v48 }
 0x183   : > { %v3412_v44 = vpop.f32.mrf.mxu1  ;;  %v3476_v2 = vpop.f32.mrf.mxu0 }
 0x184   : > { %v3413_v24 = vadd.f32 %v3412_v44, %v3411_v16  ;;  %v3477_v33 = vadd.f32 %v3476_v2, %v3475_v17 }
 0x185   : > { %v3414_v31 = vpop.f32.mrf.mxu1  ;;  %v3478_v32 = vpop.f32.mrf.mxu0 }
 0x186   : > { %v4693_v37 = vadd.f32 %v3413_v24, %v1858_v34  ;;  %v4696_v19 = vadd.f32 %v3477_v33, %v4586_v38  ;;  %v1866_v38 = vadd.f32 %v4471_v45, %v4476_v48 }
 0x187   : > { %v3415_v43 = vpop.f32.mrf.mxu1  ;;  %v3479_v54 = vpop.f32.mrf.mxu0 }
 0x188   : > { %v3416_v12 = vadd.f32 %v3415_v43, %v3414_v31  ;;  %v3480_v46 = vadd.f32 %v3479_v54, %v3478_v32 }
 0x189   : > { %v3417_v62 = vpop.f32.mrf.mxu1  ;;  %v3481_v49 = vpop.f32.mrf.mxu0 }
 0x18a   : > { %v4700_v52 = vadd.f32 %v3416_v12, %v1863_v36  ;;  %v4703_v29 = vadd.f32 %v3480_v46, %v4592_v56 }
 0x18b   : > { %v3418_v63 = vpop.f32.mrf.mxu1  ;;  %v3482_v0 = vpop.f32.mrf.mxu0 }
 0x18c   : > { %v3419_v53 = vadd.f32 %v3418_v63, %v3417_v62  ;;  %v3483_v59 = vadd.f32 %v3482_v0, %v3481_v49 }
 0x18d   : > { %v3484_v9 = vpop.f32.mrf.mxu0  ;;  %v3548_v28 = vpop.f32.mrf.mxu1 }
 0x18e   : > { %v4707_v4 = vadd.f32 %v3419_v53, %v1866_v38  ;;  %v4710_v35 = vadd.f32 %v3483_v59, %v4598_v60 }
 0x18f   : > { %v3485_v1 = vpop.f32.mrf.mxu0  ;;  %v3549_v14 = vpop.f32.mrf.mxu1 }
 0x190   : > { %v3486_v5 = vadd.f32 %v3485_v1, %v3484_v9  ;;  %v3550_v10 = vadd.f32 %v3549_v14, %v3548_v28 }
 0x191   : > { %v3487_v56 = vpop.f32.mrf.mxu0  ;;  %v4712_v22 = vpop.f32.mrf.mxu1 }
 0x192   : > { %v4715_v16 = vadd.f32 %v3486_v5, %v4602_v30  ;;  %v4718_v45 = vadd.f32 %v3550_v10, %v4605_v20 }
 0x193   : > { %v3488_v48 = vpop.f32.mrf.mxu0  ;;  %v4720_v17 = vpop.f32.mrf.mxu1 }
 0x194   : > { %v3489_v44 = vadd.f32 %v3488_v48, %v3487_v56 }
 0x195   : > { %v3490_v2 = vpop.f32.mrf.mxu0  ;;  %v4722_v60 = vpop.f32.mrf.mxu1 }
 0x196   : > { %v4725_v34 = vadd.f32 %v3489_v44, %v4609_v42 }
 0x197   : > { %v3491_v24 = vpop.f32.mrf.mxu0  ;;  %v4727_v33 = vpop.f32.mrf.mxu1 }
 0x198   : > { %v3492_v31 = vadd.f32 %v3491_v24, %v3490_v2 }
 0x199   : > { %v3493_v32 = vpop.f32.mrf.mxu0  ;;  %v4729_v30 = vpop.f32.mrf.mxu1 }
 0x19a   : > { %v4732_v20 = vadd.f32 %v3492_v31, %v4616_v58 }
 0x19b   : > { %v3494_v43 = vpop.f32.mrf.mxu0  ;;  %v4734_v54 = vpop.f32.mrf.mxu1 }
 0x19c   : > { %v3495_v36 = vadd.f32 %v3494_v43, %v3493_v32 }
 0x19d   : > { %v3496_v12 = vpop.f32.mrf.mxu0  ;;  %v4736_v46 = vpop.f32.mrf.mxu1 }
 0x19e   : > { %v4739_v42 = vadd.f32 %v3495_v36, %v4623_v11 }
 0x19f   : > { %v3497_v62 = vpop.f32.mrf.mxu0  ;;  %v4741_v49 = vpop.f32.mrf.mxu1 }
 0x1a0   : > { %v3498_v63 = vadd.f32 %v3497_v62, %v3496_v12 }
 0x1a1   : > { %v3499_v0 = vpop.f32.mrf.mxu0  ;;  %v4743_v38 = vpop.f32.mrf.mxu1 }
 0x1a2   : > { %v4746_v58 = vadd.f32 %v3498_v63, %v4630_v25 }
 0x1a3   : > { %v3500_v53 = vpop.f32.mrf.mxu0  ;;  %v4748_v59 = vpop.f32.mrf.mxu1 }
 0x1a4   : > { %4950 = vst [vmem:[#allocation2_spill] sm:$0xff] %v4746_v58  ;;  %v3501_v9 = vadd.f32 %v3500_v53, %v3499_v0 }
 0x1a5   : > { %v3502_v28 = vpop.f32.mrf.mxu0  ;;  %v4750_v1 = vpop.f32.mrf.mxu1 }
 0x1a6   : > { %v4753_v11 = vadd.f32 %v3501_v9, %v4637_v40 }
 0x1a7   : > { %v3503_v14 = vpop.f32.mrf.mxu0  ;;  %v4755_v5 = vpop.f32.mrf.mxu1 }
 0x1a8   : > { %4951 = vst [vmem:[#allocation3_spill] sm:$0xff] %v4753_v11  ;;  %v3504_v10 = vadd.f32 %v3503_v14, %v3502_v28 }
 0x1a9   : > { %v3505_v56 = vpop.f32.mrf.mxu0  ;;  %v4757_v48 = vpop.f32.mrf.mxu1 }
 0x1aa   : > { %v4760_v25 = vadd.f32 %v3504_v10, %v4644_v6 }
 0x1ab   : > { %v3506_v44 = vpop.f32.mrf.mxu0  ;;  %v4762_v2 = vpop.f32.mrf.mxu1 }
 0x1ac   : > { %4952 = vst [vmem:[#allocation4_spill] sm:$0xff] %v4760_v25  ;;  %v3507_v24 = vadd.f32 %v3506_v44, %v3505_v56 }
 0x1ad   : > { %v3508_v31 = vpop.f32.mrf.mxu0  ;;  %v4764_v32 = vpop.f32.mrf.mxu1 }
 0x1ae   : > { %v4767_v40 = vadd.f32 %v3507_v24, %v4651_v8 }
 0x1af   : > { %v3509_v43 = vpop.f32.mrf.mxu0  ;;  %v4769_v36 = vpop.f32.mrf.mxu1 }
 0x1b0   : > { %4953 = vst [vmem:[#allocation5_spill] sm:$0xff] %v4767_v40  ;;  %v3510_v12 = vadd.f32 %v3509_v43, %v3508_v31 }
 0x1b1   : > { %v3511_v62 = vpop.f32.mrf.mxu0  ;;  %v4771_v63 = vpop.f32.mrf.mxu1 }
 0x1b2   : > { %v4774_v6 = vadd.f32 %v3510_v12, %v4658_v23 }
 0x1b3   : > { %v3512_v0 = vpop.f32.mrf.mxu0  ;;  %v4776_v53 = vpop.f32.mrf.mxu1 }
 0x1b4   : > { %4954 = vst [vmem:[#allocation6_spill] sm:$0xff] %v4774_v6  ;;  %v3513_v9 = vadd.f32 %v3512_v0, %v3511_v62 }
 0x1b5   : > { %v3514_v28 = vpop.f32.mrf.mxu0  ;;  %v4778_v14 = vpop.f32.mrf.mxu1 }
 0x1b6   : > { %v4781_v8 = vadd.f32 %v3513_v9, %v4665_v39 }
 0x1b7   : > { %v3515_v10 = vpop.f32.mrf.mxu0  ;;  %v4783_v56 = vpop.f32.mrf.mxu1 }
 0x1b8   : > { %4955 = vst [vmem:[#allocation7_spill] sm:$0xff] %v4781_v8  ;;  %v3516_v44 = vadd.f32 %v3515_v10, %v3514_v28 }
 0x1b9   : > { %v3517_v24 = vpop.f32.mrf.mxu0  ;;  %v4785_v31 = vpop.f32.mrf.mxu1 }
 0x1ba   : > { %v4788_v23 = vadd.f32 %v3516_v44, %v4672_v55 }
 0x1bb   : > { %v3518_v43 = vpop.f32.mrf.mxu0  ;;  %v4790_v12 = vpop.f32.mrf.mxu1 }
 0x1bc   : > { %4956 = vst [vmem:[#allocation8_spill] sm:$0xff] %v4788_v23  ;;  %v3519_v62 = vadd.f32 %v3518_v43, %v3517_v24 }
 0x1bd   : > { %v3520_v0 = vpop.f32.mrf.mxu0  ;;  %v4792_v6 = vpop.f32.mrf.mxu1 }
 0x1be   : > { %v4795_v39 = vadd.f32 %v3519_v62, %v4679_v7 }
 0x1bf   : > { %v3521_v9 = vpop.f32.mrf.mxu0  ;;  %v4797_v8 = vpop.f32.mrf.mxu1 }
 0x1c0   : > { %4957 = vst [vmem:[#allocation9_spill] sm:$0xff] %v4795_v39  ;;  %v3522_v28 = vadd.f32 %v3521_v9, %v3520_v0 }
 0x1c1   : > { %v3523_v10 = vpop.f32.mrf.mxu0  ;;  %v4799_v11 = vpop.f32.mrf.mxu1 }
 0x1c2   : > { %v4802_v55 = vadd.f32 %v3522_v28, %v4686_v21  ;;  %v3556_v21 = vadd.f32 %v4727_v33, %v4722_v60 }
 0x1c3   : > { %v3524_v44 = vpop.f32.mrf.mxu0  ;;  %v4804_v23 = vpop.f32.mrf.mxu1 }
 0x1c4   : > { %4958 = vst [vmem:[#allocation10_spill] sm:$0xff] %v4802_v55  ;;  %v3525_v24 = vadd.f32 %v3524_v44, %v3523_v10 }
 0x1c5   : > { %v3526_v43 = vpop.f32.mrf.mxu0  ;;  %v4806_v40 = vpop.f32.mrf.mxu1 }
 0x1c6   : > { %v4809_v7 = vadd.f32 %v3525_v24, %v4693_v37  ;;  %v3559_v37 = vadd.f32 %v4734_v54, %v4729_v30  ;;  %v3568_v54 = vadd.f32 %v4755_v5, %v4750_v1  ;;  %v3565_v1 = vadd.f32 %v4748_v59, %v4743_v38 }
 0x1c7   : > { %v3527_v62 = vpop.f32.mrf.mxu0  ;;  %v4811_v39 = vpop.f32.mrf.mxu1 }
 0x1c8   : > { %4959 = vst [vmem:[#allocation11_spill] sm:$0xff] %v4809_v7  ;;  %v3528_v0 = vadd.f32 %v3527_v62, %v3526_v43  ;;  %v3553_v62 = vadd.f32 %v4720_v17, %v4712_v22 }
 0x1c9   : > { %v3529_v9 = vpop.f32.mrf.mxu0  ;;  %v4813_v58 = vpop.f32.mrf.mxu1 }
 0x1ca   : > { %v4818_v28 = vadd.f32 %v3528_v0, %v4700_v52  ;;  %v2234_v52 = vadd.f32 %v3556_v21, %v4619_v47  ;;  %v3562_v47 = vadd.f32 %v4741_v49, %v4736_v46 }
 0x1cb   : > { %v3530_v10 = vpop.f32.mrf.mxu0  ;;  %v4820_v44 = vpop.f32.mrf.mxu1 }
 0x1cc   : > { %4960 = vst [vmem:[#allocation12_spill] sm:$0xff] %v4818_v28  ;;  %v3531_v24 = vadd.f32 %v3530_v10, %v3529_v9  ;;  %v2237_v28 = vadd.f32 %v3559_v37, %v4626_v57  ;;  %v3571_v57 = vadd.f32 %v4762_v2, %v4757_v48  ;;  %v2250_v48 = vadd.f32 %v3568_v54, %v4647_v41 }
 0x1cd   : > { %v4824_v7 = vpop.f32.mrf.mxu1  ;;  %v3686_v43 = vpop.f32.mrf.mxu0  ;;  %v2245_v41 = vadd.f32 %v3565_v1, %v4640_v26  ;;  %v3574_v54 = vadd.f32 %v4769_v36, %v4764_v32 }
 0x1ce   : > { %v4829_v55 = vadd.f32 %v3531_v24, %v4707_v4  ;;  %v2395_v0 = vadd.f32 %v3686_v43, %v2234_v52  ;;  %v2229_v4 = vadd.f32 %v3553_v62, %v4612_v27  ;;  %v2242_v43 = vadd.f32 %v3562_v47, %v4633_v15 }
 0x1cf   : > { %v4832_v60 = vpop.f32.mrf.mxu1  ;;  %v2386_v33 = vpop.f32.mrf.mxu0  ;;  %v2253_v62 = vadd.f32 %v3571_v57, %v4654_v18  ;;  %v3583_v15 = vadd.f32 %v4790_v12, %v4785_v31  ;;  %v2258_v1 = vadd.f32 %v3574_v54, %v4661_v50  ;;  %v3595_v50 = vadd.f32 %v4820_v44, %v4813_v58 }
 0x1d0   : > { %v2387_v9 = vadd.f32 %v2386_v33, %v4718_v45  ;;  %v2515_v10 = vmax.f32 %v2395_v0, 0.0  ;;  %v3580_v0 = vadd.f32 %v4783_v56, %v4778_v14  ;;  %v3577_v14 = vadd.f32 %v4776_v53, %v4771_v63 }
 0x1d1   : > { %v4835_v25 = vpop.f32.mrf.mxu1  ;;  %v3687_v30 = vpop.f32.mrf.mxu0  ;;  %v2285_v44 = vadd.f32 %v3595_v50, %v4710_v35 }
 0x1d2   : > { %v2398_v22 = vadd.f32 %v3687_v30, %v2237_v28  ;;  %v2513_v46 = vmax.f32 %v2387_v9, 0.0  ;;  %v2266_v32 = vadd.f32 %v3580_v0, %v4675_v61  ;;  %v2261_v61 = vadd.f32 %v3577_v14, %v4668_v51 }
 0x1d3   : > { %v4844_v17 = vpop.f32.mrf.mxu1  ;;  %v2389_v21 = vpop.f32.mrf.mxu0 }
 0x1d4   : > { %v2516_v37 = vmax.f32 %v2398_v22, 0.0  ;;  %v2390_v24 = vadd.f32 %v2389_v21, %v2229_v4 }
 0x1d5   : > { %v4855_v27 = vpop.f32.mrf.mxu1  ;;  %v3690_v45 = vpop.f32.mrf.mxu0 }
 0x1d6   : > { %v3109_v49 = vpack.c.bf16 %v2516_v37, %v2515_v10  ;;  %v2514_v5 = vmax.f32 %v2390_v24, 0.0  ;;  %v2411_v59 = vadd.f32 %v3690_v45, %v2250_v48  ;;  %v2269_v45 = vadd.f32 %v3583_v15, %v4682_v3 }
 0x1d7   : > { %v4858_v2 = vpop.f32.mrf.mxu1  ;;  %v2402_v28 = vpop.f32.mrf.mxu0  ;;  %v3586_v48 = vadd.f32 %v4797_v8, %v4792_v6 }
 0x1d8   : > { %3181 = vst [vmem:[%s4853_s8 + $0x8] sm:$0xff] %v3109_v49   ;;  %v3104_v38 = vpack.c.bf16 %v2514_v5, %v2513_v46  ;;  %v2403_v30 = vadd.f32 %v2402_v28, %v2242_v43  ;;  %v2519_v18 = vmax.f32 %v2411_v59, 0.0  ;;  %v3592_v46 = vadd.f32 %v4811_v39, %v4806_v40 }
 0x1d9   : > { %v4863_v52 = vpop.f32.mrf.mxu1  ;;  %v3691_v33 = vpop.f32.mrf.mxu0  ;;  %v3589_v40 = vadd.f32 %v4804_v23, %v4799_v11  ;;  %v2274_v58 = vadd.f32 %v3586_v48, %v4689_v13  ;;  %v3604_v11 = vadd.f32 %v4858_v2, %v4855_v27 }
 0x1da   : > { %3105 = vst [vmem:[%s4853_s8] sm:$0xff] %v3104_v38   ;;  %v2414_v9 = vadd.f32 %v3691_v33, %v2253_v62  ;;  %v2517_v26 = vmax.f32 %v2403_v30, 0.0  ;;  %v2282_v6 = vadd.f32 %v3592_v46, %v4703_v29  ;;  %v3598_v29 = vadd.f32 %v4832_v60, %v4824_v7 }
 0x1db   : > { %v3606_v22 = vpop.f32.mrf.mxu1  ;;  %v2405_v4 = vpop.f32.mrf.mxu0 }
 0x1dc   : > { %v2520_v47 = vmax.f32 %v2414_v9, 0.0  ;;  %v2406_v21 = vadd.f32 %v2405_v4, %v2245_v41  ;;  %v3607_v13 = vadd.f32 %v3606_v22, %v4863_v52  ;;  %v2290_v52 = vadd.f32 %v3598_v29, %v4715_v16 }
 0x1dd   : > { %v4875_v56 = vpop.f32.mrf.mxu1  ;;  %v3694_v57 = vpop.f32.mrf.mxu0 }
 0x1de   : > { %v3119_v10 = vpack.c.bf16 %v2520_v47, %v2519_v18  ;;  %v2518_v37 = vmax.f32 %v2406_v21, 0.0  ;;  %v2427_v12 = vadd.f32 %v3694_v57, %v2266_v32  ;;  %v2277_v18 = vadd.f32 %v3589_v40, %v4696_v19  ;;  %v4961_v40 = vld [vmem:[#allocation4_spill] sm:$0xff] }
 0x1df   : > { %v4878_v36 = vpop.f32.mrf.mxu1  ;;  %v2418_v24 = vpop.f32.mrf.mxu0  ;;  %v2298_v32 = vadd.f32 %v3604_v11, %v4732_v20  ;;  %v2301_v22 = vadd.f32 %v3607_v13, %v4739_v42 }
 0x1e0   : > { %3183 = vst [vmem:[%s4853_s8 + $0x18] sm:$0xff] %v3119_v10   ;;  %v3114_v31 = vpack.c.bf16 %v2518_v37, %v2517_v26  ;;  %v2419_v49 = vadd.f32 %v2418_v24, %v2258_v1  ;;  %v2523_v3 = vmax.f32 %v2427_v12, 0.0  ;;  %v3601_v26 = vadd.f32 %v4844_v17, %v4835_v25 }
 0x1e1   : > { %v4883_v63 = vpop.f32.mrf.mxu1  ;;  %v3695_v53 = vpop.f32.mrf.mxu0  ;;  %v3610_v20 = vadd.f32 %v4878_v36, %v4875_v56 }
 0x1e2   : > { %3182 = vst [vmem:[%s4853_s8 + $0x10] sm:$0xff] %v3114_v31   ;;  %v2430_v5 = vadd.f32 %v3695_v53, %v2269_v45  ;;  %v2521_v33 = vmax.f32 %v2419_v49, 0.0  ;;  %v2293_v53 = vadd.f32 %v3601_v26, %v4725_v34 }
 0x1e3   : > { %v3612_v28 = vpop.f32.mrf.mxu1  ;;  %v2421_v38 = vpop.f32.mrf.mxu0 }
 0x1e4   : > { %v2524_v59 = vmax.f32 %v2430_v5, 0.0  ;;  %v2422_v43 = vadd.f32 %v2421_v38, %v2261_v61  ;;  %v3613_v42 = vadd.f32 %v3612_v28, %v4883_v63 }
 0x1e5   : > { %v3614_v39 = vpop.f32.mrf.mxu1  ;;  %v3698_v62 = vpop.f32.mrf.mxu0 }
 0x1e6   : > { %v3129_v51 = vpack.c.bf16 %v2524_v59, %v2523_v3  ;;  %v2522_v0 = vmax.f32 %v2422_v43, 0.0  ;;  %v2443_v41 = vadd.f32 %v3698_v62, %v2282_v6 }
 0x1e7   : > { %v3615_v8 = vpop.f32.mrf.mxu1  ;;  %v2434_v30 = vpop.f32.mrf.mxu0 }
 0x1e8   : > { %3185 = vst [vmem:[%s4853_s8 + $0x28] sm:$0xff] %v3129_v51   ;;  %v3124_v9 = vpack.c.bf16 %v2522_v0, %v2521_v33  ;;  %v2435_v23 = vadd.f32 %v2434_v30, %v2274_v58  ;;  %v2527_v14 = vmax.f32 %v2443_v41, 0.0  ;;  %v3616_v25 = vadd.f32 %v3615_v8, %v3614_v39  ;;  %v4962_v33 = vld [vmem:[#allocation2_spill] sm:$0xff]  ;;  %v4963_v0 = vld [vmem:[#allocation5_spill] sm:$0xff]  ;;  %v4964_v41 = vld [vmem:[#allocation3_spill] sm:$0xff] }
 0x1e9   : > { %v3617_v54 = vpop.f32.mrf.mxu1  ;;  %v3699_v4 = vpop.f32.mrf.mxu0  ;;  %v2306_v51 = vadd.f32 %v3610_v20, %v4962_v33  ;;  %v2309_v58 = vadd.f32 %v3613_v42, %v4964_v41  ;;  %v4971_v33 = vld [vmem:[#allocation11_spill] sm:$0xff] }
 0x1ea   : > { %3184 = vst [vmem:[%s4853_s8 + $0x20] sm:$0xff] %v3124_v9   ;;  %v2446_v15 = vadd.f32 %v3699_v4, %v2285_v44  ;;  %v2525_v10 = vmax.f32 %v2435_v23, 0.0  ;;  %v2314_v34 = vadd.f32 %v3616_v25, %v4961_v40 }
 0x1eb   : > { %v3618_v47 = vpop.f32.mrf.mxu1  ;;  %v2437_v21 = vpop.f32.mrf.mxu0 }
 0x1ec   : > { %v2528_v35 = vmax.f32 %v2446_v15, 0.0  ;;  %v2438_v57 = vadd.f32 %v2437_v21, %v2277_v18  ;;  %v3619_v5 = vadd.f32 %v3618_v47, %v3617_v54 }
 0x1ed   : > { %v3620_v27 = vpop.f32.mrf.mxu1  ;;  %v3702_v2 = vpop.f32.mrf.mxu0 }
 0x1ee   : > { %v3139_v37 = vpack.c.bf16 %v2528_v35, %v2527_v14  ;;  %v2526_v19 = vmax.f32 %v2438_v57, 0.0  ;;  %v2459_v31 = vadd.f32 %v3702_v2, %v2298_v32  ;;  %v2317_v6 = vadd.f32 %v3619_v5, %v4963_v0  ;;  %v4965_v57 = vld [vmem:[#allocation8_spill] sm:$0xff] }
 0x1ef   : > { %v3621_v7 = vpop.f32.mrf.mxu1  ;;  %v2450_v60 = vpop.f32.mrf.mxu0 }
 0x1f0   : > { %3187 = vst [vmem:[%s4853_s8 + $0x38] sm:$0xff] %v3139_v37   ;;  %v3134_v24 = vpack.c.bf16 %v2526_v19, %v2525_v10  ;;  %v2451_v17 = vadd.f32 %v2450_v60, %v2290_v52  ;;  %v2531_v61 = vmax.f32 %v2459_v31, 0.0  ;;  %v3622_v44 = vadd.f32 %v3621_v7, %v3620_v27  ;;  %v4966_v19 = vld [vmem:[#allocation6_spill] sm:$0xff]  ;;  %v4967_v7 = vld [vmem:[#allocation9_spill] sm:$0xff] }
 0x1f1   : > { %v3623_v12 = vpop.f32.mrf.mxu1  ;;  %v3703_v1 = vpop.f32.mrf.mxu0 }
 0x1f2   : > { %3186 = vst [vmem:[%s4853_s8 + $0x30] sm:$0xff] %v3134_v24   ;;  %v2462_v45 = vadd.f32 %v3703_v1, %v2301_v22  ;;  %v2529_v3 = vmax.f32 %v2451_v17, 0.0  ;;  %v2322_v32 = vadd.f32 %v3622_v44, %v4966_v19 }
 0x1f3   : > { %v3624_v46 = vpop.f32.mrf.mxu1  ;;  %v2453_v49 = vpop.f32.mrf.mxu0 }
 0x1f4   : > { %v2532_v48 = vmax.f32 %v2462_v45, 0.0  ;;  %v2454_v16 = vadd.f32 %v2453_v49, %v2293_v53  ;;  %v3625_v29 = vadd.f32 %v3624_v46, %v3623_v12  ;;  %v4968_v12 = vld [vmem:[#allocation7_spill] sm:$0xff] }
 0x1f5   : > { %v3626_v38 = vpop.f32.mrf.mxu1  ;;  %v3706_v50 = vpop.f32.mrf.mxu0 }
 0x1f6   : > { %v3149_v59 = vpack.c.bf16 %v2532_v48, %v2531_v61  ;;  %v2530_v43 = vmax.f32 %v2454_v16, 0.0  ;;  %v2475_v36 = vadd.f32 %v3706_v50, %v2314_v34  ;;  %v2325_v1 = vadd.f32 %v3625_v29, %v4968_v12 }
 0x1f7   : > { %v3627_v39 = vpop.f32.mrf.mxu1  ;;  %v2466_v62 = vpop.f32.mrf.mxu0 }
 0x1f8   : > { %3189 = vst [vmem:[%s4853_s8 + $0x48] sm:$0xff] %v3149_v59   ;;  %v3144_v56 = vpack.c.bf16 %v2530_v43, %v2529_v3  ;;  %v3628_v63 = vadd.f32 %v3627_v39, %v3626_v38  ;;  %v2467_v28 = vadd.f32 %v2466_v62, %v2306_v51  ;;  %v2535_v11 = vmax.f32 %v2475_v36, 0.0  ;;  %v4969_v43 = vld [vmem:[#allocation10_spill] sm:$0xff]  ;;  %v4970_v62 = vld [vmem:[#allocation12_spill] sm:$0xff] }
 0x1f9   : > { %v3629_v8 = vpop.f32.mrf.mxu1  ;;  %v3707_v30 = vpop.f32.mrf.mxu0 }
 0x1fa   : > { %3188 = vst [vmem:[%s4853_s8 + $0x40] sm:$0xff] %v3144_v56   ;;  %v2478_v9 = vadd.f32 %v3707_v30, %v2317_v6  ;;  %v2533_v13 = vmax.f32 %v2467_v28, 0.0  ;;  %v2330_v26 = vadd.f32 %v3628_v63, %v4965_v57 }
 0x1fb   : > { %v3630_v54 = vpop.f32.mrf.mxu1  ;;  %v2469_v4 = vpop.f32.mrf.mxu0 }
 0x1fc   : > { %v2536_v23 = vmax.f32 %v2478_v9, 0.0  ;;  %v3631_v15 = vadd.f32 %v3630_v54, %v3629_v8  ;;  %v2470_v18 = vadd.f32 %v2469_v4, %v2309_v58 }
 0x1fd   : > { %v3632_v47 = vpop.f32.mrf.mxu1  ;;  %v3710_v21 = vpop.f32.mrf.mxu0 }
 0x1fe   : > { %v3159_v14 = vpack.c.bf16 %v2536_v23, %v2535_v11  ;;  %v2534_v35 = vmax.f32 %v2470_v18, 0.0  ;;  %v2491_v37 = vadd.f32 %v3710_v21, %v2330_v26  ;;  %v2333_v60 = vadd.f32 %v3631_v15, %v4967_v7 }
 0x1ff   : > { %v3633_v2 = vpop.f32.mrf.mxu1  ;;  %v2482_v10 = vpop.f32.mrf.mxu0 }
 0x200   : > { %3191 = vst [vmem:[%s4853_s8 + $0x58] sm:$0xff] %v3159_v14   ;;  %v3154_v27 = vpack.c.bf16 %v2534_v35, %v2533_v13  ;;  %v2483_v52 = vadd.f32 %v2482_v10, %v2322_v32  ;;  %v2539_v45 = vmax.f32 %v2491_v37, 0.0  ;;  %v3634_v53 = vadd.f32 %v3633_v2, %v3632_v47 }
 0x201   : > { %v3635_v24 = vpop.f32.mrf.mxu1  ;;  %v3711_v31 = vpop.f32.mrf.mxu0 }
 0x202   : > { %3190 = vst [vmem:[%s4853_s8 + $0x50] sm:$0xff] %v3154_v27   ;;  %v2494_v22 = vadd.f32 %v3711_v31, %v2333_v60  ;;  %v2537_v61 = vmax.f32 %v2483_v52, 0.0  ;;  %v2338_v40 = vadd.f32 %v3634_v53, %v4969_v43 }
 0x203   : > { %v3636_v25 = vpop.f32.mrf.mxu1  ;;  %v2485_v17 = vpop.f32.mrf.mxu0 }
 0x204   : > { %v2540_v20 = vmax.f32 %v2494_v22, 0.0  ;;  %v2486_v46 = vadd.f32 %v2485_v17, %v2325_v1  ;;  %v3637_v16 = vadd.f32 %v3636_v25, %v3635_v24 }
 0x205   : > { %v3638_v49 = vpop.f32.mrf.mxu1  ;;  %v3714_v5 = vpop.f32.mrf.mxu0 }
 0x206   : > { %v3169_v48 = vpack.c.bf16 %v2540_v20, %v2539_v45  ;;  %v2538_v42 = vmax.f32 %v2486_v46, 0.0  ;;  %v2341_v51 = vadd.f32 %v3637_v16, %v4971_v33 }
 0x207   : > { %v3639_v38 = vpop.f32.mrf.mxu1  ;;  %v2498_v50 = vpop.f32.mrf.mxu0 }
 0x208   : > { %3193 = vst [vmem:[%s4853_s8 + $0x68] sm:$0xff] %v3169_v48   ;;  %v3164_v3 = vpack.c.bf16 %v2538_v42, %v2537_v61  ;;  %v3640_v59 = vadd.f32 %v3639_v38, %v3638_v49  ;;  %v2499_v36 = vadd.f32 %v2498_v50, %v2338_v40 }
 0x209   : > { %v3641_v34 = vpop.f32.mrf.mxu1  ;;  %v3715_v39 = vpop.f32.mrf.mxu0 }
 0x20a   : > { %3192 = vst [vmem:[%s4853_s8 + $0x60] sm:$0xff] %v3164_v3   ;;  %v2346_v56 = vadd.f32 %v3640_v59, %v4970_v62  ;;  %v2541_v28 = vmax.f32 %v2499_v36, 0.0 }
 0x20b   : > { %v3642_v0 = vpop.f32.mrf.mxu1  ;;  %v2501_v6 = vpop.f32.mrf.mxu0 }
 0x20c   : > { %v3643_v8 = vadd.f32 %v3642_v0, %v3641_v34  ;;  %v2502_v30 = vadd.f32 %v2501_v6, %v2341_v51  ;;  %v2507_v63 = vadd.f32 %v3714_v5, %v2346_v56 }
 0x20e   : > { %v2349_v9 = vadd.f32 %v3643_v8, %v4829_v55  ;;  %v2542_v41 = vmax.f32 %v2502_v30, 0.0  ;;  %v2543_v54 = vmax.f32 %v2507_v63, 0.0 }
 0x210   : > { %v2510_v58 = vadd.f32 %v3715_v39, %v2349_v9  ;;  %v3174_v44 = vpack.c.bf16 %v2542_v41, %v2541_v28 }
 0x212   : > { %v2544_v4 = vmax.f32 %v2510_v58, 0.0  ;;  %3194 = vst [vmem:[%s4853_s8 + $0x70] sm:$0xff] %v3174_v44  }
 0x214   : > { %v3179_v11 = vpack.c.bf16 %v2544_v4, %v2543_v54 }
 0x216   : > { %3195 = vst [vmem:[%s4853_s8 + $0x78] sm:$0xff] %v3179_v11  }
 0x217 PF: > { %s13_s14 = sadd.s32 1, %s4059_s14   ;;  %s4972_s12 = smov %s4055_s13 }
 0x218   : > { %p10_p5 = scmp.ge.s32.totalorder %s13_s14, 4   ;;  %s4973_s13 = smov %s4975_s15 }
 0x21a   :  { %12 = sbr.rel (!%p10_p5) target bundleno = 2 (0x2), region = 68 }

// kernel: qimage_forward.7
= control target key start
LH: loop header
LB: loop body
LE: loop exit
PB: predicated region body
PF: predicated region fallthrough
CT: control target
= control target key end

     0   :  { %s3485_s12 = smov 0   ;;  %s3487_s13 = smov 0   ;;  %s4294_s0 = inlined_call_operand.vmem [shape: bf16[128,1152], index: 0, kind: input, shape index: {}]   ;;  %s4295_s1 = inlined_call_operand.vmem [shape: bf16[1152,256], index: 1, kind: input, shape index: {}]   ;;  %s4296_s2 = inlined_call_operand.vmem [shape: f32[1,256], index: 2, kind: input, shape index: {}]   ;;  %s4297_s3 = inlined_call_operand.vmem [shape: bf16[128,256], index: 3, kind: output, shape index: {}]  }
   0x1   :  { %s3489_s14 = smov 0   ;;  %s3491_s15 = smov 0  }
   0x2   :  { %s3493_s16 = smov 0  }
   0x3 LB: > { %s22_s17 = sadd.s32 1, %s3459_s15  ;;  %s2651_s18 = sadd.s32 4294967295, %s3463_s16   ;;  %s3463_s16 = sphi %s3493_s16, %s13_s16   ;;  %s3459_s15 = sphi %s3491_s15, %s4332_s15   ;;  %s3455_s14 = sphi %s3489_s14, %s4331_s14   ;;  %s3451_s13 = sphi %s3487_s13, %s4330_s13   ;;  %s3447_s12 = sphi %s3485_s12, %s4329_s12  }
   0x4   : > { %p23_p0 = scmp.ge.s32.totalorder %s22_s17, 2  ;;  %p65_p1 = scmp.ne.s32.totalorder %s3451_s13, %s3447_s12 }
   0x5   : > { %p66_p2 = scmp.eq.s32.totalorder %s3463_s16, 0  ;;  %p123_p4 = scmp.eq.s32.totalorder %s2651_s18, 1 }
   0x6   : > { %s4334_s17 = smov (%p23_p0, %s22_s17), 0  ;;  %s58_s20 = sadd.s32 1, %s3451_s13 }
   0x7   : > { %p67_p3 = por %p66_p2, %p65_p1  ;;  %s55_s19 = ssub.s32 %s3459_s15, %s4334_s17 }
   0x8   : > { %p56_p5 = scmp.eq.s32.totalorder %s55_s19, 0  ;;  %p3520_p6 = por %p123_p4, %p65_p1 }
   0x9   : > { %p2655_p7 = scmp.ge.s32.totalorder %s3463_s16, 2 }
   0xa   : > { %s3525_s22 = scalar_select %p56_p5, %s3451_s13, %s58_s20  }
   0xb   : > { %155 = sbr.rel (%p2655_p7) target bundleno = 116 (0x74), region = 20 }
  0x10   : > { %158 = sbr.rel (!%p67_p3) target bundleno = 116 (0x74), region = 24  ;;  %s160_s23 = sand.u32 (%p67_p3), 1, %s3451_s13  }
  0x11   : > { %s2656_s24 = sshll.u32 (%p67_p3), %s3459_s15, 2  ;;  %s3207_s25 = smul.u32 (%p67_p3), 576, %s160_s23 }
  0x12   : > { %s3533_s28 = scalar_lea.vmem (%p67_p3), %s4295_s1, %s2656_s24 }
  0x13   : > { %v181_v0 = vld [vmem:[%s3533_s28] sm:$0xf] (%p67_p3)  ;;  %v183_v1 = vld [vmem:[%s3533_s28 + $0x8] sm:$0xf] (%p67_p3)  ;;  %v185_v2 = vld [vmem:[%s3533_s28 + $0x10] sm:$0xf] (%p67_p3) }
  0x14   : > { %v187_v3 = vld [vmem:[%s3533_s28 + $0x18] sm:$0xf] (%p67_p3)  ;;  %v189_v4 = vld [vmem:[%s3533_s28 + $0x20] sm:$0xf] (%p67_p3)  ;;  %s3540_s29 = scalar_lea.vmem (%p67_p3), [#allocation2], %s3207_s25 }
  0x15   : > { %182 = vst [vmem:[%s3540_s29] sm:$0xf] %v181_v0  ;;  %184 = vst [vmem:[%s3540_s29 + $0x4] sm:$0xf] %v183_v1  ;;  %v191_v5 = vld [vmem:[%s3533_s28 + $0x28] sm:$0xf] }
  0x16   : > { %186 = vst [vmem:[%s3540_s29 + $0x8] sm:$0xf] %v185_v2  ;;  %188 = vst [vmem:[%s3540_s29 + $0xc] sm:$0xf] %v187_v3  ;;  %v193_v6 = vld [vmem:[%s3533_s28 + $0x30] sm:$0xf] }
  0x17   : > { %190 = vst [vmem:[%s3540_s29 + $0x10] sm:$0xf] %v189_v4  ;;  %v195_v7 = vld [vmem:[%s3533_s28 + $0x38] sm:$0xf]  ;;  %192 = vst [vmem:[%s3540_s29 + $0x14] sm:$0xf] %v191_v5 }
  0x18   : > { %194 = vst [vmem:[%s3540_s29 + $0x18] sm:$0xf] %v193_v6  ;;  %196 = vst [vmem:[%s3540_s29 + $0x1c] sm:$0xf] %v195_v7  ;;  %v197_v8 = vld [vmem:[%s3533_s28 + $0x40] sm:$0xf] }
  0x19   : > { %v199_v9 = vld [vmem:[%s3533_s28 + $0x48] sm:$0xf]  ;;  %v201_v10 = vld [vmem:[%s3533_s28 + $0x50] sm:$0xf]  ;;  %198 = vst [vmem:[%s3540_s29 + $0x20] sm:$0xf] %v197_v8 }
  0x1a   : > { %200 = vst [vmem:[%s3540_s29 + $0x24] sm:$0xf] %v199_v9  ;;  %202 = vst [vmem:[%s3540_s29 + $0x28] sm:$0xf] %v201_v10  ;;  %v203_v11 = vld [vmem:[%s3533_s28 + $0x58] sm:$0xf] }
  0x1b   : > { %v205_v12 = vld [vmem:[%s3533_s28 + $0x60] sm:$0xf]  ;;  %v207_v13 = vld [vmem:[%s3533_s28 + $0x68] sm:$0xf]  ;;  %204 = vst [vmem:[%s3540_s29 + $0x2c] sm:$0xf] %v203_v11 }
  0x1c   : > { %206 = vst [vmem:[%s3540_s29 + $0x30] sm:$0xf] %v205_v12  ;;  %208 = vst [vmem:[%s3540_s29 + $0x34] sm:$0xf] %v207_v13  ;;  %v209_v14 = vld [vmem:[%s3533_s28 + $0x70] sm:$0xf] }
  0x1d   : > { %v211_v15 = vld [vmem:[%s3533_s28 + $0x78] sm:$0xf]  ;;  %v213_v16 = vld [vmem:[%s3533_s28 + $0x80] sm:$0xf]  ;;  %210 = vst [vmem:[%s3540_s29 + $0x38] sm:$0xf] %v209_v14 }
  0x1e   : > { %212 = vst [vmem:[%s3540_s29 + $0x3c] sm:$0xf] %v211_v15  ;;  %214 = vst [vmem:[%s3540_s29 + $0x40] sm:$0xf] %v213_v16  ;;  %v215_v17 = vld [vmem:[%s3533_s28 + $0x88] sm:$0xf] }
  0x1f   : > { %v217_v18 = vld [vmem:[%s3533_s28 + $0x90] sm:$0xf]  ;;  %v219_v19 = vld [vmem:[%s3533_s28 + $0x98] sm:$0xf]  ;;  %216 = vst [vmem:[%s3540_s29 + $0x44] sm:$0xf] %v215_v17 }
  0x20   : > { %218 = vst [vmem:[%s3540_s29 + $0x48] sm:$0xf] %v217_v18  ;;  %220 = vst [vmem:[%s3540_s29 + $0x4c] sm:$0xf] %v219_v19  ;;  %v221_v20 = vld [vmem:[%s3533_s28 + $0xa0] sm:$0xf] }
  0x21   : > { %v223_v21 = vld [vmem:[%s3533_s28 + $0xa8] sm:$0xf]  ;;  %v225_v22 = vld [vmem:[%s3533_s28 + $0xb0] sm:$0xf]  ;;  %222 = vst [vmem:[%s3540_s29 + $0x50] sm:$0xf] %v221_v20 }
  0x22   : > { %224 = vst [vmem:[%s3540_s29 + $0x54] sm:$0xf] %v223_v21  ;;  %226 = vst [vmem:[%s3540_s29 + $0x58] sm:$0xf] %v225_v22  ;;  %v227_v23 = vld [vmem:[%s3533_s28 + $0xb8] sm:$0xf] }
  0x23   : > { %v229_v24 = vld [vmem:[%s3533_s28 + $0xc0] sm:$0xf]  ;;  %v231_v25 = vld [vmem:[%s3533_s28 + $0xc8] sm:$0xf]  ;;  %228 = vst [vmem:[%s3540_s29 + $0x5c] sm:$0xf] %v227_v23 }
  0x24   : > { %230 = vst [vmem:[%s3540_s29 + $0x60] sm:$0xf] %v229_v24  ;;  %232 = vst [vmem:[%s3540_s29 + $0x64] sm:$0xf] %v231_v25  ;;  %v233_v26 = vld [vmem:[%s3533_s28 + $0xd0] sm:$0xf] }
  0x25   : > { %v235_v27 = vld [vmem:[%s3533_s28 + $0xd8] sm:$0xf]  ;;  %v237_v28 = vld [vmem:[%s3533_s28 + $0xe0] sm:$0xf]  ;;  %234 = vst [vmem:[%s3540_s29 + $0x68] sm:$0xf] %v233_v26 }
  0x26   : > { %236 = vst [vmem:[%s3540_s29 + $0x6c] sm:$0xf] %v235_v27  ;;  %238 = vst [vmem:[%s3540_s29 + $0x70] sm:$0xf] %v237_v28  ;;  %v239_v29 = vld [vmem:[%s3533_s28 + $0xe8] sm:$0xf] }
  0x27   : > { %v241_v30 = vld [vmem:[%s3533_s28 + $0xf0] sm:$0xf]  ;;  %v243_v31 = vld [vmem:[%s3533_s28 + $0xf8] sm:$0xf]  ;;  %240 = vst [vmem:[%s3540_s29 + $0x74] sm:$0xf] %v239_v29 }
  0x28   : > { %242 = vst [vmem:[%s3540_s29 + $0x78] sm:$0xf] %v241_v30  ;;  %244 = vst [vmem:[%s3540_s29 + $0x7c] sm:$0xf] %v243_v31  ;;  %v245_v32 = vld [vmem:[%s3533_s28 + $0x100] sm:$0xf] }
  0x29   : > { %v247_v33 = vld [vmem:[%s3533_s28 + $0x108] sm:$0xf]  ;;  %v249_v34 = vld [vmem:[%s3533_s28 + $0x110] sm:$0xf]  ;;  %246 = vst [vmem:[%s3540_s29 + $0x80] sm:$0xf] %v245_v32 }
  0x2a   : > { %248 = vst [vmem:[%s3540_s29 + $0x84] sm:$0xf] %v247_v33  ;;  %250 = vst [vmem:[%s3540_s29 + $0x88] sm:$0xf] %v249_v34  ;;  %v251_v35 = vld [vmem:[%s3533_s28 + $0x118] sm:$0xf] }
  0x2b   : > { %v253_v36 = vld [vmem:[%s3533_s28 + $0x120] sm:$0xf]  ;;  %v255_v37 = vld [vmem:[%s3533_s28 + $0x128] sm:$0xf]  ;;  %252 = vst [vmem:[%s3540_s29 + $0x8c] sm:$0xf] %v251_v35 }
  0x2c   : > { %254 = vst [vmem:[%s3540_s29 + $0x90] sm:$0xf] %v253_v36  ;;  %256 = vst [vmem:[%s3540_s29 + $0x94] sm:$0xf] %v255_v37  ;;  %v257_v38 = vld [vmem:[%s3533_s28 + $0x130] sm:$0xf] }
  0x2d   : > { %v259_v39 = vld [vmem:[%s3533_s28 + $0x138] sm:$0xf]  ;;  %v261_v40 = vld [vmem:[%s3533_s28 + $0x140] sm:$0xf]  ;;  %258 = vst [vmem:[%s3540_s29 + $0x98] sm:$0xf] %v257_v38 }
  0x2e   : > { %260 = vst [vmem:[%s3540_s29 + $0x9c] sm:$0xf] %v259_v39  ;;  %262 = vst [vmem:[%s3540_s29 + $0xa0] sm:$0xf] %v261_v40  ;;  %v263_v41 = vld [vmem:[%s3533_s28 + $0x148] sm:$0xf] }
  0x2f   : > { %v265_v42 = vld [vmem:[%s3533_s28 + $0x150] sm:$0xf]  ;;  %v267_v43 = vld [vmem:[%s3533_s28 + $0x158] sm:$0xf]  ;;  %264 = vst [vmem:[%s3540_s29 + $0xa4] sm:$0xf] %v263_v41 }
  0x30   : > { %266 = vst [vmem:[%s3540_s29 + $0xa8] sm:$0xf] %v265_v42  ;;  %268 = vst [vmem:[%s3540_s29 + $0xac] sm:$0xf] %v267_v43  ;;  %v269_v44 = vld [vmem:[%s3533_s28 + $0x160] sm:$0xf] }
  0x31   : > { %v271_v45 = vld [vmem:[%s3533_s28 + $0x168] sm:$0xf]  ;;  %v273_v46 = vld [vmem:[%s3533_s28 + $0x170] sm:$0xf]  ;;  %270 = vst [vmem:[%s3540_s29 + $0xb0] sm:$0xf] %v269_v44 }
  0x32   : > { %272 = vst [vmem:[%s3540_s29 + $0xb4] sm:$0xf] %v271_v45  ;;  %274 = vst [vmem:[%s3540_s29 + $0xb8] sm:$0xf] %v273_v46  ;;  %v275_v47 = vld [vmem:[%s3533_s28 + $0x178] sm:$0xf] }
  0x33   : > { %v277_v48 = vld [vmem:[%s3533_s28 + $0x180] sm:$0xf]  ;;  %v279_v49 = vld [vmem:[%s3533_s28 + $0x188] sm:$0xf]  ;;  %276 = vst [vmem:[%s3540_s29 + $0xbc] sm:$0xf] %v275_v47 }
  0x34   : > { %278 = vst [vmem:[%s3540_s29 + $0xc0] sm:$0xf] %v277_v48  ;;  %280 = vst [vmem:[%s3540_s29 + $0xc4] sm:$0xf] %v279_v49  ;;  %v281_v50 = vld [vmem:[%s3533_s28 + $0x190] sm:$0xf] }
  0x35   : > { %v283_v51 = vld [vmem:[%s3533_s28 + $0x198] sm:$0xf]  ;;  %v285_v52 = vld [vmem:[%s3533_s28 + $0x1a0] sm:$0xf]  ;;  %282 = vst [vmem:[%s3540_s29 + $0xc8] sm:$0xf] %v281_v50 }
  0x36   : > { %284 = vst [vmem:[%s3540_s29 + $0xcc] sm:$0xf] %v283_v51  ;;  %286 = vst [vmem:[%s3540_s29 + $0xd0] sm:$0xf] %v285_v52  ;;  %v287_v53 = vld [vmem:[%s3533_s28 + $0x1a8] sm:$0xf] }
  0x37   : > { %v289_v54 = vld [vmem:[%s3533_s28 + $0x1b0] sm:$0xf]  ;;  %v291_v55 = vld [vmem:[%s3533_s28 + $0x1b8] sm:$0xf]  ;;  %288 = vst [vmem:[%s3540_s29 + $0xd4] sm:$0xf] %v287_v53 }
  0x38   : > { %290 = vst [vmem:[%s3540_s29 + $0xd8] sm:$0xf] %v289_v54  ;;  %292 = vst [vmem:[%s3540_s29 + $0xdc] sm:$0xf] %v291_v55  ;;  %v293_v56 = vld [vmem:[%s3533_s28 + $0x1c0] sm:$0xf] }
  0x39   : > { %v295_v57 = vld [vmem:[%s3533_s28 + $0x1c8] sm:$0xf]  ;;  %v297_v58 = vld [vmem:[%s3533_s28 + $0x1d0] sm:$0xf]  ;;  %294 = vst [vmem:[%s3540_s29 + $0xe0] sm:$0xf] %v293_v56 }
  0x3a   : > { %296 = vst [vmem:[%s3540_s29 + $0xe4] sm:$0xf] %v295_v57  ;;  %298 = vst [vmem:[%s3540_s29 + $0xe8] sm:$0xf] %v297_v58  ;;  %v299_v59 = vld [vmem:[%s3533_s28 + $0x1d8] sm:$0xf] }
  0x3b   : > { %v301_v60 = vld [vmem:[%s3533_s28 + $0x1e0] sm:$0xf]  ;;  %v303_v61 = vld [vmem:[%s3533_s28 + $0x1e8] sm:$0xf]  ;;  %300 = vst [vmem:[%s3540_s29 + $0xec] sm:$0xf] %v299_v59 }
  0x3c   : > { %302 = vst [vmem:[%s3540_s29 + $0xf0] sm:$0xf] %v301_v60  ;;  %304 = vst [vmem:[%s3540_s29 + $0xf4] sm:$0xf] %v303_v61  ;;  %v305_v62 = vld [vmem:[%s3533_s28 + $0x1f0] sm:$0xf] }
  0x3d   : > { %v307_v63 = vld [vmem:[%s3533_s28 + $0x1f8] sm:$0xf]  ;;  %v309_v0 = vld [vmem:[%s3533_s28 + $0x200] sm:$0xf]  ;;  %306 = vst [vmem:[%s3540_s29 + $0xf8] sm:$0xf] %v305_v62 }
  0x3e   : > { %308 = vst [vmem:[%s3540_s29 + $0xfc] sm:$0xf] %v307_v63  ;;  %310 = vst [vmem:[%s3540_s29 + $0x100] sm:$0xf] %v309_v0  ;;  %v311_v1 = vld [vmem:[%s3533_s28 + $0x208] sm:$0xf] }
  0x3f   : > { %v313_v2 = vld [vmem:[%s3533_s28 + $0x210] sm:$0xf]  ;;  %v315_v3 = vld [vmem:[%s3533_s28 + $0x218] sm:$0xf]  ;;  %312 = vst [vmem:[%s3540_s29 + $0x104] sm:$0xf] %v311_v1 }
  0x40   : > { %314 = vst [vmem:[%s3540_s29 + $0x108] sm:$0xf] %v313_v2  ;;  %316 = vst [vmem:[%s3540_s29 + $0x10c] sm:$0xf] %v315_v3  ;;  %v317_v4 = vld [vmem:[%s3533_s28 + $0x220] sm:$0xf] }
  0x41   : > { %v319_v5 = vld [vmem:[%s3533_s28 + $0x228] sm:$0xf]  ;;  %v321_v6 = vld [vmem:[%s3533_s28 + $0x230] sm:$0xf]  ;;  %318 = vst [vmem:[%s3540_s29 + $0x110] sm:$0xf] %v317_v4 }
  0x42   : > { %320 = vst [vmem:[%s3540_s29 + $0x114] sm:$0xf] %v319_v5  ;;  %322 = vst [vmem:[%s3540_s29 + $0x118] sm:$0xf] %v321_v6  ;;  %v323_v7 = vld [vmem:[%s3533_s28 + $0x238] sm:$0xf] }
  0x43   : > { %v325_v8 = vld [vmem:[%s3533_s28 + $0x240] sm:$0xf]  ;;  %v327_v9 = vld [vmem:[%s3533_s28 + $0x248] sm:$0xf]  ;;  %324 = vst [vmem:[%s3540_s29 + $0x11c] sm:$0xf] %v323_v7 }
  0x44   : > { %326 = vst [vmem:[%s3540_s29 + $0x120] sm:$0xf] %v325_v8  ;;  %328 = vst [vmem:[%s3540_s29 + $0x124] sm:$0xf] %v327_v9  ;;  %v329_v10 = vld [vmem:[%s3533_s28 + $0x250] sm:$0xf] }
  0x45   : > { %v331_v11 = vld [vmem:[%s3533_s28 + $0x258] sm:$0xf]  ;;  %v333_v12 = vld [vmem:[%s3533_s28 + $0x260] sm:$0xf]  ;;  %330 = vst [vmem:[%s3540_s29 + $0x128] sm:$0xf] %v329_v10 }
  0x46   : > { %332 = vst [vmem:[%s3540_s29 + $0x12c] sm:$0xf] %v331_v11  ;;  %334 = vst [vmem:[%s3540_s29 + $0x130] sm:$0xf] %v333_v12  ;;  %v335_v13 = vld [vmem:[%s3533_s28 + $0x268] sm:$0xf] }
  0x47   : > { %v337_v14 = vld [vmem:[%s3533_s28 + $0x270] sm:$0xf]  ;;  %v339_v15 = vld [vmem:[%s3533_s28 + $0x278] sm:$0xf]  ;;  %336 = vst [vmem:[%s3540_s29 + $0x134] sm:$0xf] %v335_v13 }
  0x48   : > { %338 = vst [vmem:[%s3540_s29 + $0x138] sm:$0xf] %v337_v14  ;;  %340 = vst [vmem:[%s3540_s29 + $0x13c] sm:$0xf] %v339_v15  ;;  %v341_v16 = vld [vmem:[%s3533_s28 + $0x280] sm:$0xf] }
  0x49   : > { %v343_v17 = vld [vmem:[%s3533_s28 + $0x288] sm:$0xf]  ;;  %v345_v18 = vld [vmem:[%s3533_s28 + $0x290] sm:$0xf]  ;;  %342 = vst [vmem:[%s3540_s29 + $0x140] sm:$0xf] %v341_v16 }
  0x4a   : > { %344 = vst [vmem:[%s3540_s29 + $0x144] sm:$0xf] %v343_v17  ;;  %346 = vst [vmem:[%s3540_s29 + $0x148] sm:$0xf] %v345_v18  ;;  %v347_v19 = vld [vmem:[%s3533_s28 + $0x298] sm:$0xf] }
  0x4b   : > { %v349_v20 = vld [vmem:[%s3533_s28 + $0x2a0] sm:$0xf]  ;;  %v351_v21 = vld [vmem:[%s3533_s28 + $0x2a8] sm:$0xf]  ;;  %348 = vst [vmem:[%s3540_s29 + $0x14c] sm:$0xf] %v347_v19 }
  0x4c   : > { %350 = vst [vmem:[%s3540_s29 + $0x150] sm:$0xf] %v349_v20  ;;  %352 = vst [vmem:[%s3540_s29 + $0x154] sm:$0xf] %v351_v21  ;;  %v353_v22 = vld [vmem:[%s3533_s28 + $0x2b0] sm:$0xf] }
  0x4d   : > { %v355_v23 = vld [vmem:[%s3533_s28 + $0x2b8] sm:$0xf]  ;;  %v357_v24 = vld [vmem:[%s3533_s28 + $0x2c0] sm:$0xf]  ;;  %354 = vst [vmem:[%s3540_s29 + $0x158] sm:$0xf] %v353_v22 }
  0x4e   : > { %356 = vst [vmem:[%s3540_s29 + $0x15c] sm:$0xf] %v355_v23  ;;  %358 = vst [vmem:[%s3540_s29 + $0x160] sm:$0xf] %v357_v24  ;;  %v359_v25 = vld [vmem:[%s3533_s28 + $0x2c8] sm:$0xf] }
  0x4f   : > { %v361_v26 = vld [vmem:[%s3533_s28 + $0x2d0] sm:$0xf]  ;;  %v363_v27 = vld [vmem:[%s3533_s28 + $0x2d8] sm:$0xf]  ;;  %360 = vst [vmem:[%s3540_s29 + $0x164] sm:$0xf] %v359_v25 }
  0x50   : > { %362 = vst [vmem:[%s3540_s29 + $0x168] sm:$0xf] %v361_v26  ;;  %364 = vst [vmem:[%s3540_s29 + $0x16c] sm:$0xf] %v363_v27  ;;  %v365_v28 = vld [vmem:[%s3533_s28 + $0x2e0] sm:$0xf] }
  0x51   : > { %v367_v29 = vld [vmem:[%s3533_s28 + $0x2e8] sm:$0xf]  ;;  %v369_v30 = vld [vmem:[%s3533_s28 + $0x2f0] sm:$0xf]  ;;  %366 = vst [vmem:[%s3540_s29 + $0x170] sm:$0xf] %v365_v28 }
  0x52   : > { %368 = vst [vmem:[%s3540_s29 + $0x174] sm:$0xf] %v367_v29  ;;  %370 = vst [vmem:[%s3540_s29 + $0x178] sm:$0xf] %v369_v30  ;;  %v371_v31 = vld [vmem:[%s3533_s28 + $0x2f8] sm:$0xf] }
  0x53   : > { %v373_v32 = vld [vmem:[%s3533_s28 + $0x300] sm:$0xf]  ;;  %v375_v33 = vld [vmem:[%s3533_s28 + $0x308] sm:$0xf]  ;;  %372 = vst [vmem:[%s3540_s29 + $0x17c] sm:$0xf] %v371_v31 }
  0x54   : > { %374 = vst [vmem:[%s3540_s29 + $0x180] sm:$0xf] %v373_v32  ;;  %376 = vst [vmem:[%s3540_s29 + $0x184] sm:$0xf] %v375_v33  ;;  %v377_v34 = vld [vmem:[%s3533_s28 + $0x310] sm:$0xf] }
  0x55   : > { %v379_v35 = vld [vmem:[%s3533_s28 + $0x318] sm:$0xf]  ;;  %v381_v36 = vld [vmem:[%s3533_s28 + $0x320] sm:$0xf]  ;;  %378 = vst [vmem:[%s3540_s29 + $0x188] sm:$0xf] %v377_v34 }
  0x56   : > { %380 = vst [vmem:[%s3540_s29 + $0x18c] sm:$0xf] %v379_v35  ;;  %382 = vst [vmem:[%s3540_s29 + $0x190] sm:$0xf] %v381_v36  ;;  %v383_v37 = vld [vmem:[%s3533_s28 + $0x328] sm:$0xf] }
  0x57   : > { %v385_v38 = vld [vmem:[%s3533_s28 + $0x330] sm:$0xf]  ;;  %v387_v39 = vld [vmem:[%s3533_s28 + $0x338] sm:$0xf]  ;;  %384 = vst [vmem:[%s3540_s29 + $0x194] sm:$0xf] %v383_v37 }
  0x58   : > { %386 = vst [vmem:[%s3540_s29 + $0x198] sm:$0xf] %v385_v38  ;;  %388 = vst [vmem:[%s3540_s29 + $0x19c] sm:$0xf] %v387_v39  ;;  %v389_v40 = vld [vmem:[%s3533_s28 + $0x340] sm:$0xf] }
  0x59   : > { %v391_v41 = vld [vmem:[%s3533_s28 + $0x348] sm:$0xf]  ;;  %v393_v42 = vld [vmem:[%s3533_s28 + $0x350] sm:$0xf]  ;;  %390 = vst [vmem:[%s3540_s29 + $0x1a0] sm:$0xf] %v389_v40 }
  0x5a   : > { %392 = vst [vmem:[%s3540_s29 + $0x1a4] sm:$0xf] %v391_v41  ;;  %394 = vst [vmem:[%s3540_s29 + $0x1a8] sm:$0xf] %v393_v42  ;;  %v395_v43 = vld [vmem:[%s3533_s28 + $0x358] sm:$0xf] }
  0x5b   : > { %v397_v44 = vld [vmem:[%s3533_s28 + $0x360] sm:$0xf]  ;;  %v399_v45 = vld [vmem:[%s3533_s28 + $0x368] sm:$0xf]  ;;  %396 = vst [vmem:[%s3540_s29 + $0x1ac] sm:$0xf] %v395_v43 }
  0x5c   : > { %398 = vst [vmem:[%s3540_s29 + $0x1b0] sm:$0xf] %v397_v44  ;;  %400 = vst [vmem:[%s3540_s29 + $0x1b4] sm:$0xf] %v399_v45  ;;  %v401_v46 = vld [vmem:[%s3533_s28 + $0x370] sm:$0xf] }
  0x5d   : > { %v403_v47 = vld [vmem:[%s3533_s28 + $0x378] sm:$0xf]  ;;  %v405_v48 = vld [vmem:[%s3533_s28 + $0x380] sm:$0xf]  ;;  %402 = vst [vmem:[%s3540_s29 + $0x1b8] sm:$0xf] %v401_v46 }
  0x5e   : > { %404 = vst [vmem:[%s3540_s29 + $0x1bc] sm:$0xf] %v403_v47  ;;  %406 = vst [vmem:[%s3540_s29 + $0x1c0] sm:$0xf] %v405_v48  ;;  %v407_v49 = vld [vmem:[%s3533_s28 + $0x388] sm:$0xf] }
  0x5f   : > { %v409_v50 = vld [vmem:[%s3533_s28 + $0x390] sm:$0xf]  ;;  %v411_v51 = vld [vmem:[%s3533_s28 + $0x398] sm:$0xf]  ;;  %408 = vst [vmem:[%s3540_s29 + $0x1c4] sm:$0xf] %v407_v49 }
  0x60   : > { %410 = vst [vmem:[%s3540_s29 + $0x1c8] sm:$0xf] %v409_v50  ;;  %412 = vst [vmem:[%s3540_s29 + $0x1cc] sm:$0xf] %v411_v51  ;;  %v413_v52 = vld [vmem:[%s3533_s28 + $0x3a0] sm:$0xf] }
  0x61   : > { %v415_v53 = vld [vmem:[%s3533_s28 + $0x3a8] sm:$0xf]  ;;  %v417_v54 = vld [vmem:[%s3533_s28 + $0x3b0] sm:$0xf]  ;;  %414 = vst [vmem:[%s3540_s29 + $0x1d0] sm:$0xf] %v413_v52 }
  0x62   : > { %416 = vst [vmem:[%s3540_s29 + $0x1d4] sm:$0xf] %v415_v53  ;;  %418 = vst [vmem:[%s3540_s29 + $0x1d8] sm:$0xf] %v417_v54  ;;  %v419_v55 = vld [vmem:[%s3533_s28 + $0x3b8] sm:$0xf] }
  0x63   : > { %v421_v56 = vld [vmem:[%s3533_s28 + $0x3c0] sm:$0xf]  ;;  %v423_v57 = vld [vmem:[%s3533_s28 + $0x3c8] sm:$0xf]  ;;  %420 = vst [vmem:[%s3540_s29 + $0x1dc] sm:$0xf] %v419_v55 }
  0x64   : > { %422 = vst [vmem:[%s3540_s29 + $0x1e0] sm:$0xf] %v421_v56  ;;  %424 = vst [vmem:[%s3540_s29 + $0x1e4] sm:$0xf] %v423_v57  ;;  %v425_v58 = vld [vmem:[%s3533_s28 + $0x3d0] sm:$0xf] }
  0x65   : > { %v427_v59 = vld [vmem:[%s3533_s28 + $0x3d8] sm:$0xf]  ;;  %v429_v60 = vld [vmem:[%s3533_s28 + $0x3e0] sm:$0xf]  ;;  %426 = vst [vmem:[%s3540_s29 + $0x1e8] sm:$0xf] %v425_v58 }
  0x66   : > { %428 = vst [vmem:[%s3540_s29 + $0x1ec] sm:$0xf] %v427_v59  ;;  %430 = vst [vmem:[%s3540_s29 + $0x1f0] sm:$0xf] %v429_v60  ;;  %v431_v61 = vld [vmem:[%s3533_s28 + $0x3e8] sm:$0xf] }
  0x67   : > { %v433_v62 = vld [vmem:[%s3533_s28 + $0x3f0] sm:$0xf]  ;;  %v435_v63 = vld [vmem:[%s3533_s28 + $0x3f8] sm:$0xf]  ;;  %432 = vst [vmem:[%s3540_s29 + $0x1f4] sm:$0xf] %v431_v61 }
  0x68   : > { %434 = vst [vmem:[%s3540_s29 + $0x1f8] sm:$0xf] %v433_v62  ;;  %436 = vst [vmem:[%s3540_s29 + $0x1fc] sm:$0xf] %v435_v63  ;;  %v437_v0 = vld [vmem:[%s3533_s28 + $0x400] sm:$0xf] }
  0x69   : > { %v439_v1 = vld [vmem:[%s3533_s28 + $0x408] sm:$0xf]  ;;  %v441_v2 = vld [vmem:[%s3533_s28 + $0x410] sm:$0xf]  ;;  %438 = vst [vmem:[%s3540_s29 + $0x200] sm:$0xf] %v437_v0 }
  0x6a   : > { %440 = vst [vmem:[%s3540_s29 + $0x204] sm:$0xf] %v439_v1  ;;  %442 = vst [vmem:[%s3540_s29 + $0x208] sm:$0xf] %v441_v2  ;;  %v443_v3 = vld [vmem:[%s3533_s28 + $0x418] sm:$0xf] }
  0x6b   : > { %v445_v4 = vld [vmem:[%s3533_s28 + $0x420] sm:$0xf]  ;;  %v447_v5 = vld [vmem:[%s3533_s28 + $0x428] sm:$0xf]  ;;  %444 = vst [vmem:[%s3540_s29 + $0x20c] sm:$0xf] %v443_v3 }
  0x6c   : > { %446 = vst [vmem:[%s3540_s29 + $0x210] sm:$0xf] %v445_v4  ;;  %448 = vst [vmem:[%s3540_s29 + $0x214] sm:$0xf] %v447_v5  ;;  %v449_v6 = vld [vmem:[%s3533_s28 + $0x430] sm:$0xf] }
  0x6d   : > { %v451_v7 = vld [vmem:[%s3533_s28 + $0x438] sm:$0xf]  ;;  %v453_v8 = vld [vmem:[%s3533_s28 + $0x440] sm:$0xf]  ;;  %450 = vst [vmem:[%s3540_s29 + $0x218] sm:$0xf] %v449_v6 }
  0x6e   : > { %452 = vst [vmem:[%s3540_s29 + $0x21c] sm:$0xf] %v451_v7  ;;  %454 = vst [vmem:[%s3540_s29 + $0x220] sm:$0xf] %v453_v8  ;;  %v455_v9 = vld [vmem:[%s3533_s28 + $0x448] sm:$0xf] }
  0x6f   : > { %v457_v10 = vld [vmem:[%s3533_s28 + $0x450] sm:$0xf]  ;;  %v459_v11 = vld [vmem:[%s3533_s28 + $0x458] sm:$0xf]  ;;  %456 = vst [vmem:[%s3540_s29 + $0x224] sm:$0xf] %v455_v9 }
  0x70   : > { %458 = vst [vmem:[%s3540_s29 + $0x228] sm:$0xf] %v457_v10  ;;  %460 = vst [vmem:[%s3540_s29 + $0x22c] sm:$0xf] %v459_v11  ;;  %v461_v12 = vld [vmem:[%s3533_s28 + $0x460] sm:$0xf] }
  0x71   : > { %v463_v13 = vld [vmem:[%s3533_s28 + $0x468] sm:$0xf]  ;;  %v465_v14 = vld [vmem:[%s3533_s28 + $0x470] sm:$0xf]  ;;  %462 = vst [vmem:[%s3540_s29 + $0x230] sm:$0xf] %v461_v12 }
  0x72   : > { %464 = vst [vmem:[%s3540_s29 + $0x234] sm:$0xf] %v463_v13  ;;  %466 = vst [vmem:[%s3540_s29 + $0x238] sm:$0xf] %v465_v14  ;;  %v467_v15 = vld [vmem:[%s3533_s28 + $0x478] sm:$0xf] }
  0x73   : > { %468 = vst [vmem:[%s3540_s29 + $0x23c] sm:$0xf] %v467_v15 }
  0x74 PF: > { %p2657_p8 = scmp.ge.s32.totalorder %s3463_s16, 1  ;;  %p785_p9 = scmp.lt.s32.totalorder %s3463_s16, 3 }
  0x76   : > { %p786_p10 = pnand %p2657_p8, %p785_p9 }
  0x78   : > { %789 = sbr.rel (%p786_p10) target bundleno = 515 (0x203), region = 69 }
  0x7d   : > { %s792_s30 = sand.u32 1, %s3447_s12   ;;  %v3283_v16 = vld [vmem:[%s4294_s0 + $0x4] ss:$36 sps:$4 sm:$0xff]   ;;  %v3286_v17 = vld [vmem:[%s4294_s0 + $0xc] ss:$36 sps:$4 sm:$0xff]   ;;  %p830_p11 = scmp.lt.s32.totalorder %s3455_s14, 1 }
  0x7e   : > { %s3208_s4 = smul.u32 576, %s792_s30  ;;  %1898 = vmatprep.mubr.bf16.mxu0 %v3283_v16  ;;  %1995 = vmatprep.mubr.bf16.mxu1 %v3286_v17  ;;  %v3281_v48 = vld [vmem:[%s4294_s0] ss:$36 sps:$4 sm:$0xff]   ;;  %v3284_v50 = vld [vmem:[%s4294_s0 + $0x8] ss:$36 sps:$4 sm:$0xff]   ;;  %s2658_s23 = sshll.u32 %s792_s30, 6 }
  0x7f   : > { %v3291_v52 = vld [vmem:[%s4294_s0 + $0x4c] ss:$36 sps:$4 sm:$0xff]   ;;  %v3293_v57 = vld [vmem:[%s4294_s0 + $0x54] ss:$36 sps:$4 sm:$0xff]   ;;  %v3303_v1 = vld [vmem:[%s4294_s0 + $0x9c] ss:$36 sps:$4 sm:$0xff]  }
  0x80   : > { %s3836_s9 = scalar_lea.vmem [#allocation2], %s3208_s4  ;;  %v3295_v58 = vld [vmem:[%s4294_s0 + $0x48] ss:$36 sps:$4 sm:$0xff]   ;;  %v3296_v59 = vld [vmem:[%s4294_s0 + $0x50] ss:$36 sps:$4 sm:$0xff]   ;;  %s4242_s12 = scalar_lea.vmem [#allocation3], %s2658_s23 }
  0x81   : > { %v3249_v18 = vld [vmem:[%s3836_s9 + $0x78] sm:$0xff]   ;;  %v3253_v22 = vld [vmem:[%s3836_s9 + $0x70] sm:$0xff]   ;;  %v3257_v26 = vld [vmem:[%s3836_s9 + $0x68] sm:$0xff]   ;;  %s831_s11 = scalar_select %p830_p11, %s3455_s14, 1 }
  0x82   : > { %v3250_v19 = vld [vmem:[%s3836_s9 + $0xf8] sm:$0xff]   ;;  %2887 = vmatprep.subr.bf16.mxu0 %v3249_v18  ;;  %v3254_v23 = vld [vmem:[%s3836_s9 + $0xf0] sm:$0xff]   ;;  %v3258_v27 = vld [vmem:[%s3836_s9 + $0xe8] sm:$0xff]   ;;  %s2821_s30 = sshll.u32 (%p3520_p6), %s3455_s14, 2 }
  0x83   : > { %v3251_v20 = vld [vmem:[%s3836_s9 + $0x38] sm:$0xff]   ;;  %2951 = vmatprep.subr.bf16.mxu1 %v3250_v19  ;;  %v3255_v24 = vld [vmem:[%s3836_s9 + $0x30] sm:$0xff]   ;;  %v3259_v28 = vld [vmem:[%s3836_s9 + $0x28] sm:$0xff]   ;;  %s832_s20 = scalar_lea.vmem %s4296_s2, %s831_s11  ;;  %s2458_s26 = scalar_lea.vmem (%p3520_p6), %s4297_s3, %s2821_s30 }
  0x84   : > { %v3252_v21 = vld [vmem:[%s3836_s9 + $0xb8] sm:$0xff]   ;;  %2888 = vmatpush3.bf16.msra.mxu0 %v3251_v20  ;;  %v3256_v25 = vld [vmem:[%s3836_s9 + $0xb0] sm:$0xff]   ;;  %v3260_v29 = vld [vmem:[%s3836_s9 + $0xa8] sm:$0xff]  }
  0x85   : > { %2952 = vmatpush3.bf16.msra.mxu1 %v3252_v21  ;;  %2889 = vmatprep.subr.bf16.mxu0 %v3253_v22  ;;  %v3261_v30 = vld [vmem:[%s3836_s9 + $0x60] sm:$0xff]   ;;  %v3265_v34 = vld [vmem:[%s3836_s9 + $0x58] sm:$0xff]   ;;  %v3269_v38 = vld [vmem:[%s3836_s9 + $0x50] sm:$0xff]  }
  0x86   : > { %2953 = vmatprep.subr.bf16.mxu1 %v3254_v23  ;;  %v3262_v31 = vld [vmem:[%s3836_s9 + $0xe0] sm:$0xff]   ;;  %v3266_v35 = vld [vmem:[%s3836_s9 + $0xd8] sm:$0xff]   ;;  %v3270_v39 = vld [vmem:[%s3836_s9 + $0xd0] sm:$0xff]  }
  0x87   : > { %v3263_v32 = vld [vmem:[%s3836_s9 + $0x20] sm:$0xff]   ;;  %v3267_v36 = vld [vmem:[%s3836_s9 + $0x18] sm:$0xff]   ;;  %v3271_v40 = vld [vmem:[%s3836_s9 + $0x10] sm:$0xff]  }
  0x88   : > { %2890 = vmatpush3.bf16.msra.mxu0 %v3255_v24  ;;  %v3264_v33 = vld [vmem:[%s3836_s9 + $0xa0] sm:$0xff]   ;;  %v3268_v37 = vld [vmem:[%s3836_s9 + $0x98] sm:$0xff]   ;;  %v3272_v41 = vld [vmem:[%s3836_s9 + $0x90] sm:$0xff]  }
  0x89   : > { %2954 = vmatpush3.bf16.msra.mxu1 %v3256_v25  ;;  %2891 = vmatprep.subr.bf16.mxu0 %v3257_v26  ;;  %v3273_v42 = vld [vmem:[%s3836_s9 + $0x48] sm:$0xff]   ;;  %v3277_v46 = vld [vmem:[%s3836_s9 + $0x40] sm:$0xff]   ;;  %v3287_v53 = vld [vmem:[%s3836_s9 + $0x178] sm:$0xff]  }
  0x8a   : > { %2955 = vmatprep.subr.bf16.mxu1 %v3258_v27  ;;  %v3274_v43 = vld [vmem:[%s3836_s9 + $0xc8] sm:$0xff]   ;;  %v3278_v47 = vld [vmem:[%s3836_s9 + $0xc0] sm:$0xff]   ;;  %v3288_v54 = vld [vmem:[%s3836_s9 + $0x1f8] sm:$0xff]  }
  0x8b   : > { %v3275_v44 = vld [vmem:[%s3836_s9 + $0x8] sm:$0xff]   ;;  %v3279_v49 = vld [vmem:[%s3836_s9] sm:$0xff]   ;;  %v3289_v55 = vld [vmem:[%s3836_s9 + $0x138] sm:$0xff]  }
  0x8c   : > { %2892 = vmatpush3.bf16.msra.mxu0 %v3259_v28  ;;  %v3276_v45 = vld [vmem:[%s3836_s9 + $0x88] sm:$0xff]   ;;  %v3280_v51 = vld [vmem:[%s3836_s9 + $0x80] sm:$0xff]   ;;  %v3290_v56 = vld [vmem:[%s3836_s9 + $0x1b8] sm:$0xff]  }
  0x8d   : > { %2956 = vmatpush3.bf16.msra.mxu1 %v3260_v29  ;;  %2893 = vmatprep.subr.bf16.mxu0 %v3261_v30  ;;  %v3297_v60 = vld [vmem:[%s3836_s9 + $0x170] sm:$0xff]   ;;  %v3307_v2 = vld [vmem:[%s3836_s9 + $0x168] sm:$0xff]   ;;  %v3306_v5 = vld [vmem:[%s4294_s0 + $0x98] ss:$36 sps:$4 sm:$0xff]  }
  0x8e   : > { %2957 = vmatprep.subr.bf16.mxu1 %v3262_v31  ;;  %v3298_v61 = vld [vmem:[%s3836_s9 + $0x1f0] sm:$0xff]   ;;  %v3308_v4 = vld [vmem:[%s3836_s9 + $0x1e8] sm:$0xff]   ;;  %v3311_v8 = vld [vmem:[%s4294_s0 + $0xdc] ss:$36 sps:$4 sm:$0xff]  }
  0x8f   : > { %v3299_v62 = vld [vmem:[%s3836_s9 + $0x130] sm:$0xff]   ;;  %v3309_v6 = vld [vmem:[%s3836_s9 + $0x128] sm:$0xff]   ;;  %v3317_v10 = vld [vmem:[%s3836_s9 + $0x160] sm:$0xff]  }
  0x90   : > { %2894 = vmatpush3.bf16.msra.mxu0 %v3263_v32  ;;  %v3300_v63 = vld [vmem:[%s3836_s9 + $0x1b0] sm:$0xff]   ;;  %v3310_v7 = vld [vmem:[%s3836_s9 + $0x1a8] sm:$0xff]   ;;  %v3318_v11 = vld [vmem:[%s3836_s9 + $0x1e0] sm:$0xff]  }
  0x91   : > { %2958 = vmatpush3.bf16.msra.mxu1 %v3264_v33  ;;  %2895 = vmatprep.subr.bf16.mxu0 %v3265_v34  ;;  %v3301_v0 = vld [vmem:[%s4294_s0 + $0x94] ss:$36 sps:$4 sm:$0xff]   ;;  %v3313_v9 = vld [vmem:[%s4294_s0 + $0xe4] ss:$36 sps:$4 sm:$0xff]   ;;  %v3323_v17 = vld [vmem:[%s4294_s0 + $0x12c] ss:$36 sps:$4 sm:$0xff]  }
  0x92   : > { %2959 = vmatprep.subr.bf16.mxu1 %v3266_v35  ;;  %v3305_v3 = vld [vmem:[%s4294_s0 + $0x90] ss:$36 sps:$4 sm:$0xff]   ;;  %v3319_v12 = vld [vmem:[%s3836_s9 + $0x120] sm:$0xff]   ;;  %v3315_v14 = vld [vmem:[%s4294_s0 + $0xd8] ss:$36 sps:$4 sm:$0xff]  }
  0x93   : > { %v3320_v13 = vld [vmem:[%s3836_s9 + $0x1a0] sm:$0xff]   ;;  %v3327_v18 = vld [vmem:[%s3836_s9 + $0x158] sm:$0xff]   ;;  %v3326_v23 = vld [vmem:[%s4294_s0 + $0x128] ss:$36 sps:$4 sm:$0xff]  }
  0x94   : > { %2896 = vmatpush3.bf16.msra.mxu0 %v3267_v36  ;;  %v3316_v15 = vld [vmem:[%s4294_s0 + $0xe0] ss:$36 sps:$4 sm:$0xff]   ;;  %v3328_v19 = vld [vmem:[%s3836_s9 + $0x1d8] sm:$0xff]   ;;  %v3331_v24 = vld [vmem:[%s4294_s0 + $0x16c] ss:$36 sps:$4 sm:$0xff]  }
  0x95   : > { %2960 = vmatpush3.bf16.msra.mxu1 %v3268_v37  ;;  %2897 = vmatprep.subr.bf16.mxu0 %v3269_v38  ;;  %v3321_v16 = vld [vmem:[%s4294_s0 + $0x124] ss:$36 sps:$4 sm:$0xff]   ;;  %v3329_v20 = vld [vmem:[%s3836_s9 + $0x118] sm:$0xff]   ;;  %v3337_v26 = vld [vmem:[%s3836_s9 + $0x150] sm:$0xff]  }
  0x96   : > { %2961 = vmatprep.subr.bf16.mxu1 %v3270_v39  ;;  %v3330_v21 = vld [vmem:[%s3836_s9 + $0x198] sm:$0xff]   ;;  %v3325_v22 = vld [vmem:[%s4294_s0 + $0x120] ss:$36 sps:$4 sm:$0xff]   ;;  %v3338_v27 = vld [vmem:[%s3836_s9 + $0x1d0] sm:$0xff]  }
  0x97   : > { %v3333_v25 = vld [vmem:[%s4294_s0 + $0x174] ss:$36 sps:$4 sm:$0xff]   ;;  %v3335_v30 = vld [vmem:[%s4294_s0 + $0x168] ss:$36 sps:$4 sm:$0xff]   ;;  %v3343_v33 = vld [vmem:[%s4294_s0 + $0x1bc] ss:$36 sps:$4 sm:$0xff]  }
  0x98   : > { %2898 = vmatpush3.bf16.msra.mxu0 %v3271_v40  ;;  %v3339_v28 = vld [vmem:[%s3836_s9 + $0x110] sm:$0xff]   ;;  %v3347_v34 = vld [vmem:[%s3836_s9 + $0x148] sm:$0xff]   ;;  %v3346_v39 = vld [vmem:[%s4294_s0 + $0x1b8] ss:$36 sps:$4 sm:$0xff]  }
  0x99   : > { %2962 = vmatpush3.bf16.msra.mxu1 %v3272_v41  ;;  %2899 = vmatprep.subr.bf16.mxu0 %v3273_v42  ;;  %v3340_v29 = vld [vmem:[%s3836_s9 + $0x190] sm:$0xff]   ;;  %v3348_v35 = vld [vmem:[%s3836_s9 + $0x1c8] sm:$0xff]   ;;  %v3351_v40 = vld [vmem:[%s4294_s0 + $0x1fc] ss:$36 sps:$4 sm:$0xff]  }
  0x9a   : > { %2963 = vmatprep.subr.bf16.mxu1 %v3274_v43  ;;  %v3336_v31 = vld [vmem:[%s4294_s0 + $0x170] ss:$36 sps:$4 sm:$0xff]   ;;  %v3349_v36 = vld [vmem:[%s3836_s9 + $0x108] sm:$0xff]   ;;  %v3357_v41 = vld [vmem:[%s3836_s9 + $0x140] sm:$0xff]  }
  0x9b   : > { %v3341_v32 = vld [vmem:[%s4294_s0 + $0x1b4] ss:$36 sps:$4 sm:$0xff]   ;;  %v3350_v37 = vld [vmem:[%s3836_s9 + $0x188] sm:$0xff]   ;;  %v3358_v43 = vld [vmem:[%s3836_s9 + $0x1c0] sm:$0xff]  }
  0x9c   : > { %2900 = vmatpush3.bf16.msra.mxu0 %v3275_v44  ;;  %v3345_v38 = vld [vmem:[%s4294_s0 + $0x1b0] ss:$36 sps:$4 sm:$0xff]   ;;  %v3353_v42 = vld [vmem:[%s4294_s0 + $0x204] ss:$36 sps:$4 sm:$0xff]  }
  0x9d   : > { %2964 = vmatpush3.bf16.msra.mxu1 %v3276_v45  ;;  %2901 = vmatprep.subr.bf16.mxu0 %v3277_v46  ;;  %v3359_v44 = vld [vmem:[%s3836_s9 + $0x100] sm:$0xff]   ;;  %v3367_v46 = vld [vmem:[%s3836_s9 + $0x238] sm:$0xff]  }
  0x9e   : > { %2965 = vmatprep.subr.bf16.mxu1 %v3278_v47  ;;  %v3360_v45 = vld [vmem:[%s3836_s9 + $0x180] sm:$0xff]   ;;  %v3355_v47 = vld [vmem:[%s4294_s0 + $0x1f8] ss:$36 sps:$4 sm:$0xff]  }
  0xa0   : > { %2902 = vmatpush3.bf16.msra.mxu0 %v3279_v49  ;;  %v3363_v49 = vld [vmem:[%s4294_s0 + $0x14] ss:$36 sps:$4 sm:$0xff]  }
  0xa1   : > { %2966 = vmatpush3.bf16.msra.mxu1 %v3280_v51  ;;  %3015 = vmatprep.subr.bf16.mxu0 %v3287_v53  ;;  %v3361_v51 = vld [vmem:[%s4294_s0 + $0x10] ss:$36 sps:$4 sm:$0xff]   ;;  %v3368_v53 = vld [vmem:[%s4294_s0 + $0x5c] ss:$36 sps:$4 sm:$0xff]  }
  0xa2   : > { %3079 = vmatprep.subr.bf16.mxu1 %v3288_v54  ;;  %v3370_v54 = vld [vmem:[%s4294_s0 + $0x64] ss:$36 sps:$4 sm:$0xff]  }
  0xa3   : > { %1899 = vmatmul.mubr.bf16.vlgmr.msra.gmra.mxu0 %v3281_v48  ;;  %v3356_v48 = vld [vmem:[%s4294_s0 + $0x200] ss:$36 sps:$4 sm:$0xff]  }
  0xa4   : > { %1996 = vmatmul.mubr.bf16.vlgmr.msra.gmra.mxu1 %v3284_v50  ;;  %3016 = vmatpush3.bf16.msra.mxu0 %v3289_v55  ;;  %v3366_v50 = vld [vmem:[%s4294_s0 + $0x1c] ss:$36 sps:$4 sm:$0xff]   ;;  %v3374_v55 = vld [vmem:[%s3836_s9 + $0x230] sm:$0xff]  }
  0xa5   : > { %3080 = vmatpush3.bf16.msra.mxu1 %v3290_v56  ;;  %1906 = vmatprep.mubr.bf16.mxu0 %v3291_v52  ;;  %v3364_v52 = vld [vmem:[%s4294_s0 + $0x18] ss:$36 sps:$4 sm:$0xff]   ;;  %v3381_v56 = vld [vmem:[%s3836_s9 + $0x228] sm:$0xff]  }
  0xa6   : > { %2003 = vmatprep.mubr.bf16.mxu1 %v3293_v57  ;;  %3017 = vmatprep.subr.bf16.mxu0 %v3297_v60  ;;  %v3372_v57 = vld [vmem:[%s4294_s0 + $0x58] ss:$36 sps:$4 sm:$0xff]   ;;  %v3377_v60 = vld [vmem:[%s4294_s0 + $0xac] ss:$36 sps:$4 sm:$0xff]  }
  0xa7   : > { %3081 = vmatprep.subr.bf16.mxu1 %v3298_v61  ;;  %v3388_v61 = vld [vmem:[%s3836_s9 + $0x220] sm:$0xff]  }
  0xa8   : > { %3018 = vmatpush3.bf16.msra.mxu0 %v3299_v62  ;;  %v3379_v62 = vld [vmem:[%s4294_s0 + $0xa0] ss:$36 sps:$4 sm:$0xff]  }
  0xa9   : > { %3082 = vmatpush3.bf16.msra.mxu1 %v3300_v63  ;;  %3019 = vmatprep.subr.bf16.mxu0 %v3307_v2  ;;  %v3395_v63 = vld [vmem:[%s3836_s9 + $0x218] sm:$0xff]  }
  0xaa   : > { %3083 = vmatprep.subr.bf16.mxu1 %v3308_v4  ;;  %v3384_v2 = vld [vmem:[%s4294_s0 + $0xf4] ss:$36 sps:$4 sm:$0xff]   ;;  %v3409_v4 = vld [vmem:[%s3836_s9 + $0x208] sm:$0xff]  }
  0xab   : > { %1907 = vmatmul.mubr.bf16.gmra.mxu0 %v3295_v58  ;;  %v3373_v58 = vld [vmem:[%s4294_s0 + $0x60] ss:$36 sps:$4 sm:$0xff]  }
  0xac   : > { %2004 = vmatmul.mubr.bf16.gmra.mxu1 %v3296_v59  ;;  %1914 = vmatprep.mubr.bf16.mxu0 %v3301_v0  ;;  %v3375_v59 = vld [vmem:[%s4294_s0 + $0xa4] ss:$36 sps:$4 sm:$0xff]  }
  0xad   : > { %2011 = vmatprep.mubr.bf16.mxu1 %v3303_v1  ;;  %3020 = vmatpush3.bf16.msra.mxu0 %v3309_v6  ;;  %v3380_v0 = vld [vmem:[%s4294_s0 + $0xa8] ss:$36 sps:$4 sm:$0xff]   ;;  %v3387_v6 = vld [vmem:[%s4294_s0 + $0xf0] ss:$36 sps:$4 sm:$0xff]  }
  0xae   : > { %3084 = vmatpush3.bf16.msra.mxu1 %v3310_v7  ;;  %3021 = vmatprep.subr.bf16.mxu0 %v3317_v10  ;;  %v3382_v1 = vld [vmem:[%s4294_s0 + $0xec] ss:$36 sps:$4 sm:$0xff]   ;;  %v3389_v7 = vld [vmem:[%s4294_s0 + $0x134] ss:$36 sps:$4 sm:$0xff]  }
  0xaf   : > { %3085 = vmatprep.subr.bf16.mxu1 %v3318_v11  ;;  %v3393_v10 = vld [vmem:[%s4294_s0 + $0x130] ss:$36 sps:$4 sm:$0xff]   ;;  %v3394_v11 = vld [vmem:[%s4294_s0 + $0x138] ss:$36 sps:$4 sm:$0xff]  }
  0xb1   : > { %3022 = vmatpush3.bf16.msra.mxu0 %v3319_v12  ;;  %v3396_v12 = vld [vmem:[%s4294_s0 + $0x17c] ss:$36 sps:$4 sm:$0xff]  }
  0xb2   : > { %3086 = vmatpush3.bf16.msra.mxu1 %v3320_v13  ;;  %3023 = vmatprep.subr.bf16.mxu0 %v3327_v18  ;;  %v3398_v13 = vld [vmem:[%s4294_s0 + $0x184] ss:$36 sps:$4 sm:$0xff]  }
  0xb3   : > { %1915 = vmatmul.mubr.bf16.gmra.mxu0 %v3305_v3  ;;  %3087 = vmatprep.subr.bf16.mxu1 %v3328_v19  ;;  %v3402_v3 = vld [vmem:[%s3836_s9 + $0x210] sm:$0xff]   ;;  %v3407_v18 = vld [vmem:[%s4294_s0 + $0x1c0] ss:$36 sps:$4 sm:$0xff]   ;;  %v3408_v19 = vld [vmem:[%s4294_s0 + $0x1c8] ss:$36 sps:$4 sm:$0xff]  }
  0xb4   : > { %2012 = vmatmul.mubr.bf16.gmra.mxu1 %v3306_v5  ;;  %1922 = vmatprep.mubr.bf16.mxu0 %v3311_v8  ;;  %v3386_v5 = vld [vmem:[%s4294_s0 + $0xe8] ss:$36 sps:$4 sm:$0xff]   ;;  %v3391_v8 = vld [vmem:[%s4294_s0 + $0x13c] ss:$36 sps:$4 sm:$0xff]  }
  0xb5   : > { %2019 = vmatprep.mubr.bf16.mxu1 %v3313_v9  ;;  %3024 = vmatpush3.bf16.msra.mxu0 %v3329_v20  ;;  %v3416_v9 = vld [vmem:[%s3836_s9 + $0x200] sm:$0xff]   ;;  %v3410_v20 = vld [vmem:[%s4294_s0 + $0x20c] ss:$36 sps:$4 sm:$0xff]  }
  0xb6   : > { %3088 = vmatpush3.bf16.msra.mxu1 %v3330_v21  ;;  %3025 = vmatprep.subr.bf16.mxu0 %v3337_v26  ;;  %v3412_v21 = vld [vmem:[%s4294_s0 + $0x214] ss:$36 sps:$4 sm:$0xff]   ;;  %v3419_v26 = vld [vmem:[%s4294_s0 + $0x68] ss:$36 sps:$4 sm:$0xff]  }
  0xb7   : > { %3089 = vmatprep.subr.bf16.mxu1 %v3338_v27  ;;  %v3420_v27 = vld [vmem:[%s4294_s0 + $0x188] ss:$36 sps:$4 sm:$0xff]  }
  0xb9   : > { %3026 = vmatpush3.bf16.msra.mxu0 %v3339_v28  ;;  %v3421_v28 = vld [vmem:[%s4294_s0 + $0xb0] ss:$36 sps:$4 sm:$0xff]  }
  0xba   : > { %3090 = vmatpush3.bf16.msra.mxu1 %v3340_v29  ;;  %3027 = vmatprep.subr.bf16.mxu0 %v3347_v34  ;;  %v3422_v29 = vld [vmem:[%s4294_s0 + $0x1d0] ss:$36 sps:$4 sm:$0xff]   ;;  %v4125_v34 = vld [vmem:[%s832_s20] ss:$0 sm:$0xff] }
  0xbb   : > { %1923 = vmatmul.mubr.bf16.gmra.mxu0 %v3315_v14  ;;  %3091 = vmatprep.subr.bf16.mxu1 %v3348_v35  ;;  %v3400_v14 = vld [vmem:[%s4294_s0 + $0x178] ss:$36 sps:$4 sm:$0xff]  }
  0xbc   : > { %2020 = vmatmul.mubr.bf16.gmra.mxu1 %v3316_v15  ;;  %1930 = vmatprep.mubr.bf16.mxu0 %v3321_v16  ;;  %v3401_v15 = vld [vmem:[%s4294_s0 + $0x180] ss:$36 sps:$4 sm:$0xff]  }
  0xbd   : > { %2027 = vmatprep.mubr.bf16.mxu1 %v3323_v17  ;;  %3028 = vmatpush3.bf16.msra.mxu0 %v3349_v36  ;;  %v3403_v16 = vld [vmem:[%s4294_s0 + $0x1c4] ss:$36 sps:$4 sm:$0xff]   ;;  %v3405_v17 = vld [vmem:[%s4294_s0 + $0x1cc] ss:$36 sps:$4 sm:$0xff]  }
  0xbe   : > { %3092 = vmatpush3.bf16.msra.mxu1 %v3350_v37  ;;  %3029 = vmatprep.subr.bf16.mxu0 %v3357_v41 }
  0xbf   : > { %3093 = vmatprep.subr.bf16.mxu1 %v3358_v43 }
  0xc1   : > { %3030 = vmatpush3.bf16.msra.mxu0 %v3359_v44 }
  0xc2   : > { %3094 = vmatpush3.bf16.msra.mxu1 %v3360_v45  ;;  %3159 = vmatprep.subr.bf16.mxu0 %v3367_v46 }
  0xc3   : > { %1931 = vmatmul.mubr.bf16.gmra.mxu0 %v3325_v22  ;;  %3191 = vmatprep.subr.bf16.mxu1 %v3367_v46  ;;  %v3414_v22 = vld [vmem:[%s4294_s0 + $0x208] ss:$36 sps:$4 sm:$0xff]  }
  0xc4   : > { %2028 = vmatmul.mubr.bf16.gmra.mxu1 %v3326_v23  ;;  %1938 = vmatprep.mubr.bf16.mxu0 %v3331_v24  ;;  %v3415_v23 = vld [vmem:[%s4294_s0 + $0x210] ss:$36 sps:$4 sm:$0xff]   ;;  %v3417_v24 = vld [vmem:[%s4294_s0 + $0x20] ss:$36 sps:$4 sm:$0xff]  }
  0xc5   : > { %2035 = vmatprep.mubr.bf16.mxu1 %v3333_v25  ;;  %v3418_v25 = vld [vmem:[%s4294_s0 + $0x140] ss:$36 sps:$4 sm:$0xff]  }
  0xcb   : > { %1939 = vmatmul.mubr.bf16.gmra.mxu0 %v3335_v30  ;;  %v3423_v30 = vld [vmem:[%s4294_s0 + $0xf8] ss:$36 sps:$4 sm:$0xff]  }
  0xcc   : > { %2036 = vmatmul.mubr.bf16.gmra.mxu1 %v3336_v31  ;;  %1946 = vmatprep.mubr.bf16.mxu0 %v3341_v32  ;;  %v3424_v31 = vld [vmem:[%s4294_s0 + $0x218] ss:$36 sps:$4 sm:$0xff]  }
  0xcd   : > { %2043 = vmatprep.mubr.bf16.mxu1 %v3343_v33 }
  0xd3   : > { %1947 = vmatmul.mubr.bf16.gmra.mxu0 %v3345_v38 }
  0xd4   : > { %2044 = vmatmul.mubr.bf16.gmra.mxu1 %v3346_v39  ;;  %1954 = vmatprep.mubr.bf16.mxu0 %v3351_v40 }
  0xd5   : > { %2051 = vmatprep.mubr.bf16.mxu1 %v3353_v42 }
  0xdb   : > { %1955 = vmatmul.mubr.bf16.gmra.mxu0 %v3355_v47 }
  0xdc   : > { %2052 = vmatmul.mubr.bf16.gmra.mxu1 %v3356_v48  ;;  %2092 = vmatprep.mubr.bf16.mxu0 %v3363_v49 }
  0xdd   : > { %2189 = vmatprep.mubr.bf16.mxu1 %v3366_v50 }
  0xe3   : > { %2093 = vmatmul.mubr.bf16.vlgmr.msra.gmra.mxu0 %v3361_v51 }
  0xe4   : > { %2190 = vmatmul.mubr.bf16.vlgmr.msra.gmra.mxu1 %v3364_v52  ;;  %3160 = vmatpush3.bf16.msra.mxu0 %v3367_v46 }
  0xe5   : > { %3199 = vmatpush3.bf16.msra.mxu1 %v3367_v46  ;;  %2100 = vmatprep.mubr.bf16.mxu0 %v3368_v53 }
  0xe6   : > { %2197 = vmatprep.mubr.bf16.mxu1 %v3370_v54  ;;  %3161 = vmatprep.subr.bf16.mxu0 %v3374_v55 }
  0xe7   : > { %3192 = vmatprep.subr.bf16.mxu1 %v3374_v55 }
  0xe8   : > { %3162 = vmatpush3.bf16.msra.mxu0 %v3374_v55 }
  0xe9   : > { %3200 = vmatpush3.bf16.msra.mxu1 %v3374_v55  ;;  %3163 = vmatprep.subr.bf16.mxu0 %v3381_v56 }
  0xea   : > { %3193 = vmatprep.subr.bf16.mxu1 %v3381_v56 }
  0xeb   : > { %2101 = vmatmul.mubr.bf16.gmra.mxu0 %v3372_v57 }
  0xec   : > { %2198 = vmatmul.mubr.bf16.gmra.mxu1 %v3373_v58  ;;  %2108 = vmatprep.mubr.bf16.mxu0 %v3375_v59 }
  0xed   : > { %2205 = vmatprep.mubr.bf16.mxu1 %v3377_v60  ;;  %3164 = vmatpush3.bf16.msra.mxu0 %v3381_v56 }
  0xee   : > { %3201 = vmatpush3.bf16.msra.mxu1 %v3381_v56  ;;  %3165 = vmatprep.subr.bf16.mxu0 %v3388_v61 }
  0xef   : > { %3194 = vmatprep.subr.bf16.mxu1 %v3388_v61 }
  0xf1   : > { %3166 = vmatpush3.bf16.msra.mxu0 %v3388_v61 }
  0xf2   : > { %3202 = vmatpush3.bf16.msra.mxu1 %v3388_v61  ;;  %3167 = vmatprep.subr.bf16.mxu0 %v3395_v63 }
  0xf3   : > { %2109 = vmatmul.mubr.bf16.gmra.mxu0 %v3379_v62  ;;  %3195 = vmatprep.subr.bf16.mxu1 %v3395_v63 }
  0xf4   : > { %2206 = vmatmul.mubr.bf16.gmra.mxu1 %v3380_v0  ;;  %2116 = vmatprep.mubr.bf16.mxu0 %v3382_v1 }
  0xf5   : > { %2213 = vmatprep.mubr.bf16.mxu1 %v3384_v2  ;;  %3168 = vmatpush3.bf16.msra.mxu0 %v3395_v63 }
  0xf6   : > { %3203 = vmatpush3.bf16.msra.mxu1 %v3395_v63  ;;  %3169 = vmatprep.subr.bf16.mxu0 %v3402_v3 }
  0xf7   : > { %3196 = vmatprep.subr.bf16.mxu1 %v3402_v3 }
  0xf9   : > { %3170 = vmatpush3.bf16.msra.mxu0 %v3402_v3 }
  0xfa   : > { %3204 = vmatpush3.bf16.msra.mxu1 %v3402_v3  ;;  %3171 = vmatprep.subr.bf16.mxu0 %v3409_v4 }
  0xfb   : > { %2117 = vmatmul.mubr.bf16.gmra.mxu0 %v3386_v5  ;;  %3197 = vmatprep.subr.bf16.mxu1 %v3409_v4 }
  0xfc   : > { %2214 = vmatmul.mubr.bf16.gmra.mxu1 %v3387_v6  ;;  %2124 = vmatprep.mubr.bf16.mxu0 %v3389_v7 }
  0xfd   : > { %2221 = vmatprep.mubr.bf16.mxu1 %v3391_v8  ;;  %3172 = vmatpush3.bf16.msra.mxu0 %v3409_v4 }
  0xfe   : > { %3205 = vmatpush3.bf16.msra.mxu1 %v3409_v4  ;;  %3173 = vmatprep.subr.bf16.mxu0 %v3416_v9 }
  0xff   : > { %3198 = vmatprep.subr.bf16.mxu1 %v3416_v9 }
 0x101   : > { %3174 = vmatpush3.bf16.msra.mxu0 %v3416_v9 }
 0x102   : > { %3206 = vmatpush3.bf16.msra.mxu1 %v3416_v9 }
 0x103   : > { %2125 = vmatmul.mubr.bf16.gmra.mxu0 %v3393_v10 }
 0x104   : > { %2222 = vmatmul.mubr.bf16.gmra.mxu1 %v3394_v11  ;;  %2132 = vmatprep.mubr.bf16.mxu0 %v3396_v12 }
 0x105   : > { %2229 = vmatprep.mubr.bf16.mxu1 %v3398_v13 }
 0x10b   : > { %2133 = vmatmul.mubr.bf16.gmra.mxu0 %v3400_v14 }
 0x10c   : > { %2230 = vmatmul.mubr.bf16.gmra.mxu1 %v3401_v15  ;;  %2140 = vmatprep.mubr.bf16.mxu0 %v3403_v16 }
 0x10d   : > { %2237 = vmatprep.mubr.bf16.mxu1 %v3405_v17 }
 0x113   : > { %2141 = vmatmul.mubr.bf16.gmra.mxu0 %v3407_v18 }
 0x114   : > { %2238 = vmatmul.mubr.bf16.gmra.mxu1 %v3408_v19  ;;  %2148 = vmatprep.mubr.bf16.mxu0 %v3410_v20 }
 0x115   : > { %2245 = vmatprep.mubr.bf16.mxu1 %v3412_v21 }
 0x11b   : > { %2149 = vmatmul.mubr.bf16.gmra.mxu0 %v3414_v22 }
 0x11c   : > { %2246 = vmatmul.mubr.bf16.gmra.mxu1 %v3415_v23  ;;  %3175 = vmatprep.mubr.bf16.mxu0 %v3417_v24 }
 0x11d   : > { %3183 = vmatprep.mubr.bf16.mxu1 %v3418_v25 }
 0x123   : > { %3176 = vmatmul.mubr.bf16.vlgmr.msra.gmra.mxu0 %v3419_v26 }
 0x124   : > { %3184 = vmatmul.mubr.bf16.vlgmr.msra.gmra.mxu1 %v3420_v27  ;;  %3179 = vmatprep.mubr.bf16.mxu0 %v3421_v28 }
 0x125   : > { %3187 = vmatprep.mubr.bf16.mxu1 %v3422_v29 }
 0x12b   : > { %3180 = vmatmul.mubr.bf16.gmra.mxu0 %v3423_v30 }
 0x12c   : > { %3188 = vmatmul.mubr.bf16.gmra.mxu1 %v3424_v31 }
 0x163   : > { %v2903_v32 = vpop.f32.mrf.mxu0 }
 0x164   : > { %v2967_v33 = vpop.f32.mrf.mxu1 }
 0x165   : > { %v2904_v35 = vpop.f32.mrf.mxu0 }
 0x166   : > { %v2905_v36 = vadd.f32 %v2904_v35, %v2903_v32  ;;  %v2968_v37 = vpop.f32.mrf.mxu1 }
 0x167   : > { %v2969_v38 = vadd.f32 %v2968_v37, %v2967_v33  ;;  %v2906_v39 = vpop.f32.mrf.mxu0 }
 0x168   : > { %v1901_v40 = vadd.f32 %v2905_v36, %v4125_v34  ;;  %v2970_v41 = vpop.f32.mrf.mxu1 }
 0x169   : > { %v2907_v42 = vpop.f32.mrf.mxu0 }
 0x16a   : > { %v4128_v43 = vadd.f32 %v2969_v38, %v1901_v40  ;;  %v2908_v44 = vadd.f32 %v2907_v42, %v2906_v39  ;;  %v2971_v45 = vpop.f32.mrf.mxu1 }
 0x16b   : > { %v2972_v46 = vadd.f32 %v2971_v45, %v2970_v41  ;;  %v2909_v47 = vpop.f32.mrf.mxu0 }
 0x16c   : > { %v1904_v48 = vadd.f32 %v2908_v44, %v4125_v34  ;;  %v2973_v49 = vpop.f32.mrf.mxu1 }
 0x16d   : > { %v2910_v50 = vpop.f32.mrf.mxu0 }
 0x16e   : > { %v4131_v51 = vadd.f32 %v2972_v46, %v1904_v48  ;;  %v2911_v52 = vadd.f32 %v2910_v50, %v2909_v47  ;;  %v2974_v53 = vpop.f32.mrf.mxu1 }
 0x16f   : > { %v2975_v54 = vadd.f32 %v2974_v53, %v2973_v49  ;;  %v2912_v55 = vpop.f32.mrf.mxu0 }
 0x170   : > { %v1909_v56 = vadd.f32 %v2911_v52, %v4125_v34  ;;  %v2976_v57 = vpop.f32.mrf.mxu1 }
 0x171   : > { %v2913_v58 = vpop.f32.mrf.mxu0 }
 0x172   : > { %v4134_v59 = vadd.f32 %v2975_v54, %v1909_v56  ;;  %v2914_v60 = vadd.f32 %v2913_v58, %v2912_v55  ;;  %v2977_v61 = vpop.f32.mrf.mxu1 }
 0x173   : > { %v2978_v62 = vadd.f32 %v2977_v61, %v2976_v57  ;;  %v2915_v63 = vpop.f32.mrf.mxu0 }
 0x174   : > { %v1912_v0 = vadd.f32 %v2914_v60, %v4125_v34  ;;  %v2979_v1 = vpop.f32.mrf.mxu1 }
 0x175   : > { %v2916_v2 = vpop.f32.mrf.mxu0 }
 0x176   : > { %v4137_v3 = vadd.f32 %v2978_v62, %v1912_v0  ;;  %v2917_v4 = vadd.f32 %v2916_v2, %v2915_v63  ;;  %v2980_v5 = vpop.f32.mrf.mxu1 }
 0x177   : > { %v2981_v6 = vadd.f32 %v2980_v5, %v2979_v1  ;;  %v2918_v7 = vpop.f32.mrf.mxu0 }
 0x178   : > { %v1917_v8 = vadd.f32 %v2917_v4, %v4125_v34  ;;  %v2982_v9 = vpop.f32.mrf.mxu1 }
 0x179   : > { %v2919_v10 = vpop.f32.mrf.mxu0 }
 0x17a   : > { %v4140_v11 = vadd.f32 %v2981_v6, %v1917_v8  ;;  %v2920_v12 = vadd.f32 %v2919_v10, %v2918_v7  ;;  %v2983_v13 = vpop.f32.mrf.mxu1 }
 0x17b   : > { %v2984_v14 = vadd.f32 %v2983_v13, %v2982_v9  ;;  %v2921_v15 = vpop.f32.mrf.mxu0 }
 0x17c   : > { %v1920_v16 = vadd.f32 %v2920_v12, %v4125_v34  ;;  %v2985_v17 = vpop.f32.mrf.mxu1 }
 0x17d   : > { %v2922_v18 = vpop.f32.mrf.mxu0 }
 0x17e   : > { %v4143_v19 = vadd.f32 %v2984_v14, %v1920_v16  ;;  %v2923_v20 = vadd.f32 %v2922_v18, %v2921_v15  ;;  %v2986_v21 = vpop.f32.mrf.mxu1 }
 0x17f   : > { %v2987_v22 = vadd.f32 %v2986_v21, %v2985_v17  ;;  %v2924_v23 = vpop.f32.mrf.mxu0 }
 0x180   : > { %4299 = vst [vmem:[#allocation4_spill] sm:$0xff] %v4143_v19  ;;  %v1925_v24 = vadd.f32 %v2923_v20, %v4125_v34  ;;  %v2988_v25 = vpop.f32.mrf.mxu1 }
 0x181   : > { %v2925_v26 = vpop.f32.mrf.mxu0 }
 0x182   : > { %v4146_v27 = vadd.f32 %v2987_v22, %v1925_v24  ;;  %v2926_v28 = vadd.f32 %v2925_v26, %v2924_v23  ;;  %v2989_v29 = vpop.f32.mrf.mxu1 }
 0x183   : > { %v2990_v30 = vadd.f32 %v2989_v29, %v2988_v25  ;;  %v2927_v31 = vpop.f32.mrf.mxu0 }
 0x184   : > { %v1928_v32 = vadd.f32 %v2926_v28, %v4125_v34  ;;  %v2991_v33 = vpop.f32.mrf.mxu1 }
 0x185   : > { %v2928_v35 = vpop.f32.mrf.mxu0 }
 0x186   : > { %v4149_v36 = vadd.f32 %v2990_v30, %v1928_v32  ;;  %v2929_v37 = vadd.f32 %v2928_v35, %v2927_v31  ;;  %v2992_v38 = vpop.f32.mrf.mxu1 }
 0x187   : > { %v2993_v39 = vadd.f32 %v2992_v38, %v2991_v33  ;;  %v2930_v40 = vpop.f32.mrf.mxu0 }
 0x188   : > { %4300 = vst [vmem:[#allocation5_spill] sm:$0xff] %v4149_v36  ;;  %v1933_v41 = vadd.f32 %v2929_v37, %v4125_v34  ;;  %v2994_v42 = vpop.f32.mrf.mxu1 }
 0x189   : > { %v2931_v44 = vpop.f32.mrf.mxu0 }
 0x18a   : > { %v4152_v45 = vadd.f32 %v2993_v39, %v1933_v41  ;;  %v2932_v46 = vadd.f32 %v2931_v44, %v2930_v40  ;;  %v2995_v47 = vpop.f32.mrf.mxu1 }
 0x18b   : > { %v2996_v48 = vadd.f32 %v2995_v47, %v2994_v42  ;;  %v2933_v49 = vpop.f32.mrf.mxu0 }
 0x18c   : > { %v1936_v50 = vadd.f32 %v2932_v46, %v4125_v34  ;;  %v2997_v52 = vpop.f32.mrf.mxu1 }
 0x18d   : > { %v2934_v53 = vpop.f32.mrf.mxu0 }
 0x18e   : > { %v4155_v54 = vadd.f32 %v2996_v48, %v1936_v50  ;;  %v2935_v55 = vadd.f32 %v2934_v53, %v2933_v49  ;;  %v2998_v56 = vpop.f32.mrf.mxu1 }
 0x18f   : > { %v2999_v57 = vadd.f32 %v2998_v56, %v2997_v52  ;;  %v2936_v58 = vpop.f32.mrf.mxu0 }
 0x190   : > { %4301 = vst [vmem:[#allocation6_spill] sm:$0xff] %v4155_v54  ;;  %v1941_v60 = vadd.f32 %v2935_v55, %v4125_v34  ;;  %v3000_v61 = vpop.f32.mrf.mxu1 }
 0x191   : > { %v2937_v62 = vpop.f32.mrf.mxu0 }
 0x192   : > { %v4158_v63 = vadd.f32 %v2999_v57, %v1941_v60  ;;  %v2938_v0 = vadd.f32 %v2937_v62, %v2936_v58  ;;  %v3001_v1 = vpop.f32.mrf.mxu1 }
 0x193   : > { %v3002_v2 = vadd.f32 %v3001_v1, %v3000_v61  ;;  %v2939_v4 = vpop.f32.mrf.mxu0 }
 0x194   : > { %v1944_v5 = vadd.f32 %v2938_v0, %v4125_v34  ;;  %v3003_v6 = vpop.f32.mrf.mxu1 }
 0x195   : > { %v2940_v7 = vpop.f32.mrf.mxu0 }
 0x196   : > { %v4161_v8 = vadd.f32 %v3002_v2, %v1944_v5  ;;  %v2941_v9 = vadd.f32 %v2940_v7, %v2939_v4  ;;  %v3004_v10 = vpop.f32.mrf.mxu1 }
 0x197   : > { %v3005_v12 = vadd.f32 %v3004_v10, %v3003_v6  ;;  %v2942_v13 = vpop.f32.mrf.mxu0 }
 0x198   : > { %4302 = vst [vmem:[#allocation7_spill] sm:$0xff] %v4161_v8  ;;  %v1949_v14 = vadd.f32 %v2941_v9, %v4125_v34  ;;  %v3006_v15 = vpop.f32.mrf.mxu1 }
 0x199   : > { %v2943_v16 = vpop.f32.mrf.mxu0 }
 0x19a   : > { %v4164_v17 = vadd.f32 %v3005_v12, %v1949_v14  ;;  %v2944_v18 = vadd.f32 %v2943_v16, %v2942_v13  ;;  %v3007_v20 = vpop.f32.mrf.mxu1 }
 0x19b   : > { %v3008_v21 = vadd.f32 %v3007_v20, %v3006_v15  ;;  %v2945_v22 = vpop.f32.mrf.mxu0 }
 0x19c   : > { %4303 = vst [vmem:[#allocation8_spill] sm:$0xff] %v4164_v17  ;;  %v1952_v23 = vadd.f32 %v2944_v18, %v4125_v34  ;;  %v3009_v24 = vpop.f32.mrf.mxu1 }
 0x19d   : > { %v2946_v25 = vpop.f32.mrf.mxu0 }
 0x19e   : > { %v4167_v26 = vadd.f32 %v3008_v21, %v1952_v23  ;;  %v2947_v28 = vadd.f32 %v2946_v25, %v2945_v22  ;;  %v3010_v29 = vpop.f32.mrf.mxu1 }
 0x19f   : > { %v3011_v30 = vadd.f32 %v3010_v29, %v3009_v24  ;;  %v2948_v31 = vpop.f32.mrf.mxu0 }
 0x1a0   : > { %4304 = vst [vmem:[#allocation9_spill] sm:$0xff] %v4167_v26  ;;  %v1957_v32 = vadd.f32 %v2947_v28, %v4125_v34  ;;  %v3012_v33 = vpop.f32.mrf.mxu1 }
 0x1a1   : > { %v2949_v35 = vpop.f32.mrf.mxu0 }
 0x1a2   : > { %v4170_v37 = vadd.f32 %v3011_v30, %v1957_v32  ;;  %v2950_v38 = vadd.f32 %v2949_v35, %v2948_v31  ;;  %v3013_v39 = vpop.f32.mrf.mxu1 }
 0x1a3   : > { %v3014_v40 = vadd.f32 %v3013_v39, %v3012_v33  ;;  %v3031_v41 = vpop.f32.mrf.mxu0 }
 0x1a4   : > { %4305 = vst [vmem:[#allocation10_spill] sm:$0xff] %v4170_v37  ;;  %v1960_v42 = vadd.f32 %v2950_v38, %v4125_v34  ;;  %v3095_v44 = vpop.f32.mrf.mxu1 }
 0x1a5   : > { %v3032_v46 = vpop.f32.mrf.mxu0 }
 0x1a6   : > { %v4173_v47 = vadd.f32 %v3014_v40, %v1960_v42  ;;  %v3033_v48 = vadd.f32 %v3032_v46, %v3031_v41  ;;  %v3096_v49 = vpop.f32.mrf.mxu1 }
 0x1a7   : > { %v3034_v50 = vpop.f32.mrf.mxu0  ;;  %v3097_v53 = vadd.f32 %v3096_v49, %v3095_v44 }
 0x1a8   : > { %4306 = vst [vmem:[#allocation11_spill] sm:$0xff] %v4173_v47  ;;  %v2095_v52 = vadd.f32 %v3033_v48, %v4128_v43  ;;  %v4176_v55 = vpop.f32.mrf.mxu1 }
 0x1a9   : > { %v3035_v56 = vpop.f32.mrf.mxu0 }
 0x1aa   : > { %v4178_v57 = vpop.f32.mrf.mxu1  ;;  %v4180_v58 = vadd.f32 %v3097_v53, %v2095_v52  ;;  %v3036_v26 = vadd.f32 %v3035_v56, %v3034_v50 }
 0x1ab   : > { %v3037_v60 = vpop.f32.mrf.mxu0 }
 0x1ac   : > { %4307 = vst [vmem:[#allocation12_spill] sm:$0xff] %v4180_v58  ;;  %v3101_v61 = vpop.f32.mrf.mxu1  ;;  %v2098_v8 = vadd.f32 %v3036_v26, %v4131_v51 }
 0x1ad   : > { %v3038_v34 = vpop.f32.mrf.mxu0 }
 0x1ae   : > { %v3102_v62 = vpop.f32.mrf.mxu1  ;;  %v3039_v58 = vadd.f32 %v3038_v34, %v3037_v60  ;;  %v3100_v60 = vadd.f32 %v4178_v57, %v4176_v55 }
 0x1af   : > { %v3040_v0 = vpop.f32.mrf.mxu0  ;;  %v3103_v34 = vadd.f32 %v3102_v62, %v3101_v61 }
 0x1b0   : > { %v3104_v1 = vpop.f32.mrf.mxu1 }
 0x1b1   : > { %v3041_v2 = vpop.f32.mrf.mxu0 }
 0x1b2   : > { %v3105_v4 = vpop.f32.mrf.mxu1  ;;  %v3042_v37 = vadd.f32 %v3041_v2, %v3040_v0 }
 0x1b3   : > { %v3043_v5 = vpop.f32.mrf.mxu0  ;;  %v3106_v0 = vadd.f32 %v3105_v4, %v3104_v1 }
 0x1b4   : > { %v3107_v6 = vpop.f32.mrf.mxu1 }
 0x1b5   : > { %v3044_v7 = vpop.f32.mrf.mxu0 }
 0x1b6   : > { %v3108_v43 = vpop.f32.mrf.mxu1 }
 0x1b7   : > { %v3046_v9 = vpop.f32.mrf.mxu0 }
 0x1b8   : > { %v4182_v10 = vpop.f32.mrf.mxu1 }
 0x1b9   : > { %v3047_v12 = vpop.f32.mrf.mxu0 }
 0x1ba   : > { %v4184_v13 = vpop.f32.mrf.mxu1  ;;  %v3048_v51 = vadd.f32 %v3047_v12, %v3046_v9 }
 0x1bb   : > { %v3049_v14 = vpop.f32.mrf.mxu0  ;;  %v4218_v57 = vadd.f32 %v4184_v13, %v4182_v10 }
 0x1bc   : > { %v4186_v15 = vpop.f32.mrf.mxu1 }
 0x1bd   : > { %v3050_v16 = vpop.f32.mrf.mxu0 }
 0x1be   : > { %v3114_v18 = vpop.f32.mrf.mxu1  ;;  %v3051_v54 = vadd.f32 %v3050_v16, %v3049_v14 }
 0x1bf   : > { %v3052_v20 = vpop.f32.mrf.mxu0  ;;  %v3115_v61 = vadd.f32 %v3114_v18, %v4186_v15 }
 0x1c0   : > { %v4188_v21 = vpop.f32.mrf.mxu1 }
 0x1c1   : > { %4308 = vst [vmem:[#allocation13_spill] sm:$0xff] %v4188_v21  ;;  %v3053_v22 = vpop.f32.mrf.mxu0 }
 0x1c2   : > { %v4190_v23 = vpop.f32.mrf.mxu1  ;;  %v3054_v62 = vadd.f32 %v3053_v22, %v3052_v20 }
 0x1c3   : > { %4309 = vst [vmem:[#allocation14_spill] sm:$0xff] %v4190_v23  ;;  %v3055_v24 = vpop.f32.mrf.mxu0  ;;  %v3045_v23 = vadd.f32 %v3044_v7, %v3043_v5  ;;  %v3109_v7 = vadd.f32 %v3108_v43, %v3107_v6  ;;  %v4316_v43 = vld [vmem:[#allocation7_spill] sm:$0xff] }
 0x1c4   : > { %v4192_v25 = vpop.f32.mrf.mxu1 }
 0x1c5   : > { %4310 = vst [vmem:[#allocation15_spill] sm:$0xff] %v4192_v25  ;;  %v3056_v28 = vpop.f32.mrf.mxu0  ;;  %v2111_v50 = vadd.f32 %v3045_v23, %v4140_v11 }
 0x1c6   : > { %v3120_v29 = vpop.f32.mrf.mxu1  ;;  %v3057_v2 = vadd.f32 %v3056_v28, %v3055_v24 }
 0x1c7   : > { %v3058_v30 = vpop.f32.mrf.mxu0  ;;  %v4214_v55 = vadd.f32 %v3109_v7, %v2111_v50  ;;  %v4326_v7 = vld [vmem:[#allocation9_spill] sm:$0xff] }
 0x1c8   : > { %v3122_v31 = vpop.f32.mrf.mxu1  ;;  %v2127_v1 = vadd.f32 %v3057_v2, %v4152_v45 }
 0x1c9   : > { %v3059_v32 = vpop.f32.mrf.mxu0 }
 0x1ca   : > { %v3123_v33 = vpop.f32.mrf.mxu1  ;;  %v3060_v26 = vadd.f32 %v3059_v32, %v3058_v30 }
 0x1cb   : > { %v3061_v35 = vpop.f32.mrf.mxu0  ;;  %v3124_v30 = vadd.f32 %v3123_v33, %v3122_v31 }
 0x1cc   : > { %v3125_v38 = vpop.f32.mrf.mxu1  ;;  %v4317_v24 = vld [vmem:[#allocation15_spill] sm:$0xff] }
 0x1cd   : > { %v3062_v39 = vpop.f32.mrf.mxu0  ;;  %v3121_v28 = vadd.f32 %v3120_v29, %v4317_v24 }
 0x1ce   : > { %v3126_v40 = vpop.f32.mrf.mxu1  ;;  %v3063_v56 = vadd.f32 %v3062_v39, %v3061_v35  ;;  %v4318_v39 = vld [vmem:[#allocation5_spill] sm:$0xff] }
 0x1cf   : > { %v3064_v41 = vpop.f32.mrf.mxu0  ;;  %v3127_v6 = vadd.f32 %v3126_v40, %v3125_v38 }
 0x1d0   : > { %v3128_v42 = vpop.f32.mrf.mxu1  ;;  %v2135_v11 = vadd.f32 %v3063_v56, %v4158_v63 }
 0x1d1   : > { %v3065_v44 = vpop.f32.mrf.mxu0 }
 0x1d2   : > { %v3129_v46 = vpop.f32.mrf.mxu1  ;;  %v3066_v14 = vadd.f32 %v3065_v44, %v3064_v41  ;;  %v2232_v45 = vadd.f32 %v3127_v6, %v2135_v11  ;;  %v2122_v41 = vadd.f32 %v3054_v62, %v4318_v39  ;;  %v4319_v44 = vld [vmem:[#allocation13_spill] sm:$0xff]  ;;  %v4327_v62 = vld [vmem:[#allocation11_spill] sm:$0xff] }
 0x1d3   : > { %v3067_v48 = vpop.f32.mrf.mxu0  ;;  %v3130_v15 = vadd.f32 %v3129_v46, %v3128_v42 }
 0x1d4   : > { %v4194_v49 = vpop.f32.mrf.mxu1  ;;  %v2138_v9 = vadd.f32 %v3066_v14, %v4316_v43 }
 0x1d5   : > { %4311 = vst [vmem:[#allocation16_spill] sm:$0xff] %v4194_v49  ;;  %v3068_v52 = vpop.f32.mrf.mxu0  ;;  %v2103_v49 = vadd.f32 %v3039_v58, %v4134_v59  ;;  %v2119_v59 = vadd.f32 %v3051_v54, %v4146_v27  ;;  %v4314_v54 = vld [vmem:[#allocation4_spill] sm:$0xff] }
 0x1d6   : > { %v4196_v53 = vpop.f32.mrf.mxu1  ;;  %v4223_v4 = vadd.f32 %v3048_v51, %v4314_v54  ;;  %v3069_v18 = vadd.f32 %v3068_v52, %v3067_v48  ;;  %v4324_v48 = vld [vmem:[#allocation12_spill] sm:$0xff] }
 0x1d7   : > { %4312 = vst [vmem:[#allocation17_spill] sm:$0xff] %v4196_v53  ;;  %v3070_v47 = vpop.f32.mrf.mxu0  ;;  %v2106_v53 = vadd.f32 %v3042_v37, %v4137_v3  ;;  %v2195_v3 = vadd.f32 %v3100_v60, %v2098_v8  ;;  %v2200_v23 = vadd.f32 %v3103_v34, %v2103_v49  ;;  %v4315_v8 = vld [vmem:[#allocation6_spill] sm:$0xff]  ;;  %v2216_v32 = vadd.f32 %v3115_v61, %v2119_v59 }
 0x1d8   : > { %v4198_v17 = vpop.f32.mrf.mxu1  ;;  %v2130_v63 = vadd.f32 %v3060_v26, %v4315_v8  ;;  %v4320_v49 = vld [vmem:[#allocation14_spill] sm:$0xff] }
 0x1d9   : > { %4313 = vst [vmem:[#allocation18_spill] sm:$0xff] %v4198_v17  ;;  %v3071_v21 = vpop.f32.mrf.mxu0  ;;  %v2203_v35 = vadd.f32 %v3106_v0, %v2106_v53  ;;  %v3118_v38 = vadd.f32 %v4320_v49, %v4319_v44  ;;  %v2224_v53 = vadd.f32 %v3121_v28, %v2127_v1  ;;  %v4325_v0 = vld [vmem:[#allocation8_spill] sm:$0xff] }
 0x1da   : > { %v4200_v36 = vpop.f32.mrf.mxu1  ;;  %v3072_v20 = vadd.f32 %v3071_v21, %v3070_v47  ;;  %v4323_v47 = vld [vmem:[#allocation10_spill] sm:$0xff]  ;;  %v2143_v2 = vadd.f32 %v3069_v18, %v4325_v0 }
 0x1db   : > { %v3073_v25 = vpop.f32.mrf.mxu0 }
 0x1dc   : > { %v4203_v19 = vpop.f32.mrf.mxu1  ;;  %v4321_v33 = vld [vmem:[#allocation16_spill] sm:$0xff]  ;;  %v2146_v51 = vadd.f32 %v3072_v20, %v4326_v7  ;;  %v2219_v20 = vadd.f32 %v3118_v38, %v2122_v41 }
 0x1dd   : > { %v3074_v17 = vpop.f32.mrf.mxu0 }
 0x1de   : > { %v3138_v5 = vpop.f32.mrf.mxu1  ;;  %v3075_v10 = vadd.f32 %v3074_v17, %v3073_v25  ;;  %v2235_v17 = vadd.f32 %v3130_v15, %v2138_v9  ;;  %v2227_v25 = vadd.f32 %v3124_v30, %v2130_v63  ;;  %v4322_v42 = vld [vmem:[#allocation17_spill] sm:$0xff] }
 0x1df   : > { %v3076_v16 = vpop.f32.mrf.mxu0  ;;  %v3133_v46 = vadd.f32 %v4322_v42, %v4321_v33  ;;  %v3139_v59 = vadd.f32 %v3138_v5, %v4203_v19 }
 0x1e0   : > { %v4211_v58 = vpop.f32.mrf.mxu1  ;;  %v2151_v21 = vadd.f32 %v3075_v10, %v4323_v47 }
 0x1e1   : > { %v3077_v37 = vpop.f32.mrf.mxu0  ;;  %v2240_v15 = vadd.f32 %v3133_v46, %v2143_v2 }
 0x1e2   : > { %v3141_v27 = vpop.f32.mrf.mxu1  ;;  %v3078_v56 = vadd.f32 %v3077_v37, %v3076_v16 }
 0x1e3   : > { %v3177_v12 = vpop.f32.mrf.mxu0  ;;  %v3142_v28 = vadd.f32 %v3141_v27, %v4211_v58 }
 0x1e4   : > { %v3185_v13 = vpop.f32.mrf.mxu1  ;;  %v2297_v40 = vadd.f32 %v3177_v12, %v2200_v23  ;;  %v2154_v1 = vadd.f32 %v3078_v56, %v4327_v62  ;;  %v2248_v12 = vadd.f32 %v3139_v59, %v2151_v21 }
 0x1e5   : > { %v2288_v22 = vpop.f32.mrf.mxu0  ;;  %v2329_v29 = vadd.f32 %v3185_v13, %v2232_v45  ;;  %v4328_v45 = vld [vmem:[#allocation18_spill] sm:$0xff] }
 0x1e6   : > { %v2320_v50 = vpop.f32.mrf.mxu1  ;;  %v2289_v52 = vadd.f32 %v2288_v22, %v4324_v48  ;;  %v2353_v11 = vmax.f32 %v2297_v40, 0.0  ;;  %v3136_v22 = vadd.f32 %v4200_v36, %v4328_v45  ;;  %v2251_v44 = vadd.f32 %v3142_v28, %v2154_v1 }
 0x1e7   : > { %v3178_v31 = vpop.f32.mrf.mxu0  ;;  %v2321_v26 = vadd.f32 %v2320_v50, %v2224_v53  ;;  %v2361_v54 = vmax.f32 %v2329_v29, 0.0  ;;  %v2211_v50 = vadd.f32 %v4218_v57, %v4223_v4 }
 0x1e8   : > { %v2300_v60 = vadd.f32 %v3178_v31, %v2203_v35  ;;  %v3186_v34 = vpop.f32.mrf.mxu1  ;;  %v2351_v6 = vmax.f32 %v2289_v52, 0.0  ;;  %v2243_v38 = vadd.f32 %v3136_v22, %v2146_v51 }
 0x1e9   : > { %v2332_v14 = vadd.f32 %v3186_v34, %v2235_v17  ;;  %v2291_v16 = vpop.f32.mrf.mxu0  ;;  %v2359_v30 = vmax.f32 %v2321_v26, 0.0 }
 0x1ea   : > { %v2354_v37 = vmax.f32 %v2300_v60, 0.0  ;;  %v2292_v23 = vadd.f32 %v2291_v16, %v2195_v3  ;;  %v2323_v61 = vpop.f32.mrf.mxu1 }
 0x1eb   : > { %v2362_v8 = vmax.f32 %v2332_v14, 0.0  ;;  %v2324_v63 = vadd.f32 %v2323_v61, %v2227_v25  ;;  %v3181_v35 = vpop.f32.mrf.mxu0 }
 0x1ec   : > { %v2848_v43 = vpack.c.bf16 %v2354_v37, %v2353_v11  ;;  %v2352_v9 = vmax.f32 %v2292_v23, 0.0  ;;  %v3189_v24 = vpop.f32.mrf.mxu1  ;;  %v2313_v13 = vadd.f32 %v3181_v35, %v2216_v32 }
 0x1ed   : > { %v2868_v10 = vpack.c.bf16 %v2362_v8, %v2361_v54  ;;  %v2360_v19 = vmax.f32 %v2324_v63, 0.0  ;;  %v2304_v5 = vpop.f32.mrf.mxu0  ;;  %v2345_v27 = vadd.f32 %v3189_v24, %v2248_v12 }
 0x1ee   : > { %2880 = vst [vmem:[%s4242_s12 + $0x8] sm:$0xff] %v2848_v43   ;;  %v2843_v3 = vpack.c.bf16 %v2352_v9, %v2351_v6  ;;  %v2336_v18 = vpop.f32.mrf.mxu1  ;;  %v2305_v49 = vadd.f32 %v2304_v5, %v4214_v55  ;;  %v2357_v36 = vmax.f32 %v2313_v13, 0.0 }
 0x1ef   : > { %2884 = vst [vmem:[%s4242_s12 + $0x28] sm:$0xff] %v2868_v10   ;;  %v2863_v58 = vpack.c.bf16 %v2360_v19, %v2359_v30  ;;  %v3182_v39 = vpop.f32.mrf.mxu0  ;;  %v2337_v32 = vadd.f32 %v2336_v18, %v2240_v15  ;;  %v2365_v25 = vmax.f32 %v2345_v27, 0.0 }
 0x1f0   : > { %2844 = vst [vmem:[%s4242_s12] sm:$0xff] %v2843_v3   ;;  %v2316_v40 = vadd.f32 %v3182_v39, %v2219_v20  ;;  %v3190_v53 = vpop.f32.mrf.mxu1  ;;  %v2355_v42 = vmax.f32 %v2305_v49, 0.0 }
 0x1f1   : > { %2883 = vst [vmem:[%s4242_s12 + $0x20] sm:$0xff] %v2863_v58   ;;  %v2348_v56 = vadd.f32 %v3190_v53, %v2251_v44  ;;  %v2307_v41 = vpop.f32.mrf.mxu0  ;;  %v2363_v57 = vmax.f32 %v2337_v32, 0.0 }
 0x1f2   : > { %v2358_v29 = vmax.f32 %v2316_v40, 0.0  ;;  %v2308_v31 = vadd.f32 %v2307_v41, %v2211_v50  ;;  %v2339_v17 = vpop.f32.mrf.mxu1 }
 0x1f3   : > { %v2366_v55 = vmax.f32 %v2348_v56, 0.0  ;;  %v2340_v33 = vadd.f32 %v2339_v17, %v2243_v38 }
 0x1f4   : > { %v2858_v46 = vpack.c.bf16 %v2358_v29, %v2357_v36  ;;  %v2356_v47 = vmax.f32 %v2308_v31, 0.0 }
 0x1f5   : > { %v2878_v4 = vpack.c.bf16 %v2366_v55, %v2365_v25  ;;  %v2364_v21 = vmax.f32 %v2340_v33, 0.0  ;;  %2453 = sbr.rel (!%p3520_p6) target bundleno = 515 (0x203), region = 77  ;;  %v2479_v0 = vld [vmem:[%s4242_s12 + $0x8] sm:$0xf] (%p3520_p6)  ;;  %v2481_v2 = vld [vmem:[%s4242_s12 + $0xc] sm:$0xf] (%p3520_p6) }
 0x1f6   : > { %2882 = vst [vmem:[%s4242_s12 + $0x18] sm:$0xff] %v2858_v46   ;;  %v2853_v48 = vpack.c.bf16 %v2356_v47, %v2355_v42  ;;  %2480 = vst [vmem:[%s2458_s26 + $0x10] sm:$0xf] (%p3520_p6), %v2479_v0  ;;  %v2495_v11 = vld [vmem:[%s4242_s12 + $0x28] sm:$0xf] (%p3520_p6) }
 0x1f7   : > { %2886 = vst [vmem:[%s4242_s12 + $0x38] sm:$0xff] %v2878_v4   ;;  %v2873_v52 = vpack.c.bf16 %v2364_v21, %v2363_v57  ;;  %v2475_v60 = vld [vmem:[%s4242_s12] sm:$0xf] (%p3520_p6)  ;;  %v2477_v34 = vld [vmem:[%s4242_s12 + $0x4] sm:$0xf] (%p3520_p6) }
 0x1f8   : > { %2881 = vst [vmem:[%s4242_s12 + $0x10] sm:$0xff] %v2853_v48   ;;  %2476 = vst [vmem:[%s2458_s26] sm:$0xf] (%p3520_p6), %v2475_v60  ;;  %v2491_v16 = vld [vmem:[%s4242_s12 + $0x20] sm:$0xf] (%p3520_p6)  ;;  %v2493_v59 = vld [vmem:[%s4242_s12 + $0x24] sm:$0xf] (%p3520_p6) }
 0x1f9   : > { %2885 = vst [vmem:[%s4242_s12 + $0x30] sm:$0xff] %v2873_v52   ;;  %2478 = vst [vmem:[%s2458_s26 + $0x8] sm:$0xf] (%p3520_p6), %v2477_v34  ;;  %v2497_v37 = vld [vmem:[%s4242_s12 + $0x2c] sm:$0xf] (%p3520_p6) }
 0x1fa   : > { %2482 = vst [vmem:[%s2458_s26 + $0x18] sm:$0xf] %v2481_v2  ;;  %2492 = vst [vmem:[%s2458_s26 + $0x40] sm:$0xf] %v2491_v16 }
 0x1fb   : > { %2494 = vst [vmem:[%s2458_s26 + $0x48] sm:$0xf] %v2493_v59  ;;  %2496 = vst [vmem:[%s2458_s26 + $0x50] sm:$0xf] %v2495_v11 }
 0x1fc   : > { %2498 = vst [vmem:[%s2458_s26 + $0x58] sm:$0xf] %v2497_v37 }
 0x1fd   : > { %v2487_v26 = vld [vmem:[%s4242_s12 + $0x18] sm:$0xf]  ;;  %v2489_v14 = vld [vmem:[%s4242_s12 + $0x1c] sm:$0xf] }
 0x1fe   : > { %2488 = vst [vmem:[%s2458_s26 + $0x30] sm:$0xf] %v2487_v26  ;;  %2490 = vst [vmem:[%s2458_s26 + $0x38] sm:$0xf] %v2489_v14  ;;  %v2503_v62 = vld [vmem:[%s4242_s12 + $0x38] sm:$0xf] }
 0x1ff   : > { %v2483_v7 = vld [vmem:[%s4242_s12 + $0x10] sm:$0xf]  ;;  %v2485_v51 = vld [vmem:[%s4242_s12 + $0x14] sm:$0xf]  ;;  %v2505_v1 = vld [vmem:[%s4242_s12 + $0x3c] sm:$0xf] }
 0x200   : > { %2484 = vst [vmem:[%s2458_s26 + $0x20] sm:$0xf] %v2483_v7  ;;  %2486 = vst [vmem:[%s2458_s26 + $0x28] sm:$0xf] %v2485_v51  ;;  %v2499_v23 = vld [vmem:[%s4242_s12 + $0x30] sm:$0xf] }
 0x201   : > { %v2501_v61 = vld [vmem:[%s4242_s12 + $0x34] sm:$0xf]  ;;  %2500 = vst [vmem:[%s2458_s26 + $0x60] sm:$0xf] %v2499_v23  ;;  %2504 = vst [vmem:[%s2458_s26 + $0x70] sm:$0xf] %v2503_v62 }
 0x202   : > { %2502 = vst [vmem:[%s2458_s26 + $0x68] sm:$0xf] %v2501_v61  ;;  %2506 = vst [vmem:[%s2458_s26 + $0x78] sm:$0xf] %v2505_v1 }
 0x203 PF: > { %s13_s16 = sadd.s32 1, %s3463_s16   ;;  %s4329_s12 = smov %s3451_s13 }
 0x204   : > { %p10_p12 = scmp.ge.s32.totalorder %s13_s16, 4   ;;  %s4330_s13 = smov %s3525_s22 }
 0x205   : > { %s4331_s14 = smov %s3459_s15  ;;  %s4332_s15 = smov %s4334_s17 }
 0x206   :  { %12 = sbr.rel (!%p10_p12) target bundleno = 3 (0x3), region = 155 }

// kernel: qimage_forward.9
= control target key start
LH: loop header
LB: loop body
LE: loop exit
PB: predicated region body
PF: predicated region fallthrough
CT: control target
= control target key end

     0   :  { %s3130_s18 = smov 0   ;;  %s3526_s0 = inlined_call_operand.vmem [shape: bf16[8,6272], index: 0, kind: input, shape index: {}]   ;;  %s3527_s1 = inlined_call_operand.vmem [shape: bf16[6272,512], index: 1, kind: input, shape index: {}]   ;;  %s3528_s2 = inlined_call_operand.vmem [shape: f32[1,512], index: 2, kind: input, shape index: {}]   ;;  %s3529_s3 = inlined_call_operand.vmem [shape: bf16[512,128], index: 3, kind: input, shape index: {}]   ;;  %s3530_s4 = inlined_call_operand.vmem [shape: f32[1,128], index: 4, kind: input, shape index: {}]   ;;  %s3531_s5 = inlined_call_operand.vmem [shape: f32[8,128], index: 5, kind: output, shape index: {}]  }
   0x1 LB: > { %s3136_s19 = sadd.s32 4294967295, %s3096_s18   ;;  %p2388_p0 = scmp.ge.s32.totalorder %s3096_s18, 1  ;;  %s3096_s18 = sphi %s3130_s18, %s15_s18  }
   0x2   : > { %p195_p1 = scmp.lt.s32.totalorder %s3096_s18, 8 }
   0x4   : > { %p196_p2 = pnand %p2388_p0, %p195_p1 }
   0x5   : > { %s224_s20 = smul.u32 (!%p196_p2), 7, %s3136_s19  ;;  %p2392_p5 = scmp.ne.s32.totalorder (!%p196_p2), %s3136_s19, 0 }
   0x6   : > { %199 = sbr.rel (%p196_p2) target bundleno = 686 (0x2ae), region = 40 }
   0x7   : > { %s230_s21 = smul.u32 (!%p196_p2), 112, %s3136_s19  ;;  %p225_p3 = scmp.lt.s32.totalorder (!%p196_p2), %s224_s20, 48 }
   0x9   : > { %p231_p4 = scmp.lt.s32.totalorder (!%p196_p2), %s230_s21, 783 }
   0xb   : > { %s3533_s20 = smov (!%p225_p3, %s224_s20), 48  ;;  %s3535_s21 = smov (!%p231_p4, %s230_s21), 783 }
   0xc   : > { %s2389_s22 = sshll.u32 %s3533_s20, 2  ;;  %s2660_s26 = sshll.u32 %s3535_s21, 4 }
   0xd   : > { %s3145_s25 = scalar_lea.vmem %s3526_s0, %s2389_s22  ;;  %s3150_s29 = scalar_lea.vmem %s3527_s1, %s2660_s26 }
   0xe   : > { %241 = sbr.rel (%p2392_p5) target bundleno = 22 (0x16), region = 44 }
  0x13   : > { %v3098_v0 = vmov 0.0  }
  0x14   : > { %242 = vst [vmem:[#allocation2 + $0x10] sm:$0xff] %v3098_v0  ;;  %243 = vst [vmem:[#allocation2] sm:$0xff] %v3098_v0 }
  0x15   : > { %244 = vst [vmem:[#allocation2 + $0x18] sm:$0xff] %v3098_v0  ;;  %245 = vst [vmem:[#allocation2 + $0x8] sm:$0xff] %v3098_v0 }
  0x16 PF: > { %v2715_v1 = vld [vmem:[%s3150_s29 + $0xe4] ss:$16 sps:$4 sm:$0xff]   ;;  %v2719_v3 = vld [vmem:[%s3150_s29 + $0xe0] ss:$16 sps:$4 sm:$0xff]   ;;  %v251_v49 = vld [vmem:[%s3145_s25 + $0x8] sm:$0xff]  ;;  %p2624_p6 = scmp.ne.s32.totalorder %s3136_s19, 6 }
  0x17   : > { %v2717_v2 = vld [vmem:[%s3150_s29 + $0x2e4] ss:$16 sps:$4 sm:$0xff]   ;;  %1623 = vmatprep.subr.bf16.mxu0 %v2715_v1  ;;  %v2720_v4 = vld [vmem:[%s3150_s29 + $0x2e0] ss:$16 sps:$4 sm:$0xff]   ;;  %v3205_v52 = vcombine.high %v251_v49, %v251_v49 }
  0x18   : > { %1664 = vmatprep.subr.bf16.mxu1 %v2717_v2  ;;  %v2721_v5 = vld [vmem:[%s3150_s29 + $0xc4] ss:$16 sps:$4 sm:$0xff]   ;;  %1624 = vmatpush1.bf16.msra.mxu0 %v2719_v3  ;;  %v2725_v7 = vld [vmem:[%s3150_s29 + $0xc0] ss:$16 sps:$4 sm:$0xff]  }
  0x19   : > { %1665 = vmatpush1.bf16.msra.mxu1 %v2720_v4  ;;  %v2723_v6 = vld [vmem:[%s3150_s29 + $0x2c4] ss:$16 sps:$4 sm:$0xff]   ;;  %1625 = vmatprep.subr.bf16.mxu0 %v2721_v5  ;;  %v2726_v8 = vld [vmem:[%s3150_s29 + $0x2c0] ss:$16 sps:$4 sm:$0xff]  }
  0x1a   : > { %1666 = vmatprep.subr.bf16.mxu1 %v2723_v6  ;;  %v2727_v9 = vld [vmem:[%s3150_s29 + $0xa4] ss:$16 sps:$4 sm:$0xff]   ;;  %v2731_v11 = vld [vmem:[%s3150_s29 + $0xa0] ss:$16 sps:$4 sm:$0xff]   ;;  %1696 = vmatprep.mubr.bf16.mxu1 %v3205_v52 }
  0x1b   : > { %v2729_v10 = vld [vmem:[%s3150_s29 + $0x2a4] ss:$16 sps:$4 sm:$0xff]   ;;  %v2732_v12 = vld [vmem:[%s3150_s29 + $0x2a0] ss:$16 sps:$4 sm:$0xff]  }
  0x1c   : > { %1626 = vmatpush1.bf16.msra.mxu0 %v2725_v7  ;;  %v2733_v13 = vld [vmem:[%s3150_s29 + $0x84] ss:$16 sps:$4 sm:$0xff]   ;;  %v2737_v15 = vld [vmem:[%s3150_s29 + $0x80] ss:$16 sps:$4 sm:$0xff]  }
  0x1d   : > { %1667 = vmatpush1.bf16.msra.mxu1 %v2726_v8  ;;  %1627 = vmatprep.subr.bf16.mxu0 %v2727_v9  ;;  %v2735_v14 = vld [vmem:[%s3150_s29 + $0x284] ss:$16 sps:$4 sm:$0xff]   ;;  %v2738_v16 = vld [vmem:[%s3150_s29 + $0x280] ss:$16 sps:$4 sm:$0xff]   ;;  %v3229_v8 = vcombine.low %v251_v49, %v251_v49  ;;  %v2875_v49 = vld [vmem:[%s3150_s29 + $0xcc] ss:$16 sps:$4 sm:$0xff]  }
  0x1e   : > { %1668 = vmatprep.subr.bf16.mxu1 %v2729_v10  ;;  %v2739_v17 = vld [vmem:[%s3150_s29 + $0x64] ss:$16 sps:$4 sm:$0xff]   ;;  %v2743_v19 = vld [vmem:[%s3150_s29 + $0x60] ss:$16 sps:$4 sm:$0xff]  }
  0x1f   : > { %v2741_v18 = vld [vmem:[%s3150_s29 + $0x264] ss:$16 sps:$4 sm:$0xff]   ;;  %v2744_v20 = vld [vmem:[%s3150_s29 + $0x260] ss:$16 sps:$4 sm:$0xff]  }
  0x20   : > { %1628 = vmatpush1.bf16.msra.mxu0 %v2731_v11  ;;  %v2745_v21 = vld [vmem:[%s3150_s29 + $0x44] ss:$16 sps:$4 sm:$0xff]   ;;  %v2749_v23 = vld [vmem:[%s3150_s29 + $0x40] ss:$16 sps:$4 sm:$0xff]  }
  0x21   : > { %1669 = vmatpush1.bf16.msra.mxu1 %v2732_v12  ;;  %1629 = vmatprep.subr.bf16.mxu0 %v2733_v13  ;;  %v2747_v22 = vld [vmem:[%s3150_s29 + $0x244] ss:$16 sps:$4 sm:$0xff]   ;;  %v2750_v24 = vld [vmem:[%s3150_s29 + $0x240] ss:$16 sps:$4 sm:$0xff]  }
  0x22   : > { %1670 = vmatprep.subr.bf16.mxu1 %v2735_v14  ;;  %v2751_v25 = vld [vmem:[%s3150_s29 + $0x24] ss:$16 sps:$4 sm:$0xff]   ;;  %v2755_v27 = vld [vmem:[%s3150_s29 + $0x20] ss:$16 sps:$4 sm:$0xff]  }
  0x23   : > { %v2753_v26 = vld [vmem:[%s3150_s29 + $0x224] ss:$16 sps:$4 sm:$0xff]   ;;  %v2756_v28 = vld [vmem:[%s3150_s29 + $0x220] ss:$16 sps:$4 sm:$0xff]  }
  0x24   : > { %1630 = vmatpush1.bf16.msra.mxu0 %v2737_v15  ;;  %v2757_v29 = vld [vmem:[%s3150_s29 + $0x4] ss:$16 sps:$4 sm:$0xff]   ;;  %v2761_v31 = vld [vmem:[%s3150_s29] ss:$16 sps:$4 sm:$0xff]  }
  0x25   : > { %1671 = vmatpush1.bf16.msra.mxu1 %v2738_v16  ;;  %1631 = vmatprep.subr.bf16.mxu0 %v2739_v17  ;;  %v2759_v30 = vld [vmem:[%s3150_s29 + $0x204] ss:$16 sps:$4 sm:$0xff]   ;;  %v2762_v32 = vld [vmem:[%s3150_s29 + $0x200] ss:$16 sps:$4 sm:$0xff]   ;;  %v3099_v17 = vmov 0  }
  0x26   : > { %1672 = vmatprep.subr.bf16.mxu1 %v2741_v18  ;;  %v2763_v33 = vld [vmem:[%s3150_s29 + $0x1e4] ss:$16 sps:$4 sm:$0xff]   ;;  %v2767_v35 = vld [vmem:[%s3150_s29 + $0x1e0] ss:$16 sps:$4 sm:$0xff]  }
  0x27   : > { %v2765_v34 = vld [vmem:[%s3150_s29 + $0x3e4] ss:$16 sps:$4 sm:$0xff]   ;;  %v2768_v36 = vld [vmem:[%s3150_s29 + $0x3e0] ss:$16 sps:$4 sm:$0xff]  }
  0x28   : > { %1632 = vmatpush1.bf16.msra.mxu0 %v2743_v19  ;;  %v2769_v37 = vld [vmem:[%s3150_s29 + $0x1c4] ss:$16 sps:$4 sm:$0xff]   ;;  %v2773_v39 = vld [vmem:[%s3150_s29 + $0x1c0] ss:$16 sps:$4 sm:$0xff]  }
  0x29   : > { %1673 = vmatpush1.bf16.msra.mxu1 %v2744_v20  ;;  %1633 = vmatprep.subr.bf16.mxu0 %v2745_v21  ;;  %v2771_v38 = vld [vmem:[%s3150_s29 + $0x3c4] ss:$16 sps:$4 sm:$0xff]   ;;  %v2774_v40 = vld [vmem:[%s3150_s29 + $0x3c0] ss:$16 sps:$4 sm:$0xff]  }
  0x2a   : > { %1674 = vmatprep.subr.bf16.mxu1 %v2747_v22  ;;  %v2775_v41 = vld [vmem:[%s3150_s29 + $0x1a4] ss:$16 sps:$4 sm:$0xff]   ;;  %v2779_v43 = vld [vmem:[%s3150_s29 + $0x1a0] ss:$16 sps:$4 sm:$0xff]  }
  0x2b   : > { %v2777_v42 = vld [vmem:[%s3150_s29 + $0x3a4] ss:$16 sps:$4 sm:$0xff]   ;;  %v2780_v44 = vld [vmem:[%s3150_s29 + $0x3a0] ss:$16 sps:$4 sm:$0xff]  }
  0x2c   : > { %1634 = vmatpush1.bf16.msra.mxu0 %v2749_v23  ;;  %v2781_v45 = vld [vmem:[%s3150_s29 + $0x184] ss:$16 sps:$4 sm:$0xff]   ;;  %v2785_v50 = vld [vmem:[%s3150_s29 + $0x180] ss:$16 sps:$4 sm:$0xff]  }
  0x2d   : > { %1675 = vmatpush1.bf16.msra.mxu1 %v2750_v24  ;;  %1635 = vmatprep.subr.bf16.mxu0 %v2751_v25  ;;  %v2783_v46 = vld [vmem:[%s3150_s29 + $0x384] ss:$16 sps:$4 sm:$0xff]   ;;  %v2786_v51 = vld [vmem:[%s3150_s29 + $0x380] ss:$16 sps:$4 sm:$0xff]  }
  0x2e   : > { %1676 = vmatprep.subr.bf16.mxu1 %v2753_v26  ;;  %v250_v47 = vld [vmem:[%s3145_s25] sm:$0xff] }
  0x2f   : > { %v3200_v48 = vcombine.high %v250_v47, %v250_v47  ;;  %v2787_v53 = vld [vmem:[%s3150_s29 + $0x164] ss:$16 sps:$4 sm:$0xff]   ;;  %v2791_v55 = vld [vmem:[%s3150_s29 + $0x160] ss:$16 sps:$4 sm:$0xff]   ;;  %v3227_v7 = vcombine.low %v250_v47, %v250_v47 }
  0x30   : > { %1636 = vmatpush1.bf16.msra.mxu0 %v2755_v27  ;;  %v2789_v54 = vld [vmem:[%s3150_s29 + $0x364] ss:$16 sps:$4 sm:$0xff]   ;;  %v2792_v56 = vld [vmem:[%s3150_s29 + $0x360] ss:$16 sps:$4 sm:$0xff]  }
  0x31   : > { %1677 = vmatpush1.bf16.msra.mxu1 %v2756_v28  ;;  %1637 = vmatprep.subr.bf16.mxu0 %v2757_v29  ;;  %v2793_v57 = vld [vmem:[%s3150_s29 + $0x144] ss:$16 sps:$4 sm:$0xff]   ;;  %v2797_v59 = vld [vmem:[%s3150_s29 + $0x140] ss:$16 sps:$4 sm:$0xff]  }
  0x32   : > { %1678 = vmatprep.subr.bf16.mxu1 %v2759_v30  ;;  %1655 = vmatprep.mubr.bf16.mxu0 %v3200_v48  ;;  %v2795_v58 = vld [vmem:[%s3150_s29 + $0x344] ss:$16 sps:$4 sm:$0xff]   ;;  %v2798_v60 = vld [vmem:[%s3150_s29 + $0x340] ss:$16 sps:$4 sm:$0xff]  }
  0x33   : > { %v2799_v61 = vld [vmem:[%s3150_s29 + $0x124] ss:$16 sps:$4 sm:$0xff]   ;;  %v2803_v63 = vld [vmem:[%s3150_s29 + $0x120] ss:$16 sps:$4 sm:$0xff]  }
  0x34   : > { %1638 = vmatpush1.bf16.msra.mxu0 %v2761_v31  ;;  %v2801_v62 = vld [vmem:[%s3150_s29 + $0x324] ss:$16 sps:$4 sm:$0xff]   ;;  %v2804_v0 = vld [vmem:[%s3150_s29 + $0x320] ss:$16 sps:$4 sm:$0xff]  }
  0x35   : > { %1679 = vmatpush1.bf16.msra.mxu1 %v2762_v32  ;;  %1639 = vmatprep.subr.bf16.mxu0 %v2763_v33  ;;  %v2805_v1 = vld [vmem:[%s3150_s29 + $0x104] ss:$16 sps:$4 sm:$0xff]   ;;  %v2809_v3 = vld [vmem:[%s3150_s29 + $0x100] ss:$16 sps:$4 sm:$0xff]  }
  0x36   : > { %1680 = vmatprep.subr.bf16.mxu1 %v2765_v34  ;;  %v2807_v2 = vld [vmem:[%s3150_s29 + $0x304] ss:$16 sps:$4 sm:$0xff]   ;;  %v2810_v4 = vld [vmem:[%s3150_s29 + $0x300] ss:$16 sps:$4 sm:$0xff]  }
  0x37   : > { %v2817_v5 = vld [vmem:[%s3150_s29 + $0x4e4] ss:$16 sps:$4 sm:$0xff]   ;;  %v2815_v9 = vld [vmem:[%s3150_s29 + $0x4e0] ss:$16 sps:$4 sm:$0xff]  }
  0x38   : > { %1640 = vmatpush2.bf16.msra.mxu0 %v2767_v35  ;;  %v2820_v6 = vld [vmem:[%s3150_s29 + $0x6e4] ss:$16 sps:$4 sm:$0xff]   ;;  %v2818_v10 = vld [vmem:[%s3150_s29 + $0x6e0] ss:$16 sps:$4 sm:$0xff]  }
  0x39   : > { %1681 = vmatpush2.bf16.msra.mxu1 %v2768_v36  ;;  %1641 = vmatprep.subr.bf16.mxu0 %v2769_v37  ;;  %v2823_v11 = vld [vmem:[%s3150_s29 + $0x4c4] ss:$16 sps:$4 sm:$0xff]   ;;  %v2821_v13 = vld [vmem:[%s3150_s29 + $0x4c0] ss:$16 sps:$4 sm:$0xff]  }
  0x3a   : > { %1682 = vmatprep.subr.bf16.mxu1 %v2771_v38  ;;  %v2826_v12 = vld [vmem:[%s3150_s29 + $0x6c4] ss:$16 sps:$4 sm:$0xff]   ;;  %v2824_v14 = vld [vmem:[%s3150_s29 + $0x6c0] ss:$16 sps:$4 sm:$0xff]  }
  0x3b   : > { %v2829_v15 = vld [vmem:[%s3150_s29 + $0x4a4] ss:$16 sps:$4 sm:$0xff]   ;;  %v2827_v18 = vld [vmem:[%s3150_s29 + $0x4a0] ss:$16 sps:$4 sm:$0xff]  }
  0x3c   : > { %1642 = vmatpush2.bf16.msra.mxu0 %v2773_v39  ;;  %v2832_v16 = vld [vmem:[%s3150_s29 + $0x6a4] ss:$16 sps:$4 sm:$0xff]   ;;  %v2830_v19 = vld [vmem:[%s3150_s29 + $0x6a0] ss:$16 sps:$4 sm:$0xff]  }
  0x3d   : > { %1683 = vmatpush2.bf16.msra.mxu1 %v2774_v40  ;;  %1643 = vmatprep.subr.bf16.mxu0 %v2775_v41  ;;  %v2835_v20 = vld [vmem:[%s3150_s29 + $0x484] ss:$16 sps:$4 sm:$0xff]   ;;  %v2833_v22 = vld [vmem:[%s3150_s29 + $0x480] ss:$16 sps:$4 sm:$0xff]  }
  0x3e   : > { %1684 = vmatprep.subr.bf16.mxu1 %v2777_v42  ;;  %v2838_v21 = vld [vmem:[%s3150_s29 + $0x684] ss:$16 sps:$4 sm:$0xff]   ;;  %v2836_v23 = vld [vmem:[%s3150_s29 + $0x680] ss:$16 sps:$4 sm:$0xff]  }
  0x3f   : > { %v2841_v24 = vld [vmem:[%s3150_s29 + $0x464] ss:$16 sps:$4 sm:$0xff]   ;;  %v2839_v26 = vld [vmem:[%s3150_s29 + $0x460] ss:$16 sps:$4 sm:$0xff]  }
  0x40   : > { %1644 = vmatpush2.bf16.msra.mxu0 %v2779_v43  ;;  %v2844_v25 = vld [vmem:[%s3150_s29 + $0x664] ss:$16 sps:$4 sm:$0xff]   ;;  %v2842_v27 = vld [vmem:[%s3150_s29 + $0x660] ss:$16 sps:$4 sm:$0xff]   ;;  %v2869_v43 = vld [vmem:[%s3150_s29 + $0xec] ss:$16 sps:$4 sm:$0xff]  }
  0x41   : > { %1685 = vmatpush2.bf16.msra.mxu1 %v2780_v44  ;;  %1645 = vmatprep.subr.bf16.mxu0 %v2781_v45  ;;  %v2847_v28 = vld [vmem:[%s3150_s29 + $0x444] ss:$16 sps:$4 sm:$0xff]   ;;  %v2845_v30 = vld [vmem:[%s3150_s29 + $0x440] ss:$16 sps:$4 sm:$0xff]   ;;  %v3276_v45 = vld [vmem:[%s3145_s25 + $0x18] ss:$0 sps:$4 sm:$0xff]  }
  0x42   : > { %1686 = vmatprep.subr.bf16.mxu1 %v2783_v46  ;;  %v2850_v29 = vld [vmem:[%s3150_s29 + $0x644] ss:$16 sps:$4 sm:$0xff]   ;;  %v2848_v31 = vld [vmem:[%s3150_s29 + $0x640] ss:$16 sps:$4 sm:$0xff]   ;;  %v2867_v46 = vld [vmem:[%s3150_s29 + $0xe8] ss:$16 sps:$4 sm:$0xff]  }
  0x43   : > { %v2853_v32 = vld [vmem:[%s3150_s29 + $0x424] ss:$16 sps:$4 sm:$0xff]   ;;  %v2851_v35 = vld [vmem:[%s3150_s29 + $0x420] ss:$16 sps:$4 sm:$0xff]  }
  0x44   : > { %1646 = vmatpush2.bf16.msra.mxu0 %v2785_v50  ;;  %v2856_v33 = vld [vmem:[%s3150_s29 + $0x624] ss:$16 sps:$4 sm:$0xff]   ;;  %v2854_v37 = vld [vmem:[%s3150_s29 + $0x620] ss:$16 sps:$4 sm:$0xff]  }
  0x45   : > { %1687 = vmatpush2.bf16.msra.mxu1 %v2786_v51  ;;  %1647 = vmatprep.subr.bf16.mxu0 %v2787_v53  ;;  %v3259_v34 = vld [vmem:[%s3145_s25 + $0x10] sm:$0xff]  ;;  %v2873_v51 = vld [vmem:[%s3150_s29 + $0xc8] ss:$16 sps:$4 sm:$0xff]  }
  0x46   : > { %1688 = vmatprep.subr.bf16.mxu1 %v2789_v54  ;;  %v3264_v36 = vcombine.high %v3259_v34, %v3259_v34  ;;  %v2859_v38 = vld [vmem:[%s3150_s29 + $0x404] ss:$16 sps:$4 sm:$0xff]   ;;  %v2857_v40 = vld [vmem:[%s3150_s29 + $0x400] ss:$16 sps:$4 sm:$0xff]   ;;  %v2881_v54 = vld [vmem:[%s3150_s29 + $0xac] ss:$16 sps:$4 sm:$0xff]  }
  0x47   : > { %v2862_v39 = vld [vmem:[%s3150_s29 + $0x604] ss:$16 sps:$4 sm:$0xff]   ;;  %v2860_v41 = vld [vmem:[%s3150_s29 + $0x600] ss:$16 sps:$4 sm:$0xff]  }
  0x48   : > { %1648 = vmatpush2.bf16.msra.mxu0 %v2791_v55  ;;  %v2865_v42 = vld [vmem:[%s3150_s29 + $0x5e4] ss:$16 sps:$4 sm:$0xff]   ;;  %v2863_v44 = vld [vmem:[%s3150_s29 + $0x5e0] ss:$16 sps:$4 sm:$0xff]  }
  0x49   : > { %1689 = vmatpush2.bf16.msra.mxu1 %v2792_v56  ;;  %1649 = vmatprep.subr.bf16.mxu0 %v2793_v57  ;;  %v2872_v47 = vld [vmem:[%s3150_s29 + $0x5c4] ss:$16 sps:$4 sm:$0xff]   ;;  %v2870_v50 = vld [vmem:[%s3150_s29 + $0x5c0] ss:$16 sps:$4 sm:$0xff]   ;;  %v2879_v56 = vld [vmem:[%s3150_s29 + $0xa8] ss:$16 sps:$4 sm:$0xff]  }
  0x4a   : > { %1690 = vmatprep.subr.bf16.mxu1 %v2795_v58  ;;  %v2878_v53 = vld [vmem:[%s3150_s29 + $0x5a4] ss:$16 sps:$4 sm:$0xff]   ;;  %v2876_v55 = vld [vmem:[%s3150_s29 + $0x5a0] ss:$16 sps:$4 sm:$0xff]   ;;  %v2887_v58 = vld [vmem:[%s3150_s29 + $0x8c] ss:$16 sps:$4 sm:$0xff]  }
  0x4b   : > { %v2884_v57 = vld [vmem:[%s3150_s29 + $0x584] ss:$16 sps:$4 sm:$0xff]  }
  0x4c   : > { %1650 = vmatpush2.bf16.msra.mxu0 %v2797_v59  ;;  %v2882_v59 = vld [vmem:[%s3150_s29 + $0x580] ss:$16 sps:$4 sm:$0xff]  }
  0x4d   : > { %1691 = vmatpush2.bf16.msra.mxu1 %v2798_v60  ;;  %1651 = vmatprep.subr.bf16.mxu0 %v2799_v61  ;;  %v2885_v60 = vld [vmem:[%s3150_s29 + $0x88] ss:$16 sps:$4 sm:$0xff]   ;;  %v2893_v61 = vld [vmem:[%s3150_s29 + $0x6c] ss:$16 sps:$4 sm:$0xff]  }
  0x4e   : > { %1692 = vmatprep.subr.bf16.mxu1 %v2801_v62  ;;  %v2888_v62 = vld [vmem:[%s3150_s29 + $0x560] ss:$16 sps:$4 sm:$0xff]  }
  0x50   : > { %1652 = vmatpush2.bf16.msra.mxu0 %v2803_v63  ;;  %v2891_v63 = vld [vmem:[%s3150_s29 + $0x68] ss:$16 sps:$4 sm:$0xff]  }
  0x51   : > { %1693 = vmatpush2.bf16.msra.mxu1 %v2804_v0  ;;  %1653 = vmatprep.subr.bf16.mxu0 %v2805_v1  ;;  %v2896_v0 = vld [vmem:[%s3150_s29 + $0x544] ss:$16 sps:$4 sm:$0xff]   ;;  %v2899_v1 = vld [vmem:[%s3150_s29 + $0x4c] ss:$16 sps:$4 sm:$0xff]  }
  0x52   : > { %1694 = vmatprep.subr.bf16.mxu1 %v2807_v2  ;;  %v2894_v2 = vld [vmem:[%s3150_s29 + $0x540] ss:$16 sps:$4 sm:$0xff]  }
  0x54   : > { %1654 = vmatpush2.bf16.msra.mxu0 %v2809_v3  ;;  %v2897_v3 = vld [vmem:[%s3150_s29 + $0x48] ss:$16 sps:$4 sm:$0xff]  }
  0x55   : > { %1695 = vmatpush2.bf16.msra.mxu1 %v2810_v4  ;;  %1705 = vmatprep.subr.bf16.mxu0 %v2817_v5  ;;  %v2902_v4 = vld [vmem:[%s3150_s29 + $0x524] ss:$16 sps:$4 sm:$0xff]   ;;  %v2905_v5 = vld [vmem:[%s3150_s29 + $0x2c] ss:$16 sps:$4 sm:$0xff]  }
  0x56   : > { %1746 = vmatprep.subr.bf16.mxu1 %v2820_v6  ;;  %v2900_v6 = vld [vmem:[%s3150_s29 + $0x520] ss:$16 sps:$4 sm:$0xff]  }
  0x57   : > { %1656 = vmatmul.mubr.bf16.vlgmr.msra.gmra.mxu0 %v3227_v7 }
  0x58   : > { %1697 = vmatmul.mubr.bf16.vlgmr.msra.gmra.mxu1 %v3229_v8  ;;  %1706 = vmatpush1.bf16.msra.mxu0 %v2815_v9  ;;  %v2903_v9 = vld [vmem:[%s3150_s29 + $0x28] ss:$16 sps:$4 sm:$0xff]  }
  0x59   : > { %1747 = vmatpush1.bf16.msra.mxu1 %v2818_v10  ;;  %1707 = vmatprep.subr.bf16.mxu0 %v2823_v11  ;;  %v2908_v10 = vld [vmem:[%s3150_s29 + $0x504] ss:$16 sps:$4 sm:$0xff]   ;;  %v2911_v11 = vld [vmem:[%s3150_s29 + $0xc] ss:$16 sps:$4 sm:$0xff]  }
  0x5a   : > { %1748 = vmatprep.subr.bf16.mxu1 %v2826_v12  ;;  %1778 = vmatprep.mubr.bf16.mxu1 %v3099_v17  ;;  %v2906_v12 = vld [vmem:[%s3150_s29 + $0x500] ss:$16 sps:$4 sm:$0xff]  }
  0x5b   : > { %1737 = vmatprep.mubr.bf16.mxu0 %v3264_v36 }
  0x5c   : > { %1708 = vmatpush1.bf16.msra.mxu0 %v2821_v13  ;;  %v2909_v13 = vld [vmem:[%s3150_s29 + $0x8] ss:$16 sps:$4 sm:$0xff]  }
  0x5d   : > { %1749 = vmatpush1.bf16.msra.mxu1 %v2824_v14  ;;  %1709 = vmatprep.subr.bf16.mxu0 %v2829_v15  ;;  %v2916_v14 = vld [vmem:[%s3150_s29 + $0x1ec] ss:$16 sps:$4 sm:$0xff]  }
  0x5e   : > { %1750 = vmatprep.subr.bf16.mxu1 %v2832_v16  ;;  %v2919_v15 = vld [vmem:[%s3150_s29 + $0x2ec] ss:$16 sps:$4 sm:$0xff]   ;;  %v3313_v16 = vcombine.low %v3259_v34, %v3259_v34  ;;  %v2941_v34 = vld [vmem:[%s3150_s29 + $0x268] ss:$16 sps:$4 sm:$0xff]  }
  0x60   : > { %1710 = vmatpush1.bf16.msra.mxu0 %v2827_v18  ;;  %v2914_v18 = vld [vmem:[%s3150_s29 + $0x1e8] ss:$16 sps:$4 sm:$0xff]  }
  0x61   : > { %1751 = vmatpush1.bf16.msra.mxu1 %v2830_v19  ;;  %1711 = vmatprep.subr.bf16.mxu0 %v2835_v20  ;;  %v2917_v19 = vld [vmem:[%s3150_s29 + $0x2e8] ss:$16 sps:$4 sm:$0xff]   ;;  %v2922_v20 = vld [vmem:[%s3150_s29 + $0x1cc] ss:$16 sps:$4 sm:$0xff]  }
  0x62   : > { %1752 = vmatprep.subr.bf16.mxu1 %v2838_v21  ;;  %v2925_v21 = vld [vmem:[%s3150_s29 + $0x2cc] ss:$16 sps:$4 sm:$0xff]  }
  0x64   : > { %1712 = vmatpush1.bf16.msra.mxu0 %v2833_v22  ;;  %v2920_v22 = vld [vmem:[%s3150_s29 + $0x1c8] ss:$16 sps:$4 sm:$0xff]  }
  0x65   : > { %1753 = vmatpush1.bf16.msra.mxu1 %v2836_v23  ;;  %1713 = vmatprep.subr.bf16.mxu0 %v2841_v24  ;;  %v2923_v23 = vld [vmem:[%s3150_s29 + $0x2c8] ss:$16 sps:$4 sm:$0xff]   ;;  %v2928_v24 = vld [vmem:[%s3150_s29 + $0x1ac] ss:$16 sps:$4 sm:$0xff]  }
  0x66   : > { %1754 = vmatprep.subr.bf16.mxu1 %v2844_v25  ;;  %v2931_v25 = vld [vmem:[%s3150_s29 + $0x2ac] ss:$16 sps:$4 sm:$0xff]  }
  0x68   : > { %1714 = vmatpush1.bf16.msra.mxu0 %v2839_v26  ;;  %v2926_v26 = vld [vmem:[%s3150_s29 + $0x1a8] ss:$16 sps:$4 sm:$0xff]  }
  0x69   : > { %1755 = vmatpush1.bf16.msra.mxu1 %v2842_v27  ;;  %1715 = vmatprep.subr.bf16.mxu0 %v2847_v28  ;;  %v2929_v27 = vld [vmem:[%s3150_s29 + $0x2a8] ss:$16 sps:$4 sm:$0xff]   ;;  %v2934_v28 = vld [vmem:[%s3150_s29 + $0x18c] ss:$16 sps:$4 sm:$0xff]  }
  0x6a   : > { %1756 = vmatprep.subr.bf16.mxu1 %v2850_v29  ;;  %v2937_v29 = vld [vmem:[%s3150_s29 + $0x28c] ss:$16 sps:$4 sm:$0xff]  }
  0x6c   : > { %1716 = vmatpush1.bf16.msra.mxu0 %v2845_v30  ;;  %v2932_v30 = vld [vmem:[%s3150_s29 + $0x188] ss:$16 sps:$4 sm:$0xff]  }
  0x6d   : > { %1757 = vmatpush1.bf16.msra.mxu1 %v2848_v31  ;;  %1717 = vmatprep.subr.bf16.mxu0 %v2853_v32  ;;  %v2935_v31 = vld [vmem:[%s3150_s29 + $0x288] ss:$16 sps:$4 sm:$0xff]   ;;  %v2943_v32 = vld [vmem:[%s3150_s29 + $0x26c] ss:$16 sps:$4 sm:$0xff]  }
  0x6e   : > { %1758 = vmatprep.subr.bf16.mxu1 %v2856_v33  ;;  %v2938_v33 = vld [vmem:[%s3150_s29 + $0x168] ss:$16 sps:$4 sm:$0xff]  }
  0x70   : > { %1718 = vmatpush1.bf16.msra.mxu0 %v2851_v35  ;;  %v2946_v35 = vld [vmem:[%s3150_s29 + $0x14c] ss:$16 sps:$4 sm:$0xff]  }
  0x71   : > { %1759 = vmatpush1.bf16.msra.mxu1 %v2854_v37  ;;  %1719 = vmatprep.subr.bf16.mxu0 %v2859_v38  ;;  %v2949_v37 = vld [vmem:[%s3150_s29 + $0x24c] ss:$16 sps:$4 sm:$0xff]   ;;  %v2944_v38 = vld [vmem:[%s3150_s29 + $0x148] ss:$16 sps:$4 sm:$0xff]  }
  0x72   : > { %1760 = vmatprep.subr.bf16.mxu1 %v2862_v39  ;;  %v2947_v39 = vld [vmem:[%s3150_s29 + $0x248] ss:$16 sps:$4 sm:$0xff]  }
  0x74   : > { %1720 = vmatpush1.bf16.msra.mxu0 %v2857_v40  ;;  %v2952_v40 = vld [vmem:[%s3150_s29 + $0x12c] ss:$16 sps:$4 sm:$0xff]  }
  0x75   : > { %1761 = vmatpush1.bf16.msra.mxu1 %v2860_v41  ;;  %1721 = vmatprep.subr.bf16.mxu0 %v2865_v42  ;;  %v2955_v41 = vld [vmem:[%s3150_s29 + $0x22c] ss:$16 sps:$4 sm:$0xff]   ;;  %v2950_v42 = vld [vmem:[%s3150_s29 + $0x128] ss:$16 sps:$4 sm:$0xff]  }
  0x76   : > { %1787 = vmatprep.subr.bf16.mxu1 %v2869_v43  ;;  %v2953_v43 = vld [vmem:[%s3150_s29 + $0x228] ss:$16 sps:$4 sm:$0xff]  }
  0x78   : > { %1779 = vmatmul.mubr.bf16.vlgmr.msra.gmra.mxu1 %v3276_v45  ;;  %1722 = vmatpush2.bf16.msra.mxu0 %v2863_v44  ;;  %v2958_v44 = vld [vmem:[%s3150_s29 + $0x10c] ss:$16 sps:$4 sm:$0xff]  }
  0x79   : > { %1788 = vmatpush1.bf16.msra.mxu1 %v2867_v46  ;;  %1723 = vmatprep.subr.bf16.mxu0 %v2872_v47  ;;  %v2961_v46 = vld [vmem:[%s3150_s29 + $0x20c] ss:$16 sps:$4 sm:$0xff]   ;;  %v2956_v47 = vld [vmem:[%s3150_s29 + $0x108] ss:$16 sps:$4 sm:$0xff]  }
  0x7a   : > { %1789 = vmatprep.subr.bf16.mxu1 %v2875_v49  ;;  %1819 = vmatprep.mubr.bf16.mxu1 %v3200_v48  ;;  %v2890_v48 = vld [vmem:[%s3150_s29 + $0x564] ss:$16 sps:$4 sm:$0xff]   ;;  %v2959_v49 = vld [vmem:[%s3150_s29 + $0x208] ss:$16 sps:$4 sm:$0xff]  }
  0x7c   : > { %1724 = vmatpush2.bf16.msra.mxu0 %v2870_v50  ;;  %v2964_v50 = vld [vmem:[%s3150_s29 + $0x3ec] ss:$16 sps:$4 sm:$0xff]  }
  0x7d   : > { %1790 = vmatpush1.bf16.msra.mxu1 %v2873_v51  ;;  %1725 = vmatprep.subr.bf16.mxu0 %v2878_v53  ;;  %v2967_v51 = vld [vmem:[%s3150_s29 + $0x4ec] ss:$16 sps:$4 sm:$0xff]   ;;  %v2962_v53 = vld [vmem:[%s3150_s29 + $0x3e8] ss:$16 sps:$4 sm:$0xff]  }
  0x7e   : > { %1791 = vmatprep.subr.bf16.mxu1 %v2881_v54  ;;  %v2965_v54 = vld [vmem:[%s3150_s29 + $0x4e8] ss:$16 sps:$4 sm:$0xff]  }
  0x80   : > { %1726 = vmatpush2.bf16.msra.mxu0 %v2876_v55  ;;  %v2970_v55 = vld [vmem:[%s3150_s29 + $0x3cc] ss:$16 sps:$4 sm:$0xff]  }
  0x81   : > { %1792 = vmatpush1.bf16.msra.mxu1 %v2879_v56  ;;  %1727 = vmatprep.subr.bf16.mxu0 %v2884_v57  ;;  %v2973_v56 = vld [vmem:[%s3150_s29 + $0x4cc] ss:$16 sps:$4 sm:$0xff]   ;;  %v2968_v57 = vld [vmem:[%s3150_s29 + $0x3c8] ss:$16 sps:$4 sm:$0xff]  }
  0x82   : > { %1793 = vmatprep.subr.bf16.mxu1 %v2887_v58  ;;  %v2971_v58 = vld [vmem:[%s3150_s29 + $0x4c8] ss:$16 sps:$4 sm:$0xff]  }
  0x84   : > { %1728 = vmatpush2.bf16.msra.mxu0 %v2882_v59  ;;  %v2976_v59 = vld [vmem:[%s3150_s29 + $0x3ac] ss:$16 sps:$4 sm:$0xff]  }
  0x85   : > { %1794 = vmatpush1.bf16.msra.mxu1 %v2885_v60  ;;  %1729 = vmatprep.subr.bf16.mxu0 %v2890_v48  ;;  %v2979_v60 = vld [vmem:[%s3150_s29 + $0x4ac] ss:$16 sps:$4 sm:$0xff]   ;;  %v2974_v48 = vld [vmem:[%s3150_s29 + $0x3a8] ss:$16 sps:$4 sm:$0xff]  }
  0x86   : > { %1795 = vmatprep.subr.bf16.mxu1 %v2893_v61  ;;  %v2982_v61 = vld [vmem:[%s3150_s29 + $0x38c] ss:$16 sps:$4 sm:$0xff]  }
  0x88   : > { %1730 = vmatpush2.bf16.msra.mxu0 %v2888_v62  ;;  %v2985_v62 = vld [vmem:[%s3150_s29 + $0x48c] ss:$16 sps:$4 sm:$0xff]  }
  0x89   : > { %1796 = vmatpush1.bf16.msra.mxu1 %v2891_v63  ;;  %1731 = vmatprep.subr.bf16.mxu0 %v2896_v0  ;;  %v2980_v63 = vld [vmem:[%s3150_s29 + $0x388] ss:$16 sps:$4 sm:$0xff]  }
  0x8a   : > { %1797 = vmatprep.subr.bf16.mxu1 %v2899_v1  ;;  %v2983_v0 = vld [vmem:[%s3150_s29 + $0x488] ss:$16 sps:$4 sm:$0xff]   ;;  %v2991_v1 = vld [vmem:[%s3150_s29 + $0x46c] ss:$16 sps:$4 sm:$0xff]  }
  0x8c   : > { %1732 = vmatpush2.bf16.msra.mxu0 %v2894_v2  ;;  %v2986_v2 = vld [vmem:[%s3150_s29 + $0x368] ss:$16 sps:$4 sm:$0xff]  }
  0x8d   : > { %1798 = vmatpush1.bf16.msra.mxu1 %v2897_v3  ;;  %1733 = vmatprep.subr.bf16.mxu0 %v2902_v4  ;;  %v2989_v3 = vld [vmem:[%s3150_s29 + $0x468] ss:$16 sps:$4 sm:$0xff]   ;;  %v2994_v4 = vld [vmem:[%s3150_s29 + $0x34c] ss:$16 sps:$4 sm:$0xff]  }
  0x8e   : > { %1799 = vmatprep.subr.bf16.mxu1 %v2905_v5  ;;  %v2997_v5 = vld [vmem:[%s3150_s29 + $0x44c] ss:$16 sps:$4 sm:$0xff]  }
  0x90   : > { %1734 = vmatpush2.bf16.msra.mxu0 %v2900_v6  ;;  %v2992_v6 = vld [vmem:[%s3150_s29 + $0x348] ss:$16 sps:$4 sm:$0xff]  }
  0x91   : > { %1800 = vmatpush1.bf16.msra.mxu1 %v2903_v9  ;;  %1735 = vmatprep.subr.bf16.mxu0 %v2908_v10  ;;  %v2995_v9 = vld [vmem:[%s3150_s29 + $0x448] ss:$16 sps:$4 sm:$0xff]   ;;  %v3000_v10 = vld [vmem:[%s3150_s29 + $0x32c] ss:$16 sps:$4 sm:$0xff]  }
  0x92   : > { %1801 = vmatprep.subr.bf16.mxu1 %v2911_v11  ;;  %v3003_v11 = vld [vmem:[%s3150_s29 + $0x42c] ss:$16 sps:$4 sm:$0xff]  }
  0x94   : > { %1736 = vmatpush2.bf16.msra.mxu0 %v2906_v12  ;;  %v2998_v12 = vld [vmem:[%s3150_s29 + $0x328] ss:$16 sps:$4 sm:$0xff]  }
  0x95   : > { %1802 = vmatpush1.bf16.msra.mxu1 %v2909_v13  ;;  %1828 = vmatprep.subr.bf16.mxu0 %v2919_v15  ;;  %v3001_v13 = vld [vmem:[%s3150_s29 + $0x428] ss:$16 sps:$4 sm:$0xff]   ;;  %v3009_v15 = vld [vmem:[%s3150_s29 + $0x40c] ss:$16 sps:$4 sm:$0xff]  }
  0x96   : > { %1803 = vmatprep.subr.bf16.mxu1 %v2916_v14  ;;  %v3006_v14 = vld [vmem:[%s3150_s29 + $0x30c] ss:$16 sps:$4 sm:$0xff]  }
  0x97   : > { %1738 = vmatmul.mubr.bf16.vlgmr.msra.gmra.mxu0 %v3313_v16 }
  0x98   : > { %1829 = vmatpush1.bf16.msra.mxu0 %v2917_v19  ;;  %1860 = vmatprep.mubr.bf16.mxu0 %v3205_v52  ;;  %v2940_v52 = vld [vmem:[%s3150_s29 + $0x16c] ss:$16 sps:$4 sm:$0xff]   ;;  %v3007_v19 = vld [vmem:[%s3150_s29 + $0x408] ss:$16 sps:$4 sm:$0xff]  }
  0x99   : > { %1804 = vmatpush2.bf16.msra.mxu1 %v2914_v18  ;;  %1830 = vmatprep.subr.bf16.mxu0 %v2925_v21  ;;  %v3004_v18 = vld [vmem:[%s3150_s29 + $0x308] ss:$16 sps:$4 sm:$0xff]   ;;  %v3015_v21 = vld [vmem:[%s3150_s29 + $0x6ec] ss:$16 sps:$4 sm:$0xff]  }
  0x9a   : > { %1805 = vmatprep.subr.bf16.mxu1 %v2922_v20  ;;  %v3012_v20 = vld [vmem:[%s3150_s29 + $0x5ec] ss:$16 sps:$4 sm:$0xff]  }
  0x9c   : > { %1831 = vmatpush1.bf16.msra.mxu0 %v2923_v23  ;;  %v3013_v23 = vld [vmem:[%s3150_s29 + $0x6e8] ss:$16 sps:$4 sm:$0xff]  }
  0x9d   : > { %1806 = vmatpush2.bf16.msra.mxu1 %v2920_v22  ;;  %1832 = vmatprep.subr.bf16.mxu0 %v2931_v25  ;;  %v3010_v22 = vld [vmem:[%s3150_s29 + $0x5e8] ss:$16 sps:$4 sm:$0xff]   ;;  %v3021_v25 = vld [vmem:[%s3150_s29 + $0x6cc] ss:$16 sps:$4 sm:$0xff]  }
  0x9e   : > { %1807 = vmatprep.subr.bf16.mxu1 %v2928_v24  ;;  %v3018_v24 = vld [vmem:[%s3150_s29 + $0x5cc] ss:$16 sps:$4 sm:$0xff]  }
  0xa0   : > { %1833 = vmatpush1.bf16.msra.mxu0 %v2929_v27  ;;  %v3019_v27 = vld [vmem:[%s3150_s29 + $0x6c8] ss:$16 sps:$4 sm:$0xff]  }
  0xa1   : > { %1808 = vmatpush2.bf16.msra.mxu1 %v2926_v26  ;;  %1834 = vmatprep.subr.bf16.mxu0 %v2937_v29  ;;  %v3016_v26 = vld [vmem:[%s3150_s29 + $0x5c8] ss:$16 sps:$4 sm:$0xff]   ;;  %v3027_v29 = vld [vmem:[%s3150_s29 + $0x6ac] ss:$16 sps:$4 sm:$0xff]  }
  0xa2   : > { %1809 = vmatprep.subr.bf16.mxu1 %v2934_v28  ;;  %v3024_v28 = vld [vmem:[%s3150_s29 + $0x5ac] ss:$16 sps:$4 sm:$0xff]  }
  0xa4   : > { %1835 = vmatpush1.bf16.msra.mxu0 %v2935_v31  ;;  %v3030_v31 = vld [vmem:[%s3150_s29 + $0x58c] ss:$16 sps:$4 sm:$0xff]  }
  0xa5   : > { %1810 = vmatpush2.bf16.msra.mxu1 %v2932_v30  ;;  %1836 = vmatprep.subr.bf16.mxu0 %v2943_v32  ;;  %v3022_v30 = vld [vmem:[%s3150_s29 + $0x5a8] ss:$16 sps:$4 sm:$0xff]  }
  0xa6   : > { %1811 = vmatprep.subr.bf16.mxu1 %v2940_v52  ;;  %v3033_v52 = vld [vmem:[%s3150_s29 + $0x68c] ss:$16 sps:$4 sm:$0xff]   ;;  %v3028_v32 = vld [vmem:[%s3150_s29 + $0x588] ss:$16 sps:$4 sm:$0xff]  }
  0xa8   : > { %1837 = vmatpush1.bf16.msra.mxu0 %v2941_v34  ;;  %v3039_v34 = vld [vmem:[%s3150_s29 + $0x66c] ss:$16 sps:$4 sm:$0xff]  }
  0xa9   : > { %1812 = vmatpush2.bf16.msra.mxu1 %v2938_v33  ;;  %1838 = vmatprep.subr.bf16.mxu0 %v2949_v37  ;;  %v3031_v33 = vld [vmem:[%s3150_s29 + $0x688] ss:$16 sps:$4 sm:$0xff]  }
  0xaa   : > { %1813 = vmatprep.subr.bf16.mxu1 %v2946_v35  ;;  %v3034_v35 = vld [vmem:[%s3150_s29 + $0x568] ss:$16 sps:$4 sm:$0xff]  }
  0xab   : > { %v3037_v37 = vld [vmem:[%s3150_s29 + $0x668] ss:$16 sps:$4 sm:$0xff]  }
  0xac   : > { %1839 = vmatpush1.bf16.msra.mxu0 %v2947_v39  ;;  %v3045_v39 = vld [vmem:[%s3150_s29 + $0x64c] ss:$16 sps:$4 sm:$0xff]  }
  0xad   : > { %1814 = vmatpush2.bf16.msra.mxu1 %v2944_v38  ;;  %1840 = vmatprep.subr.bf16.mxu0 %v2955_v41  ;;  %v3042_v38 = vld [vmem:[%s3150_s29 + $0x54c] ss:$16 sps:$4 sm:$0xff]   ;;  %v3043_v41 = vld [vmem:[%s3150_s29 + $0x648] ss:$16 sps:$4 sm:$0xff]  }
  0xae   : > { %1815 = vmatprep.subr.bf16.mxu1 %v2952_v40  ;;  %v3040_v40 = vld [vmem:[%s3150_s29 + $0x548] ss:$16 sps:$4 sm:$0xff]  }
  0xb0   : > { %1841 = vmatpush1.bf16.msra.mxu0 %v2953_v43  ;;  %v3051_v43 = vld [vmem:[%s3150_s29 + $0x62c] ss:$16 sps:$4 sm:$0xff]  }
  0xb1   : > { %1816 = vmatpush2.bf16.msra.mxu1 %v2950_v42  ;;  %1842 = vmatprep.subr.bf16.mxu0 %v2961_v46  ;;  %v3048_v42 = vld [vmem:[%s3150_s29 + $0x52c] ss:$16 sps:$4 sm:$0xff]   ;;  %v3049_v46 = vld [vmem:[%s3150_s29 + $0x628] ss:$16 sps:$4 sm:$0xff]  }
  0xb2   : > { %1817 = vmatprep.subr.bf16.mxu1 %v2958_v44  ;;  %v3046_v44 = vld [vmem:[%s3150_s29 + $0x528] ss:$16 sps:$4 sm:$0xff]  }
  0xb4   : > { %1843 = vmatpush1.bf16.msra.mxu0 %v2959_v49  ;;  %v3057_v49 = vld [vmem:[%s3150_s29 + $0x60c] ss:$16 sps:$4 sm:$0xff]  }
  0xb5   : > { %1818 = vmatpush2.bf16.msra.mxu1 %v2956_v47  ;;  %1844 = vmatprep.subr.bf16.mxu0 %v2964_v50  ;;  %v3054_v47 = vld [vmem:[%s3150_s29 + $0x50c] ss:$16 sps:$4 sm:$0xff]   ;;  %v3052_v50 = vld [vmem:[%s3150_s29 + $0x508] ss:$16 sps:$4 sm:$0xff]  }
  0xb6   : > { %1869 = vmatprep.subr.bf16.mxu1 %v2967_v51  ;;  %v3055_v51 = vld [vmem:[%s3150_s29 + $0x608] ss:$16 sps:$4 sm:$0xff]  }
  0xb8   : > { %1820 = vmatmul.mubr.bf16.vlgmr.msra.gmra.mxu1 %v3227_v7  ;;  %1845 = vmatpush2.bf16.msra.mxu0 %v2962_v53  ;;  %v2977_v7 = vld [vmem:[%s3150_s29 + $0x4a8] ss:$16 sps:$4 sm:$0xff]  }
  0xb9   : > { %1870 = vmatpush1.bf16.msra.mxu1 %v2965_v54  ;;  %1846 = vmatprep.subr.bf16.mxu0 %v2970_v55 }
  0xba   : > { %1871 = vmatprep.subr.bf16.mxu1 %v2973_v56  ;;  %1901 = vmatprep.mubr.bf16.mxu1 %v3264_v36  ;;  %v2988_v36 = vld [vmem:[%s3150_s29 + $0x36c] ss:$16 sps:$4 sm:$0xff]  }
  0xbc   : > { %1847 = vmatpush2.bf16.msra.mxu0 %v2968_v57 }
  0xbd   : > { %1872 = vmatpush1.bf16.msra.mxu1 %v2971_v58  ;;  %1848 = vmatprep.subr.bf16.mxu0 %v2976_v59 }
  0xbe   : > { %1873 = vmatprep.subr.bf16.mxu1 %v2979_v60 }
  0xc0   : > { %1849 = vmatpush2.bf16.msra.mxu0 %v2974_v48 }
  0xc1   : > { %1874 = vmatpush1.bf16.msra.mxu1 %v2977_v7  ;;  %1850 = vmatprep.subr.bf16.mxu0 %v2982_v61 }
  0xc2   : > { %1875 = vmatprep.subr.bf16.mxu1 %v2985_v62 }
  0xc4   : > { %1851 = vmatpush2.bf16.msra.mxu0 %v2980_v63 }
  0xc5   : > { %1876 = vmatpush1.bf16.msra.mxu1 %v2983_v0  ;;  %1852 = vmatprep.subr.bf16.mxu0 %v2988_v36 }
  0xc6   : > { %1877 = vmatprep.subr.bf16.mxu1 %v2991_v1 }
  0xc8   : > { %1853 = vmatpush2.bf16.msra.mxu0 %v2986_v2  ;;  %v246_v2 = vld [vmem:[#allocation2 + $0x10] sm:$0xff] }
  0xc9   : > { %1878 = vmatpush1.bf16.msra.mxu1 %v2989_v3  ;;  %1854 = vmatprep.subr.bf16.mxu0 %v2994_v4  ;;  %v247_v4 = vld [vmem:[#allocation2] sm:$0xff] }
  0xca   : > { %1879 = vmatprep.subr.bf16.mxu1 %v2997_v5 }
  0xcc   : > { %1855 = vmatpush2.bf16.msra.mxu0 %v2992_v6 }
  0xcd   : > { %1880 = vmatpush1.bf16.msra.mxu1 %v2995_v9  ;;  %1856 = vmatprep.subr.bf16.mxu0 %v3000_v10 }
  0xce   : > { %1881 = vmatprep.subr.bf16.mxu1 %v3003_v11 }
  0xd0   : > { %1857 = vmatpush2.bf16.msra.mxu0 %v2998_v12 }
  0xd1   : > { %1882 = vmatpush1.bf16.msra.mxu1 %v3001_v13  ;;  %1858 = vmatprep.subr.bf16.mxu0 %v3006_v14 }
  0xd2   : > { %1883 = vmatprep.subr.bf16.mxu1 %v3009_v15 }
  0xd4   : > { %1859 = vmatpush2.bf16.msra.mxu0 %v3004_v18 }
  0xd5   : > { %1884 = vmatpush1.bf16.msra.mxu1 %v3007_v19  ;;  %1910 = vmatprep.subr.bf16.mxu0 %v3015_v21 }
  0xd6   : > { %1885 = vmatprep.subr.bf16.mxu1 %v3012_v20 }
  0xd7   : > { %1861 = vmatmul.mubr.bf16.vlgmr.msra.gmra.mxu0 %v3229_v8  ;;  %v3025_v8 = vld [vmem:[%s3150_s29 + $0x6a8] ss:$16 sps:$4 sm:$0xff]  }
  0xd8   : > { %1911 = vmatpush1.bf16.msra.mxu0 %v3013_v23  ;;  %1942 = vmatprep.mubr.bf16.mxu0 %v3099_v17  ;;  %v3036_v17 = vld [vmem:[%s3150_s29 + $0x56c] ss:$16 sps:$4 sm:$0xff]  }
  0xd9   : > { %1886 = vmatpush2.bf16.msra.mxu1 %v3010_v22  ;;  %1912 = vmatprep.subr.bf16.mxu0 %v3021_v25 }
  0xda   : > { %1887 = vmatprep.subr.bf16.mxu1 %v3018_v24 }
  0xdc   : > { %1913 = vmatpush1.bf16.msra.mxu0 %v3019_v27  ;;  %v248_v27 = vld [vmem:[#allocation2 + $0x18] sm:$0xff] }
  0xdd   : > { %1888 = vmatpush2.bf16.msra.mxu1 %v3016_v26  ;;  %1914 = vmatprep.subr.bf16.mxu0 %v3027_v29 }
  0xde   : > { %1889 = vmatprep.subr.bf16.mxu1 %v3024_v28 }
  0xe0   : > { %1915 = vmatpush1.bf16.msra.mxu0 %v3025_v8 }
  0xe1   : > { %1890 = vmatpush2.bf16.msra.mxu1 %v3022_v30  ;;  %1916 = vmatprep.subr.bf16.mxu0 %v3033_v52 }
  0xe2   : > { %1891 = vmatprep.subr.bf16.mxu1 %v3030_v31  ;;  %v249_v31 = vld [vmem:[#allocation2 + $0x8] sm:$0xff] }
  0xe4   : > { %1917 = vmatpush1.bf16.msra.mxu0 %v3031_v33 }
  0xe5   : > { %1892 = vmatpush2.bf16.msra.mxu1 %v3028_v32  ;;  %1918 = vmatprep.subr.bf16.mxu0 %v3039_v34 }
  0xe6   : > { %1893 = vmatprep.subr.bf16.mxu1 %v3036_v17 }
  0xe8   : > { %1919 = vmatpush1.bf16.msra.mxu0 %v3037_v37 }
  0xe9   : > { %1894 = vmatpush2.bf16.msra.mxu1 %v3034_v35  ;;  %1920 = vmatprep.subr.bf16.mxu0 %v3045_v39 }
  0xea   : > { %1895 = vmatprep.subr.bf16.mxu1 %v3042_v38 }
  0xec   : > { %1921 = vmatpush1.bf16.msra.mxu0 %v3043_v41 }
  0xed   : > { %1896 = vmatpush2.bf16.msra.mxu1 %v3040_v40  ;;  %1922 = vmatprep.subr.bf16.mxu0 %v3051_v43 }
  0xee   : > { %1897 = vmatprep.subr.bf16.mxu1 %v3048_v42 }
  0xf0   : > { %1923 = vmatpush1.bf16.msra.mxu0 %v3049_v46 }
  0xf1   : > { %1898 = vmatpush2.bf16.msra.mxu1 %v3046_v44  ;;  %1924 = vmatprep.subr.bf16.mxu0 %v3057_v49 }
  0xf2   : > { %1899 = vmatprep.subr.bf16.mxu1 %v3054_v47 }
  0xf4   : > { %1925 = vmatpush1.bf16.msra.mxu0 %v3055_v51 }
  0xf5   : > { %1900 = vmatpush2.bf16.msra.mxu1 %v3052_v50 }
  0xf7   : > { %1943 = vmatmul.mubr.bf16.vlgmr.msra.gmra.mxu0 %v3276_v45 }
  0xf8   : > { %1902 = vmatmul.mubr.bf16.vlgmr.msra.gmra.mxu1 %v3313_v16 }
 0x117   : > { %v1657_v53 = vpop.f32.mrf.mxu0 }
 0x118   : > { %v1698_v54 = vpop.f32.mrf.mxu1 }
 0x119   : > { %v1659_v55 = vpop.f32.mrf.mxu0  ;;  %v1699_v63 = vadd.f32 %v1698_v54, %v1657_v53 }
 0x11a   : > { %v1700_v56 = vpop.f32.mrf.mxu1 }
 0x11b   : > { %v1661_v57 = vpop.f32.mrf.mxu0  ;;  %v1701_v36 = vadd.f32 %v1700_v56, %v1659_v55 }
 0x11c   : > { %v1702_v58 = vpop.f32.mrf.mxu1 }
 0x11d   : > { %v1662_v59 = vpop.f32.mrf.mxu0 }
 0x11e   : > { %v1703_v60 = vpop.f32.mrf.mxu1 }
 0x138   : > { %v1780_v48 = vpop.f32.mrf.mxu1 }
 0x13a   : > { %v1782_v7 = vpop.f32.mrf.mxu1 }
 0x13c   : > { %v1784_v61 = vpop.f32.mrf.mxu1 }
 0x13e   : > { %v1785_v62 = vpop.f32.mrf.mxu1 }
 0x157   : > { %v1739_v0 = vpop.f32.mrf.mxu0 }
 0x158   : > { %v1740_v1 = vadd.f32 %v1739_v0, %v1699_v63 }
 0x159   : > { %v1741_v16 = vpop.f32.mrf.mxu0 }
 0x15a   : > { %v1781_v3 = vadd.f32 %v1780_v48, %v1740_v1  ;;  %v1742_v45 = vadd.f32 %v1741_v16, %v1701_v36 }
 0x15b   : > { %v1743_v5 = vpop.f32.mrf.mxu0 }
 0x15c   : > { %v1951_v6 = vadd.f32 %v1781_v3, %v246_v2  ;;  %v1783_v9 = vadd.f32 %v1782_v7, %v1742_v45 }
 0x15d   : > { %v1744_v10 = vpop.f32.mrf.mxu0 }
 0x15e   : > { %1955 = vst [vmem:[#allocation2 + $0x10] sm:$0xff] %v1951_v6  ;;  %v1952_v11 = vadd.f32 %v1783_v9, %v247_v4 }
 0x160   : > { %1956 = vst [vmem:[#allocation2] sm:$0xff] %v1952_v11 }
 0x178   : > { %v1821_v12 = vpop.f32.mrf.mxu1 }
 0x17a   : > { %v1823_v13 = vpop.f32.mrf.mxu1 }
 0x17c   : > { %v1825_v14 = vpop.f32.mrf.mxu1 }
 0x17e   : > { %v1826_v15 = vpop.f32.mrf.mxu1 }
 0x197   : > { %v1862_v18 = vpop.f32.mrf.mxu0 }
 0x198   : > { %v1863_v22 = vadd.f32 %v1862_v18, %v1821_v12 }
 0x199   : > { %v1864_v19 = vpop.f32.mrf.mxu0 }
 0x19a   : > { %v1865_v25 = vadd.f32 %v1864_v19, %v1823_v13 }
 0x19b   : > { %v1866_v20 = vpop.f32.mrf.mxu0 }
 0x19d   : > { %v1867_v21 = vpop.f32.mrf.mxu0 }
 0x1b7   : > { %v1944_v24 = vpop.f32.mrf.mxu0 }
 0x1b8   : > { %v1903_v23 = vpop.f32.mrf.mxu1 }
 0x1b9   : > { %v1904_v26 = vadd.f32 %v1903_v23, %v1863_v22  ;;  %v1946_v29 = vpop.f32.mrf.mxu0 }
 0x1ba   : > { %v1905_v28 = vpop.f32.mrf.mxu1 }
 0x1bb   : > { %v1945_v30 = vadd.f32 %v1944_v24, %v1904_v26  ;;  %v1906_v8 = vadd.f32 %v1905_v28, %v1865_v25  ;;  %v1948_v32 = vpop.f32.mrf.mxu0 }
 0x1bc   : > { %v1907_v52 = vpop.f32.mrf.mxu1 }
 0x1bd   : > { %v1953_v33 = vadd.f32 %v1945_v30, %v248_v27  ;;  %v1947_v17 = vadd.f32 %v1946_v29, %v1906_v8  ;;  %v1949_v35 = vpop.f32.mrf.mxu0  ;;  %1962 = sbr.rel (%p2624_p6) target bundleno = 686 (0x2ae), region = 48 }
 0x1be   : > { %v1908_v34 = vpop.f32.mrf.mxu1 }
 0x1bf   : > { %1957 = vst [vmem:[#allocation2 + $0x18] sm:$0xff] %v1953_v33  ;;  %v1954_v37 = vadd.f32 %v1947_v17, %v249_v31 }
 0x1c1   : > { %1958 = vst [vmem:[#allocation2 + $0x8] sm:$0xff] %v1954_v37 }
 0x1c2   : > { %v3058_v38 = vld [vmem:[%s3529_s3 + $0x78] sm:$0xff]   ;;  %v3062_v42 = vld [vmem:[%s3529_s3 + $0x70] sm:$0xff]   ;;  %v3066_v47 = vld [vmem:[%s3529_s3 + $0x68] sm:$0xff]   ;;  %v1969_v60 = vlaneseq }
 0x1c3   : > { %v3059_v39 = vld [vmem:[%s3529_s3 + $0xf8] sm:$0xff]   ;;  %2661 = vmatprep.subr.bf16.mxu0 %v3058_v38  ;;  %v3063_v43 = vld [vmem:[%s3529_s3 + $0xf0] sm:$0xff]   ;;  %v3067_v49 = vld [vmem:[%s3529_s3 + $0xe8] sm:$0xff]  }
 0x1c4   : > { %v3060_v40 = vld [vmem:[%s3529_s3 + $0x38] sm:$0xff]   ;;  %2683 = vmatprep.subr.bf16.mxu1 %v3059_v39  ;;  %v3064_v44 = vld [vmem:[%s3529_s3 + $0x30] sm:$0xff]   ;;  %v3068_v50 = vld [vmem:[%s3529_s3 + $0x28] sm:$0xff]   ;;  %v1970_v63 = vshrl.u32 %v1969_v60, 7 }
 0x1c5   : > { %v3061_v41 = vld [vmem:[%s3529_s3 + $0xb8] sm:$0xff]   ;;  %2662 = vmatpush3.bf16.msra.mxu0 %v3060_v40  ;;  %v3065_v46 = vld [vmem:[%s3529_s3 + $0xb0] sm:$0xff]   ;;  %v3069_v51 = vld [vmem:[%s3529_s3 + $0xa8] sm:$0xff]  }
 0x1c6   : > { %2684 = vmatpush3.bf16.msra.mxu1 %v3061_v41  ;;  %2663 = vmatprep.subr.bf16.mxu0 %v3062_v42  ;;  %v3070_v53 = vld [vmem:[%s3529_s3 + $0x60] sm:$0xff]   ;;  %v3074_v57 = vld [vmem:[%s3529_s3 + $0x58] sm:$0xff]   ;;  %v3078_v7 = vld [vmem:[%s3529_s3 + $0x50] sm:$0xff]   ;;  %v1975_v16 = vsub.s32 1, %v1970_v63  ;;  %v1983_v45 = vsub.s32 3, %v1970_v63  ;;  %v1971_v5 = vsub.s32 0, %v1970_v63 }
 0x1c7   : > { %2685 = vmatprep.subr.bf16.mxu1 %v3063_v43  ;;  %v3071_v54 = vld [vmem:[%s3529_s3 + $0xe0] sm:$0xff]   ;;  %v3075_v58 = vld [vmem:[%s3529_s3 + $0xd8] sm:$0xff]   ;;  %v3079_v61 = vld [vmem:[%s3529_s3 + $0xd0] sm:$0xff]   ;;  %v1979_v9 = vsub.s32 2, %v1970_v63 }
 0x1c8   : > { %v3072_v55 = vld [vmem:[%s3529_s3 + $0x20] sm:$0xff]   ;;  %v3076_v59 = vld [vmem:[%s3529_s3 + $0x18] sm:$0xff]   ;;  %v3080_v62 = vld [vmem:[%s3529_s3 + $0x10] sm:$0xff]  }
 0x1c9   : > { %2664 = vmatpush3.bf16.msra.mxu0 %v3064_v44  ;;  %v3073_v56 = vld [vmem:[%s3529_s3 + $0xa0] sm:$0xff]   ;;  %v3077_v48 = vld [vmem:[%s3529_s3 + $0x98] sm:$0xff]   ;;  %v3081_v0 = vld [vmem:[%s3529_s3 + $0x90] sm:$0xff]  }
 0x1ca   : > { %2686 = vmatpush3.bf16.msra.mxu1 %v3065_v46  ;;  %2665 = vmatprep.subr.bf16.mxu0 %v3066_v47  ;;  %v3082_v36 = vld [vmem:[%s3529_s3 + $0x48] sm:$0xff]   ;;  %v3086_v4 = vld [vmem:[%s3529_s3 + $0x40] sm:$0xff]   ;;  %v1963_v19 = vld [vmem:[#allocation2 + $0x10] sm:$0xff] }
 0x1cb   : > { %2687 = vmatprep.subr.bf16.mxu1 %v3067_v49  ;;  %v3083_v1 = vld [vmem:[%s3529_s3 + $0xc8] sm:$0xff]   ;;  %v3087_v6 = vld [vmem:[%s3529_s3 + $0xc0] sm:$0xff]   ;;  %v1965_v21 = vld [vmem:[#allocation2 + $0x18] sm:$0xff] }
 0x1cc   : > { %v3084_v2 = vld [vmem:[%s3529_s3 + $0x8] sm:$0xff]   ;;  %v3088_v10 = vld [vmem:[%s3529_s3] sm:$0xff]  }
 0x1cd   : > { %2666 = vmatpush3.bf16.msra.mxu0 %v3068_v50  ;;  %v3085_v3 = vld [vmem:[%s3529_s3 + $0x88] sm:$0xff]   ;;  %v3089_v11 = vld [vmem:[%s3529_s3 + $0x80] sm:$0xff]  }
 0x1ce   : > { %2688 = vmatpush3.bf16.msra.mxu1 %v3069_v51  ;;  %2667 = vmatprep.subr.bf16.mxu0 %v3070_v53  ;;  %v1964_v12 = vld [vmem:[#allocation2] sm:$0xff]  ;;  %v1966_v14 = vld [vmem:[#allocation2 + $0x8] sm:$0xff] }
 0x1cf   : > { %2689 = vmatprep.subr.bf16.mxu1 %v3071_v54  ;;  %v1967_v13 = vld [vmem:[%s3528_s2] sm:$0xf] }
 0x1d0   : > { %v1976_v15 = vrot.slane %v1967_v13, %v1975_v16  ;;  %v1984_v18 = vrot.slane %v1967_v13, %v1983_v45  ;;  %v1972_v20 = vrot.slane %v1967_v13, %v1971_v5  ;;  %v1980_v22 = vrot.slane %v1967_v13, %v1979_v9  ;;  %v2625_v34 = vld [vmem:[%s3530_s4] ss:$0 sm:$0xff] }
 0x1d1   : > { %2668 = vmatpush3.bf16.msra.mxu0 %v3072_v55 }
 0x1d2   : > { %2690 = vmatpush3.bf16.msra.mxu1 %v3073_v56  ;;  %2669 = vmatprep.subr.bf16.mxu0 %v3074_v57  ;;  %v1990_v23 = vadd.f32 %v1976_v15, %v1964_v12  ;;  %v1992_v24 = vadd.f32 %v1984_v18, %v1966_v14  ;;  %v1989_v25 = vadd.f32 %v1972_v20, %v1963_v19 }
 0x1d3   : > { %2691 = vmatprep.subr.bf16.mxu1 %v3075_v58  ;;  %v1991_v26 = vadd.f32 %v1980_v22, %v1965_v21 }
 0x1d4   : > { %v1994_v27 = vmax.f32 %v1990_v23, 0.0  ;;  %v1996_v28 = vmax.f32 %v1992_v24, 0.0  ;;  %v1993_v29 = vmax.f32 %v1989_v25, 0.0 }
 0x1d5   : > { %2670 = vmatpush3.bf16.msra.mxu0 %v3076_v59  ;;  %v1995_v30 = vmax.f32 %v1991_v26, 0.0 }
 0x1d6   : > { %2692 = vmatpush3.bf16.msra.mxu1 %v3077_v48  ;;  %2671 = vmatprep.subr.bf16.mxu0 %v3078_v7  ;;  %v1998_v8 = vpack.c.bf16 %v1994_v27, %v1994_v27  ;;  %v2000_v31 = vpack.c.bf16 %v1996_v28, %v1996_v28  ;;  %v1997_v52 = vpack.c.bf16 %v1993_v29, %v1993_v29 }
 0x1d7   : > { %2693 = vmatprep.subr.bf16.mxu1 %v3079_v61  ;;  %v1999_v32 = vpack.c.bf16 %v1995_v30, %v1995_v30 }
 0x1d8   : > { %2296 = vmatprep.mubr.bf16.mxu0 %v1998_v8  ;;  %2336 = vmatprep.mubr.bf16.mxu1 %v2000_v31 }
 0x1d9   : > { %2672 = vmatpush3.bf16.msra.mxu0 %v3080_v62 }
 0x1da   : > { %2694 = vmatpush3.bf16.msra.mxu1 %v3081_v0  ;;  %2673 = vmatprep.subr.bf16.mxu0 %v3082_v36 }
 0x1db   : > { %2695 = vmatprep.subr.bf16.mxu1 %v3083_v1 }
 0x1dd   : > { %2674 = vmatpush3.bf16.msra.mxu0 %v3084_v2 }
 0x1de   : > { %2696 = vmatpush3.bf16.msra.mxu1 %v3085_v3  ;;  %2675 = vmatprep.subr.bf16.mxu0 %v3086_v4 }
 0x1df   : > { %2697 = vmatprep.subr.bf16.mxu1 %v3087_v6 }
 0x1e1   : > { %2676 = vmatpush3.bf16.msra.mxu0 %v3088_v10 }
 0x1e2   : > { %2698 = vmatpush3.bf16.msra.mxu1 %v3089_v11 }
 0x1e4   : > { %2297 = vmatmul.mubr.bf16.vlgmr.msra.gmra.mxu0 %v1997_v52 }
 0x1e5   : > { %2337 = vmatmul.mubr.bf16.vlgmr.msra.gmra.mxu1 %v1999_v32 }
 0x2a4   : > { %v2677_v33 = vpop.f32.mrf.mxu0 }
 0x2a5   : > { %v2699_v17 = vpop.f32.mrf.mxu1 }
 0x2a6   : > { %v2678_v35 = vpop.f32.mrf.mxu0 }
 0x2a7   : > { %v2700_v37 = vpop.f32.mrf.mxu1  ;;  %v2679_v38 = vadd.f32 %v2678_v35, %v2677_v33 }
 0x2a8   : > { %v2680_v39 = vpop.f32.mrf.mxu0  ;;  %v2701_v42 = vadd.f32 %v2700_v37, %v2699_v17 }
 0x2a9   : > { %v2702_v40 = vpop.f32.mrf.mxu1  ;;  %v2299_v41 = vadd.f32 %v2679_v38, %v2625_v34 }
 0x2aa   : > { %v2681_v43 = vpop.f32.mrf.mxu0 }
 0x2ab   : > { %v2703_v44 = vpop.f32.mrf.mxu1  ;;  %v2339_v46 = vadd.f32 %v2701_v42, %v2299_v41 }
 0x2ad   : > { %2344 = vst [vmem:[%s3531_s5] sm:$0xff] %v2339_v46 }
 0x2ae PF: > { %s15_s18 = sadd.s32 1, %s3096_s18  }
 0x2af   : > { %p12_p7 = scmp.ge.s32.totalorder %s15_s18, 9  }
 0x2b1   :  { %14 = sbr.rel (!%p12_p7) target bundleno = 1 (0x1), region = 77 }

// kernel: qimage_forward.8
= control target key start
LH: loop header
LB: loop body
LE: loop exit
PB: predicated region body
PF: predicated region fallthrough
CT: control target
= control target key end

     0   :  { %s5524_s1 = inlined_call_operand.vmem [shape: bf16[2304,128], index: 1, kind: input, shape index: {}]   ;;  %s5525_s0 = inlined_call_operand.vmem [shape: bf16[128,2304], index: 0, kind: input, shape index: {}]   ;;  %s5526_s2 = inlined_call_operand.vmem [shape: f32[1,128], index: 2, kind: input, shape index: {}]   ;;  %s5527_s3 = inlined_call_operand.vmem [shape: bf16[128,128], index: 3, kind: output, shape index: {}]  }
   0x1   :  { %v3971_v0 = vld [vmem:[%s5524_s1 + $0x78] sm:$0xff]   ;;  %v3973_v2 = vld [vmem:[%s5524_s1 + $0x70] sm:$0xff]   ;;  %v3975_v4 = vld [vmem:[%s5524_s1 + $0x68] sm:$0xff]  }
   0x2   :  { %v3972_v1 = vld [vmem:[%s5524_s1 + $0x38] sm:$0xff]   ;;  %3379 = vmatprep.subr.bf16.mxu0 %v3971_v0  ;;  %3955 = vmatprep.subr.bf16.mxu1 %v3971_v0  ;;  %v3974_v3 = vld [vmem:[%s5524_s1 + $0x30] sm:$0xff]   ;;  %v3976_v5 = vld [vmem:[%s5524_s1 + $0x28] sm:$0xff]  }
   0x3   :  { %3380 = vmatpush3.bf16.msra.mxu0 %v3972_v1  ;;  %3963 = vmatpush3.bf16.msra.mxu1 %v3972_v1  ;;  %v3977_v6 = vld [vmem:[%s5524_s1 + $0x60] sm:$0xff]   ;;  %v3979_v8 = vld [vmem:[%s5524_s1 + $0x58] sm:$0xff]   ;;  %v3981_v10 = vld [vmem:[%s5524_s1 + $0x50] sm:$0xff]  }
   0x4   :  { %3381 = vmatprep.subr.bf16.mxu0 %v3973_v2  ;;  %3956 = vmatprep.subr.bf16.mxu1 %v3973_v2  ;;  %v3978_v7 = vld [vmem:[%s5524_s1 + $0x20] sm:$0xff]   ;;  %v3980_v9 = vld [vmem:[%s5524_s1 + $0x18] sm:$0xff]   ;;  %v3982_v13 = vld [vmem:[%s5524_s1 + $0x10] sm:$0xff]  }
   0x5   :  { %v3989_v11 = vld [vmem:[%s5525_s0 + $0x4] ss:$72 sps:$4 sm:$0xff]   ;;  %v3987_v18 = vld [vmem:[%s5525_s0] ss:$72 sps:$4 sm:$0xff]   ;;  %v3993_v20 = vld [vmem:[%s5524_s1 + $0xf8] sm:$0xff]  }
   0x6   :  { %v3992_v12 = vld [vmem:[%s5525_s0 + $0x244] ss:$72 sps:$4 sm:$0xff]   ;;  %2070 = vmatprep.mubr.bf16.mxu0 %v3989_v11  ;;  %v3990_v19 = vld [vmem:[%s5525_s0 + $0x240] ss:$72 sps:$4 sm:$0xff]   ;;  %v3994_v21 = vld [vmem:[%s5524_s1 + $0x178] sm:$0xff]  }
   0x7   :  { %3382 = vmatpush3.bf16.msra.mxu0 %v3974_v3  ;;  %3964 = vmatpush3.bf16.msra.mxu1 %v3974_v3  ;;  %v3983_v14 = vld [vmem:[%s5524_s1 + $0x48] sm:$0xff]   ;;  %v3985_v16 = vld [vmem:[%s5524_s1 + $0x40] sm:$0xff]   ;;  %v3995_v22 = vld [vmem:[%s5524_s1 + $0xb8] sm:$0xff]  }
   0x8   :  { %3383 = vmatprep.subr.bf16.mxu0 %v3975_v4  ;;  %3957 = vmatprep.subr.bf16.mxu1 %v3975_v4  ;;  %v3984_v15 = vld [vmem:[%s5524_s1 + $0x8] sm:$0xff]   ;;  %v3986_v17 = vld [vmem:[%s5524_s1] sm:$0xff]   ;;  %v3996_v23 = vld [vmem:[%s5524_s1 + $0x138] sm:$0xff]  }
   0x9   :  { %2102 = vmatprep.mubr.bf16.mxu1 %v3992_v12  ;;  %v3997_v24 = vld [vmem:[%s5524_s1 + $0xf0] sm:$0xff]   ;;  %v4007_v30 = vld [vmem:[%s5524_s1 + $0xe8] sm:$0xff]   ;;  %v4011_v36 = vld [vmem:[%s5524_s1 + $0xe0] sm:$0xff]  }
   0xa   :  { %v3998_v25 = vld [vmem:[%s5524_s1 + $0x170] sm:$0xff]   ;;  %v4008_v32 = vld [vmem:[%s5524_s1 + $0x168] sm:$0xff]   ;;  %v4012_v37 = vld [vmem:[%s5524_s1 + $0x160] sm:$0xff]  }
   0xb   :  { %3384 = vmatpush3.bf16.msra.mxu0 %v3976_v5  ;;  %3965 = vmatpush3.bf16.msra.mxu1 %v3976_v5  ;;  %v4001_v26 = vld [vmem:[%s5525_s0 + $0x94] ss:$72 sps:$4 sm:$0xff]   ;;  %v4005_v31 = vld [vmem:[%s5525_s0 + $0x90] ss:$72 sps:$4 sm:$0xff]   ;;  %v4009_v34 = vld [vmem:[%s5524_s1 + $0xa8] sm:$0xff]  }
   0xc   :  { %3385 = vmatprep.subr.bf16.mxu0 %v3977_v6  ;;  %3958 = vmatprep.subr.bf16.mxu1 %v3977_v6  ;;  %v3999_v27 = vld [vmem:[%s5524_s1 + $0xb0] sm:$0xff]   ;;  %v4010_v35 = vld [vmem:[%s5524_s1 + $0x128] sm:$0xff]   ;;  %v4013_v39 = vld [vmem:[%s5524_s1 + $0xa0] sm:$0xff]  }
   0xd   :  { %v4003_v28 = vld [vmem:[%s5525_s0 + $0x2d4] ss:$72 sps:$4 sm:$0xff]   ;;  %v4006_v33 = vld [vmem:[%s5525_s0 + $0x2d0] ss:$72 sps:$4 sm:$0xff]   ;;  %v4015_v38 = vld [vmem:[%s5525_s0 + $0x124] ss:$72 sps:$4 sm:$0xff]  }
   0xe   :  { %v4000_v29 = vld [vmem:[%s5524_s1 + $0x130] sm:$0xff]   ;;  %v4017_v40 = vld [vmem:[%s5525_s0 + $0x364] ss:$72 sps:$4 sm:$0xff]   ;;  %v4021_v42 = vld [vmem:[%s5524_s1 + $0xd8] sm:$0xff]  }
   0xf   :  { %3386 = vmatpush3.bf16.msra.mxu0 %v3978_v7  ;;  %3966 = vmatpush3.bf16.msra.mxu1 %v3978_v7  ;;  %v4014_v41 = vld [vmem:[%s5524_s1 + $0x120] sm:$0xff]   ;;  %v4022_v45 = vld [vmem:[%s5524_s1 + $0x158] sm:$0xff]   ;;  %v4025_v48 = vld [vmem:[%s5524_s1 + $0xd0] sm:$0xff]  }
  0x10   :  { %3387 = vmatprep.subr.bf16.mxu0 %v3979_v8  ;;  %3959 = vmatprep.subr.bf16.mxu1 %v3979_v8  ;;  %v4019_v43 = vld [vmem:[%s5525_s0 + $0x120] ss:$72 sps:$4 sm:$0xff]   ;;  %v4023_v46 = vld [vmem:[%s5524_s1 + $0x98] sm:$0xff]   ;;  %v4026_v49 = vld [vmem:[%s5524_s1 + $0x150] sm:$0xff]  }
  0x11   :  { %v4020_v44 = vld [vmem:[%s5525_s0 + $0x360] ss:$72 sps:$4 sm:$0xff]   ;;  %v4024_v47 = vld [vmem:[%s5524_s1 + $0x118] sm:$0xff]   ;;  %v4027_v52 = vld [vmem:[%s5524_s1 + $0x90] sm:$0xff]  }
  0x12   :  { %v4029_v50 = vld [vmem:[%s5525_s0 + $0x1b4] ss:$72 sps:$4 sm:$0xff]   ;;  %v4035_v54 = vld [vmem:[%s5524_s1 + $0xc8] sm:$0xff]   ;;  %v4033_v55 = vld [vmem:[%s5525_s0 + $0x1b0] ss:$72 sps:$4 sm:$0xff]  }
  0x13   :  { %3388 = vmatpush3.bf16.msra.mxu0 %v3980_v9  ;;  %3967 = vmatpush3.bf16.msra.mxu1 %v3980_v9  ;;  %v4031_v51 = vld [vmem:[%s5525_s0 + $0x3f4] ss:$72 sps:$4 sm:$0xff]   ;;  %v4034_v56 = vld [vmem:[%s5525_s0 + $0x3f0] ss:$72 sps:$4 sm:$0xff]   ;;  %v4036_v57 = vld [vmem:[%s5524_s1 + $0x148] sm:$0xff]  }
  0x14   :  { %3389 = vmatprep.subr.bf16.mxu0 %v3981_v10  ;;  %3960 = vmatprep.subr.bf16.mxu1 %v3981_v10  ;;  %v4028_v53 = vld [vmem:[%s5524_s1 + $0x110] sm:$0xff]   ;;  %v4037_v58 = vld [vmem:[%s5524_s1 + $0x88] sm:$0xff]   ;;  %v4039_v60 = vld [vmem:[%s5524_s1 + $0xc0] sm:$0xff]  }
  0x15   :  { %v4038_v59 = vld [vmem:[%s5524_s1 + $0x108] sm:$0xff]   ;;  %v4040_v61 = vld [vmem:[%s5524_s1 + $0x140] sm:$0xff]   ;;  %v4046_v2 = vld [vmem:[%s5525_s0 + $0x10] ss:$72 sps:$4 sm:$0xff]  }
  0x16   :  { %v4041_v62 = vld [vmem:[%s5524_s1 + $0x80] sm:$0xff]   ;;  %v4045_v0 = vld [vmem:[%s5525_s0 + $0xc] ss:$72 sps:$4 sm:$0xff]   ;;  %v4043_v1 = vld [vmem:[%s5525_s0 + $0x8] ss:$72 sps:$4 sm:$0xff]  }
  0x17   :  { %3390 = vmatpush3.bf16.msra.mxu0 %v3982_v13  ;;  %3968 = vmatpush3.bf16.msra.mxu1 %v3982_v13  ;;  %v4042_v63 = vld [vmem:[%s5524_s1 + $0x100] sm:$0xff]   ;;  %v4048_v3 = vld [vmem:[%s5525_s0 + $0x14] ss:$72 sps:$4 sm:$0xff]  }
  0x18   :  { %3391 = vmatprep.subr.bf16.mxu0 %v3983_v14  ;;  %3961 = vmatprep.subr.bf16.mxu1 %v3983_v14  ;;  %v4049_v4 = vld [vmem:[%s5524_s1 + $0x1f8] sm:$0xff]   ;;  %v4055_v9 = vld [vmem:[%s5525_s0 + $0xa4] ss:$72 sps:$4 sm:$0xff]   ;;  %v4058_v11 = vld [vmem:[%s5525_s0 + $0xa0] ss:$72 sps:$4 sm:$0xff]  }
  0x19   :  { %v4050_v5 = vld [vmem:[%s5524_s1 + $0x1b8] sm:$0xff]   ;;  %v4059_v12 = vld [vmem:[%s5524_s1 + $0x1f0] sm:$0xff]  }
  0x1a   :  { %v4051_v6 = vld [vmem:[%s5524_s1 + $0x278] sm:$0xff]   ;;  %v4060_v13 = vld [vmem:[%s5524_s1 + $0x1b0] sm:$0xff]  }
  0x1b   :  { %3392 = vmatpush3.bf16.msra.mxu0 %v3984_v15  ;;  %3969 = vmatpush3.bf16.msra.mxu1 %v3984_v15  ;;  %v4052_v7 = vld [vmem:[%s5524_s1 + $0x238] sm:$0xff]   ;;  %v4061_v14 = vld [vmem:[%s5524_s1 + $0x270] sm:$0xff]  }
  0x1c   :  { %3393 = vmatprep.subr.bf16.mxu0 %v3985_v16  ;;  %3962 = vmatprep.subr.bf16.mxu1 %v3985_v16  ;;  %v4053_v8 = vld [vmem:[%s5525_s0 + $0x9c] ss:$72 sps:$4 sm:$0xff]   ;;  %v4057_v10 = vld [vmem:[%s5525_s0 + $0x98] ss:$72 sps:$4 sm:$0xff]   ;;  %v4062_v15 = vld [vmem:[%s5524_s1 + $0x230] sm:$0xff]  }
  0x1d   :  { %v4063_v16 = vld [vmem:[%s5525_s0 + $0x12c] ss:$72 sps:$4 sm:$0xff]  }
  0x1f   :  { %3394 = vmatpush3.bf16.msra.mxu0 %v3986_v17  ;;  %3970 = vmatpush3.bf16.msra.mxu1 %v3986_v17  ;;  %v4065_v17 = vld [vmem:[%s5525_s0 + $0x134] ss:$72 sps:$4 sm:$0xff]  }
  0x20   :  { %3443 = vmatprep.subr.bf16.mxu1 %v3993_v20  ;;  %3507 = vmatprep.subr.bf16.mxu0 %v3994_v21  ;;  %v4068_v20 = vld [vmem:[%s5525_s0 + $0x130] ss:$72 sps:$4 sm:$0xff]   ;;  %v4070_v21 = vld [vmem:[%s5524_s1 + $0x1a8] sm:$0xff]  }
  0x22   :  { %2071 = vmatmul.mubr.bf16.vlgmr.msra.gmra.mxu0 %v3987_v18  ;;  %2103 = vmatmul.mubr.bf16.vlgmr.msra.gmra.mxu1 %v3990_v19  ;;  %v4069_v18 = vld [vmem:[%s5524_s1 + $0x1e8] sm:$0xff]  }
  0x23   :  { %3444 = vmatpush3.bf16.msra.mxu1 %v3995_v22  ;;  %3508 = vmatpush3.bf16.msra.mxu0 %v3996_v23  ;;  %v4067_v19 = vld [vmem:[%s5525_s0 + $0x128] ss:$72 sps:$4 sm:$0xff]  }
  0x24   :  { %3445 = vmatprep.subr.bf16.mxu1 %v3997_v24  ;;  %3509 = vmatprep.subr.bf16.mxu0 %v3998_v25  ;;  %v4071_v22 = vld [vmem:[%s5524_s1 + $0x268] sm:$0xff]   ;;  %v4073_v24 = vld [vmem:[%s5525_s0 + $0x1bc] ss:$72 sps:$4 sm:$0xff]  }
  0x25   :  { %2078 = vmatprep.mubr.bf16.mxu0 %v4001_v26  ;;  %2110 = vmatprep.mubr.bf16.mxu1 %v4003_v28  ;;  %v4072_v23 = vld [vmem:[%s5524_s1 + $0x228] sm:$0xff]   ;;  %v4079_v26 = vld [vmem:[%s5524_s1 + $0x1e0] sm:$0xff]  }
  0x26   :  { %v4075_v25 = vld [vmem:[%s5525_s0 + $0x1c4] ss:$72 sps:$4 sm:$0xff]   ;;  %v4077_v28 = vld [vmem:[%s5525_s0 + $0x1b8] ss:$72 sps:$4 sm:$0xff]  }
  0x27   :  { %3446 = vmatpush3.bf16.msra.mxu1 %v3999_v27  ;;  %3510 = vmatpush3.bf16.msra.mxu0 %v4000_v29  ;;  %v4080_v27 = vld [vmem:[%s5524_s1 + $0x1a0] sm:$0xff]  }
  0x28   :  { %3447 = vmatprep.subr.bf16.mxu1 %v4007_v30  ;;  %3511 = vmatprep.subr.bf16.mxu0 %v4008_v32  ;;  %v4081_v29 = vld [vmem:[%s5524_s1 + $0x260] sm:$0xff]   ;;  %v4083_v32 = vld [vmem:[%s5525_s0 + $0x24c] ss:$72 sps:$4 sm:$0xff]  }
  0x29   :  { %v4082_v30 = vld [vmem:[%s5524_s1 + $0x220] sm:$0xff]  }
  0x2a   :  { %2079 = vmatmul.mubr.bf16.gmra.mxu0 %v4005_v31  ;;  %2111 = vmatmul.mubr.bf16.gmra.mxu1 %v4006_v33  ;;  %v4078_v31 = vld [vmem:[%s5525_s0 + $0x1c0] ss:$72 sps:$4 sm:$0xff]   ;;  %v4085_v33 = vld [vmem:[%s5525_s0 + $0x254] ss:$72 sps:$4 sm:$0xff]  }
  0x2b   :  { %3448 = vmatpush3.bf16.msra.mxu1 %v4009_v34  ;;  %3512 = vmatpush3.bf16.msra.mxu0 %v4010_v35  ;;  %v4089_v34 = vld [vmem:[%s5524_s1 + $0x1d8] sm:$0xff]  }
  0x2c   :  { %3449 = vmatprep.subr.bf16.mxu1 %v4011_v36  ;;  %3513 = vmatprep.subr.bf16.mxu0 %v4012_v37  ;;  %v4090_v35 = vld [vmem:[%s5524_s1 + $0x198] sm:$0xff]  }
  0x2d   :  { %2086 = vmatprep.mubr.bf16.mxu0 %v4015_v38  ;;  %2118 = vmatprep.mubr.bf16.mxu1 %v4017_v40  ;;  %v4091_v36 = vld [vmem:[%s5524_s1 + $0x258] sm:$0xff]   ;;  %v4087_v38 = vld [vmem:[%s5525_s0 + $0x248] ss:$72 sps:$4 sm:$0xff]  }
  0x2e   :  { %v4092_v37 = vld [vmem:[%s5524_s1 + $0x218] sm:$0xff]  }
  0x2f   :  { %3450 = vmatpush3.bf16.msra.mxu1 %v4013_v39  ;;  %3514 = vmatpush3.bf16.msra.mxu0 %v4014_v41  ;;  %v4088_v39 = vld [vmem:[%s5525_s0 + $0x250] ss:$72 sps:$4 sm:$0xff]   ;;  %v4093_v40 = vld [vmem:[%s5525_s0 + $0x2dc] ss:$72 sps:$4 sm:$0xff]  }
  0x30   :  { %3451 = vmatprep.subr.bf16.mxu1 %v4021_v42  ;;  %3515 = vmatprep.subr.bf16.mxu0 %v4022_v45  ;;  %v4095_v41 = vld [vmem:[%s5525_s0 + $0x2e4] ss:$72 sps:$4 sm:$0xff]   ;;  %v4099_v42 = vld [vmem:[%s5524_s1 + $0x1d0] sm:$0xff]  }
  0x31   :  { %v4102_v45 = vld [vmem:[%s5524_s1 + $0x210] sm:$0xff]  }
  0x32   :  { %2087 = vmatmul.mubr.bf16.gmra.mxu0 %v4019_v43  ;;  %2119 = vmatmul.mubr.bf16.gmra.mxu1 %v4020_v44  ;;  %v4100_v43 = vld [vmem:[%s5524_s1 + $0x190] sm:$0xff]  }
  0x33   :  { %3452 = vmatpush3.bf16.msra.mxu1 %v4023_v46  ;;  %3516 = vmatpush3.bf16.msra.mxu0 %v4024_v47  ;;  %v4101_v44 = vld [vmem:[%s5524_s1 + $0x250] sm:$0xff]   ;;  %v4097_v46 = vld [vmem:[%s5525_s0 + $0x2d8] ss:$72 sps:$4 sm:$0xff]  }
  0x34   :  { %3453 = vmatprep.subr.bf16.mxu1 %v4025_v48  ;;  %3517 = vmatprep.subr.bf16.mxu0 %v4026_v49  ;;  %v4098_v47 = vld [vmem:[%s5525_s0 + $0x2e0] ss:$72 sps:$4 sm:$0xff]   ;;  %v4103_v48 = vld [vmem:[%s5525_s0 + $0x36c] ss:$72 sps:$4 sm:$0xff]  }
  0x35   :  { %2094 = vmatprep.mubr.bf16.mxu0 %v4029_v50  ;;  %2126 = vmatprep.mubr.bf16.mxu1 %v4031_v51  ;;  %v4105_v49 = vld [vmem:[%s5525_s0 + $0x374] ss:$72 sps:$4 sm:$0xff]   ;;  %v4109_v50 = vld [vmem:[%s5524_s1 + $0x1c8] sm:$0xff]  }
  0x36   :  { %v4110_v51 = vld [vmem:[%s5524_s1 + $0x188] sm:$0xff]  }
  0x37   :  { %3454 = vmatpush3.bf16.msra.mxu1 %v4027_v52  ;;  %3518 = vmatpush3.bf16.msra.mxu0 %v4028_v53  ;;  %v4111_v52 = vld [vmem:[%s5524_s1 + $0x248] sm:$0xff]  }
  0x38   :  { %3455 = vmatprep.subr.bf16.mxu1 %v4035_v54  ;;  %3519 = vmatprep.subr.bf16.mxu0 %v4036_v57  ;;  %v4112_v53 = vld [vmem:[%s5524_s1 + $0x208] sm:$0xff]   ;;  %v4113_v57 = vld [vmem:[%s5525_s0 + $0x3fc] ss:$72 sps:$4 sm:$0xff]  }
  0x39   :  { %v4107_v54 = vld [vmem:[%s5525_s0 + $0x368] ss:$72 sps:$4 sm:$0xff]  }
  0x3a   :  { %2095 = vmatmul.mubr.bf16.gmra.mxu0 %v4033_v55  ;;  %2127 = vmatmul.mubr.bf16.gmra.mxu1 %v4034_v56  ;;  %v4108_v55 = vld [vmem:[%s5525_s0 + $0x370] ss:$72 sps:$4 sm:$0xff]   ;;  %v4119_v56 = vld [vmem:[%s5524_s1 + $0x1c0] sm:$0xff]  }
  0x3b   :  { %3456 = vmatpush3.bf16.msra.mxu1 %v4037_v58  ;;  %3520 = vmatpush3.bf16.msra.mxu0 %v4038_v59  ;;  %v4115_v58 = vld [vmem:[%s5525_s0 + $0x404] ss:$72 sps:$4 sm:$0xff]  }
  0x3c   :  { %3457 = vmatprep.subr.bf16.mxu1 %v4039_v60  ;;  %3521 = vmatprep.subr.bf16.mxu0 %v4040_v61  ;;  %v4120_v59 = vld [vmem:[%s5524_s1 + $0x180] sm:$0xff]  }
  0x3d   :  { %2167 = vmatprep.mubr.bf16.mxu1 %v4045_v0  ;;  %2264 = vmatprep.mubr.bf16.mxu0 %v4048_v3  ;;  %v4121_v60 = vld [vmem:[%s5524_s1 + $0x240] sm:$0xff]  }
  0x3e   :  { %v4122_v61 = vld [vmem:[%s5524_s1 + $0x200] sm:$0xff]  }
  0x3f   :  { %3458 = vmatpush3.bf16.msra.mxu1 %v4041_v62  ;;  %3522 = vmatpush3.bf16.msra.mxu0 %v4042_v63  ;;  %v4129_v62 = vld [vmem:[%s5524_s1 + $0x2f8] sm:$0xff]   ;;  %v4118_v0 = vld [vmem:[%s5525_s0 + $0x400] ss:$72 sps:$4 sm:$0xff]   ;;  %v4128_v3 = vld [vmem:[%s5525_s0 + $0x24] ss:$72 sps:$4 sm:$0xff]  }
  0x40   :  { %3571 = vmatprep.subr.bf16.mxu1 %v4049_v4  ;;  %3635 = vmatprep.subr.bf16.mxu0 %v4051_v6  ;;  %v4117_v63 = vld [vmem:[%s5525_s0 + $0x3f8] ss:$72 sps:$4 sm:$0xff]  }
  0x41   :  { %v4123_v4 = vld [vmem:[%s5525_s0 + $0x18] ss:$72 sps:$4 sm:$0xff]  }
  0x42   :  { %2168 = vmatmul.mubr.bf16.vlgmr.msra.gmra.mxu1 %v4043_v1  ;;  %2265 = vmatmul.mubr.bf16.vlgmr.msra.gmra.mxu0 %v4046_v2  ;;  %v4131_v1 = vld [vmem:[%s5524_s1 + $0x378] sm:$0xff]  }
  0x43   :  { %3572 = vmatpush3.bf16.msra.mxu1 %v4050_v5  ;;  %3636 = vmatpush3.bf16.msra.mxu0 %v4052_v7  ;;  %v4125_v2 = vld [vmem:[%s5525_s0 + $0x1c] ss:$72 sps:$4 sm:$0xff]   ;;  %v4126_v5 = vld [vmem:[%s5525_s0 + $0x20] ss:$72 sps:$4 sm:$0xff]  }
  0x44   :  { %2175 = vmatprep.mubr.bf16.mxu1 %v4053_v8  ;;  %2272 = vmatprep.mubr.bf16.mxu0 %v4055_v9  ;;  %v4130_v6 = vld [vmem:[%s5524_s1 + $0x2b8] sm:$0xff]   ;;  %v4133_v8 = vld [vmem:[%s5525_s0 + $0xac] ss:$72 sps:$4 sm:$0xff]  }
  0x45   :  { %3573 = vmatprep.subr.bf16.mxu1 %v4059_v12  ;;  %3637 = vmatprep.subr.bf16.mxu0 %v4061_v14  ;;  %v4132_v7 = vld [vmem:[%s5524_s1 + $0x338] sm:$0xff]   ;;  %v4141_v12 = vld [vmem:[%s5524_s1 + $0x370] sm:$0xff]   ;;  %v4149_v14 = vld [vmem:[%s5524_s1 + $0x2e8] sm:$0xff]  }
  0x46   :  { %v4135_v9 = vld [vmem:[%s5525_s0 + $0xb4] ss:$72 sps:$4 sm:$0xff]  }
  0x47   :  { %3574 = vmatpush3.bf16.msra.mxu1 %v4060_v13  ;;  %3638 = vmatpush3.bf16.msra.mxu0 %v4062_v15  ;;  %v4142_v13 = vld [vmem:[%s5524_s1 + $0x330] sm:$0xff]  }
  0x48   :  { %3575 = vmatprep.subr.bf16.mxu1 %v4069_v18  ;;  %3639 = vmatprep.subr.bf16.mxu0 %v4071_v22  ;;  %v4137_v15 = vld [vmem:[%s5525_s0 + $0xa8] ss:$72 sps:$4 sm:$0xff]   ;;  %v4143_v18 = vld [vmem:[%s5525_s0 + $0x13c] ss:$72 sps:$4 sm:$0xff]  }
  0x49   :  { %v4159_v22 = vld [vmem:[%s5524_s1 + $0x2e0] sm:$0xff]  }
  0x4a   :  { %2176 = vmatmul.mubr.bf16.gmra.mxu1 %v4057_v10  ;;  %2273 = vmatmul.mubr.bf16.gmra.mxu0 %v4058_v11  ;;  %v4139_v10 = vld [vmem:[%s5524_s1 + $0x2f0] sm:$0xff]  }
  0x4b   :  { %2183 = vmatprep.mubr.bf16.mxu1 %v4063_v16  ;;  %2280 = vmatprep.mubr.bf16.mxu0 %v4065_v17  ;;  %v4140_v11 = vld [vmem:[%s5524_s1 + $0x2b0] sm:$0xff]   ;;  %v4151_v17 = vld [vmem:[%s5524_s1 + $0x368] sm:$0xff]  }
  0x4c   :  { %3576 = vmatpush3.bf16.msra.mxu1 %v4070_v21  ;;  %3640 = vmatpush3.bf16.msra.mxu0 %v4072_v23  ;;  %v4138_v16 = vld [vmem:[%s5525_s0 + $0xb0] ss:$72 sps:$4 sm:$0xff]   ;;  %v4152_v21 = vld [vmem:[%s5524_s1 + $0x328] sm:$0xff]   ;;  %v4161_v23 = vld [vmem:[%s5524_s1 + $0x360] sm:$0xff]  }
  0x4d   :  { %3577 = vmatprep.subr.bf16.mxu1 %v4079_v26  ;;  %3641 = vmatprep.subr.bf16.mxu0 %v4081_v29  ;;  %v4160_v26 = vld [vmem:[%s5524_s1 + $0x2a0] sm:$0xff]   ;;  %v4155_v29 = vld [vmem:[%s5525_s0 + $0x1d4] ss:$72 sps:$4 sm:$0xff]  }
  0x50   :  { %3578 = vmatpush3.bf16.msra.mxu1 %v4080_v27  ;;  %3642 = vmatpush3.bf16.msra.mxu0 %v4082_v30  ;;  %v4162_v27 = vld [vmem:[%s5524_s1 + $0x320] sm:$0xff]   ;;  %v4169_v30 = vld [vmem:[%s5524_s1 + $0x2d8] sm:$0xff]  }
  0x51   :  { %3579 = vmatprep.subr.bf16.mxu1 %v4089_v34  ;;  %3643 = vmatprep.subr.bf16.mxu0 %v4091_v36  ;;  %v4157_v34 = vld [vmem:[%s5525_s0 + $0x1c8] ss:$72 sps:$4 sm:$0xff]  }
  0x52   :  { %2184 = vmatmul.mubr.bf16.gmra.mxu1 %v4067_v19  ;;  %2281 = vmatmul.mubr.bf16.gmra.mxu0 %v4068_v20  ;;  %v4145_v19 = vld [vmem:[%s5525_s0 + $0x144] ss:$72 sps:$4 sm:$0xff]   ;;  %v4179_v36 = vld [vmem:[%s5524_s1 + $0x2d0] sm:$0xff]  }
  0x53   :  { %2191 = vmatprep.mubr.bf16.mxu1 %v4073_v24  ;;  %2288 = vmatprep.mubr.bf16.mxu0 %v4075_v25  ;;  %v4150_v20 = vld [vmem:[%s5524_s1 + $0x2a8] sm:$0xff]   ;;  %v4147_v24 = vld [vmem:[%s5525_s0 + $0x138] ss:$72 sps:$4 sm:$0xff]  }
  0x54   :  { %3580 = vmatpush3.bf16.msra.mxu1 %v4090_v35  ;;  %3644 = vmatpush3.bf16.msra.mxu0 %v4092_v37  ;;  %v4148_v25 = vld [vmem:[%s5525_s0 + $0x140] ss:$72 sps:$4 sm:$0xff]   ;;  %v4158_v35 = vld [vmem:[%s5525_s0 + $0x1d0] ss:$72 sps:$4 sm:$0xff]   ;;  %v4163_v37 = vld [vmem:[%s5525_s0 + $0x25c] ss:$72 sps:$4 sm:$0xff]  }
  0x55   :  { %3581 = vmatprep.subr.bf16.mxu1 %v4099_v42  ;;  %3645 = vmatprep.subr.bf16.mxu0 %v4101_v44  ;;  %v4189_v42 = vld [vmem:[%s5524_s1 + $0x2c8] sm:$0xff]  }
  0x56   :  { %v4168_v44 = vld [vmem:[%s5525_s0 + $0x260] ss:$72 sps:$4 sm:$0xff]  }
  0x58   :  { %3582 = vmatpush3.bf16.msra.mxu1 %v4100_v43  ;;  %3646 = vmatpush3.bf16.msra.mxu0 %v4102_v45  ;;  %v4167_v43 = vld [vmem:[%s5525_s0 + $0x258] ss:$72 sps:$4 sm:$0xff]   ;;  %v4190_v45 = vld [vmem:[%s5524_s1 + $0x288] sm:$0xff]  }
  0x59   :  { %3583 = vmatprep.subr.bf16.mxu1 %v4109_v50  ;;  %3647 = vmatprep.subr.bf16.mxu0 %v4111_v52  ;;  %v4199_v50 = vld [vmem:[%s5524_s1 + $0x2c0] sm:$0xff]  }
  0x5a   :  { %2192 = vmatmul.mubr.bf16.gmra.mxu1 %v4077_v28  ;;  %2289 = vmatmul.mubr.bf16.gmra.mxu0 %v4078_v31  ;;  %v4153_v28 = vld [vmem:[%s5525_s0 + $0x1cc] ss:$72 sps:$4 sm:$0xff]   ;;  %v4170_v31 = vld [vmem:[%s5524_s1 + $0x298] sm:$0xff]   ;;  %v4201_v52 = vld [vmem:[%s5524_s1 + $0x340] sm:$0xff]  }
  0x5b   :  { %2199 = vmatprep.mubr.bf16.mxu1 %v4083_v32  ;;  %2296 = vmatprep.mubr.bf16.mxu0 %v4085_v33  ;;  %v4171_v32 = vld [vmem:[%s5524_s1 + $0x358] sm:$0xff]  }
  0x5c   :  { %3584 = vmatpush3.bf16.msra.mxu1 %v4110_v51  ;;  %3648 = vmatpush3.bf16.msra.mxu0 %v4112_v53  ;;  %v4172_v33 = vld [vmem:[%s5524_s1 + $0x318] sm:$0xff]   ;;  %v4200_v51 = vld [vmem:[%s5524_s1 + $0x280] sm:$0xff]  }
  0x5d   :  { %3585 = vmatprep.subr.bf16.mxu1 %v4119_v56  ;;  %3649 = vmatprep.subr.bf16.mxu0 %v4121_v60  ;;  %v4202_v53 = vld [vmem:[%s5524_s1 + $0x300] sm:$0xff]  }
  0x5e   :  { %v4183_v56 = vld [vmem:[%s5525_s0 + $0x37c] ss:$72 sps:$4 sm:$0xff]   ;;  %v4187_v60 = vld [vmem:[%s5525_s0 + $0x378] ss:$72 sps:$4 sm:$0xff]  }
  0x60   :  { %3586 = vmatpush3.bf16.msra.mxu1 %v4120_v59  ;;  %3650 = vmatpush3.bf16.msra.mxu0 %v4122_v61  ;;  %v4211_v59 = vld [vmem:[%s5524_s1 + $0x478] sm:$0xff]   ;;  %v4188_v61 = vld [vmem:[%s5525_s0 + $0x380] ss:$72 sps:$4 sm:$0xff]  }
  0x61   :  { %3699 = vmatprep.subr.bf16.mxu1 %v4129_v62  ;;  %3763 = vmatprep.subr.bf16.mxu0 %v4131_v1  ;;  %v4193_v62 = vld [vmem:[%s5525_s0 + $0x40c] ss:$72 sps:$4 sm:$0xff]   ;;  %v4198_v1 = vld [vmem:[%s5525_s0 + $0x410] ss:$72 sps:$4 sm:$0xff]  }
  0x62   :  { %2200 = vmatmul.mubr.bf16.gmra.mxu1 %v4087_v38  ;;  %2297 = vmatmul.mubr.bf16.gmra.mxu0 %v4088_v39  ;;  %v4165_v38 = vld [vmem:[%s5525_s0 + $0x264] ss:$72 sps:$4 sm:$0xff]   ;;  %v4180_v39 = vld [vmem:[%s5524_s1 + $0x290] sm:$0xff]  }
  0x63   :  { %2207 = vmatprep.mubr.bf16.mxu1 %v4093_v40  ;;  %2304 = vmatprep.mubr.bf16.mxu0 %v4095_v41  ;;  %v4181_v40 = vld [vmem:[%s5524_s1 + $0x350] sm:$0xff]  }
  0x64   :  { %v4182_v41 = vld [vmem:[%s5524_s1 + $0x310] sm:$0xff]  }
  0x6a   :  { %2208 = vmatmul.mubr.bf16.gmra.mxu1 %v4097_v46  ;;  %2305 = vmatmul.mubr.bf16.gmra.mxu0 %v4098_v47  ;;  %v4173_v46 = vld [vmem:[%s5525_s0 + $0x2ec] ss:$72 sps:$4 sm:$0xff]  }
  0x6b   :  { %2215 = vmatprep.mubr.bf16.mxu1 %v4103_v48  ;;  %2312 = vmatprep.mubr.bf16.mxu0 %v4105_v49  ;;  %v4191_v47 = vld [vmem:[%s5524_s1 + $0x348] sm:$0xff]   ;;  %v4175_v49 = vld [vmem:[%s5525_s0 + $0x2f4] ss:$72 sps:$4 sm:$0xff]  }
  0x6c   :  { %v4192_v48 = vld [vmem:[%s5524_s1 + $0x308] sm:$0xff]  }
  0x72   :  { %2216 = vmatmul.mubr.bf16.gmra.mxu1 %v4107_v54  ;;  %2313 = vmatmul.mubr.bf16.gmra.mxu0 %v4108_v55  ;;  %v4177_v54 = vld [vmem:[%s5525_s0 + $0x2e8] ss:$72 sps:$4 sm:$0xff]  }
  0x73   :  { %2223 = vmatprep.mubr.bf16.mxu1 %v4113_v57  ;;  %2320 = vmatprep.mubr.bf16.mxu0 %v4115_v58  ;;  %v4178_v55 = vld [vmem:[%s5525_s0 + $0x2f0] ss:$72 sps:$4 sm:$0xff]   ;;  %v4185_v57 = vld [vmem:[%s5525_s0 + $0x384] ss:$72 sps:$4 sm:$0xff]  }
  0x74   :  { %v4209_v58 = vld [vmem:[%s5524_s1 + $0x3f8] sm:$0xff]  }
  0x7a   :  { %2224 = vmatmul.mubr.bf16.gmra.mxu1 %v4117_v63  ;;  %2321 = vmatmul.mubr.bf16.gmra.mxu0 %v4118_v0  ;;  %v4195_v63 = vld [vmem:[%s5525_s0 + $0x414] ss:$72 sps:$4 sm:$0xff]   ;;  %v4197_v0 = vld [vmem:[%s5525_s0 + $0x408] ss:$72 sps:$4 sm:$0xff]  }
  0x7b   :  { %2361 = vmatprep.mubr.bf16.mxu1 %v4125_v2  ;;  %2458 = vmatprep.mubr.bf16.mxu0 %v4128_v3  ;;  %v4205_v2 = vld [vmem:[%s5525_s0 + $0x2c] ss:$72 sps:$4 sm:$0xff]  }
  0x7c   :  { %v4208_v3 = vld [vmem:[%s5525_s0 + $0x34] ss:$72 sps:$4 sm:$0xff]  }
  0x82   :  { %2362 = vmatmul.mubr.bf16.vlgmr.msra.gmra.mxu1 %v4123_v4  ;;  %2459 = vmatmul.mubr.bf16.vlgmr.msra.gmra.mxu0 %v4126_v5  ;;  %v4203_v4 = vld [vmem:[%s5525_s0 + $0x28] ss:$72 sps:$4 sm:$0xff]  }
  0x83   :  { %3700 = vmatpush3.bf16.msra.mxu1 %v4130_v6  ;;  %3764 = vmatpush3.bf16.msra.mxu0 %v4132_v7  ;;  %v4206_v5 = vld [vmem:[%s5525_s0 + $0x30] ss:$72 sps:$4 sm:$0xff]  }
  0x84   :  { %2369 = vmatprep.mubr.bf16.mxu1 %v4133_v8  ;;  %2466 = vmatprep.mubr.bf16.mxu0 %v4135_v9  ;;  %v4210_v6 = vld [vmem:[%s5524_s1 + $0x3b8] sm:$0xff]   ;;  %v4215_v9 = vld [vmem:[%s5525_s0 + $0xc4] ss:$72 sps:$4 sm:$0xff]  }
  0x85   :  { %3701 = vmatprep.subr.bf16.mxu1 %v4139_v10  ;;  %3765 = vmatprep.subr.bf16.mxu0 %v4141_v12  ;;  %v4212_v7 = vld [vmem:[%s5524_s1 + $0x438] sm:$0xff]   ;;  %v4219_v10 = vld [vmem:[%s5524_s1 + $0x3f0] sm:$0xff]  }
  0x86   :  { %v4213_v8 = vld [vmem:[%s5525_s0 + $0xbc] ss:$72 sps:$4 sm:$0xff]   ;;  %v4220_v12 = vld [vmem:[%s5524_s1 + $0x3b0] sm:$0xff]  }
  0x87   :  { %3702 = vmatpush3.bf16.msra.mxu1 %v4140_v11  ;;  %3766 = vmatpush3.bf16.msra.mxu0 %v4142_v13  ;;  %v4221_v11 = vld [vmem:[%s5524_s1 + $0x470] sm:$0xff]  }
  0x88   :  { %3703 = vmatprep.subr.bf16.mxu1 %v4149_v14  ;;  %3767 = vmatprep.subr.bf16.mxu0 %v4151_v17  ;;  %v4222_v13 = vld [vmem:[%s5524_s1 + $0x430] sm:$0xff]   ;;  %v4217_v14 = vld [vmem:[%s5525_s0 + $0xb8] ss:$72 sps:$4 sm:$0xff]   ;;  %v4231_v17 = vld [vmem:[%s5524_s1 + $0x468] sm:$0xff]  }
  0x8a   :  { %2370 = vmatmul.mubr.bf16.gmra.mxu1 %v4137_v15  ;;  %2467 = vmatmul.mubr.bf16.gmra.mxu0 %v4138_v16  ;;  %v4218_v15 = vld [vmem:[%s5525_s0 + $0xc0] ss:$72 sps:$4 sm:$0xff]  }
  0x8b   :  { %2377 = vmatprep.mubr.bf16.mxu1 %v4143_v18  ;;  %2474 = vmatprep.mubr.bf16.mxu0 %v4145_v19  ;;  %v4229_v16 = vld [vmem:[%s5524_s1 + $0x3e8] sm:$0xff]   ;;  %v4225_v19 = vld [vmem:[%s5525_s0 + $0x154] ss:$72 sps:$4 sm:$0xff]  }
  0x8c   :  { %3704 = vmatpush3.bf16.msra.mxu1 %v4150_v20  ;;  %3768 = vmatpush3.bf16.msra.mxu0 %v4152_v21  ;;  %v4223_v18 = vld [vmem:[%s5525_s0 + $0x14c] ss:$72 sps:$4 sm:$0xff]  }
  0x8d   :  { %3705 = vmatprep.subr.bf16.mxu1 %v4159_v22  ;;  %3769 = vmatprep.subr.bf16.mxu0 %v4161_v23  ;;  %v4230_v20 = vld [vmem:[%s5524_s1 + $0x3a8] sm:$0xff]   ;;  %v4239_v22 = vld [vmem:[%s5524_s1 + $0x3e0] sm:$0xff]  }
  0x8e   :  { %v4232_v21 = vld [vmem:[%s5524_s1 + $0x428] sm:$0xff]   ;;  %v4241_v23 = vld [vmem:[%s5524_s1 + $0x460] sm:$0xff]  }
  0x90   :  { %3706 = vmatpush3.bf16.msra.mxu1 %v4160_v26  ;;  %3770 = vmatpush3.bf16.msra.mxu0 %v4162_v27  ;;  %v4227_v26 = vld [vmem:[%s5525_s0 + $0x148] ss:$72 sps:$4 sm:$0xff]  }
  0x91   :  { %3707 = vmatprep.subr.bf16.mxu1 %v4169_v30  ;;  %3771 = vmatprep.subr.bf16.mxu0 %v4171_v32  ;;  %v4228_v27 = vld [vmem:[%s5525_s0 + $0x150] ss:$72 sps:$4 sm:$0xff]  }
  0x92   :  { %2378 = vmatmul.mubr.bf16.gmra.mxu1 %v4147_v24  ;;  %2475 = vmatmul.mubr.bf16.gmra.mxu0 %v4148_v25  ;;  %v4240_v24 = vld [vmem:[%s5524_s1 + $0x3a0] sm:$0xff]   ;;  %v4251_v30 = vld [vmem:[%s5524_s1 + $0x458] sm:$0xff]  }
  0x93   :  { %2385 = vmatprep.mubr.bf16.mxu1 %v4153_v28  ;;  %2482 = vmatprep.mubr.bf16.mxu0 %v4155_v29  ;;  %v4242_v25 = vld [vmem:[%s5524_s1 + $0x420] sm:$0xff]   ;;  %v4249_v28 = vld [vmem:[%s5524_s1 + $0x3d8] sm:$0xff]  }
  0x94   :  { %3708 = vmatpush3.bf16.msra.mxu1 %v4170_v31  ;;  %3772 = vmatpush3.bf16.msra.mxu0 %v4172_v33  ;;  %v4233_v29 = vld [vmem:[%s5525_s0 + $0x1dc] ss:$72 sps:$4 sm:$0xff]  }
  0x95   :  { %3709 = vmatprep.subr.bf16.mxu1 %v4179_v36  ;;  %3773 = vmatprep.subr.bf16.mxu0 %v4181_v40  ;;  %v4235_v31 = vld [vmem:[%s5525_s0 + $0x1e4] ss:$72 sps:$4 sm:$0xff]   ;;  %v4250_v32 = vld [vmem:[%s5524_s1 + $0x398] sm:$0xff]   ;;  %v4260_v36 = vld [vmem:[%s5524_s1 + $0x390] sm:$0xff]  }
  0x96   :  { %v4252_v33 = vld [vmem:[%s5524_s1 + $0x418] sm:$0xff]   ;;  %v4269_v40 = vld [vmem:[%s5524_s1 + $0x3c8] sm:$0xff]  }
  0x98   :  { %3710 = vmatpush3.bf16.msra.mxu1 %v4180_v39  ;;  %3774 = vmatpush3.bf16.msra.mxu0 %v4182_v41  ;;  %v4238_v39 = vld [vmem:[%s5525_s0 + $0x1e0] ss:$72 sps:$4 sm:$0xff]  }
  0x99   :  { %3711 = vmatprep.subr.bf16.mxu1 %v4189_v42  ;;  %3775 = vmatprep.subr.bf16.mxu0 %v4191_v47  ;;  %v4271_v41 = vld [vmem:[%s5524_s1 + $0x448] sm:$0xff]   ;;  %v4281_v47 = vld [vmem:[%s5524_s1 + $0x440] sm:$0xff]  }
  0x9a   :  { %2386 = vmatmul.mubr.bf16.gmra.mxu1 %v4157_v34  ;;  %2483 = vmatmul.mubr.bf16.gmra.mxu0 %v4158_v35  ;;  %v4259_v34 = vld [vmem:[%s5524_s1 + $0x3d0] sm:$0xff]  }
  0x9b   :  { %2393 = vmatprep.mubr.bf16.mxu1 %v4163_v37  ;;  %2490 = vmatprep.mubr.bf16.mxu0 %v4165_v38  ;;  %v4261_v35 = vld [vmem:[%s5524_s1 + $0x450] sm:$0xff]   ;;  %v4237_v38 = vld [vmem:[%s5525_s0 + $0x1d8] ss:$72 sps:$4 sm:$0xff]  }
  0x9c   :  { %3712 = vmatpush3.bf16.msra.mxu1 %v4190_v45  ;;  %3776 = vmatpush3.bf16.msra.mxu0 %v4192_v48  ;;  %v4262_v37 = vld [vmem:[%s5524_s1 + $0x410] sm:$0xff]   ;;  %v4272_v45 = vld [vmem:[%s5524_s1 + $0x408] sm:$0xff]   ;;  %v4280_v48 = vld [vmem:[%s5524_s1 + $0x380] sm:$0xff]  }
  0x9d   :  { %3713 = vmatprep.subr.bf16.mxu1 %v4199_v50  ;;  %3777 = vmatprep.subr.bf16.mxu0 %v4201_v52  ;;  %v4243_v42 = vld [vmem:[%s5525_s0 + $0x26c] ss:$72 sps:$4 sm:$0xff]   ;;  %v4247_v50 = vld [vmem:[%s5525_s0 + $0x268] ss:$72 sps:$4 sm:$0xff]   ;;  %v4253_v52 = vld [vmem:[%s5525_s0 + $0x2fc] ss:$72 sps:$4 sm:$0xff]  }
  0xa0   :  { %3714 = vmatpush3.bf16.msra.mxu1 %v4200_v51  ;;  %3778 = vmatpush3.bf16.msra.mxu0 %v4202_v53  ;;  %v4248_v51 = vld [vmem:[%s5525_s0 + $0x270] ss:$72 sps:$4 sm:$0xff]   ;;  %v4255_v53 = vld [vmem:[%s5525_s0 + $0x304] ss:$72 sps:$4 sm:$0xff]  }
  0xa1   :  { %3827 = vmatprep.subr.bf16.mxu1 %v4209_v58  ;;  %3891 = vmatprep.subr.bf16.mxu0 %v4211_v59 }
  0xa2   :  { %2394 = vmatmul.mubr.bf16.gmra.mxu1 %v4167_v43  ;;  %2491 = vmatmul.mubr.bf16.gmra.mxu0 %v4168_v44  ;;  %v4245_v43 = vld [vmem:[%s5525_s0 + $0x274] ss:$72 sps:$4 sm:$0xff]   ;;  %v4270_v44 = vld [vmem:[%s5524_s1 + $0x388] sm:$0xff]  }
  0xa3   :  { %2401 = vmatprep.mubr.bf16.mxu1 %v4173_v46  ;;  %2498 = vmatprep.mubr.bf16.mxu0 %v4175_v49  ;;  %v4279_v46 = vld [vmem:[%s5524_s1 + $0x3c0] sm:$0xff]  }
  0xa4   :  { %v4282_v49 = vld [vmem:[%s5524_s1 + $0x400] sm:$0xff]  }
  0xaa   :  { %2402 = vmatmul.mubr.bf16.gmra.mxu1 %v4177_v54  ;;  %2499 = vmatmul.mubr.bf16.gmra.mxu0 %v4178_v55 }
  0xab   :  { %2409 = vmatprep.mubr.bf16.mxu1 %v4183_v56  ;;  %2506 = vmatprep.mubr.bf16.mxu0 %v4185_v57 }
  0xb2   :  { %2410 = vmatmul.mubr.bf16.gmra.mxu1 %v4187_v60  ;;  %2507 = vmatmul.mubr.bf16.gmra.mxu0 %v4188_v61  ;;  %v4257_v60 = vld [vmem:[%s5525_s0 + $0x2f8] ss:$72 sps:$4 sm:$0xff]  }
  0xb3   :  { %2417 = vmatprep.mubr.bf16.mxu1 %v4193_v62  ;;  %2514 = vmatprep.mubr.bf16.mxu0 %v4195_v63  ;;  %v4258_v63 = vld [vmem:[%s5525_s0 + $0x300] ss:$72 sps:$4 sm:$0xff]  }
  0xba   :  { %2418 = vmatmul.mubr.bf16.gmra.mxu1 %v4197_v0  ;;  %2515 = vmatmul.mubr.bf16.gmra.mxu0 %v4198_v1  ;;  %v4263_v0 = vld [vmem:[%s5525_s0 + $0x38c] ss:$72 sps:$4 sm:$0xff]  }
  0xbb   :  { %2555 = vmatprep.mubr.bf16.mxu1 %v4205_v2  ;;  %2652 = vmatprep.mubr.bf16.mxu0 %v4208_v3  ;;  %v4265_v1 = vld [vmem:[%s5525_s0 + $0x394] ss:$72 sps:$4 sm:$0xff]  }
  0xc2   :  { %2556 = vmatmul.mubr.bf16.vlgmr.msra.gmra.mxu1 %v4203_v4  ;;  %2653 = vmatmul.mubr.bf16.vlgmr.msra.gmra.mxu0 %v4206_v5 }
  0xc3   :  { %3828 = vmatpush3.bf16.msra.mxu1 %v4210_v6  ;;  %3892 = vmatpush3.bf16.msra.mxu0 %v4212_v7 }
  0xc4   :  { %2563 = vmatprep.mubr.bf16.mxu1 %v4213_v8  ;;  %2660 = vmatprep.mubr.bf16.mxu0 %v4215_v9 }
  0xc5   :  { %3829 = vmatprep.subr.bf16.mxu1 %v4219_v10  ;;  %3893 = vmatprep.subr.bf16.mxu0 %v4221_v11 }
  0xc7   :  { %3830 = vmatpush3.bf16.msra.mxu1 %v4220_v12  ;;  %3894 = vmatpush3.bf16.msra.mxu0 %v4222_v13  ;;  %v4267_v12 = vld [vmem:[%s5525_s0 + $0x388] ss:$72 sps:$4 sm:$0xff]  }
  0xc8   :  { %3831 = vmatprep.subr.bf16.mxu1 %v4229_v16  ;;  %3895 = vmatprep.subr.bf16.mxu0 %v4231_v17  ;;  %v4273_v16 = vld [vmem:[%s5525_s0 + $0x41c] ss:$72 sps:$4 sm:$0xff]  }
  0xc9   :  { %v4275_v17 = vld [vmem:[%s5525_s0 + $0x424] ss:$72 sps:$4 sm:$0xff]  }
  0xca   :  { %2564 = vmatmul.mubr.bf16.gmra.mxu1 %v4217_v14  ;;  %2661 = vmatmul.mubr.bf16.gmra.mxu0 %v4218_v15  ;;  %v4268_v15 = vld [vmem:[%s5525_s0 + $0x390] ss:$72 sps:$4 sm:$0xff]  }
  0xcb   :  { %2571 = vmatprep.mubr.bf16.mxu1 %v4223_v18  ;;  %2668 = vmatprep.mubr.bf16.mxu0 %v4225_v19 }
  0xcc   :  { %3832 = vmatpush3.bf16.msra.mxu1 %v4230_v20  ;;  %3896 = vmatpush3.bf16.msra.mxu0 %v4232_v21 }
  0xcd   :  { %3833 = vmatprep.subr.bf16.mxu1 %v4239_v22  ;;  %3897 = vmatprep.subr.bf16.mxu0 %v4241_v23 }
  0xd0   :  { %3834 = vmatpush3.bf16.msra.mxu1 %v4240_v24  ;;  %3898 = vmatpush3.bf16.msra.mxu0 %v4242_v25 }
  0xd1   :  { %3835 = vmatprep.subr.bf16.mxu1 %v4249_v28  ;;  %3899 = vmatprep.subr.bf16.mxu0 %v4251_v30  ;;  %v4277_v30 = vld [vmem:[%s5525_s0 + $0x418] ss:$72 sps:$4 sm:$0xff]  }
  0xd2   :  { %2572 = vmatmul.mubr.bf16.gmra.mxu1 %v4227_v26  ;;  %2669 = vmatmul.mubr.bf16.gmra.mxu0 %v4228_v27 }
  0xd3   :  { %2579 = vmatprep.mubr.bf16.mxu1 %v4233_v29  ;;  %2676 = vmatprep.mubr.bf16.mxu0 %v4235_v31  ;;  %v4278_v31 = vld [vmem:[%s5525_s0 + $0x420] ss:$72 sps:$4 sm:$0xff]  }
  0xd4   :  { %3836 = vmatpush3.bf16.msra.mxu1 %v4250_v32  ;;  %3900 = vmatpush3.bf16.msra.mxu0 %v4252_v33  ;;  %v4285_v32 = vld [vmem:[%s5525_s0 + $0x3c] ss:$72 sps:$4 sm:$0xff]  }
  0xd5   :  { %3837 = vmatprep.subr.bf16.mxu1 %v4259_v34  ;;  %3901 = vmatprep.subr.bf16.mxu0 %v4261_v35  ;;  %v4288_v33 = vld [vmem:[%s5525_s0 + $0x44] ss:$72 sps:$4 sm:$0xff]  }
  0xd8   :  { %3838 = vmatpush3.bf16.msra.mxu1 %v4260_v36  ;;  %3902 = vmatpush3.bf16.msra.mxu0 %v4262_v37 }
  0xd9   :  { %3839 = vmatprep.subr.bf16.mxu1 %v4269_v40  ;;  %3903 = vmatprep.subr.bf16.mxu0 %v4271_v41 }
  0xda   :  { %2580 = vmatmul.mubr.bf16.gmra.mxu1 %v4237_v38  ;;  %2677 = vmatmul.mubr.bf16.gmra.mxu0 %v4238_v39 }
  0xdb   :  { %2587 = vmatprep.mubr.bf16.mxu1 %v4243_v42  ;;  %2684 = vmatprep.mubr.bf16.mxu0 %v4245_v43 }
  0xdc   :  { %3840 = vmatpush3.bf16.msra.mxu1 %v4270_v44  ;;  %3904 = vmatpush3.bf16.msra.mxu0 %v4272_v45 }
  0xdd   :  { %3841 = vmatprep.subr.bf16.mxu1 %v4279_v46  ;;  %3905 = vmatprep.subr.bf16.mxu0 %v4281_v47  ;;  %v4283_v46 = vld [vmem:[%s5525_s0 + $0x38] ss:$72 sps:$4 sm:$0xff]  }
  0xde   :  { %v4286_v47 = vld [vmem:[%s5525_s0 + $0x40] ss:$72 sps:$4 sm:$0xff]  }
  0xe0   :  { %3842 = vmatpush3.bf16.msra.mxu1 %v4280_v48  ;;  %3906 = vmatpush3.bf16.msra.mxu0 %v4282_v49  ;;  %v4291_v48 = vld [vmem:[%s5525_s0 + $0xcc] ss:$72 sps:$4 sm:$0xff]  }
  0xe1   :  { %v4294_v49 = vld [vmem:[%s5525_s0 + $0xd4] ss:$72 sps:$4 sm:$0xff]  }
  0xe2   :  { %v3395_v54 = vpop.f32.mrf.mxu0  ;;  %v3419_v55 = vpop.f32.mrf.mxu1  ;;  %2588 = vmatmul.mubr.bf16.gmra.mxu1 %v4247_v50  ;;  %2685 = vmatmul.mubr.bf16.gmra.mxu0 %v4248_v51 }
  0xe3   :  { %2595 = vmatprep.mubr.bf16.mxu1 %v4253_v52  ;;  %2692 = vmatprep.mubr.bf16.mxu0 %v4255_v53 }
  0xe4   :  { %v3396_v56 = vpop.f32.mrf.mxu0  ;;  %v3420_v57 = vpop.f32.mrf.mxu1 }
  0xe5   :  { %v5089_v58 = vadd.f32 %v3396_v56, %v3395_v54  ;;  %v5091_v59 = vadd.f32 %v3420_v57, %v3419_v55  ;;  %v5172_v54 = vld [vmem:[%s5526_s2] ss:$0 sm:$0xff] }
  0xe6   :  { %v3398_v61 = vpop.f32.mrf.mxu0  ;;  %v3422_v62 = vpop.f32.mrf.mxu1 }
  0xe8   :  { %v3399_v2 = vpop.f32.mrf.mxu0  ;;  %v3423_v3 = vpop.f32.mrf.mxu1 }
  0xe9   :  { %v5105_v4 = vadd.f32 %v3399_v2, %v3398_v61  ;;  %v5107_v5 = vadd.f32 %v3423_v3, %v3422_v62  ;;  %v2073_v61 = vadd.f32 %v5089_v58, %v5172_v54  ;;  %v4289_v2 = vld [vmem:[%s5525_s0 + $0xc8] ss:$72 sps:$4 sm:$0xff]   ;;  %v4300_v58 = vld [vmem:[%s5525_s0 + $0x164] ss:$72 sps:$4 sm:$0xff]  }
  0xea   :  { %v3401_v6 = vpop.f32.mrf.mxu0  ;;  %v3425_v7 = vpop.f32.mrf.mxu1  ;;  %2596 = vmatmul.mubr.bf16.gmra.mxu1 %v4257_v60  ;;  %2693 = vmatmul.mubr.bf16.gmra.mxu0 %v4258_v63  ;;  %v4292_v3 = vld [vmem:[%s5525_s0 + $0xd0] ss:$72 sps:$4 sm:$0xff]  }
  0xeb   :  { %2603 = vmatprep.mubr.bf16.mxu1 %v4263_v0  ;;  %2700 = vmatprep.mubr.bf16.mxu0 %v4265_v1 }
  0xec   :  { %v3402_v8 = vpop.f32.mrf.mxu0  ;;  %v3426_v9 = vpop.f32.mrf.mxu1 }
  0xed   :  { %v5109_v10 = vadd.f32 %v3402_v8, %v3401_v6  ;;  %v5111_v11 = vadd.f32 %v3426_v9, %v3425_v7  ;;  %v4297_v7 = vld [vmem:[%s5525_s0 + $0x15c] ss:$72 sps:$4 sm:$0xff]  }
  0xee   :  { %v3404_v13 = vpop.f32.mrf.mxu0  ;;  %v3428_v14 = vpop.f32.mrf.mxu1 }
  0xf0   :  { %v3405_v18 = vpop.f32.mrf.mxu0  ;;  %v3429_v19 = vpop.f32.mrf.mxu1 }
  0xf1   :  { %v5125_v20 = vadd.f32 %v3405_v18, %v3404_v13  ;;  %v5127_v21 = vadd.f32 %v3429_v19, %v3428_v14 }
  0xf2   :  { %v3407_v22 = vpop.f32.mrf.mxu0  ;;  %v3431_v23 = vpop.f32.mrf.mxu1  ;;  %2604 = vmatmul.mubr.bf16.gmra.mxu1 %v4267_v12  ;;  %2701 = vmatmul.mubr.bf16.gmra.mxu0 %v4268_v15  ;;  %v2076_v12 = vadd.f32 %v5105_v4, %v5172_v54 }
  0xf3   :  { %2611 = vmatprep.mubr.bf16.mxu1 %v4273_v16  ;;  %2708 = vmatprep.mubr.bf16.mxu0 %v4275_v17 }
  0xf4   :  { %v3408_v24 = vpop.f32.mrf.mxu0  ;;  %v3432_v25 = vpop.f32.mrf.mxu1 }
  0xf5   :  { %v5129_v26 = vadd.f32 %v3408_v24, %v3407_v22  ;;  %v5131_v27 = vadd.f32 %v3432_v25, %v3431_v23  ;;  %v2081_v23 = vadd.f32 %v5109_v10, %v5172_v54  ;;  %v4306_v10 = vld [vmem:[%s5525_s0 + $0x1f4] ss:$72 sps:$4 sm:$0xff]  }
  0xf6   :  { %v3410_v28 = vpop.f32.mrf.mxu0  ;;  %v3434_v29 = vpop.f32.mrf.mxu1 }
  0xf8   :  { %v3411_v34 = vpop.f32.mrf.mxu0  ;;  %v3435_v35 = vpop.f32.mrf.mxu1 }
  0xf9   :  { %v5145_v36 = vadd.f32 %v3411_v34, %v3410_v28  ;;  %v5147_v37 = vadd.f32 %v3435_v35, %v3434_v29 }
  0xfa   :  { %v3413_v38 = vpop.f32.mrf.mxu0  ;;  %v3437_v39 = vpop.f32.mrf.mxu1  ;;  %2612 = vmatmul.mubr.bf16.gmra.mxu1 %v4277_v30  ;;  %2709 = vmatmul.mubr.bf16.gmra.mxu0 %v4278_v31  ;;  %v4295_v30 = vld [vmem:[%s5525_s0 + $0x158] ss:$72 sps:$4 sm:$0xff]  }
  0xfb   :  { %2749 = vmatprep.mubr.bf16.mxu1 %v4285_v32  ;;  %2846 = vmatprep.mubr.bf16.mxu0 %v4288_v33  ;;  %v4298_v31 = vld [vmem:[%s5525_s0 + $0x160] ss:$72 sps:$4 sm:$0xff]   ;;  %v4303_v33 = vld [vmem:[%s5525_s0 + $0x1ec] ss:$72 sps:$4 sm:$0xff]  }
  0xfc   :  { %v3414_v40 = vpop.f32.mrf.mxu0  ;;  %v3438_v41 = vpop.f32.mrf.mxu1 }
  0xfd   :  { %v5149_v42 = vadd.f32 %v3414_v40, %v3413_v38  ;;  %v5151_v43 = vadd.f32 %v3438_v41, %v3437_v39  ;;  %v2084_v38 = vadd.f32 %v5125_v20, %v5172_v54 }
  0xfe   :  { %v3416_v44 = vpop.f32.mrf.mxu0  ;;  %v3440_v45 = vpop.f32.mrf.mxu1 }
 0x100   :  { %v3417_v50 = vpop.f32.mrf.mxu0  ;;  %v3441_v51 = vpop.f32.mrf.mxu1 }
 0x101   :  { %v5165_v52 = vadd.f32 %v3417_v50, %v3416_v44  ;;  %v5167_v53 = vadd.f32 %v3441_v51, %v3440_v45 }
 0x102   :  { %v3459_v55 = vpop.f32.mrf.mxu1  ;;  %v3523_v56 = vpop.f32.mrf.mxu0  ;;  %2750 = vmatmul.mubr.bf16.vlgmr.msra.gmra.mxu1 %v4283_v46  ;;  %2847 = vmatmul.mubr.bf16.vlgmr.msra.gmra.mxu0 %v4286_v47 }
 0x103   :  { %2757 = vmatprep.mubr.bf16.mxu1 %v4291_v48  ;;  %2854 = vmatprep.mubr.bf16.mxu0 %v4294_v49  ;;  %v2089_v49 = vadd.f32 %v5129_v26, %v5172_v54  ;;  %v4312_v26 = vld [vmem:[%s5525_s0 + $0x284] ss:$72 sps:$4 sm:$0xff]  }
 0x104   :  { %v3460_v57 = vpop.f32.mrf.mxu1  ;;  %v3524_v60 = vpop.f32.mrf.mxu0 }
 0x105   :  { %v3461_v62 = vadd.f32 %v3460_v57, %v3459_v55  ;;  %v3525_v63 = vadd.f32 %v3524_v60, %v3523_v56  ;;  %v4301_v57 = vld [vmem:[%s5525_s0 + $0x1e8] ss:$72 sps:$4 sm:$0xff]  }
 0x106   :  { %v3462_v0 = vpop.f32.mrf.mxu1  ;;  %v3526_v1 = vpop.f32.mrf.mxu0  ;;  %v4304_v60 = vld [vmem:[%s5525_s0 + $0x1f0] ss:$72 sps:$4 sm:$0xff]  }
 0x107   :  { %v2170_v6 = vadd.f32 %v3461_v62, %v2073_v61  ;;  %v4309_v62 = vld [vmem:[%s5525_s0 + $0x27c] ss:$72 sps:$4 sm:$0xff]  }
 0x108   :  { %v3463_v8 = vpop.f32.mrf.mxu1  ;;  %v3527_v9 = vpop.f32.mrf.mxu0 }
 0x109   :  { %v5190_v13 = vadd.f32 %v3525_v63, %v2170_v6  ;;  %v3464_v14 = vadd.f32 %v3463_v8, %v3462_v0  ;;  %v3528_v15 = vadd.f32 %v3527_v9, %v3526_v1  ;;  %v2092_v1 = vadd.f32 %v5145_v36, %v5172_v54 }
 0x10a   :  { %v3465_v16 = vpop.f32.mrf.mxu1  ;;  %v3529_v17 = vpop.f32.mrf.mxu0  ;;  %2758 = vmatmul.mubr.bf16.gmra.mxu1 %v4289_v2  ;;  %2855 = vmatmul.mubr.bf16.gmra.mxu0 %v4292_v3 }
 0x10b   :  { %v2173_v18 = vadd.f32 %v3464_v14, %v2076_v12  ;;  %2765 = vmatprep.mubr.bf16.mxu1 %v4297_v7  ;;  %2862 = vmatprep.mubr.bf16.mxu0 %v4300_v58  ;;  %v2097_v14 = vadd.f32 %v5149_v42, %v5172_v54  ;;  %v4318_v42 = vld [vmem:[%s5525_s0 + $0x314] ss:$72 sps:$4 sm:$0xff]  }
 0x10c   :  { %v3466_v19 = vpop.f32.mrf.mxu1  ;;  %v3530_v22 = vpop.f32.mrf.mxu0 }
 0x10d   :  { %v5194_v24 = vadd.f32 %v3528_v15, %v2173_v18  ;;  %v3467_v25 = vadd.f32 %v3466_v19, %v3465_v16  ;;  %v3531_v4 = vadd.f32 %v3530_v22, %v3529_v17  ;;  %v4307_v19 = vld [vmem:[%s5525_s0 + $0x278] ss:$72 sps:$4 sm:$0xff]  }
 0x10e   :  { %v3468_v28 = vpop.f32.mrf.mxu1  ;;  %v3532_v29 = vpop.f32.mrf.mxu0  ;;  %v4310_v22 = vld [vmem:[%s5525_s0 + $0x280] ss:$72 sps:$4 sm:$0xff]  }
 0x10f   :  { %v2178_v32 = vadd.f32 %v3467_v25, %v2081_v23  ;;  %v4315_v25 = vld [vmem:[%s5525_s0 + $0x30c] ss:$72 sps:$4 sm:$0xff]  }
 0x110   :  { %v3469_v34 = vpop.f32.mrf.mxu1  ;;  %v3533_v35 = vpop.f32.mrf.mxu0 }
 0x111   :  { %v5210_v39 = vadd.f32 %v3531_v4, %v2178_v32  ;;  %v3470_v40 = vadd.f32 %v3469_v34, %v3468_v28  ;;  %v3534_v41 = vadd.f32 %v3533_v35, %v3532_v29  ;;  %v2100_v29 = vadd.f32 %v5165_v52, %v5172_v54 }
 0x112   :  { %v3471_v44 = vpop.f32.mrf.mxu1  ;;  %v3535_v45 = vpop.f32.mrf.mxu0  ;;  %2766 = vmatmul.mubr.bf16.gmra.mxu1 %v4295_v30  ;;  %2863 = vmatmul.mubr.bf16.gmra.mxu0 %v4298_v31 }
 0x113   :  { %v2181_v46 = vadd.f32 %v3470_v40, %v2084_v38  ;;  %2773 = vmatprep.mubr.bf16.mxu1 %v4303_v33  ;;  %2870 = vmatprep.mubr.bf16.mxu0 %v4306_v10  ;;  %v2105_v40 = vadd.f32 %v5091_v59, %v5172_v54  ;;  %v4324_v59 = vld [vmem:[%s5525_s0 + $0x3a4] ss:$72 sps:$4 sm:$0xff]  }
 0x114   :  { %v3472_v47 = vpop.f32.mrf.mxu1  ;;  %v3536_v48 = vpop.f32.mrf.mxu0 }
 0x115   :  { %v5214_v50 = vadd.f32 %v3534_v41, %v2181_v46  ;;  %v3473_v51 = vadd.f32 %v3472_v47, %v3471_v44  ;;  %v3537_v20 = vadd.f32 %v3536_v48, %v3535_v45  ;;  %v4313_v47 = vld [vmem:[%s5525_s0 + $0x308] ss:$72 sps:$4 sm:$0xff]  }
 0x116   :  { %v3474_v55 = vpop.f32.mrf.mxu1  ;;  %v3538_v56 = vpop.f32.mrf.mxu0  ;;  %v4316_v48 = vld [vmem:[%s5525_s0 + $0x310] ss:$72 sps:$4 sm:$0xff]  }
 0x117   :  { %v2186_v61 = vadd.f32 %v3473_v51, %v2089_v49  ;;  %v4321_v51 = vld [vmem:[%s5525_s0 + $0x39c] ss:$72 sps:$4 sm:$0xff]  }
 0x118   :  { %v3475_v63 = vpop.f32.mrf.mxu1  ;;  %v3539_v0 = vpop.f32.mrf.mxu0 }
 0x119   :  { %v5230_v2 = vadd.f32 %v3537_v20, %v2186_v61  ;;  %v3476_v3 = vadd.f32 %v3475_v63, %v3474_v55  ;;  %v3540_v6 = vadd.f32 %v3539_v0, %v3538_v56  ;;  %v2108_v56 = vadd.f32 %v5107_v5, %v5172_v54 }
 0x11a   :  { %v3477_v7 = vpop.f32.mrf.mxu1  ;;  %v3541_v58 = vpop.f32.mrf.mxu0  ;;  %2774 = vmatmul.mubr.bf16.gmra.mxu1 %v4301_v57  ;;  %2871 = vmatmul.mubr.bf16.gmra.mxu0 %v4304_v60 }
 0x11b   :  { %v2189_v8 = vadd.f32 %v3476_v3, %v2092_v1  ;;  %2781 = vmatprep.mubr.bf16.mxu1 %v4309_v62  ;;  %2878 = vmatprep.mubr.bf16.mxu0 %v4312_v26  ;;  %v2113_v3 = vadd.f32 %v5111_v11, %v5172_v54  ;;  %v4330_v11 = vld [vmem:[%s5525_s0 + $0x434] ss:$72 sps:$4 sm:$0xff]  }
 0x11c   :  { %v3478_v9 = vpop.f32.mrf.mxu1  ;;  %v3542_v12 = vpop.f32.mrf.mxu0 }
 0x11d   :  { %v5234_v15 = vadd.f32 %v3540_v6, %v2189_v8  ;;  %v3479_v16 = vadd.f32 %v3478_v9, %v3477_v7  ;;  %v3543_v36 = vadd.f32 %v3542_v12, %v3541_v58  ;;  %v4319_v9 = vld [vmem:[%s5525_s0 + $0x398] ss:$72 sps:$4 sm:$0xff]  }
 0x11e   :  { %v3480_v17 = vpop.f32.mrf.mxu1  ;;  %v3544_v18 = vpop.f32.mrf.mxu0  ;;  %v4322_v12 = vld [vmem:[%s5525_s0 + $0x3a0] ss:$72 sps:$4 sm:$0xff]  }
 0x11f   :  { %v2194_v23 = vadd.f32 %v3479_v16, %v2097_v14  ;;  %v4327_v16 = vld [vmem:[%s5525_s0 + $0x42c] ss:$72 sps:$4 sm:$0xff]  }
 0x120   :  { %v3481_v4 = vpop.f32.mrf.mxu1  ;;  %v3545_v28 = vpop.f32.mrf.mxu0 }
 0x121   :  { %v5250_v30 = vadd.f32 %v3543_v36, %v2194_v23  ;;  %v3482_v31 = vadd.f32 %v3481_v4, %v3480_v17  ;;  %v3546_v32 = vadd.f32 %v3545_v28, %v3544_v18  ;;  %v2116_v18 = vadd.f32 %v5127_v21, %v5172_v54 }
 0x122   :  { %v3483_v33 = vpop.f32.mrf.mxu1  ;;  %v3547_v10 = vpop.f32.mrf.mxu0  ;;  %2782 = vmatmul.mubr.bf16.gmra.mxu1 %v4307_v19  ;;  %2879 = vmatmul.mubr.bf16.gmra.mxu0 %v4310_v22 }
 0x123   :  { %v2197_v34 = vadd.f32 %v3482_v31, %v2100_v29  ;;  %2789 = vmatprep.mubr.bf16.mxu1 %v4315_v25  ;;  %2886 = vmatprep.mubr.bf16.mxu0 %v4318_v42  ;;  %v2121_v31 = vadd.f32 %v5131_v27, %v5172_v54  ;;  %v2124_v27 = vadd.f32 %v5147_v37, %v5172_v54 }
 0x124   :  { %v3484_v35 = vpop.f32.mrf.mxu1  ;;  %v3548_v38 = vpop.f32.mrf.mxu0 }
 0x125   :  { %v5254_v41 = vadd.f32 %v3546_v32, %v2197_v34  ;;  %v3485_v44 = vadd.f32 %v3484_v35, %v3483_v33  ;;  %v3549_v52 = vadd.f32 %v3548_v38, %v3547_v10  ;;  %v4325_v35 = vld [vmem:[%s5525_s0 + $0x428] ss:$72 sps:$4 sm:$0xff]  }
 0x126   :  { %v3486_v45 = vpop.f32.mrf.mxu1  ;;  %v3550_v46 = vpop.f32.mrf.mxu0  ;;  %v4328_v38 = vld [vmem:[%s5525_s0 + $0x430] ss:$72 sps:$4 sm:$0xff]  }
 0x127   :  { %v2202_v49 = vadd.f32 %v3485_v44, %v2105_v40 }
 0x128   :  { %v3487_v20 = vpop.f32.mrf.mxu1  ;;  %v3551_v55 = vpop.f32.mrf.mxu0 }
 0x129   :  { %v5270_v57 = vadd.f32 %v3549_v52, %v2202_v49  ;;  %v3488_v60 = vadd.f32 %v3487_v20, %v3486_v45  ;;  %v3552_v61 = vadd.f32 %v3551_v55, %v3550_v46  ;;  %v2129_v55 = vadd.f32 %v5151_v43, %v5172_v54 }
 0x12a   :  { %v3489_v62 = vpop.f32.mrf.mxu1  ;;  %v3553_v26 = vpop.f32.mrf.mxu0  ;;  %2790 = vmatmul.mubr.bf16.gmra.mxu1 %v4313_v47  ;;  %2887 = vmatmul.mubr.bf16.gmra.mxu0 %v4316_v48 }
 0x12b   :  { %v2205_v63 = vadd.f32 %v3488_v60, %v2108_v56  ;;  %2797 = vmatprep.mubr.bf16.mxu1 %v4321_v51  ;;  %2894 = vmatprep.mubr.bf16.mxu0 %v4324_v59 }
 0x12c   :  { %v3490_v0 = vpop.f32.mrf.mxu1  ;;  %v3554_v1 = vpop.f32.mrf.mxu0 }
 0x12d   :  { %v5274_v6 = vadd.f32 %v3552_v61, %v2205_v63  ;;  %v3491_v7 = vadd.f32 %v3490_v0, %v3489_v62  ;;  %v3555_v5 = vadd.f32 %v3554_v1, %v3553_v26  ;;  %v2132_v1 = vadd.f32 %v5167_v53, %v5172_v54 }
 0x12e   :  { %v3492_v58 = vpop.f32.mrf.mxu1  ;;  %v3556_v8 = vpop.f32.mrf.mxu0 }
 0x12f   :  { %v2210_v14 = vadd.f32 %v3491_v7, %v2113_v3 }
 0x130   :  { %v3493_v36 = vpop.f32.mrf.mxu1  ;;  %v3557_v17 = vpop.f32.mrf.mxu0 }
 0x131   :  { %v5290_v19 = vadd.f32 %v3555_v5, %v2210_v14  ;;  %v3494_v22 = vadd.f32 %v3493_v36, %v3492_v58  ;;  %v3558_v23 = vadd.f32 %v3557_v17, %v3556_v8 }
 0x132   :  { %v3495_v25 = vpop.f32.mrf.mxu1  ;;  %v3559_v42 = vpop.f32.mrf.mxu0  ;;  %2798 = vmatmul.mubr.bf16.gmra.mxu1 %v4319_v9  ;;  %2895 = vmatmul.mubr.bf16.gmra.mxu0 %v4322_v12 }
 0x133   :  { %v2213_v4 = vadd.f32 %v3494_v22, %v2116_v18  ;;  %2805 = vmatprep.mubr.bf16.mxu1 %v4327_v16  ;;  %2902 = vmatprep.mubr.bf16.mxu0 %v4330_v11 }
 0x134   :  { %v3496_v28 = vpop.f32.mrf.mxu1  ;;  %v3560_v29 = vpop.f32.mrf.mxu0 }
 0x135   :  { %v5294_v32 = vadd.f32 %v3558_v23, %v2213_v4  ;;  %v3497_v33 = vadd.f32 %v3496_v28, %v3495_v25  ;;  %v3561_v21 = vadd.f32 %v3560_v29, %v3559_v42 }
 0x136   :  { %v3498_v10 = vpop.f32.mrf.mxu1  ;;  %v3562_v34 = vpop.f32.mrf.mxu0 }
 0x137   :  { %v2218_v40 = vadd.f32 %v3497_v33, %v2121_v31 }
 0x138   :  { %v3499_v44 = vpop.f32.mrf.mxu1  ;;  %v3563_v52 = vpop.f32.mrf.mxu0 }
 0x139   :  { %v5304_v45 = vadd.f32 %v3561_v21, %v2218_v40  ;;  %v3500_v46 = vadd.f32 %v3499_v44, %v3498_v10  ;;  %v3564_v47 = vadd.f32 %v3563_v52, %v3562_v34 }
 0x13a   :  { %v3501_v48 = vpop.f32.mrf.mxu1  ;;  %v3565_v49 = vpop.f32.mrf.mxu0  ;;  %2806 = vmatmul.mubr.bf16.gmra.mxu1 %v4325_v35  ;;  %2903 = vmatmul.mubr.bf16.gmra.mxu0 %v4328_v38 }
 0x13b   :  { %v2221_v51 = vadd.f32 %v3500_v46, %v2124_v27 }
 0x13c   :  { %v3502_v59 = vpop.f32.mrf.mxu1  ;;  %v3566_v20 = vpop.f32.mrf.mxu0 }
 0x13d   :  { %v5308_v56 = vadd.f32 %v3564_v47, %v2221_v51  ;;  %v3503_v60 = vadd.f32 %v3502_v59, %v3501_v48  ;;  %v3567_v61 = vadd.f32 %v3566_v20, %v3565_v49 }
 0x13e   :  { %v3504_v62 = vpop.f32.mrf.mxu1  ;;  %v3568_v37 = vpop.f32.mrf.mxu0 }
 0x13f   :  { %v2226_v26 = vadd.f32 %v3503_v60, %v2129_v55 }
 0x140   :  { %v3505_v63 = vpop.f32.mrf.mxu1  ;;  %v3569_v0 = vpop.f32.mrf.mxu0 }
 0x141   :  { %v5312_v3 = vadd.f32 %v3567_v61, %v2226_v26  ;;  %v3506_v7 = vadd.f32 %v3505_v63, %v3504_v62  ;;  %v3570_v5 = vadd.f32 %v3569_v0, %v3568_v37 }
 0x142   :  { %v3587_v58 = vpop.f32.mrf.mxu1  ;;  %v3651_v8 = vpop.f32.mrf.mxu0 }
 0x143   :  { %v2229_v9 = vadd.f32 %v3506_v7, %v2132_v1 }
 0x144   :  { %v3588_v43 = vpop.f32.mrf.mxu1  ;;  %v3652_v12 = vpop.f32.mrf.mxu0 }
 0x145   :  { %v5314_v14 = vadd.f32 %v3570_v5, %v2229_v9  ;;  %v3589_v16 = vadd.f32 %v3588_v43, %v3587_v58  ;;  %v3653_v11 = vadd.f32 %v3652_v12, %v3651_v8 }
 0x146   :  { %v3590_v36 = vpop.f32.mrf.mxu1  ;;  %v3654_v17 = vpop.f32.mrf.mxu0 }
 0x147   :  { %v2364_v18 = vadd.f32 %v3589_v16, %v5190_v13 }
 0x148   :  { %v3591_v22 = vpop.f32.mrf.mxu1  ;;  %v3655_v23 = vpop.f32.mrf.mxu0 }
 0x149   :  { %v5317_v53 = vadd.f32 %v3653_v11, %v2364_v18  ;;  %v3592_v54 = vadd.f32 %v3591_v22, %v3590_v36  ;;  %v3656_v25 = vadd.f32 %v3655_v23, %v3654_v17 }
 0x14a   :  { %v3593_v42 = vpop.f32.mrf.mxu1  ;;  %v3657_v4 = vpop.f32.mrf.mxu0 }
 0x14b   :  { %v2367_v28 = vadd.f32 %v3592_v54, %v5194_v24 }
 0x14c   :  { %v3594_v29 = vpop.f32.mrf.mxu1  ;;  %v3658_v31 = vpop.f32.mrf.mxu0 }
 0x14d   :  { %v5320_v33 = vadd.f32 %v3656_v25, %v2367_v28  ;;  %v3595_v21 = vadd.f32 %v3594_v29, %v3593_v42  ;;  %v3659_v10 = vadd.f32 %v3658_v31, %v3657_v4 }
 0x14e   :  { %v3596_v34 = vpop.f32.mrf.mxu1  ;;  %v3660_v35 = vpop.f32.mrf.mxu0 }
 0x14f   :  { %v2372_v13 = vadd.f32 %v3595_v21, %v5210_v39 }
 0x150   :  { %v3597_v38 = vpop.f32.mrf.mxu1  ;;  %v3661_v40 = vpop.f32.mrf.mxu0 }
 0x151   :  { %v5323_v44 = vadd.f32 %v3659_v10, %v2372_v13  ;;  %v3598_v52 = vadd.f32 %v3597_v38, %v3596_v34  ;;  %v3662_v27 = vadd.f32 %v3661_v40, %v3660_v35 }
 0x152   :  { %v3599_v46 = vpop.f32.mrf.mxu1  ;;  %v3663_v47 = vpop.f32.mrf.mxu0 }
 0x153   :  { %v2375_v24 = vadd.f32 %v3598_v52, %v5214_v50 }
 0x154   :  { %v3600_v48 = vpop.f32.mrf.mxu1  ;;  %v3664_v49 = vpop.f32.mrf.mxu0 }
 0x155   :  { %v5326_v51 = vadd.f32 %v3662_v27, %v2375_v24  ;;  %v3601_v59 = vadd.f32 %v3600_v48, %v3599_v46  ;;  %v3665_v20 = vadd.f32 %v3664_v49, %v3663_v47 }
 0x156   :  { %v3602_v55 = vpop.f32.mrf.mxu1  ;;  %v3666_v60 = vpop.f32.mrf.mxu0 }
 0x157   :  { %v2380_v39 = vadd.f32 %v3601_v59, %v5230_v2 }
 0x158   :  { %v3603_v61 = vpop.f32.mrf.mxu1  ;;  %v3667_v62 = vpop.f32.mrf.mxu0 }
 0x159   :  { %v5329_v37 = vadd.f32 %v3665_v20, %v2380_v39  ;;  %v3604_v26 = vadd.f32 %v3603_v61, %v3602_v55  ;;  %v3668_v63 = vadd.f32 %v3667_v62, %v3666_v60 }
 0x15a   :  { %v3605_v0 = vpop.f32.mrf.mxu1  ;;  %v3669_v1 = vpop.f32.mrf.mxu0 }
 0x15b   :  { %v2383_v50 = vadd.f32 %v3604_v26, %v5234_v15 }
 0x15c   :  { %v3606_v7 = vpop.f32.mrf.mxu1  ;;  %v3670_v5 = vpop.f32.mrf.mxu0 }
 0x15d   :  { %v5332_v58 = vadd.f32 %v3668_v63, %v2383_v50  ;;  %v3607_v8 = vadd.f32 %v3606_v7, %v3605_v0  ;;  %v3671_v9 = vadd.f32 %v3670_v5, %v3669_v1 }
 0x15e   :  { %v3608_v43 = vpop.f32.mrf.mxu1  ;;  %v3672_v12 = vpop.f32.mrf.mxu0 }
 0x15f   :  { %v2388_v2 = vadd.f32 %v3607_v8, %v5250_v30 }
 0x160   :  { %v3609_v16 = vpop.f32.mrf.mxu1  ;;  %v3673_v11 = vpop.f32.mrf.mxu0 }
 0x161   :  { %v5335_v36 = vadd.f32 %v3671_v9, %v2388_v2  ;;  %v3610_v17 = vadd.f32 %v3609_v16, %v3608_v43  ;;  %v3674_v18 = vadd.f32 %v3673_v11, %v3672_v12 }
 0x162   :  { %v3611_v22 = vpop.f32.mrf.mxu1  ;;  %v3675_v23 = vpop.f32.mrf.mxu0 }
 0x163   :  { %v2391_v15 = vadd.f32 %v3610_v17, %v5254_v41 }
 0x164   :  { %v3612_v54 = vpop.f32.mrf.mxu1  ;;  %v3676_v25 = vpop.f32.mrf.mxu0 }
 0x165   :  { %v5338_v42 = vadd.f32 %v3674_v18, %v2391_v15  ;;  %v3613_v4 = vadd.f32 %v3612_v54, %v3611_v22  ;;  %v3677_v28 = vadd.f32 %v3676_v25, %v3675_v23 }
 0x166   :  { %v3614_v29 = vpop.f32.mrf.mxu1  ;;  %v3678_v31 = vpop.f32.mrf.mxu0 }
 0x167   :  { %v2396_v30 = vadd.f32 %v3613_v4, %v5270_v57 }
 0x168   :  { %v3615_v21 = vpop.f32.mrf.mxu1  ;;  %v3679_v10 = vpop.f32.mrf.mxu0 }
 0x169   :  { %v5341_v34 = vadd.f32 %v3677_v28, %v2396_v30  ;;  %v3616_v35 = vadd.f32 %v3615_v21, %v3614_v29  ;;  %v3680_v13 = vadd.f32 %v3679_v10, %v3678_v31 }
 0x16a   :  { %v3617_v38 = vpop.f32.mrf.mxu1  ;;  %v3681_v40 = vpop.f32.mrf.mxu0 }
 0x16b   :  { %v2399_v41 = vadd.f32 %v3616_v35, %v5274_v6 }
 0x16c   :  { %v3618_v52 = vpop.f32.mrf.mxu1  ;;  %v3682_v27 = vpop.f32.mrf.mxu0 }
 0x16d   :  { %v5344_v46 = vadd.f32 %v3680_v13, %v2399_v41  ;;  %v3619_v47 = vadd.f32 %v3618_v52, %v3617_v38  ;;  %v3683_v24 = vadd.f32 %v3682_v27, %v3681_v40 }
 0x16e   :  { %v3620_v48 = vpop.f32.mrf.mxu1  ;;  %v3684_v49 = vpop.f32.mrf.mxu0 }
 0x16f   :  { %v2404_v57 = vadd.f32 %v3619_v47, %v5290_v19 }
 0x170   :  { %v3621_v59 = vpop.f32.mrf.mxu1  ;;  %v3685_v20 = vpop.f32.mrf.mxu0 }
 0x171   :  { %v5347_v55 = vadd.f32 %v3683_v24, %v2404_v57  ;;  %v3622_v60 = vadd.f32 %v3621_v59, %v3620_v48  ;;  %v3686_v39 = vadd.f32 %v3685_v20, %v3684_v49 }
 0x172   :  { %v3623_v61 = vpop.f32.mrf.mxu1  ;;  %v3687_v62 = vpop.f32.mrf.mxu0 }
 0x173   :  { %v2407_v6 = vadd.f32 %v3622_v60, %v5294_v32 }
 0x174   :  { %v3624_v26 = vpop.f32.mrf.mxu1  ;;  %v3688_v63 = vpop.f32.mrf.mxu0 }
 0x175   :  { %v5350_v0 = vadd.f32 %v3686_v39, %v2407_v6  ;;  %v3625_v1 = vadd.f32 %v3624_v26, %v3623_v61  ;;  %v3689_v50 = vadd.f32 %v3688_v63, %v3687_v62 }
 0x176   :  { %v3626_v7 = vpop.f32.mrf.mxu1  ;;  %v3690_v5 = vpop.f32.mrf.mxu0 }
 0x177   :  { %v2412_v19 = vadd.f32 %v3625_v1, %v5304_v45 }
 0x178   :  { %v3627_v8 = vpop.f32.mrf.mxu1  ;;  %v3691_v9 = vpop.f32.mrf.mxu0 }
 0x179   :  { %v5353_v43 = vadd.f32 %v3689_v50, %v2412_v19  ;;  %v3628_v12 = vadd.f32 %v3627_v8, %v3626_v7  ;;  %v3692_v2 = vadd.f32 %v3691_v9, %v3690_v5 }
 0x17a   :  { %v3629_v16 = vpop.f32.mrf.mxu1  ;;  %v3693_v11 = vpop.f32.mrf.mxu0 }
 0x17b   :  { %v2415_v32 = vadd.f32 %v3628_v12, %v5308_v56 }
 0x17c   :  { %v3630_v17 = vpop.f32.mrf.mxu1  ;;  %v3694_v18 = vpop.f32.mrf.mxu0 }
 0x17d   :  { %v5356_v22 = vadd.f32 %v3692_v2, %v2415_v32  ;;  %v3631_v23 = vadd.f32 %v3630_v17, %v3629_v16  ;;  %v3695_v15 = vadd.f32 %v3694_v18, %v3693_v11 }
 0x17e   :  { %v3632_v54 = vpop.f32.mrf.mxu1  ;;  %v3696_v25 = vpop.f32.mrf.mxu0 }
 0x17f   :  { %v2420_v45 = vadd.f32 %v3631_v23, %v5312_v3 }
 0x180   :  { %v3633_v4 = vpop.f32.mrf.mxu1  ;;  %v3697_v28 = vpop.f32.mrf.mxu0 }
 0x181   :  { %v5359_v29 = vadd.f32 %v3695_v15, %v2420_v45  ;;  %v3634_v31 = vadd.f32 %v3633_v4, %v3632_v54  ;;  %v3698_v30 = vadd.f32 %v3697_v28, %v3696_v25 }
 0x182   :  { %v3715_v21 = vpop.f32.mrf.mxu1  ;;  %v3779_v10 = vpop.f32.mrf.mxu0 }
 0x183   :  { %v2423_v56 = vadd.f32 %v3634_v31, %v5314_v14 }
 0x184   :  { %v3716_v35 = vpop.f32.mrf.mxu1  ;;  %v3780_v13 = vpop.f32.mrf.mxu0 }
 0x185   :  { %v5362_v38 = vadd.f32 %v3698_v30, %v2423_v56  ;;  %v3717_v40 = vadd.f32 %v3716_v35, %v3715_v21  ;;  %v3781_v41 = vadd.f32 %v3780_v13, %v3779_v10 }
 0x186   :  { %v5364_v52 = vpop.f32.mrf.mxu1  ;;  %v5366_v27 = vpop.f32.mrf.mxu0 }
 0x187   :  { %v2558_v3 = vadd.f32 %v3717_v40, %v5317_v53 }
 0x188   :  { %v5369_v47 = vpop.f32.mrf.mxu1  ;;  %v5371_v24 = vpop.f32.mrf.mxu0 }
 0x189   :  { %v5373_v48 = vadd.f32 %v3781_v41, %v2558_v3 }
 0x18a   :  { %v3721_v49 = vpop.f32.mrf.mxu1  ;;  %v3785_v14 = vpop.f32.mrf.mxu0 }
 0x18c   :  { %v3722_v57 = vpop.f32.mrf.mxu1  ;;  %v3786_v59 = vpop.f32.mrf.mxu0 }
 0x18d   :  { %v3723_v20 = vadd.f32 %v3722_v57, %v3721_v49  ;;  %v3787_v60 = vadd.f32 %v3786_v59, %v3785_v14 }
 0x18e   :  { %v5375_v39 = vpop.f32.mrf.mxu1  ;;  %v5377_v61 = vpop.f32.mrf.mxu0 }
 0x18f   :  { %v2566_v62 = vadd.f32 %v3723_v20, %v5323_v44 }
 0x190   :  { %v5380_v6 = vpop.f32.mrf.mxu1  ;;  %v5382_v53 = vpop.f32.mrf.mxu0 }
 0x191   :  { %v5384_v26 = vadd.f32 %v3787_v60, %v2566_v62 }
 0x192   :  { %v3727_v63 = vpop.f32.mrf.mxu1  ;;  %v3791_v1 = vpop.f32.mrf.mxu0 }
 0x194   :  { %v3728_v50 = vpop.f32.mrf.mxu1  ;;  %v3792_v7 = vpop.f32.mrf.mxu0 }
 0x195   :  { %v3729_v5 = vadd.f32 %v3728_v50, %v3727_v63  ;;  %v3793_v19 = vadd.f32 %v3792_v7, %v3791_v1 }
 0x196   :  { %v5386_v8 = vpop.f32.mrf.mxu1  ;;  %v5388_v9 = vpop.f32.mrf.mxu0 }
 0x197   :  { %v2574_v12 = vadd.f32 %v3729_v5, %v5329_v37 }
 0x198   :  { %v5391_v2 = vpop.f32.mrf.mxu1  ;;  %v5393_v44 = vpop.f32.mrf.mxu0 }
 0x199   :  { %v5395_v16 = vadd.f32 %v3793_v19, %v2574_v12 }
 0x19a   :  { %v3733_v11 = vpop.f32.mrf.mxu1  ;;  %v3797_v32 = vpop.f32.mrf.mxu0 }
 0x19c   :  { %v3734_v17 = vpop.f32.mrf.mxu1  ;;  %v3798_v18 = vpop.f32.mrf.mxu0 }
 0x19d   :  { %v3735_v23 = vadd.f32 %v3734_v17, %v3733_v11  ;;  %v3799_v15 = vadd.f32 %v3798_v18, %v3797_v32 }
 0x19e   :  { %v5397_v54 = vpop.f32.mrf.mxu1  ;;  %v5399_v25 = vpop.f32.mrf.mxu0 }
 0x19f   :  { %v2582_v45 = vadd.f32 %v3735_v23, %v5335_v36 }
 0x1a0   :  { %v5402_v4 = vpop.f32.mrf.mxu1  ;;  %v5404_v37 = vpop.f32.mrf.mxu0 }
 0x1a1   :  { %v5406_v28 = vadd.f32 %v3799_v15, %v2582_v45 }
 0x1a2   :  { %v3739_v31 = vpop.f32.mrf.mxu1  ;;  %v3803_v30 = vpop.f32.mrf.mxu0 }
 0x1a4   :  { %v3740_v21 = vpop.f32.mrf.mxu1  ;;  %v3804_v10 = vpop.f32.mrf.mxu0 }
 0x1a5   :  { %v3741_v56 = vadd.f32 %v3740_v21, %v3739_v31  ;;  %v3805_v35 = vadd.f32 %v3804_v10, %v3803_v30 }
 0x1a6   :  { %v5408_v13 = vpop.f32.mrf.mxu1  ;;  %v5410_v40 = vpop.f32.mrf.mxu0 }
 0x1a7   :  { %v2590_v41 = vadd.f32 %v3741_v56, %v5341_v34 }
 0x1a8   :  { %v5413_v3 = vpop.f32.mrf.mxu1  ;;  %v5415_v36 = vpop.f32.mrf.mxu0 }
 0x1a9   :  { %v5417_v49 = vadd.f32 %v3805_v35, %v2590_v41 }
 0x1aa   :  { %v3745_v14 = vpop.f32.mrf.mxu1  ;;  %v3809_v57 = vpop.f32.mrf.mxu0 }
 0x1ac   :  { %v3746_v59 = vpop.f32.mrf.mxu1  ;;  %v3810_v20 = vpop.f32.mrf.mxu0 }
 0x1ad   :  { %v3747_v60 = vadd.f32 %v3746_v59, %v3745_v14  ;;  %v3811_v62 = vadd.f32 %v3810_v20, %v3809_v57 }
 0x1ae   :  { %v5419_v63 = vpop.f32.mrf.mxu1  ;;  %v5421_v1 = vpop.f32.mrf.mxu0 }
 0x1af   :  { %v2598_v50 = vadd.f32 %v3747_v60, %v5347_v55 }
 0x1b0   :  { %v5424_v7 = vpop.f32.mrf.mxu1  ;;  %v5426_v34 = vpop.f32.mrf.mxu0 }
 0x1b1   :  { %v5428_v5 = vadd.f32 %v3811_v62, %v2598_v50  ;;  %v3720_v62 = vadd.f32 %v5369_v47, %v5364_v52  ;;  %v3726_v52 = vadd.f32 %v5380_v6, %v5375_v39 }
 0x1b2   :  { %v3751_v19 = vpop.f32.mrf.mxu1  ;;  %v3815_v12 = vpop.f32.mrf.mxu0 }
 0x1b4   :  { %v3752_v11 = vpop.f32.mrf.mxu1  ;;  %v3816_v32 = vpop.f32.mrf.mxu0 }
 0x1b5   :  { %v3753_v17 = vadd.f32 %v3752_v11, %v3751_v19  ;;  %v3817_v18 = vadd.f32 %v3816_v32, %v3815_v12 }
 0x1b6   :  { %v5430_v23 = vpop.f32.mrf.mxu1  ;;  %v5432_v15 = vpop.f32.mrf.mxu0 }
 0x1b7   :  { %v2606_v45 = vadd.f32 %v3753_v17, %v5353_v43  ;;  %v2561_v17 = vadd.f32 %v3720_v62, %v5320_v33 }
 0x1b8   :  { %v5435_v31 = vpop.f32.mrf.mxu1  ;;  %v5437_v55 = vpop.f32.mrf.mxu0 }
 0x1b9   :  { %v5439_v30 = vadd.f32 %v3817_v18, %v2606_v45 }
 0x1ba   :  { %v3757_v21 = vpop.f32.mrf.mxu1  ;;  %v3821_v10 = vpop.f32.mrf.mxu0 }
 0x1bc   :  { %v3758_v56 = vpop.f32.mrf.mxu1  ;;  %v3822_v35 = vpop.f32.mrf.mxu0 }
 0x1bd   :  { %v3759_v41 = vadd.f32 %v3758_v56, %v3757_v21  ;;  %v3823_v14 = vadd.f32 %v3822_v35, %v3821_v10 }
 0x1be   :  { %v5441_v57 = vpop.f32.mrf.mxu1  ;;  %v5443_v59 = vpop.f32.mrf.mxu0 }
 0x1bf   :  { %5528 = vst [vmem:[#allocation2_spill] sm:$0xff] %v5443_v59  ;;  %v2614_v20 = vadd.f32 %v3759_v41, %v5359_v29  ;;  %v3784_v29 = vadd.f32 %v5371_v24, %v5366_v27  ;;  %v2569_v59 = vadd.f32 %v3726_v52, %v5326_v51 }
 0x1c0   :  { %v5446_v60 = vpop.f32.mrf.mxu1  ;;  %v5448_v43 = vpop.f32.mrf.mxu0 }
 0x1c1   :  { %5529 = vst [vmem:[#allocation3_spill] sm:$0xff] %v5448_v43  ;;  %v5452_v50 = vadd.f32 %v3823_v14, %v2614_v20  ;;  %v2658_v41 = vadd.f32 %v3784_v29, %v2561_v17  ;;  %v3790_v17 = vadd.f32 %v5382_v53, %v5377_v61 }
 0x1c2   :  { %v3843_v19 = vpop.f32.mrf.mxu1  ;;  %v3907_v12 = vpop.f32.mrf.mxu0 }
 0x1c3   :  { %5530 = vst [vmem:[#allocation4_spill] sm:$0xff] %v5452_v50 }
 0x1c4   :  { %v3844_v11 = vpop.f32.mrf.mxu1  ;;  %v3908_v32 = vpop.f32.mrf.mxu0 }
 0x1c5   :  { %v3845_v18 = vadd.f32 %v3844_v11, %v3843_v19  ;;  %v3909_v47 = vadd.f32 %v3908_v32, %v3907_v12  ;;  %v3732_v12 = vadd.f32 %v5391_v2, %v5386_v8 }
 0x1c6   :  { %v3846_v45 = vpop.f32.mrf.mxu1  ;;  %v3910_v21 = vpop.f32.mrf.mxu0 }
 0x1c7   :  { %v2752_v10 = vadd.f32 %v3845_v18, %v5373_v48 }
 0x1c8   :  { %v3847_v56 = vpop.f32.mrf.mxu1  ;;  %v3911_v35 = vpop.f32.mrf.mxu0 }
 0x1c9   :  { %v3848_v14 = vadd.f32 %v3847_v56, %v3846_v45  ;;  %v2849_v43 = vadd.f32 %v3909_v47, %v2752_v10  ;;  %v3912_v62 = vadd.f32 %v3911_v35, %v3910_v21  ;;  %v2666_v21 = vadd.f32 %v3790_v17, %v2569_v59 }
 0x1ca   :  { %v3849_v20 = vpop.f32.mrf.mxu1  ;;  %v3913_v50 = vpop.f32.mrf.mxu0  ;;  %v3796_v59 = vadd.f32 %v5393_v44, %v5388_v9 }
 0x1cb   :  { %v2755_v33 = vadd.f32 %v3848_v14, %v2658_v41  ;;  %v2911_v29 = vmax.f32 %v2849_v43, 0.0 }
 0x1cc   :  { %v3850_v19 = vpop.f32.mrf.mxu1  ;;  %v3914_v11 = vpop.f32.mrf.mxu0 }
 0x1cd   :  { %v2852_v27 = vadd.f32 %v3912_v62, %v2755_v33  ;;  %v3851_v24 = vadd.f32 %v3850_v19, %v3849_v20  ;;  %v3915_v56 = vadd.f32 %v3914_v11, %v3913_v50 }
 0x1ce   :  { %v3852_v48 = vpop.f32.mrf.mxu1  ;;  %v3916_v18 = vpop.f32.mrf.mxu0 }
 0x1cf   :  { %v2912_v39 = vmax.f32 %v2852_v27, 0.0  ;;  %v2760_v6 = vadd.f32 %v3851_v24, %v5384_v26  ;;  %v2577_v26 = vadd.f32 %v3732_v12, %v5332_v58  ;;  %v3738_v24 = vadd.f32 %v5402_v4, %v5397_v54 }
 0x1d0   :  { %v3853_v32 = vpop.f32.mrf.mxu1  ;;  %v3917_v45 = vpop.f32.mrf.mxu0  ;;  %v3802_v4 = vadd.f32 %v5404_v37, %v5399_v25 }
 0x1d1   :  { %v3335_v10 = vpack.c.bf16 %v2912_v39, %v2911_v29  ;;  %v3854_v51 = vadd.f32 %v3853_v32, %v3852_v48  ;;  %v2857_v61 = vadd.f32 %v3915_v56, %v2760_v6  ;;  %v3918_v43 = vadd.f32 %v3917_v45, %v3916_v18 }
 0x1d2   :  { %v3855_v35 = vpop.f32.mrf.mxu1  ;;  %v3919_v41 = vpop.f32.mrf.mxu0  ;;  %v2674_v19 = vadd.f32 %v3796_v59, %v2577_v26  ;;  %v2585_v12 = vadd.f32 %v3738_v24, %v5338_v42 }
 0x1d3   :  { %3336 = vst [vmem:[%s5527_s3] sm:$0xff] %v3335_v10   ;;  %v2763_v53 = vadd.f32 %v3854_v51, %v2666_v21  ;;  %v2913_v20 = vmax.f32 %v2857_v61, 0.0 }
 0x1d4   :  { %v3856_v52 = vpop.f32.mrf.mxu1  ;;  %v3920_v47 = vpop.f32.mrf.mxu0 }
 0x1d5   :  { %v2860_v8 = vadd.f32 %v3918_v43, %v2763_v53  ;;  %v3857_v2 = vadd.f32 %v3856_v52, %v3855_v35  ;;  %v3921_v48 = vadd.f32 %v3920_v47, %v3919_v41  ;;  %v3744_v35 = vadd.f32 %v5413_v3, %v5408_v13 }
 0x1d6   :  { %v3858_v50 = vpop.f32.mrf.mxu1  ;;  %v3922_v14 = vpop.f32.mrf.mxu0  ;;  %v2682_v53 = vadd.f32 %v3802_v4, %v2585_v12 }
 0x1d7   :  { %v2914_v33 = vmax.f32 %v2860_v8, 0.0  ;;  %v2768_v62 = vadd.f32 %v3857_v2, %v5395_v16 }
 0x1d8   :  { %v3859_v11 = vpop.f32.mrf.mxu1  ;;  %v3923_v27 = vpop.f32.mrf.mxu0 }
 0x1d9   :  { %v3340_v58 = vpack.c.bf16 %v2914_v33, %v2913_v20  ;;  %v3860_v18 = vadd.f32 %v3859_v11, %v3858_v50  ;;  %v2865_v9 = vadd.f32 %v3921_v48, %v2768_v62  ;;  %v3924_v39 = vadd.f32 %v3923_v27, %v3922_v14 }
 0x1da   :  { %v3861_v17 = vpop.f32.mrf.mxu1  ;;  %v3925_v29 = vpop.f32.mrf.mxu0  ;;  %v3808_v50 = vadd.f32 %v5415_v36, %v5410_v40 }
 0x1db   :  { %3372 = vst [vmem:[%s5527_s3 + $0x8] sm:$0xff] %v3340_v58   ;;  %v2771_v44 = vadd.f32 %v3860_v18, %v2674_v19  ;;  %v2915_v10 = vmax.f32 %v2865_v9, 0.0  ;;  %v3750_v58 = vadd.f32 %v5424_v7, %v5419_v63  ;;  %v3814_v7 = vadd.f32 %v5426_v34, %v5421_v1 }
 0x1dc   :  { %v3862_v6 = vpop.f32.mrf.mxu1  ;;  %v3926_v16 = vpop.f32.mrf.mxu0 }
 0x1dd   :  { %v2868_v32 = vadd.f32 %v3924_v39, %v2771_v44  ;;  %v3863_v45 = vadd.f32 %v3862_v6, %v3861_v17  ;;  %v3927_v26 = vadd.f32 %v3926_v16, %v3925_v29  ;;  %v2601_v39 = vadd.f32 %v3750_v58, %v5350_v0  ;;  %v5532_v58 = vld [vmem:[#allocation3_spill] sm:$0xff] }
 0x1de   :  { %v3864_v21 = vpop.f32.mrf.mxu1  ;;  %v3928_v54 = vpop.f32.mrf.mxu0 }
 0x1df   :  { %v2916_v56 = vmax.f32 %v2868_v32, 0.0  ;;  %v2776_v51 = vadd.f32 %v3863_v45, %v5406_v28  ;;  %v2593_v28 = vadd.f32 %v3744_v35, %v5344_v46 }
 0x1e0   :  { %v3865_v41 = vpop.f32.mrf.mxu1  ;;  %v3929_v61 = vpop.f32.mrf.mxu0 }
 0x1e1   :  { %v3345_v43 = vpack.c.bf16 %v2916_v56, %v2915_v10  ;;  %v3866_v42 = vadd.f32 %v3865_v41, %v3864_v21  ;;  %v2873_v25 = vadd.f32 %v3927_v26, %v2776_v51  ;;  %v3930_v8 = vadd.f32 %v3929_v61, %v3928_v54 }
 0x1e2   :  { %v3867_v52 = vpop.f32.mrf.mxu1  ;;  %v3931_v47 = vpop.f32.mrf.mxu0  ;;  %v2690_v11 = vadd.f32 %v3808_v50, %v2593_v28  ;;  %v3756_v54 = vadd.f32 %v5435_v31, %v5430_v23  ;;  %v2698_v56 = vadd.f32 %v3814_v7, %v2601_v39 }
 0x1e3   :  { %3373 = vst [vmem:[%s5527_s3 + $0x10] sm:$0xff] %v3345_v43   ;;  %v2779_v37 = vadd.f32 %v3866_v42, %v2682_v53  ;;  %v2917_v33 = vmax.f32 %v2873_v25, 0.0  ;;  %v3820_v42 = vadd.f32 %v5437_v55, %v5432_v15 }
 0x1e4   :  { %v3868_v2 = vpop.f32.mrf.mxu1  ;;  %v3932_v59 = vpop.f32.mrf.mxu0 }
 0x1e5   :  { %v2876_v13 = vadd.f32 %v3930_v8, %v2779_v37  ;;  %v3869_v3 = vadd.f32 %v3868_v2, %v3867_v52  ;;  %v3933_v48 = vadd.f32 %v3932_v59, %v3931_v47 }
 0x1e6   :  { %v3870_v14 = vpop.f32.mrf.mxu1  ;;  %v3934_v20 = vpop.f32.mrf.mxu0 }
 0x1e7   :  { %v2918_v62 = vmax.f32 %v2876_v13, 0.0  ;;  %v2784_v19 = vadd.f32 %v3869_v3, %v5417_v49  ;;  %v3762_v13 = vadd.f32 %v5446_v60, %v5441_v57  ;;  %v5531_v60 = vld [vmem:[#allocation2_spill] sm:$0xff] }
 0x1e8   :  { %v3871_v27 = vpop.f32.mrf.mxu1  ;;  %v3935_v24 = vpop.f32.mrf.mxu0 }
 0x1e9   :  { %v3350_v46 = vpack.c.bf16 %v2918_v62, %v2917_v33  ;;  %v3872_v18 = vadd.f32 %v3871_v27, %v3870_v14  ;;  %v2881_v40 = vadd.f32 %v3933_v48, %v2784_v19  ;;  %v3936_v9 = vadd.f32 %v3935_v24, %v3934_v20 }
 0x1ea   :  { %v3873_v17 = vpop.f32.mrf.mxu1  ;;  %v3937_v29 = vpop.f32.mrf.mxu0  ;;  %v2617_v19 = vadd.f32 %v3762_v13, %v5362_v38 }
 0x1eb   :  { %3374 = vst [vmem:[%s5527_s3 + $0x18] sm:$0xff] %v3350_v46   ;;  %v2787_v36 = vadd.f32 %v3872_v18, %v2690_v11  ;;  %v2919_v32 = vmax.f32 %v2881_v40, 0.0  ;;  %v3826_v46 = vadd.f32 %v5532_v58, %v5531_v60 }
 0x1ec   :  { %v3874_v44 = vpop.f32.mrf.mxu1  ;;  %v3938_v49 = vpop.f32.mrf.mxu0 }
 0x1ed   :  { %v2884_v6 = vadd.f32 %v3936_v9, %v2787_v36  ;;  %v3875_v16 = vadd.f32 %v3874_v44, %v3873_v17  ;;  %v3939_v35 = vadd.f32 %v3938_v49, %v3937_v29  ;;  %v5533_v17 = vld [vmem:[#allocation4_spill] sm:$0xff]  ;;  %v2714_v9 = vadd.f32 %v3826_v46, %v2617_v19 }
 0x1ee   :  { %v3876_v12 = vpop.f32.mrf.mxu1  ;;  %v3940_v63 = vpop.f32.mrf.mxu0 }
 0x1ef   :  { %v2920_v45 = vmax.f32 %v2884_v6, 0.0  ;;  %v2792_v21 = vadd.f32 %v3875_v16, %v5428_v5  ;;  %v2609_v5 = vadd.f32 %v3756_v54, %v5356_v22 }
 0x1f0   :  { %v3877_v4 = vpop.f32.mrf.mxu1  ;;  %v3941_v10 = vpop.f32.mrf.mxu0 }
 0x1f1   :  { %v3355_v51 = vpack.c.bf16 %v2920_v45, %v2919_v32  ;;  %v3878_v0 = vadd.f32 %v3877_v4, %v3876_v12  ;;  %v2889_v1 = vadd.f32 %v3939_v35, %v2792_v21  ;;  %v3942_v53 = vadd.f32 %v3941_v10, %v3940_v63 }
 0x1f2   :  { %v3879_v41 = vpop.f32.mrf.mxu1  ;;  %v3943_v61 = vpop.f32.mrf.mxu0  ;;  %v2706_v28 = vadd.f32 %v3820_v42, %v2609_v5 }
 0x1f3   :  { %3375 = vst [vmem:[%s5527_s3 + $0x20] sm:$0xff] %v3355_v51   ;;  %v2795_v34 = vadd.f32 %v3878_v0, %v2698_v56  ;;  %v2921_v25 = vmax.f32 %v2889_v1, 0.0 }
 0x1f4   :  { %v3880_v43 = vpop.f32.mrf.mxu1  ;;  %v3944_v26 = vpop.f32.mrf.mxu0 }
 0x1f5   :  { %v2892_v23 = vadd.f32 %v3942_v53, %v2795_v34  ;;  %v3881_v31 = vadd.f32 %v3880_v43, %v3879_v41  ;;  %v3945_v3 = vadd.f32 %v3944_v26, %v3943_v61 }
 0x1f6   :  { %v3882_v52 = vpop.f32.mrf.mxu1  ;;  %v3946_v47 = vpop.f32.mrf.mxu0 }
 0x1f7   :  { %v2922_v37 = vmax.f32 %v2892_v23, 0.0  ;;  %v2800_v8 = vadd.f32 %v3881_v31, %v5439_v30 }
 0x1f8   :  { %v3883_v2 = vpop.f32.mrf.mxu1  ;;  %v3947_v59 = vpop.f32.mrf.mxu0 }
 0x1f9   :  { %v3360_v22 = vpack.c.bf16 %v2922_v37, %v2921_v25  ;;  %v3884_v50 = vadd.f32 %v3883_v2, %v3882_v52  ;;  %v2897_v15 = vadd.f32 %v3945_v3, %v2800_v8  ;;  %v3948_v33 = vadd.f32 %v3947_v59, %v3946_v47 }
 0x1fa   :  { %v3885_v14 = vpop.f32.mrf.mxu1  ;;  %v3949_v20 = vpop.f32.mrf.mxu0 }
 0x1fb   :  { %3376 = vst [vmem:[%s5527_s3 + $0x28] sm:$0xff] %v3360_v22   ;;  %v2803_v55 = vadd.f32 %v3884_v50, %v2706_v28  ;;  %v2923_v48 = vmax.f32 %v2897_v15, 0.0 }
 0x1fc   :  { %v3886_v62 = vpop.f32.mrf.mxu1  ;;  %v3950_v30 = vpop.f32.mrf.mxu0 }
 0x1fd   :  { %v2900_v11 = vadd.f32 %v3948_v33, %v2803_v55  ;;  %v3887_v27 = vadd.f32 %v3886_v62, %v3885_v14  ;;  %v3951_v49 = vadd.f32 %v3950_v30, %v3949_v20 }
 0x1fe   :  { %v3888_v24 = vpop.f32.mrf.mxu1  ;;  %v3952_v57 = vpop.f32.mrf.mxu0 }
 0x1ff   :  { %v2924_v18 = vmax.f32 %v2900_v11, 0.0  ;;  %v2808_v29 = vadd.f32 %v3887_v27, %v5533_v17 }
 0x200   :  { %v3889_v40 = vpop.f32.mrf.mxu1  ;;  %v3953_v36 = vpop.f32.mrf.mxu0 }
 0x201   :  { %v3365_v44 = vpack.c.bf16 %v2924_v18, %v2923_v48  ;;  %v3890_v39 = vadd.f32 %v3889_v40, %v3888_v24  ;;  %v2905_v38 = vadd.f32 %v3951_v49, %v2808_v29  ;;  %v3954_v16 = vadd.f32 %v3953_v36, %v3952_v57 }
 0x203   :  { %3377 = vst [vmem:[%s5527_s3 + $0x30] sm:$0xff] %v3365_v44   ;;  %v2811_v6 = vadd.f32 %v3890_v39, %v2714_v9  ;;  %v2925_v63 = vmax.f32 %v2905_v38, 0.0 }
 0x205   :  { %v2908_v12 = vadd.f32 %v3954_v16, %v2811_v6 }
 0x207   :  { %v2926_v7 = vmax.f32 %v2908_v12, 0.0 }
 0x209   :  { %v3370_v32 = vpack.c.bf16 %v2926_v7, %v2925_v63 }
 0x20b   :  { %3378 = vst [vmem:[%s5527_s3 + $0x38] sm:$0xff] %v3370_v32  }

</bundles_post_ra>
